<compile_context>
chip_gen: v7x
topology: tpu7x:2x2x1
jax: 0.10.0
libtpu: 0.0.40
codegen_flags: <defaults>
</compile_context>

<pallas_src>
import numpy as np
import jax
import jax.numpy as jnp
from jax.experimental import pallas as pl
from jax.experimental.pallas import tpu as pltpu


# 2nd-derivative central-difference coefficients: order -> (c0, ((offset, w), ...))
_FD_COEFFS = {
    2: (-2.0, ((1, 1.0),)),
    4: (-2.5, ((1, 4.0 / 3.0), (2, -1.0 / 12.0))),
    8: (-205.0 / 72.0, ((1, 8.0 / 5.0), (2, -1.0 / 5.0),
                        (3, 8.0 / 315.0), (4, -1.0 / 560.0))),
}

_T_CHUNK = 8    # statically-unrolled timesteps (ping-pong parity stays static)
_T_OUT = 64     # timesteps per output block / receiver-readout matmul
_HALO = 8       # z halo rows (>= order//2, keeps the stored field sublane-aligned)


def _make_wave_kernel(t_out, t_chunk, offsets):
    """Per-shot, time-tiled wave time-stepping kernel (one TensorCore)."""
    assert t_chunk % 2 == 0 and t_out % t_chunk == 0
    n_chunks = t_out // t_chunk

    def kernel(wav_ref,      # SMEM (nt_pad,)   shared source wavelet
               sz_ref,       # SMEM (B,) int32  source depth row
               sx_ref,       # SMEM (B,) int32  source lane index
               rz_ref,       # SMEM (B,) int32  receiver depth row
               sscale_ref,   # SMEM (B,) f32    v^2*dt^2 at the source
               fld_ref,      # VMEM (3, nz, nx) [ga+2*c0*gv, gm, gv]
               rsel_ref,     # VMEM (1, nx, n_rcv_pad) receiver selection matrix
               out_ref,      # VMEM (1, t_out, n_rcv_pad) receiver traces (time tile)
               u_ref,        # VMEM scratch (2, nz+2*HALO, nx) ping-pong wavefields
               rows_ref):    # VMEM scratch (t_out, nx) receiver-row history
        b = pl.program_id(0)
        t = pl.program_id(1)
        nz = fld_ref.shape[1]
        nx = fld_ref.shape[2]

        sz = sz_ref[b]
        sx = sx_ref[b]
        rz = rz_ref[b]

        # per-shot source row (1, nx): deepwave-style v^2*dt^2 * delta(x - x_s)
        lane = jax.lax.broadcasted_iota(jnp.int32, (1, nx), 1)
        src_vec = jnp.where(lane == sx, sscale_ref[b], 0.0).astype(jnp.float32)

        # wavefield scratch persists across the (arbitrary) time axis; re-zero
        # it (field + halo rows) only at the first time block of each shot.
        @pl.when(t == 0)
        def _():
            u_ref[...] = jnp.zeros(u_ref.shape, u_ref.dtype)

        t_base = t * t_out

        def chunk_body(c, carry):
            for k in range(t_chunk):          # static unroll -> static ping-pong
                cur = k % 2
                prev = 1 - cur
                u_c = u_ref[cur, pl.ds(_HALO, nz), :]
                u_p = u_ref[prev, pl.ds(_HALO, nz), :]

                # Laplacian offset terms (center coeff folded into fld[0]):
                #   z-shifts  -> halo offset loads (no XLU rotates)
                #   x-shifts  -> XLU lane rotates via pltpu.roll
                lap = None
                for s, w in offsets:
                    term = (u_ref[cur, pl.ds(_HALO - s, nz), :]
                            + u_ref[cur, pl.ds(_HALO + s, nz), :]
                            + pltpu.roll(u_c, s, axis=1)
                            + pltpu.roll(u_c, nx - s, axis=1))
                    lap = w * term if lap is None else lap + w * term

                # leapfrog update (damping / bmask / 1/dx^2 / center coeff are
                # folded into the precomputed fields; fields re-read per step
                # to keep vreg live ranges short)
                u_n = fld_ref[0] * u_c - fld_ref[1] * u_p + fld_ref[2] * lap
                u_ref[prev, pl.ds(_HALO, nz), :] = u_n

                # point source injection: one-row read-modify-write
                amp = wav_ref[t_base + c * t_chunk + k]
                u_ref[prev, pl.ds(_HALO + sz, 1), :] = (
                    u_ref[prev, pl.ds(_HALO + sz, 1), :] + src_vec * amp)

                # record the receiver depth row for this timestep
                rows_ref[pl.ds(c * t_chunk + k, 1), :] = (
                    u_ref[prev, pl.ds(_HALO + rz, 1), :])
            return carry

        jax.lax.fori_loop(0, n_chunks, chunk_body, 0)

        # one (t_out, nx) x (nx, n_rcv_pad) MXU matmul projects the whole time
        # block onto the receivers -> one lane-dense, sublane-aligned store.
        rec = jnp.dot(rows_ref[...], rsel_ref[0],
                      preferred_element_type=jnp.float32)
        out_ref[0, :, :] = rec

    return kernel


def _smem_spec():
    return pl.BlockSpec(memory_space=pltpu.MemorySpace.SMEM)


def pallas_propagate(fields, rsel, wav, sz, sx, rz, src_scale, order,
                     t_out=_T_OUT, t_chunk=_T_CHUNK,
                     single_buffer_constants=True):
    """Run the scalar wave propagation for a batch of shots."""
    _, nz, nx = fields.shape
    B = int(sz.shape[0])
    nt_pad = int(wav.shape[0])
    n_rcv_pad = int(rsel.shape[-1])
    assert nt_pad % t_out == 0 and t_out % t_chunk == 0
    _, offsets = _FD_COEFFS[order]
    n_tblocks = nt_pad // t_out

    kernel = _make_wave_kernel(t_out, t_chunk, offsets)

    # static inputs: constant index map; single-buffer them (saves a full extra
    # VMEM copy of the coefficient fields on v7x's 64 MiB).
    const_kw = dict(pipeline_mode=pl.Buffered(1)) if single_buffer_constants else {}
    fld_spec = pl.BlockSpec((3, nz, nx), lambda b, t: (0, 0, 0), **const_kw)
    if rsel.shape[0] == 1:   # receiver line shared across shots (FWIGAN default)
        rsel_spec = pl.BlockSpec((1, nx, n_rcv_pad), lambda b, t: (0, 0, 0), **const_kw)
    else:
        rsel_spec = pl.BlockSpec((1, nx, n_rcv_pad), lambda b, t: (b, 0, 0))

    # explicit scoped-VMEM budget (fields + rsel + double-buffered output block
    # + wavefield/rows scratch), clamped below v7x's 64 MiB physical VMEM.
    n_const = 1 if single_buffer_constants else 2
    est = (3 * nz * nx * 4 * n_const
           + nx * n_rcv_pad * 4 * n_const
           + 2 * t_out * n_rcv_pad * 4
           + 2 * (nz + 2 * _HALO) * nx * 4
           + t_out * nx * 4)
    vmem_limit = int(min(max(2 * est + (4 << 20), 16 << 20), 56 << 20))

    out = pl.pallas_call(
        kernel,
        out_shape=jax.ShapeDtypeStruct((B, nt_pad, n_rcv_pad), jnp.float32),
        grid_spec=pltpu.PrefetchScalarGridSpec(
            num_scalar_prefetch=0,
            grid=(B, n_tblocks),
            in_specs=[
                _smem_spec(),   # wavelet (shared, 1-D)
                _smem_spec(),   # sz
                _smem_spec(),   # sx
                _smem_spec(),   # rz
                _smem_spec(),   # source scale v^2*dt^2
                fld_spec,       # stacked coefficient fields
                rsel_spec,      # receiver selection matrix
            ],
            out_specs=pl.BlockSpec((1, t_out, n_rcv_pad), lambda b, t: (b, t, 0)),
            scratch_shapes=[
                pltpu.VMEM((2, nz + 2 * _HALO, nx), jnp.float32),  # ping-pong + halo
                pltpu.VMEM((t_out, nx), jnp.float32),              # receiver rows
            ],
        ),
        # shots independent -> sharded across v7x TensorCores; time axis is the
        # sequential recurrence axis.
        compiler_params=pltpu.CompilerParams(
            dimension_semantics=("parallel", "arbitrary"),
            vmem_limit_bytes=vmem_limit),
    )(wav, sz, sx, rz, src_scale, fields, rsel)
    return out


class PhySimulator:
    """JAX/Pallas re-implementation of FWIGAN's PhySimulator forward pass."""

    def __init__(self, dx, num_shots, num_batches, x_s, x_r, dt,
                 pml_width, order, survey_pad):
        self.dx = float(dx)
        self.num_shots = int(num_shots)
        self.num_batches = int(num_batches)
        self.dt = float(dt)
        self.num_shots_per_batch = int(self.num_shots / self.num_batches)
        self.pml_width = int(pml_width)
        self.order = int(order)
        self.survey_pad = survey_pad  # TODO(synk): survey_pad model cropping not implemented (full model is propagated).

        # geometry is static: convert to integer grid indices ONCE (no per-call
        # host loops / syncs). Indices include the +pml offset (alignment
        # padding is added only at the bottom/right).
        xs = np.asarray(jax.device_get(x_s), dtype=np.float64)
        xr = np.asarray(jax.device_get(x_r), dtype=np.float64)
        self.s_idx = np.round(xs / self.dx).astype(np.int32) + self.pml_width
        self.r_idx = np.round(xr / self.dx).astype(np.int32) + self.pml_width

    def _build_fields(self, model):
        """Combined coefficient fields on the aligned, padded grid.

        fields[0] = 2*bmask/(1+damp) + 2*c0 * fields[2]   (FD center folded in)
        fields[1] = bmask*(1-damp)/(1+damp)
        fields[2] = bmask*(vp*dt)^2 / ((1+damp)*dx^2)
        """
        p = self.pml_width
        h = self.order // 2
        c0, _ = _FD_COEFFS[self.order]
        nz0, nx0 = model.shape
        nz_raw, nx_raw = nz0 + 2 * p, nx0 + 2 * p
        nz = ((nz_raw + 7) // 8) * 8          # sublane-aligned
        nx = ((nx_raw + 127) // 128) * 128    # lane-aligned
        ez, ex = nz - nz_raw, nx - nx_raw     # extra cells folded into sponge

        vp_pad = jnp.pad(model.astype(jnp.float32),
                         ((p, p + ez), (p, p + ex)), mode='edge')
        vp2dt2 = (vp_pad * self.dt) ** 2

        # quadratic sponge profile base (geometry only, cheap numpy)
        # TODO(synk): this is a calibrated sponge, not deepwave's exact PML.
        def prof(n, n_int, left_w, right_w):
            i = np.arange(n, dtype=np.float64)
            dl = np.maximum(left_w - i, 0.0) / max(left_w, 1)
            dr = np.maximum(i - (left_w + n_int - 1), 0.0) / max(right_w, 1)
            return np.maximum(dl, dr) ** 2

        base = prof(nz, nz0, p, p + ez)[:, None] + prof(nx, nx0, p, p + ex)[None, :]
        base = jnp.asarray(base, dtype=jnp.float32)

        # vmax stays on device -> no blocking device->host sync per call
        vmax = jnp.max(model.astype(jnp.float32))
        dmax = 3.0 * vmax * np.log(1000.0) / (2.0 * p * self.dx)
        damp_dt = dmax * base * self.dt

        # Dirichlet ring of width order//2 (also kills lane-roll wrap-around)
        bmask = np.ones((nz, nx), dtype=np.float32)
        bmask[:h, :] = 0.0
        bmask[-h:, :] = 0.0
        bmask[:, :h] = 0.0
        bmask[:, -h:] = 0.0
        bmask = jnp.asarray(bmask)

        inv = bmask / (1.0 + damp_dt)
        gv = inv * vp2dt2 / (self.dx * self.dx)
        ga = 2.0 * inv + (2.0 * c0) * gv      # center FD coefficient folded in
        gm = inv * (1.0 - damp_dt)
        fields = jnp.stack([ga, gm, gv], axis=0)
        return fields, vp2dt2, nz, nx

    def __call__(self, model, source_amplitudes, it, criticIter, j, status,
                 AddNoise=False, noi_var=None, learnAWGN=False):
        # --- batch shot/receiver selection (matches torch strided indexing) ---
        if status == 'TD':
            start = it * criticIter + j
            if start >= self.num_batches:
                start = start % self.num_batches
        elif status == 'TG':
            start = it
        else:
            raise AssertionError('Please check the status of training!!!')
        batch_s = self.s_idx[start::self.num_batches]   # (B, n_src, 2)
        batch_r = self.r_idx[start::self.num_batches]   # (B, n_rcv, 2)

        B = self.num_shots_per_batch   # keep even on v7x so both TCs get work
        nt, _, n_src = source_amplitudes.shape
        assert n_src == 1  # TODO(synk): >1 source per shot not supported in this kernel.
        n_rcv = batch_r.shape[1]

        sz = batch_s[:, 0, 0].astype(np.int32)
        sx = batch_s[:, 0, 1].astype(np.int32)
        rz_all = batch_r[:, :, 0]
        rx_all = batch_r[:, :, 1]
        # TODO(synk): kernel samples a single receiver-depth row per shot
        # (FWIGAN surface receivers); per-receiver depths not supported.
        assert np.all(rz_all == rz_all[:, :1])
        rz = rz_all[:, 0].astype(np.int32)

        fields, vp2dt2, nz, nx = self._build_fields(model)

        # deepwave-style source scaling: v^2 * dt^2 at the source cell
        src_scale = vp2dt2[sz, sx].astype(jnp.float32)    # (B,), stays on device

        # time tiling: nt padded to a multiple of the readout/output block
        nt_pad8 = ((nt + _T_CHUNK - 1) // _T_CHUNK) * _T_CHUNK
        t_out = min(_T_OUT, nt_pad8)
        nt_pad = ((nt_pad8 + t_out - 1) // t_out) * t_out
        n_rcv_pad = ((n_rcv + 127) // 128) * 128

        # receiver selection matrix (one-hot columns); shared across shots when
        # the receiver line is identical (saves B redundant HBM->VMEM DMAs).
        if np.all(rx_all == rx_all[:1]):
            rsel = np.zeros((1, nx, n_rcv_pad), dtype=np.float32)
            rsel[0, rx_all[0], np.arange(n_rcv)] = 1.0
        else:
            rsel = np.zeros((B, nx, n_rcv_pad), dtype=np.float32)
            rsel[np.arange(B)[:, None], rx_all, np.arange(n_rcv)[None, :]] = 1.0
        rsel = jnp.asarray(rsel)

        # source_amplitudes.repeat(1, B, 1): all shots share the wavelet ->
        # pass once as a 1-D SMEM trace (no (B, nt_pad) broadcast).
        wav = source_amplitudes[:, 0, 0].astype(jnp.float32)
        wav = jnp.pad(wav, (0, nt_pad - nt))

        args = (fields, rsel, wav, jnp.asarray(sz), jnp.asarray(sx),
                jnp.asarray(rz), src_scale, self.order)
        try:
            rcv = pallas_propagate(*args, t_out=t_out, single_buffer_constants=True)
        except Exception:
            # fallback if pl.Buffered(1) is unsupported on this jax version
            rcv = pallas_propagate(*args, t_out=t_out, single_buffer_constants=False)

        rcv = jnp.transpose(rcv[:, :nt, :n_rcv], (1, 0, 2))  # [nt, B, n_rcv]

        if AddNoise and (noi_var is not None) and learnAWGN:
            # TODO(synk): FWIGAN's AddAWGN uses an SNR(dB) formulation; approximated here.
            key = jax.random.PRNGKey(int(it) * 7919 + int(criticIter) * 131 + int(j) + 1)
            sig_pow = jnp.mean(rcv ** 2)
            noise_pow = sig_pow / (10.0 ** (jnp.asarray(noi_var, jnp.float32) / 10.0))
            rcv = rcv + jnp.sqrt(noise_pow) * jax.random.normal(key, rcv.shape, rcv.dtype)
        return rcv


if __name__ == "__main__":
    key = jax.random.PRNGKey(0)

    # small, deterministic problem
    dx, dt = 10.0, 0.001
    nz0, nx0 = 24, 120          # interior model; padded grid becomes (32, 128)
    pml_width, order = 4, 4
    num_shots, num_batches = 4, 2   # B = 2 shots/batch (even -> v7x megacore)
    nt = 64
    n_src, n_rcv = 1, 8

    # velocity model (m/s)
    vp = 2500.0 + 100.0 * jax.random.normal(key, (nz0, nx0), dtype=jnp.float32)

    # Ricker source wavelet, shape [nt, 1, 1] (deepwave convention)
    freq = 15.0
    t = jnp.arange(nt, dtype=jnp.float32) * dt - 1.0 / freq
    arg = (jnp.pi * freq * t) ** 2
    source_amplitudes = ((1.0 - 2.0 * arg) * jnp.exp(-arg)).reshape(nt, 1, 1)

    # geometry in meters, [num_shots, n_src, 2] and [num_shots, n_rcv, 2] as (z, x)
    sxm = jnp.linspace(1.0 * dx, (nx0 - 2) * dx, num_shots)
    x_s = jnp.stack([jnp.full((num_shots,), 1.0 * dx), sxm], axis=-1).reshape(
        num_shots, n_src, 2)
    rxm = jnp.linspace(1.0 * dx, (nx0 - 2) * dx, n_rcv)
    x_r = jnp.broadcast_to(
        jnp.stack([jnp.full((n_rcv,), 1.0 * dx), rxm], axis=-1)[None],
        (num_shots, n_rcv, 2))

    sim = PhySimulator(dx, num_shots, num_batches, x_s, x_r, dt,
                       pml_width, order, survey_pad=None)

    out = sim(vp, source_amplitudes, it=0, criticIter=1, j=0, status='TD',
              AddNoise=False, noi_var=None, learnAWGN=False)
    out = jax.block_until_ready(out)

    assert out.shape == (nt, num_shots // num_batches, n_rcv), out.shape
    assert bool(jnp.all(jnp.isfinite(out)))
    print("KERNEL_OK")
</pallas_src>

<mosaic_0001>
module attributes {stable_mosaic.version = 11 : i64} {
  func.func @kernel(%arg0: i32, %arg1: i32, %arg2: memref<64xf32, #tpu.memory_space<smem>>, %arg3: memref<2xi32, #tpu.memory_space<smem>>, %arg4: memref<2xi32, #tpu.memory_space<smem>>, %arg5: memref<2xi32, #tpu.memory_space<smem>>, %arg6: memref<2xf32, #tpu.memory_space<smem>>, %arg7: memref<3x32x128xf32, #tpu.memory_space<vmem>>, %arg8: memref<1x128x128xf32, #tpu.memory_space<vmem>>, %arg9: memref<1x64x128xf32, #tpu.memory_space<vmem>>, %arg10: memref<2x48x128xf32, #tpu.memory_space<vmem>>, %arg11: memref<64x128xf32, #tpu.memory_space<vmem>>) attributes {dimension_semantics = [#tpu.dimension_semantics<parallel>, #tpu.dimension_semantics<arbitrary>], iteration_bounds = array<i64: 2, 1>, scalar_prefetch = 0 : i64, scratch_operands = 2 : i64, tpu.core_type = #tpu.core_type<tc>, window_params = [{transform_indices = @transform_0, window_bounds = array<i64: 64>}, {transform_indices = @transform_1, window_bounds = array<i64: 2>}, {transform_indices = @transform_2, window_bounds = array<i64: 2>}, {transform_indices = @transform_3, window_bounds = array<i64: 2>}, {transform_indices = @transform_4, window_bounds = array<i64: 2>}, {pipeline_mode = #tpu.pipeline_mode<synchronous>, transform_indices = @transform_5, window_bounds = array<i64: 3, 32, 128>}, {pipeline_mode = #tpu.pipeline_mode<synchronous>, transform_indices = @transform_6, window_bounds = array<i64: 1, 128, 128>}, {transform_indices = @transform_7, window_bounds = array<i64: 1, 64, 128>}]} {
    %0 = arith.index_cast %arg0 : i32 to index
    %1 = memref.load %arg3[%0] : memref<2xi32, #tpu.memory_space<smem>>
    %2 = arith.index_cast %arg0 : i32 to index
    %3 = memref.load %arg4[%2] : memref<2xi32, #tpu.memory_space<smem>>
    %4 = arith.index_cast %arg0 : i32 to index
    %5 = memref.load %arg5[%4] : memref<2xi32, #tpu.memory_space<smem>>
    %6 = tpu.iota {dimensions = array<i32: 1>} : vector<1x128xi32>
    %7 = vector.broadcast %3 : i32 to vector<1x128xi32>
    %8 = arith.cmpi eq, %6, %7 : vector<1x128xi32>
    %9 = arith.index_cast %arg0 : i32 to index
    %10 = memref.load %arg6[%9] : memref<2xf32, #tpu.memory_space<smem>>
    %cst = arith.constant 0.000000e+00 : f32
    %11 = vector.broadcast %10 : f32 to vector<1x128xf32>
    %12 = vector.broadcast %cst : f32 to vector<1x128xf32>
    %13 = arith.select %8, %11, %12 : vector<1x128xi1>, vector<1x128xf32>
    %c0_i32 = arith.constant 0 : i32
    %14 = arith.cmpi eq, %arg1, %c0_i32 : i32
    %15 = arith.extui %14 : i1 to i32
    %c0_i32_0 = arith.constant 0 : i32
    %16 = arith.cmpi ne, %15, %c0_i32_0 : i32
    scf.if %16 {
      %cst_11 = arith.constant 0.000000e+00 : f32
      %26 = vector.broadcast %cst_11 : f32 to vector<2x48x128xf32>
      %c0_12 = arith.constant 0 : index
      %c0_13 = arith.constant 0 : index
      %c0_14 = arith.constant 0 : index
      %27 = vector.load %arg10[%c0_12, %c0_13, %c0_14] : memref<2x48x128xf32, #tpu.memory_space<vmem>>, vector<2x48x128xf32>
      tpu.vector_store %arg10[%c0_12, %c0_13, %c0_14], %26 {strides = array<i32>} : memref<2x48x128xf32, #tpu.memory_space<vmem>>, vector<2x48x128xf32>,
    } else {
    }
    %c64_i32 = arith.constant 64 : i32
    %17 = arith.muli %arg1, %c64_i32 : i32
    %c0_i32_1 = arith.constant 0 : i32
    %c8_i32 = arith.constant 8 : i32
    %18 = arith.addi %c0_i32_1, %c8_i32 : i32
    %c1_i32 = arith.constant 1 : i32
    scf.for %arg12 = %c0_i32_1 to %18 step %c1_i32  : i32 {
      %c0_11 = arith.constant 0 : index
      %c8 = arith.constant 8 : index
      %c0_12 = arith.constant 0 : index
      %26 = vector.load %arg10[%c0_11, %c8, %c0_12] : memref<2x48x128xf32, #tpu.memory_space<vmem>>, vector<1x32x128xf32>
      %27 = vector.shape_cast %26 : vector<1x32x128xf32> to vector<32x128xf32>
      %c1 = arith.constant 1 : index
      %c8_13 = arith.constant 8 : index
      %c0_14 = arith.constant 0 : index
      %28 = vector.load %arg10[%c1, %c8_13, %c0_14] : memref<2x48x128xf32, #tpu.memory_space<vmem>>, vector<1x32x128xf32>
      %29 = vector.shape_cast %28 : vector<1x32x128xf32> to vector<32x128xf32>
      %c0_15 = arith.constant 0 : index
      %c7 = arith.constant 7 : index
      %c0_16 = arith.constant 0 : index
      %30 = vector.load %arg10[%c0_15, %c7, %c0_16] : memref<2x48x128xf32, #tpu.memory_space<vmem>>, vector<1x32x128xf32>
      %31 = vector.shape_cast %30 : vector<1x32x128xf32> to vector<32x128xf32>
      %c0_17 = arith.constant 0 : index
      %c9 = arith.constant 9 : index
      %c0_18 = arith.constant 0 : index
      %32 = vector.load %arg10[%c0_17, %c9, %c0_18] : memref<2x48x128xf32, #tpu.memory_space<vmem>>, vector<1x32x128xf32>
      %33 = vector.shape_cast %32 : vector<1x32x128xf32> to vector<32x128xf32>
      %34 = arith.addf %31, %33 : vector<32x128xf32>
      %c1_i32_19 = arith.constant 1 : i32
      %35 = tpu.dynamic_rotate %27 by %c1_i32_19 dim 1 : vector<32x128xf32>, i32 -> vector<32x128xf32>
      %36 = arith.addf %34, %35 : vector<32x128xf32>
      %c127_i32 = arith.constant 127 : i32
      %37 = tpu.dynamic_rotate %27 by %c127_i32 dim 1 : vector<32x128xf32>, i32 -> vector<32x128xf32>
      %38 = arith.addf %36, %37 : vector<32x128xf32>
      %cst_20 = arith.constant 1.33333337 : f32
      %39 = vector.broadcast %cst_20 : f32 to vector<32x128xf32>
      %40 = arith.mulf %39, %38 : vector<32x128xf32>
      %c0_21 = arith.constant 0 : index
      %c6 = arith.constant 6 : index
      %c0_22 = arith.constant 0 : index
      %41 = vector.load %arg10[%c0_21, %c6, %c0_22] : memref<2x48x128xf32, #tpu.memory_space<vmem>>, vector<1x32x128xf32>
      %42 = vector.shape_cast %41 : vector<1x32x128xf32> to vector<32x128xf32>
      %c0_23 = arith.constant 0 : index
      %c10 = arith.constant 10 : index
      %c0_24 = arith.constant 0 : index
      %43 = vector.load %arg10[%c0_23, %c10, %c0_24] : memref<2x48x128xf32, #tpu.memory_space<vmem>>, vector<1x32x128xf32>
      %44 = vector.shape_cast %43 : vector<1x32x128xf32> to vector<32x128xf32>
      %45 = arith.addf %42, %44 : vector<32x128xf32>
      %c2_i32 = arith.constant 2 : i32
      %46 = tpu.dynamic_rotate %27 by %c2_i32 dim 1 : vector<32x128xf32>, i32 -> vector<32x128xf32>
      %47 = arith.addf %45, %46 : vector<32x128xf32>
      %c126_i32 = arith.constant 126 : i32
      %48 = tpu.dynamic_rotate %27 by %c126_i32 dim 1 : vector<32x128xf32>, i32 -> vector<32x128xf32>
      %49 = arith.addf %47, %48 : vector<32x128xf32>
      %cst_25 = arith.constant -0.0833333358 : f32
      %50 = vector.broadcast %cst_25 : f32 to vector<32x128xf32>
      %51 = arith.mulf %50, %49 : vector<32x128xf32>
      %52 = arith.addf %40, %51 : vector<32x128xf32>
      %c0_26 = arith.constant 0 : index
      %c0_27 = arith.constant 0 : index
      %c0_28 = arith.constant 0 : index
      %53 = vector.load %arg7[%c0_26, %c0_27, %c0_28] : memref<3x32x128xf32, #tpu.memory_space<vmem>>, vector<1x32x128xf32>
      %54 = vector.shape_cast %53 : vector<1x32x128xf32> to vector<32x128xf32>
      %55 = arith.mulf %54, %27 : vector<32x128xf32>
      %c1_29 = arith.constant 1 : index
      %c0_30 = arith.constant 0 : index
      %c0_31 = arith.constant 0 : index
      %56 = vector.load %arg7[%c1_29, %c0_30, %c0_31] : memref<3x32x128xf32, #tpu.memory_space<vmem>>, vector<1x32x128xf32>
      %57 = vector.shape_cast %56 : vector<1x32x128xf32> to vector<32x128xf32>
      %58 = arith.mulf %57, %29 : vector<32x128xf32>
      %59 = arith.subf %55, %58 : vector<32x128xf32>
      %c2 = arith.constant 2 : index
      %c0_32 = arith.constant 0 : index
      %c0_33 = arith.constant 0 : index
      %60 = vector.load %arg7[%c2, %c0_32, %c0_33] : memref<3x32x128xf32, #tpu.memory_space<vmem>>, vector<1x32x128xf32>
      %61 = vector.shape_cast %60 : vector<1x32x128xf32> to vector<32x128xf32>
      %62 = arith.mulf %61, %52 : vector<32x128xf32>
      %63 = arith.addf %59, %62 : vector<32x128xf32>
      %c1_34 = arith.constant 1 : index
      %c8_35 = arith.constant 8 : index
      %c0_36 = arith.constant 0 : index
      %64 = vector.load %arg10[%c1_34, %c8_35, %c0_36] : memref<2x48x128xf32, #tpu.memory_space<vmem>>, vector<1x32x128xf32>
      %65 = vector.shape_cast %64 : vector<1x32x128xf32> to vector<32x128xf32>
      %66 = vector.shape_cast %63 : vector<32x128xf32> to vector<1x32x128xf32>
      tpu.vector_store %arg10[%c1_34, %c8_35, %c0_36], %66 {strides = array<i32>} : memref<2x48x128xf32, #tpu.memory_space<vmem>>, vector<1x32x128xf32>,
      %c8_i32_37 = arith.constant 8 : i32
      %67 = arith.muli %arg12, %c8_i32_37 : i32
      %68 = arith.addi %17, %67 : i32
      %c0_i32_38 = arith.constant 0 : i32
      %69 = arith.addi %68, %c0_i32_38 : i32
      %70 = arith.index_cast %69 : i32 to index
      %71 = memref.load %arg2[%70] : memref<64xf32, #tpu.memory_space<smem>>
      %c8_i32_39 = arith.constant 8 : i32
      %72 = arith.addi %c8_i32_39, %1 : i32
      %c1_40 = arith.constant 1 : index
      %73 = arith.index_cast %72 : i32 to index
      %c0_41 = arith.constant 0 : index
      %74 = vector.load %arg10[%c1_40, %73, %c0_41] : memref<2x48x128xf32, #tpu.memory_space<vmem>>, vector<1x1x128xf32>
      %75 = vector.shape_cast %74 : vector<1x1x128xf32> to vector<1x128xf32>
      %76 = vector.broadcast %71 : f32 to vector<1x128xf32>
      %77 = arith.mulf %13, %76 : vector<1x128xf32>
      %78 = arith.addf %75, %77 : vector<1x128xf32>
      %c8_i32_42 = arith.constant 8 : i32
      %79 = arith.addi %c8_i32_42, %1 : i32
      %c1_43 = arith.constant 1 : index
      %80 = arith.index_cast %79 : i32 to index
      %c0_44 = arith.constant 0 : index
      %81 = vector.load %arg10[%c1_43, %80, %c0_44] : memref<2x48x128xf32, #tpu.memory_space<vmem>>, vector<1x1x128xf32>
      %82 = vector.shape_cast %81 : vector<1x1x128xf32> to vector<1x128xf32>
      %83 = vector.shape_cast %78 : vector<1x128xf32> to vector<1x1x128xf32>
      tpu.vector_store %arg10[%c1_43, %80, %c0_44], %83 {strides = array<i32>} : memref<2x48x128xf32, #tpu.memory_space<vmem>>, vector<1x1x128xf32>,
      %c8_i32_45 = arith.constant 8 : i32
      %84 = arith.addi %c8_i32_45, %5 : i32
      %c1_46 = arith.constant 1 : index
      %85 = arith.index_cast %84 : i32 to index
      %c0_47 = arith.constant 0 : index
      %86 = vector.load %arg10[%c1_46, %85, %c0_47] : memref<2x48x128xf32, #tpu.memory_space<vmem>>, vector<1x1x128xf32>
      %87 = vector.shape_cast %86 : vector<1x1x128xf32> to vector<1x128xf32>
      %c8_i32_48 = arith.constant 8 : i32
      %88 = arith.muli %arg12, %c8_i32_48 : i32
      %c0_i32_49 = arith.constant 0 : i32
      %89 = arith.addi %88, %c0_i32_49 : i32
      %90 = arith.index_cast %89 : i32 to index
      %c0_50 = arith.constant 0 : index
      %91 = vector.load %arg11[%90, %c0_50] : memref<64x128xf32, #tpu.memory_space<vmem>>, vector<1x128xf32>
      tpu.vector_store %arg11[%90, %c0_50], %87 {strides = array<i32>} : memref<64x128xf32, #tpu.memory_space<vmem>>, vector<1x128xf32>,
      %c1_51 = arith.constant 1 : index
      %c8_52 = arith.constant 8 : index
      %c0_53 = arith.constant 0 : index
      %92 = vector.load %arg10[%c1_51, %c8_52, %c0_53] : memref<2x48x128xf32, #tpu.memory_space<vmem>>, vector<1x32x128xf32>
      %93 = vector.shape_cast %92 : vector<1x32x128xf32> to vector<32x128xf32>
      %c0_54 = arith.constant 0 : index
      %c8_55 = arith.constant 8 : index
      %c0_56 = arith.constant 0 : index
      %94 = vector.load %arg10[%c0_54, %c8_55, %c0_56] : memref<2x48x128xf32, #tpu.memory_space<vmem>>, vector<1x32x128xf32>
      %95 = vector.shape_cast %94 : vector<1x32x128xf32> to vector<32x128xf32>
      %c1_57 = arith.constant 1 : index
      %c7_58 = arith.constant 7 : index
      %c0_59 = arith.constant 0 : index
      %96 = vector.load %arg10[%c1_57, %c7_58, %c0_59] : memref<2x48x128xf32, #tpu.memory_space<vmem>>, vector<1x32x128xf32>
      %97 = vector.shape_cast %96 : vector<1x32x128xf32> to vector<32x128xf32>
      %c1_60 = arith.constant 1 : index
      %c9_61 = arith.constant 9 : index
      %c0_62 = arith.constant 0 : index
      %98 = vector.load %arg10[%c1_60, %c9_61, %c0_62] : memref<2x48x128xf32, #tpu.memory_space<vmem>>, vector<1x32x128xf32>
      %99 = vector.shape_cast %98 : vector<1x32x128xf32> to vector<32x128xf32>
      %100 = arith.addf %97, %99 : vector<32x128xf32>
      %c1_i32_63 = arith.constant 1 : i32
      %101 = tpu.dynamic_rotate %93 by %c1_i32_63 dim 1 : vector<32x128xf32>, i32 -> vector<32x128xf32>
      %102 = arith.addf %100, %101 : vector<32x128xf32>
      %c127_i32_64 = arith.constant 127 : i32
      %103 = tpu.dynamic_rotate %93 by %c127_i32_64 dim 1 : vector<32x128xf32>, i32 -> vector<32x128xf32>
      %104 = arith.addf %102, %103 : vector<32x128xf32>
      %cst_65 = arith.constant 1.33333337 : f32
      %105 = vector.broadcast %cst_65 : f32 to vector<32x128xf32>
      %106 = arith.mulf %105, %104 : vector<32x128xf32>
      %c1_66 = arith.constant 1 : index
      %c6_67 = arith.constant 6 : index
      %c0_68 = arith.constant 0 : index
      %107 = vector.load %arg10[%c1_66, %c6_67, %c0_68] : memref<2x48x128xf32, #tpu.memory_space<vmem>>, vector<1x32x128xf32>
      %108 = vector.shape_cast %107 : vector<1x32x128xf32> to vector<32x128xf32>
      %c1_69 = arith.constant 1 : index
      %c10_70 = arith.constant 10 : index
      %c0_71 = arith.constant 0 : index
      %109 = vector.load %arg10[%c1_69, %c10_70, %c0_71] : memref<2x48x128xf32, #tpu.memory_space<vmem>>, vector<1x32x128xf32>
      %110 = vector.shape_cast %109 : vector<1x32x128xf32> to vector<32x128xf32>
      %111 = arith.addf %108, %110 : vector<32x128xf32>
      %c2_i32_72 = arith.constant 2 : i32
      %112 = tpu.dynamic_rotate %93 by %c2_i32_72 dim 1 : vector<32x128xf32>, i32 -> vector<32x128xf32>
      %113 = arith.addf %111, %112 : vector<32x128xf32>
      %c126_i32_73 = arith.constant 126 : i32
      %114 = tpu.dynamic_rotate %93 by %c126_i32_73 dim 1 : vector<32x128xf32>, i32 -> vector<32x128xf32>
      %115 = arith.addf %113, %114 : vector<32x128xf32>
      %cst_74 = arith.constant -0.0833333358 : f32
      %116 = vector.broadcast %cst_74 : f32 to vector<32x128xf32>
      %117 = arith.mulf %116, %115 : vector<32x128xf32>
      %118 = arith.addf %106, %117 : vector<32x128xf32>
      %c0_75 = arith.constant 0 : index
      %c0_76 = arith.constant 0 : index
      %c0_77 = arith.constant 0 : index
      %119 = vector.load %arg7[%c0_75, %c0_76, %c0_77] : memref<3x32x128xf32, #tpu.memory_space<vmem>>, vector<1x32x128xf32>
      %120 = vector.shape_cast %119 : vector<1x32x128xf32> to vector<32x128xf32>
      %121 = arith.mulf %120, %93 : vector<32x128xf32>
      %c1_78 = arith.constant 1 : index
      %c0_79 = arith.constant 0 : index
      %c0_80 = arith.constant 0 : index
      %122 = vector.load %arg7[%c1_78, %c0_79, %c0_80] : memref<3x32x128xf32, #tpu.memory_space<vmem>>, vector<1x32x128xf32>
      %123 = vector.shape_cast %122 : vector<1x32x128xf32> to vector<32x128xf32>
      %124 = arith.mulf %123, %95 : vector<32x128xf32>
      %125 = arith.subf %121, %124 : vector<32x128xf32>
      %c2_81 = arith.constant 2 : index
      %c0_82 = arith.constant 0 : index
      %c0_83 = arith.constant 0 : index
      %126 = vector.load %arg7[%c2_81, %c0_82, %c0_83] : memref<3x32x128xf32, #tpu.memory_space<vmem>>, vector<1x32x128xf32>
      %127 = vector.shape_cast %126 : vector<1x32x128xf32> to vector<32x128xf32>
      %128 = arith.mulf %127, %118 : vector<32x128xf32>
      %129 = arith.addf %125, %128 : vector<32x128xf32>
      %c0_84 = arith.constant 0 : index
      %c8_85 = arith.constant 8 : index
      %c0_86 = arith.constant 0 : index
      %130 = vector.load %arg10[%c0_84, %c8_85, %c0_86] : memref<2x48x128xf32, #tpu.memory_space<vmem>>, vector<1x32x128xf32>
      %131 = vector.shape_cast %130 : vector<1x32x128xf32> to vector<32x128xf32>
      %132 = vector.shape_cast %129 : vector<32x128xf32> to vector<1x32x128xf32>
      tpu.vector_store %arg10[%c0_84, %c8_85, %c0_86], %132 {strides = array<i32>} : memref<2x48x128xf32, #tpu.memory_space<vmem>>, vector<1x32x128xf32>,
      %c8_i32_87 = arith.constant 8 : i32
      %133 = arith.muli %arg12, %c8_i32_87 : i32
      %134 = arith.addi %17, %133 : i32
      %c1_i32_88 = arith.constant 1 : i32
      %135 = arith.addi %134, %c1_i32_88 : i32
      %136 = arith.index_cast %135 : i32 to index
      %137 = memref.load %arg2[%136] : memref<64xf32, #tpu.memory_space<smem>>
      %c8_i32_89 = arith.constant 8 : i32
      %138 = arith.addi %c8_i32_89, %1 : i32
      %c0_90 = arith.constant 0 : index
      %139 = arith.index_cast %138 : i32 to index
      %c0_91 = arith.constant 0 : index
      %140 = vector.load %arg10[%c0_90, %139, %c0_91] : memref<2x48x128xf32, #tpu.memory_space<vmem>>, vector<1x1x128xf32>
      %141 = vector.shape_cast %140 : vector<1x1x128xf32> to vector<1x128xf32>
      %142 = vector.broadcast %137 : f32 to vector<1x128xf32>
      %143 = arith.mulf %13, %142 : vector<1x128xf32>
      %144 = arith.addf %141, %143 : vector<1x128xf32>
      %c8_i32_92 = arith.constant 8 : i32
      %145 = arith.addi %c8_i32_92, %1 : i32
      %c0_93 = arith.constant 0 : index
      %146 = arith.index_cast %145 : i32 to index
      %c0_94 = arith.constant 0 : index
      %147 = vector.load %arg10[%c0_93, %146, %c0_94] : memref<2x48x128xf32, #tpu.memory_space<vmem>>, vector<1x1x128xf32>
      %148 = vector.shape_cast %147 : vector<1x1x128xf32> to vector<1x128xf32>
      %149 = vector.shape_cast %144 : vector<1x128xf32> to vector<1x1x128xf32>
      tpu.vector_store %arg10[%c0_93, %146, %c0_94], %149 {strides = array<i32>} : memref<2x48x128xf32, #tpu.memory_space<vmem>>, vector<1x1x128xf32>,
      %c8_i32_95 = arith.constant 8 : i32
      %150 = arith.addi %c8_i32_95, %5 : i32
      %c0_96 = arith.constant 0 : index
      %151 = arith.index_cast %150 : i32 to index
      %c0_97 = arith.constant 0 : index
      %152 = vector.load %arg10[%c0_96, %151, %c0_97] : memref<2x48x128xf32, #tpu.memory_space<vmem>>, vector<1x1x128xf32>
      %153 = vector.shape_cast %152 : vector<1x1x128xf32> to vector<1x128xf32>
      %c8_i32_98 = arith.constant 8 : i32
      %154 = arith.muli %arg12, %c8_i32_98 : i32
      %c1_i32_99 = arith.constant 1 : i32
      %155 = arith.addi %154, %c1_i32_99 : i32
      %156 = arith.index_cast %155 : i32 to index
      %c0_100 = arith.constant 0 : index
      %157 = vector.load %arg11[%156, %c0_100] : memref<64x128xf32, #tpu.memory_space<vmem>>, vector<1x128xf32>
      tpu.vector_store %arg11[%156, %c0_100], %153 {strides = array<i32>} : memref<64x128xf32, #tpu.memory_space<vmem>>, vector<1x128xf32>,
      %c0_101 = arith.constant 0 : index
      %c8_102 = arith.constant 8 : index
      %c0_103 = arith.constant 0 : index
      %158 = vector.load %arg10[%c0_101, %c8_102, %c0_103] : memref<2x48x128xf32, #tpu.memory_space<vmem>>, vector<1x32x128xf32>
      %159 = vector.shape_cast %158 : vector<1x32x128xf32> to vector<32x128xf32>
      %c1_104 = arith.constant 1 : index
      %c8_105 = arith.constant 8 : index
      %c0_106 = arith.constant 0 : index
      %160 = vector.load %arg10[%c1_104, %c8_105, %c0_106] : memref<2x48x128xf32, #tpu.memory_space<vmem>>, vector<1x32x128xf32>
      %161 = vector.shape_cast %160 : vector<1x32x128xf32> to vector<32x128xf32>
      %c0_107 = arith.constant 0 : index
      %c7_108 = arith.constant 7 : index
      %c0_109 = arith.constant 0 : index
      %162 = vector.load %arg10[%c0_107, %c7_108, %c0_109] : memref<2x48x128xf32, #tpu.memory_space<vmem>>, vector<1x32x128xf32>
      %163 = vector.shape_cast %162 : vector<1x32x128xf32> to vector<32x128xf32>
      %c0_110 = arith.constant 0 : index
      %c9_111 = arith.constant 9 : index
      %c0_112 = arith.constant 0 : index
      %164 = vector.load %arg10[%c0_110, %c9_111, %c0_112] : memref<2x48x128xf32, #tpu.memory_space<vmem>>, vector<1x32x128xf32>
      %165 = vector.shape_cast %164 : vector<1x32x128xf32> to vector<32x128xf32>
      %166 = arith.addf %163, %165 : vector<32x128xf32>
      %c1_i32_113 = arith.constant 1 : i32
      %167 = tpu.dynamic_rotate %159 by %c1_i32_113 dim 1 : vector<32x128xf32>, i32 -> vector<32x128xf32>
      %168 = arith.addf %166, %167 : vector<32x128xf32>
      %c127_i32_114 = arith.constant 127 : i32
      %169 = tpu.dynamic_rotate %159 by %c127_i32_114 dim 1 : vector<32x128xf32>, i32 -> vector<32x128xf32>
      %170 = arith.addf %168, %169 : vector<32x128xf32>
      %cst_115 = arith.constant 1.33333337 : f32
      %171 = vector.broadcast %cst_115 : f32 to vector<32x128xf32>
      %172 = arith.mulf %171, %170 : vector<32x128xf32>
      %c0_116 = arith.constant 0 : index
      %c6_117 = arith.constant 6 : index
      %c0_118 = arith.constant 0 : index
      %173 = vector.load %arg10[%c0_116, %c6_117, %c0_118] : memref<2x48x128xf32, #tpu.memory_space<vmem>>, vector<1x32x128xf32>
      %174 = vector.shape_cast %173 : vector<1x32x128xf32> to vector<32x128xf32>
      %c0_119 = arith.constant 0 : index
      %c10_120 = arith.constant 10 : index
      %c0_121 = arith.constant 0 : index
      %175 = vector.load %arg10[%c0_119, %c10_120, %c0_121] : memref<2x48x128xf32, #tpu.memory_space<vmem>>, vector<1x32x128xf32>
      %176 = vector.shape_cast %175 : vector<1x32x128xf32> to vector<32x128xf32>
      %177 = arith.addf %174, %176 : vector<32x128xf32>
      %c2_i32_122 = arith.constant 2 : i32
      %178 = tpu.dynamic_rotate %159 by %c2_i32_122 dim 1 : vector<32x128xf32>, i32 -> vector<32x128xf32>
      %179 = arith.addf %177, %178 : vector<32x128xf32>
      %c126_i32_123 = arith.constant 126 : i32
      %180 = tpu.dynamic_rotate %159 by %c126_i32_123 dim 1 : vector<32x128xf32>, i32 -> vector<32x128xf32>
      %181 = arith.addf %179, %180 : vector<32x128xf32>
      %cst_124 = arith.constant -0.0833333358 : f32
      %182 = vector.broadcast %cst_124 : f32 to vector<32x128xf32>
      %183 = arith.mulf %182, %181 : vector<32x128xf32>
      %184 = arith.addf %172, %183 : vector<32x128xf32>
      %c0_125 = arith.constant 0 : index
      %c0_126 = arith.constant 0 : index
      %c0_127 = arith.constant 0 : index
      %185 = vector.load %arg7[%c0_125, %c0_126, %c0_127] : memref<3x32x128xf32, #tpu.memory_space<vmem>>, vector<1x32x128xf32>
      %186 = vector.shape_cast %185 : vector<1x32x128xf32> to vector<32x128xf32>
      %187 = arith.mulf %186, %159 : vector<32x128xf32>
      %c1_128 = arith.constant 1 : index
      %c0_129 = arith.constant 0 : index
      %c0_130 = arith.constant 0 : index
      %188 = vector.load %arg7[%c1_128, %c0_129, %c0_130] : memref<3x32x128xf32, #tpu.memory_space<vmem>>, vector<1x32x128xf32>
      %189 = vector.shape_cast %188 : vector<1x32x128xf32> to vector<32x128xf32>
      %190 = arith.mulf %189, %161 : vector<32x128xf32>
      %191 = arith.subf %187, %190 : vector<32x128xf32>
      %c2_131 = arith.constant 2 : index
      %c0_132 = arith.constant 0 : index
      %c0_133 = arith.constant 0 : index
      %192 = vector.load %arg7[%c2_131, %c0_132, %c0_133] : memref<3x32x128xf32, #tpu.memory_space<vmem>>, vector<1x32x128xf32>
      %193 = vector.shape_cast %192 : vector<1x32x128xf32> to vector<32x128xf32>
      %194 = arith.mulf %193, %184 : vector<32x128xf32>
      %195 = arith.addf %191, %194 : vector<32x128xf32>
      %c1_134 = arith.constant 1 : index
      %c8_135 = arith.constant 8 : index
      %c0_136 = arith.constant 0 : index
      %196 = vector.load %arg10[%c1_134, %c8_135, %c0_136] : memref<2x48x128xf32, #tpu.memory_space<vmem>>, vector<1x32x128xf32>
      %197 = vector.shape_cast %196 : vector<1x32x128xf32> to vector<32x128xf32>
      %198 = vector.shape_cast %195 : vector<32x128xf32> to vector<1x32x128xf32>
      tpu.vector_store %arg10[%c1_134, %c8_135, %c0_136], %198 {strides = array<i32>} : memref<2x48x128xf32, #tpu.memory_space<vmem>>, vector<1x32x128xf32>,
      %c8_i32_137 = arith.constant 8 : i32
      %199 = arith.muli %arg12, %c8_i32_137 : i32
      %200 = arith.addi %17, %199 : i32
      %c2_i32_138 = arith.constant 2 : i32
      %201 = arith.addi %200, %c2_i32_138 : i32
      %202 = arith.index_cast %201 : i32 to index
      %203 = memref.load %arg2[%202] : memref<64xf32, #tpu.memory_space<smem>>
      %c8_i32_139 = arith.constant 8 : i32
      %204 = arith.addi %c8_i32_139, %1 : i32
      %c1_140 = arith.constant 1 : index
      %205 = arith.index_cast %204 : i32 to index
      %c0_141 = arith.constant 0 : index
      %206 = vector.load %arg10[%c1_140, %205, %c0_141] : memref<2x48x128xf32, #tpu.memory_space<vmem>>, vector<1x1x128xf32>
      %207 = vector.shape_cast %206 : vector<1x1x128xf32> to vector<1x128xf32>
      %208 = vector.broadcast %203 : f32 to vector<1x128xf32>
      %209 = arith.mulf %13, %208 : vector<1x128xf32>
      %210 = arith.addf %207, %209 : vector<1x128xf32>
      %c8_i32_142 = arith.constant 8 : i32
      %211 = arith.addi %c8_i32_142, %1 : i32
      %c1_143 = arith.constant 1 : index
      %212 = arith.index_cast %211 : i32 to index
      %c0_144 = arith.constant 0 : index
      %213 = vector.load %arg10[%c1_143, %212, %c0_144] : memref<2x48x128xf32, #tpu.memory_space<vmem>>, vector<1x1x128xf32>
      %214 = vector.shape_cast %213 : vector<1x1x128xf32> to vector<1x128xf32>
      %215 = vector.shape_cast %210 : vector<1x128xf32> to vector<1x1x128xf32>
      tpu.vector_store %arg10[%c1_143, %212, %c0_144], %215 {strides = array<i32>} : memref<2x48x128xf32, #tpu.memory_space<vmem>>, vector<1x1x128xf32>,
      %c8_i32_145 = arith.constant 8 : i32
      %216 = arith.addi %c8_i32_145, %5 : i32
      %c1_146 = arith.constant 1 : index
      %217 = arith.index_cast %216 : i32 to index
      %c0_147 = arith.constant 0 : index
      %218 = vector.load %arg10[%c1_146, %217, %c0_147] : memref<2x48x128xf32, #tpu.memory_space<vmem>>, vector<1x1x128xf32>
      %219 = vector.shape_cast %218 : vector<1x1x128xf32> to vector<1x128xf32>
      %c8_i32_148 = arith.constant 8 : i32
      %220 = arith.muli %arg12, %c8_i32_148 : i32
      %c2_i32_149 = arith.constant 2 : i32
      %221 = arith.addi %220, %c2_i32_149 : i32
      %222 = arith.index_cast %221 : i32 to index
      %c0_150 = arith.constant 0 : index
      %223 = vector.load %arg11[%222, %c0_150] : memref<64x128xf32, #tpu.memory_space<vmem>>, vector<1x128xf32>
      tpu.vector_store %arg11[%222, %c0_150], %219 {strides = array<i32>} : memref<64x128xf32, #tpu.memory_space<vmem>>, vector<1x128xf32>,
      %c1_151 = arith.constant 1 : index
      %c8_152 = arith.constant 8 : index
      %c0_153 = arith.constant 0 : index
      %224 = vector.load %arg10[%c1_151, %c8_152, %c0_153] : memref<2x48x128xf32, #tpu.memory_space<vmem>>, vector<1x32x128xf32>
      %225 = vector.shape_cast %224 : vector<1x32x128xf32> to vector<32x128xf32>
      %c0_154 = arith.constant 0 : index
      %c8_155 = arith.constant 8 : index
      %c0_156 = arith.constant 0 : index
      %226 = vector.load %arg10[%c0_154, %c8_155, %c0_156] : memref<2x48x128xf32, #tpu.memory_space<vmem>>, vector<1x32x128xf32>
      %227 = vector.shape_cast %226 : vector<1x32x128xf32> to vector<32x128xf32>
      %c1_157 = arith.constant 1 : index
      %c7_158 = arith.constant 7 : index
      %c0_159 = arith.constant 0 : index
      %228 = vector.load %arg10[%c1_157, %c7_158, %c0_159] : memref<2x48x128xf32, #tpu.memory_space<vmem>>, vector<1x32x128xf32>
      %229 = vector.shape_cast %228 : vector<1x32x128xf32> to vector<32x128xf32>
      %c1_160 = arith.constant 1 : index
      %c9_161 = arith.constant 9 : index
      %c0_162 = arith.constant 0 : index
      %230 = vector.load %arg10[%c1_160, %c9_161, %c0_162] : memref<2x48x128xf32, #tpu.memory_space<vmem>>, vector<1x32x128xf32>
      %231 = vector.shape_cast %230 : vector<1x32x128xf32> to vector<32x128xf32>
      %232 = arith.addf %229, %231 : vector<32x128xf32>
      %c1_i32_163 = arith.constant 1 : i32
      %233 = tpu.dynamic_rotate %225 by %c1_i32_163 dim 1 : vector<32x128xf32>, i32 -> vector<32x128xf32>
      %234 = arith.addf %232, %233 : vector<32x128xf32>
      %c127_i32_164 = arith.constant 127 : i32
      %235 = tpu.dynamic_rotate %225 by %c127_i32_164 dim 1 : vector<32x128xf32>, i32 -> vector<32x128xf32>
      %236 = arith.addf %234, %235 : vector<32x128xf32>
      %cst_165 = arith.constant 1.33333337 : f32
      %237 = vector.broadcast %cst_165 : f32 to vector<32x128xf32>
      %238 = arith.mulf %237, %236 : vector<32x128xf32>
      %c1_166 = arith.constant 1 : index
      %c6_167 = arith.constant 6 : index
      %c0_168 = arith.constant 0 : index
      %239 = vector.load %arg10[%c1_166, %c6_167, %c0_168] : memref<2x48x128xf32, #tpu.memory_space<vmem>>, vector<1x32x128xf32>
      %240 = vector.shape_cast %239 : vector<1x32x128xf32> to vector<32x128xf32>
      %c1_169 = arith.constant 1 : index
      %c10_170 = arith.constant 10 : index
      %c0_171 = arith.constant 0 : index
      %241 = vector.load %arg10[%c1_169, %c10_170, %c0_171] : memref<2x48x128xf32, #tpu.memory_space<vmem>>, vector<1x32x128xf32>
      %242 = vector.shape_cast %241 : vector<1x32x128xf32> to vector<32x128xf32>
      %243 = arith.addf %240, %242 : vector<32x128xf32>
      %c2_i32_172 = arith.constant 2 : i32
      %244 = tpu.dynamic_rotate %225 by %c2_i32_172 dim 1 : vector<32x128xf32>, i32 -> vector<32x128xf32>
      %245 = arith.addf %243, %244 : vector<32x128xf32>
      %c126_i32_173 = arith.constant 126 : i32
      %246 = tpu.dynamic_rotate %225 by %c126_i32_173 dim 1 : vector<32x128xf32>, i32 -> vector<32x128xf32>
      %247 = arith.addf %245, %246 : vector<32x128xf32>
      %cst_174 = arith.constant -0.0833333358 : f32
      %248 = vector.broadcast %cst_174 : f32 to vector<32x128xf32>
      %249 = arith.mulf %248, %247 : vector<32x128xf32>
      %250 = arith.addf %238, %249 : vector<32x128xf32>
      %c0_175 = arith.constant 0 : index
      %c0_176 = arith.constant 0 : index
      %c0_177 = arith.constant 0 : index
      %251 = vector.load %arg7[%c0_175, %c0_176, %c0_177] : memref<3x32x128xf32, #tpu.memory_space<vmem>>, vector<1x32x128xf32>
      %252 = vector.shape_cast %251 : vector<1x32x128xf32> to vector<32x128xf32>
      %253 = arith.mulf %252, %225 : vector<32x128xf32>
      %c1_178 = arith.constant 1 : index
      %c0_179 = arith.constant 0 : index
      %c0_180 = arith.constant 0 : index
      %254 = vector.load %arg7[%c1_178, %c0_179, %c0_180] : memref<3x32x128xf32, #tpu.memory_space<vmem>>, vector<1x32x128xf32>
      %255 = vector.shape_cast %254 : vector<1x32x128xf32> to vector<32x128xf32>
      %256 = arith.mulf %255, %227 : vector<32x128xf32>
      %257 = arith.subf %253, %256 : vector<32x128xf32>
      %c2_181 = arith.constant 2 : index
      %c0_182 = arith.constant 0 : index
      %c0_183 = arith.constant 0 : index
      %258 = vector.load %arg7[%c2_181, %c0_182, %c0_183] : memref<3x32x128xf32, #tpu.memory_space<vmem>>, vector<1x32x128xf32>
      %259 = vector.shape_cast %258 : vector<1x32x128xf32> to vector<32x128xf32>
      %260 = arith.mulf %259, %250 : vector<32x128xf32>
      %261 = arith.addf %257, %260 : vector<32x128xf32>
      %c0_184 = arith.constant 0 : index
      %c8_185 = arith.constant 8 : index
      %c0_186 = arith.constant 0 : index
      %262 = vector.load %arg10[%c0_184, %c8_185, %c0_186] : memref<2x48x128xf32, #tpu.memory_space<vmem>>, vector<1x32x128xf32>
      %263 = vector.shape_cast %262 : vector<1x32x128xf32> to vector<32x128xf32>
      %264 = vector.shape_cast %261 : vector<32x128xf32> to vector<1x32x128xf32>
      tpu.vector_store %arg10[%c0_184, %c8_185, %c0_186], %264 {strides = array<i32>} : memref<2x48x128xf32, #tpu.memory_space<vmem>>, vector<1x32x128xf32>,
      %c8_i32_187 = arith.constant 8 : i32
      %265 = arith.muli %arg12, %c8_i32_187 : i32
      %266 = arith.addi %17, %265 : i32
      %c3_i32 = arith.constant 3 : i32
      %267 = arith.addi %266, %c3_i32 : i32
      %268 = arith.index_cast %267 : i32 to index
      %269 = memref.load %arg2[%268] : memref<64xf32, #tpu.memory_space<smem>>
      %c8_i32_188 = arith.constant 8 : i32
      %270 = arith.addi %c8_i32_188, %1 : i32
      %c0_189 = arith.constant 0 : index
      %271 = arith.index_cast %270 : i32 to index
      %c0_190 = arith.constant 0 : index
      %272 = vector.load %arg10[%c0_189, %271, %c0_190] : memref<2x48x128xf32, #tpu.memory_space<vmem>>, vector<1x1x128xf32>
      %273 = vector.shape_cast %272 : vector<1x1x128xf32> to vector<1x128xf32>
      %274 = vector.broadcast %269 : f32 to vector<1x128xf32>
      %275 = arith.mulf %13, %274 : vector<1x128xf32>
      %276 = arith.addf %273, %275 : vector<1x128xf32>
      %c8_i32_191 = arith.constant 8 : i32
      %277 = arith.addi %c8_i32_191, %1 : i32
      %c0_192 = arith.constant 0 : index
      %278 = arith.index_cast %277 : i32 to index
      %c0_193 = arith.constant 0 : index
      %279 = vector.load %arg10[%c0_192, %278, %c0_193] : memref<2x48x128xf32, #tpu.memory_space<vmem>>, vector<1x1x128xf32>
      %280 = vector.shape_cast %279 : vector<1x1x128xf32> to vector<1x128xf32>
      %281 = vector.shape_cast %276 : vector<1x128xf32> to vector<1x1x128xf32>
      tpu.vector_store %arg10[%c0_192, %278, %c0_193], %281 {strides = array<i32>} : memref<2x48x128xf32, #tpu.memory_space<vmem>>, vector<1x1x128xf32>,
      %c8_i32_194 = arith.constant 8 : i32
      %282 = arith.addi %c8_i32_194, %5 : i32
      %c0_195 = arith.constant 0 : index
      %283 = arith.index_cast %282 : i32 to index
      %c0_196 = arith.constant 0 : index
      %284 = vector.load %arg10[%c0_195, %283, %c0_196] : memref<2x48x128xf32, #tpu.memory_space<vmem>>, vector<1x1x128xf32>
      %285 = vector.shape_cast %284 : vector<1x1x128xf32> to vector<1x128xf32>
      %c8_i32_197 = arith.constant 8 : i32
      %286 = arith.muli %arg12, %c8_i32_197 : i32
      %c3_i32_198 = arith.constant 3 : i32
      %287 = arith.addi %286, %c3_i32_198 : i32
      %288 = arith.index_cast %287 : i32 to index
      %c0_199 = arith.constant 0 : index
      %289 = vector.load %arg11[%288, %c0_199] : memref<64x128xf32, #tpu.memory_space<vmem>>, vector<1x128xf32>
      tpu.vector_store %arg11[%288, %c0_199], %285 {strides = array<i32>} : memref<64x128xf32, #tpu.memory_space<vmem>>, vector<1x128xf32>,
      %c0_200 = arith.constant 0 : index
      %c8_201 = arith.constant 8 : index
      %c0_202 = arith.constant 0 : index
      %290 = vector.load %arg10[%c0_200, %c8_201, %c0_202] : memref<2x48x128xf32, #tpu.memory_space<vmem>>, vector<1x32x128xf32>
      %291 = vector.shape_cast %290 : vector<1x32x128xf32> to vector<32x128xf32>
      %c1_203 = arith.constant 1 : index
      %c8_204 = arith.constant 8 : index
      %c0_205 = arith.constant 0 : index
      %292 = vector.load %arg10[%c1_203, %c8_204, %c0_205] : memref<2x48x128xf32, #tpu.memory_space<vmem>>, vector<1x32x128xf32>
      %293 = vector.shape_cast %292 : vector<1x32x128xf32> to vector<32x128xf32>
      %c0_206 = arith.constant 0 : index
      %c7_207 = arith.constant 7 : index
      %c0_208 = arith.constant 0 : index
      %294 = vector.load %arg10[%c0_206, %c7_207, %c0_208] : memref<2x48x128xf32, #tpu.memory_space<vmem>>, vector<1x32x128xf32>
      %295 = vector.shape_cast %294 : vector<1x32x128xf32> to vector<32x128xf32>
      %c0_209 = arith.constant 0 : index
      %c9_210 = arith.constant 9 : index
      %c0_211 = arith.constant 0 : index
      %296 = vector.load %arg10[%c0_209, %c9_210, %c0_211] : memref<2x48x128xf32, #tpu.memory_space<vmem>>, vector<1x32x128xf32>
      %297 = vector.shape_cast %296 : vector<1x32x128xf32> to vector<32x128xf32>
      %298 = arith.addf %295, %297 : vector<32x128xf32>
      %c1_i32_212 = arith.constant 1 : i32
      %299 = tpu.dynamic_rotate %291 by %c1_i32_212 dim 1 : vector<32x128xf32>, i32 -> vector<32x128xf32>
      %300 = arith.addf %298, %299 : vector<32x128xf32>
      %c127_i32_213 = arith.constant 127 : i32
      %301 = tpu.dynamic_rotate %291 by %c127_i32_213 dim 1 : vector<32x128xf32>, i32 -> vector<32x128xf32>
      %302 = arith.addf %300, %301 : vector<32x128xf32>
      %cst_214 = arith.constant 1.33333337 : f32
      %303 = vector.broadcast %cst_214 : f32 to vector<32x128xf32>
      %304 = arith.mulf %303, %302 : vector<32x128xf32>
      %c0_215 = arith.constant 0 : index
      %c6_216 = arith.constant 6 : index
      %c0_217 = arith.constant 0 : index
      %305 = vector.load %arg10[%c0_215, %c6_216, %c0_217] : memref<2x48x128xf32, #tpu.memory_space<vmem>>, vector<1x32x128xf32>
      %306 = vector.shape_cast %305 : vector<1x32x128xf32> to vector<32x128xf32>
      %c0_218 = arith.constant 0 : index
      %c10_219 = arith.constant 10 : index
      %c0_220 = arith.constant 0 : index
      %307 = vector.load %arg10[%c0_218, %c10_219, %c0_220] : memref<2x48x128xf32, #tpu.memory_space<vmem>>, vector<1x32x128xf32>
      %308 = vector.shape_cast %307 : vector<1x32x128xf32> to vector<32x128xf32>
      %309 = arith.addf %306, %308 : vector<32x128xf32>
      %c2_i32_221 = arith.constant 2 : i32
      %310 = tpu.dynamic_rotate %291 by %c2_i32_221 dim 1 : vector<32x128xf32>, i32 -> vector<32x128xf32>
      %311 = arith.addf %309, %310 : vector<32x128xf32>
      %c126_i32_222 = arith.constant 126 : i32
      %312 = tpu.dynamic_rotate %291 by %c126_i32_222 dim 1 : vector<32x128xf32>, i32 -> vector<32x128xf32>
      %313 = arith.addf %311, %312 : vector<32x128xf32>
      %cst_223 = arith.constant -0.0833333358 : f32
      %314 = vector.broadcast %cst_223 : f32 to vector<32x128xf32>
      %315 = arith.mulf %314, %313 : vector<32x128xf32>
      %316 = arith.addf %304, %315 : vector<32x128xf32>
      %c0_224 = arith.constant 0 : index
      %c0_225 = arith.constant 0 : index
      %c0_226 = arith.constant 0 : index
      %317 = vector.load %arg7[%c0_224, %c0_225, %c0_226] : memref<3x32x128xf32, #tpu.memory_space<vmem>>, vector<1x32x128xf32>
      %318 = vector.shape_cast %317 : vector<1x32x128xf32> to vector<32x128xf32>
      %319 = arith.mulf %318, %291 : vector<32x128xf32>
      %c1_227 = arith.constant 1 : index
      %c0_228 = arith.constant 0 : index
      %c0_229 = arith.constant 0 : index
      %320 = vector.load %arg7[%c1_227, %c0_228, %c0_229] : memref<3x32x128xf32, #tpu.memory_space<vmem>>, vector<1x32x128xf32>
      %321 = vector.shape_cast %320 : vector<1x32x128xf32> to vector<32x128xf32>
      %322 = arith.mulf %321, %293 : vector<32x128xf32>
      %323 = arith.subf %319, %322 : vector<32x128xf32>
      %c2_230 = arith.constant 2 : index
      %c0_231 = arith.constant 0 : index
      %c0_232 = arith.constant 0 : index
      %324 = vector.load %arg7[%c2_230, %c0_231, %c0_232] : memref<3x32x128xf32, #tpu.memory_space<vmem>>, vector<1x32x128xf32>
      %325 = vector.shape_cast %324 : vector<1x32x128xf32> to vector<32x128xf32>
      %326 = arith.mulf %325, %316 : vector<32x128xf32>
      %327 = arith.addf %323, %326 : vector<32x128xf32>
      %c1_233 = arith.constant 1 : index
      %c8_234 = arith.constant 8 : index
      %c0_235 = arith.constant 0 : index
      %328 = vector.load %arg10[%c1_233, %c8_234, %c0_235] : memref<2x48x128xf32, #tpu.memory_space<vmem>>, vector<1x32x128xf32>
      %329 = vector.shape_cast %328 : vector<1x32x128xf32> to vector<32x128xf32>
      %330 = vector.shape_cast %327 : vector<32x128xf32> to vector<1x32x128xf32>
      tpu.vector_store %arg10[%c1_233, %c8_234, %c0_235], %330 {strides = array<i32>} : memref<2x48x128xf32, #tpu.memory_space<vmem>>, vector<1x32x128xf32>,
      %c8_i32_236 = arith.constant 8 : i32
      %331 = arith.muli %arg12, %c8_i32_236 : i32
      %332 = arith.addi %17, %331 : i32
      %c4_i32 = arith.constant 4 : i32
      %333 = arith.addi %332, %c4_i32 : i32
      %334 = arith.index_cast %333 : i32 to index
      %335 = memref.load %arg2[%334] : memref<64xf32, #tpu.memory_space<smem>>
      %c8_i32_237 = arith.constant 8 : i32
      %336 = arith.addi %c8_i32_237, %1 : i32
      %c1_238 = arith.constant 1 : index
      %337 = arith.index_cast %336 : i32 to index
      %c0_239 = arith.constant 0 : index
      %338 = vector.load %arg10[%c1_238, %337, %c0_239] : memref<2x48x128xf32, #tpu.memory_space<vmem>>, vector<1x1x128xf32>
      %339 = vector.shape_cast %338 : vector<1x1x128xf32> to vector<1x128xf32>
      %340 = vector.broadcast %335 : f32 to vector<1x128xf32>
      %341 = arith.mulf %13, %340 : vector<1x128xf32>
      %342 = arith.addf %339, %341 : vector<1x128xf32>
      %c8_i32_240 = arith.constant 8 : i32
      %343 = arith.addi %c8_i32_240, %1 : i32
      %c1_241 = arith.constant 1 : index
      %344 = arith.index_cast %343 : i32 to index
      %c0_242 = arith.constant 0 : index
      %345 = vector.load %arg10[%c1_241, %344, %c0_242] : memref<2x48x128xf32, #tpu.memory_space<vmem>>, vector<1x1x128xf32>
      %346 = vector.shape_cast %345 : vector<1x1x128xf32> to vector<1x128xf32>
      %347 = vector.shape_cast %342 : vector<1x128xf32> to vector<1x1x128xf32>
      tpu.vector_store %arg10[%c1_241, %344, %c0_242], %347 {strides = array<i32>} : memref<2x48x128xf32, #tpu.memory_space<vmem>>, vector<1x1x128xf32>,
      %c8_i32_243 = arith.constant 8 : i32
      %348 = arith.addi %c8_i32_243, %5 : i32
      %c1_244 = arith.constant 1 : index
      %349 = arith.index_cast %348 : i32 to index
      %c0_245 = arith.constant 0 : index
      %350 = vector.load %arg10[%c1_244, %349, %c0_245] : memref<2x48x128xf32, #tpu.memory_space<vmem>>, vector<1x1x128xf32>
      %351 = vector.shape_cast %350 : vector<1x1x128xf32> to vector<1x128xf32>
      %c8_i32_246 = arith.constant 8 : i32
      %352 = arith.muli %arg12, %c8_i32_246 : i32
      %c4_i32_247 = arith.constant 4 : i32
      %353 = arith.addi %352, %c4_i32_247 : i32
      %354 = arith.index_cast %353 : i32 to index
      %c0_248 = arith.constant 0 : index
      %355 = vector.load %arg11[%354, %c0_248] : memref<64x128xf32, #tpu.memory_space<vmem>>, vector<1x128xf32>
      tpu.vector_store %arg11[%354, %c0_248], %351 {strides = array<i32>} : memref<64x128xf32, #tpu.memory_space<vmem>>, vector<1x128xf32>,
      %c1_249 = arith.constant 1 : index
      %c8_250 = arith.constant 8 : index
      %c0_251 = arith.constant 0 : index
      %356 = vector.load %arg10[%c1_249, %c8_250, %c0_251] : memref<2x48x128xf32, #tpu.memory_space<vmem>>, vector<1x32x128xf32>
      %357 = vector.shape_cast %356 : vector<1x32x128xf32> to vector<32x128xf32>
      %c0_252 = arith.constant 0 : index
      %c8_253 = arith.constant 8 : index
      %c0_254 = arith.constant 0 : index
      %358 = vector.load %arg10[%c0_252, %c8_253, %c0_254] : memref<2x48x128xf32, #tpu.memory_space<vmem>>, vector<1x32x128xf32>
      %359 = vector.shape_cast %358 : vector<1x32x128xf32> to vector<32x128xf32>
      %c1_255 = arith.constant 1 : index
      %c7_256 = arith.constant 7 : index
      %c0_257 = arith.constant 0 : index
      %360 = vector.load %arg10[%c1_255, %c7_256, %c0_257] : memref<2x48x128xf32, #tpu.memory_space<vmem>>, vector<1x32x128xf32>
      %361 = vector.shape_cast %360 : vector<1x32x128xf32> to vector<32x128xf32>
      %c1_258 = arith.constant 1 : index
      %c9_259 = arith.constant 9 : index
      %c0_260 = arith.constant 0 : index
      %362 = vector.load %arg10[%c1_258, %c9_259, %c0_260] : memref<2x48x128xf32, #tpu.memory_space<vmem>>, vector<1x32x128xf32>
      %363 = vector.shape_cast %362 : vector<1x32x128xf32> to vector<32x128xf32>
      %364 = arith.addf %361, %363 : vector<32x128xf32>
      %c1_i32_261 = arith.constant 1 : i32
      %365 = tpu.dynamic_rotate %357 by %c1_i32_261 dim 1 : vector<32x128xf32>, i32 -> vector<32x128xf32>
      %366 = arith.addf %364, %365 : vector<32x128xf32>
      %c127_i32_262 = arith.constant 127 : i32
      %367 = tpu.dynamic_rotate %357 by %c127_i32_262 dim 1 : vector<32x128xf32>, i32 -> vector<32x128xf32>
      %368 = arith.addf %366, %367 : vector<32x128xf32>
      %cst_263 = arith.constant 1.33333337 : f32
      %369 = vector.broadcast %cst_263 : f32 to vector<32x128xf32>
      %370 = arith.mulf %369, %368 : vector<32x128xf32>
      %c1_264 = arith.constant 1 : index
      %c6_265 = arith.constant 6 : index
      %c0_266 = arith.constant 0 : index
      %371 = vector.load %arg10[%c1_264, %c6_265, %c0_266] : memref<2x48x128xf32, #tpu.memory_space<vmem>>, vector<1x32x128xf32>
      %372 = vector.shape_cast %371 : vector<1x32x128xf32> to vector<32x128xf32>
      %c1_267 = arith.constant 1 : index
      %c10_268 = arith.constant 10 : index
      %c0_269 = arith.constant 0 : index
      %373 = vector.load %arg10[%c1_267, %c10_268, %c0_269] : memref<2x48x128xf32, #tpu.memory_space<vmem>>, vector<1x32x128xf32>
      %374 = vector.shape_cast %373 : vector<1x32x128xf32> to vector<32x128xf32>
      %375 = arith.addf %372, %374 : vector<32x128xf32>
      %c2_i32_270 = arith.constant 2 : i32
      %376 = tpu.dynamic_rotate %357 by %c2_i32_270 dim 1 : vector<32x128xf32>, i32 -> vector<32x128xf32>
      %377 = arith.addf %375, %376 : vector<32x128xf32>
      %c126_i32_271 = arith.constant 126 : i32
      %378 = tpu.dynamic_rotate %357 by %c126_i32_271 dim 1 : vector<32x128xf32>, i32 -> vector<32x128xf32>
      %379 = arith.addf %377, %378 : vector<32x128xf32>
      %cst_272 = arith.constant -0.0833333358 : f32
      %380 = vector.broadcast %cst_272 : f32 to vector<32x128xf32>
      %381 = arith.mulf %380, %379 : vector<32x128xf32>
      %382 = arith.addf %370, %381 : vector<32x128xf32>
      %c0_273 = arith.constant 0 : index
      %c0_274 = arith.constant 0 : index
      %c0_275 = arith.constant 0 : index
      %383 = vector.load %arg7[%c0_273, %c0_274, %c0_275] : memref<3x32x128xf32, #tpu.memory_space<vmem>>, vector<1x32x128xf32>
      %384 = vector.shape_cast %383 : vector<1x32x128xf32> to vector<32x128xf32>
      %385 = arith.mulf %384, %357 : vector<32x128xf32>
      %c1_276 = arith.constant 1 : index
      %c0_277 = arith.constant 0 : index
      %c0_278 = arith.constant 0 : index
      %386 = vector.load %arg7[%c1_276, %c0_277, %c0_278] : memref<3x32x128xf32, #tpu.memory_space<vmem>>, vector<1x32x128xf32>
      %387 = vector.shape_cast %386 : vector<1x32x128xf32> to vector<32x128xf32>
      %388 = arith.mulf %387, %359 : vector<32x128xf32>
      %389 = arith.subf %385, %388 : vector<32x128xf32>
      %c2_279 = arith.constant 2 : index
      %c0_280 = arith.constant 0 : index
      %c0_281 = arith.constant 0 : index
      %390 = vector.load %arg7[%c2_279, %c0_280, %c0_281] : memref<3x32x128xf32, #tpu.memory_space<vmem>>, vector<1x32x128xf32>
      %391 = vector.shape_cast %390 : vector<1x32x128xf32> to vector<32x128xf32>
      %392 = arith.mulf %391, %382 : vector<32x128xf32>
      %393 = arith.addf %389, %392 : vector<32x128xf32>
      %c0_282 = arith.constant 0 : index
      %c8_283 = arith.constant 8 : index
      %c0_284 = arith.constant 0 : index
      %394 = vector.load %arg10[%c0_282, %c8_283, %c0_284] : memref<2x48x128xf32, #tpu.memory_space<vmem>>, vector<1x32x128xf32>
      %395 = vector.shape_cast %394 : vector<1x32x128xf32> to vector<32x128xf32>
      %396 = vector.shape_cast %393 : vector<32x128xf32> to vector<1x32x128xf32>
      tpu.vector_store %arg10[%c0_282, %c8_283, %c0_284], %396 {strides = array<i32>} : memref<2x48x128xf32, #tpu.memory_space<vmem>>, vector<1x32x128xf32>,
      %c8_i32_285 = arith.constant 8 : i32
      %397 = arith.muli %arg12, %c8_i32_285 : i32
      %398 = arith.addi %17, %397 : i32
      %c5_i32 = arith.constant 5 : i32
      %399 = arith.addi %398, %c5_i32 : i32
      %400 = arith.index_cast %399 : i32 to index
      %401 = memref.load %arg2[%400] : memref<64xf32, #tpu.memory_space<smem>>
      %c8_i32_286 = arith.constant 8 : i32
      %402 = arith.addi %c8_i32_286, %1 : i32
      %c0_287 = arith.constant 0 : index
      %403 = arith.index_cast %402 : i32 to index
      %c0_288 = arith.constant 0 : index
      %404 = vector.load %arg10[%c0_287, %403, %c0_288] : memref<2x48x128xf32, #tpu.memory_space<vmem>>, vector<1x1x128xf32>
      %405 = vector.shape_cast %404 : vector<1x1x128xf32> to vector<1x128xf32>
      %406 = vector.broadcast %401 : f32 to vector<1x128xf32>
      %407 = arith.mulf %13, %406 : vector<1x128xf32>
      %408 = arith.addf %405, %407 : vector<1x128xf32>
      %c8_i32_289 = arith.constant 8 : i32
      %409 = arith.addi %c8_i32_289, %1 : i32
      %c0_290 = arith.constant 0 : index
      %410 = arith.index_cast %409 : i32 to index
      %c0_291 = arith.constant 0 : index
      %411 = vector.load %arg10[%c0_290, %410, %c0_291] : memref<2x48x128xf32, #tpu.memory_space<vmem>>, vector<1x1x128xf32>
      %412 = vector.shape_cast %411 : vector<1x1x128xf32> to vector<1x128xf32>
      %413 = vector.shape_cast %408 : vector<1x128xf32> to vector<1x1x128xf32>
      tpu.vector_store %arg10[%c0_290, %410, %c0_291], %413 {strides = array<i32>} : memref<2x48x128xf32, #tpu.memory_space<vmem>>, vector<1x1x128xf32>,
      %c8_i32_292 = arith.constant 8 : i32
      %414 = arith.addi %c8_i32_292, %5 : i32
      %c0_293 = arith.constant 0 : index
      %415 = arith.index_cast %414 : i32 to index
      %c0_294 = arith.constant 0 : index
      %416 = vector.load %arg10[%c0_293, %415, %c0_294] : memref<2x48x128xf32, #tpu.memory_space<vmem>>, vector<1x1x128xf32>
      %417 = vector.shape_cast %416 : vector<1x1x128xf32> to vector<1x128xf32>
      %c8_i32_295 = arith.constant 8 : i32
      %418 = arith.muli %arg12, %c8_i32_295 : i32
      %c5_i32_296 = arith.constant 5 : i32
      %419 = arith.addi %418, %c5_i32_296 : i32
      %420 = arith.index_cast %419 : i32 to index
      %c0_297 = arith.constant 0 : index
      %421 = vector.load %arg11[%420, %c0_297] : memref<64x128xf32, #tpu.memory_space<vmem>>, vector<1x128xf32>
      tpu.vector_store %arg11[%420, %c0_297], %417 {strides = array<i32>} : memref<64x128xf32, #tpu.memory_space<vmem>>, vector<1x128xf32>,
      %c0_298 = arith.constant 0 : index
      %c8_299 = arith.constant 8 : index
      %c0_300 = arith.constant 0 : index
      %422 = vector.load %arg10[%c0_298, %c8_299, %c0_300] : memref<2x48x128xf32, #tpu.memory_space<vmem>>, vector<1x32x128xf32>
      %423 = vector.shape_cast %422 : vector<1x32x128xf32> to vector<32x128xf32>
      %c1_301 = arith.constant 1 : index
      %c8_302 = arith.constant 8 : index
      %c0_303 = arith.constant 0 : index
      %424 = vector.load %arg10[%c1_301, %c8_302, %c0_303] : memref<2x48x128xf32, #tpu.memory_space<vmem>>, vector<1x32x128xf32>
      %425 = vector.shape_cast %424 : vector<1x32x128xf32> to vector<32x128xf32>
      %c0_304 = arith.constant 0 : index
      %c7_305 = arith.constant 7 : index
      %c0_306 = arith.constant 0 : index
      %426 = vector.load %arg10[%c0_304, %c7_305, %c0_306] : memref<2x48x128xf32, #tpu.memory_space<vmem>>, vector<1x32x128xf32>
      %427 = vector.shape_cast %426 : vector<1x32x128xf32> to vector<32x128xf32>
      %c0_307 = arith.constant 0 : index
      %c9_308 = arith.constant 9 : index
      %c0_309 = arith.constant 0 : index
      %428 = vector.load %arg10[%c0_307, %c9_308, %c0_309] : memref<2x48x128xf32, #tpu.memory_space<vmem>>, vector<1x32x128xf32>
      %429 = vector.shape_cast %428 : vector<1x32x128xf32> to vector<32x128xf32>
      %430 = arith.addf %427, %429 : vector<32x128xf32>
      %c1_i32_310 = arith.constant 1 : i32
      %431 = tpu.dynamic_rotate %423 by %c1_i32_310 dim 1 : vector<32x128xf32>, i32 -> vector<32x128xf32>
      %432 = arith.addf %430, %431 : vector<32x128xf32>
      %c127_i32_311 = arith.constant 127 : i32
      %433 = tpu.dynamic_rotate %423 by %c127_i32_311 dim 1 : vector<32x128xf32>, i32 -> vector<32x128xf32>
      %434 = arith.addf %432, %433 : vector<32x128xf32>
      %cst_312 = arith.constant 1.33333337 : f32
      %435 = vector.broadcast %cst_312 : f32 to vector<32x128xf32>
      %436 = arith.mulf %435, %434 : vector<32x128xf32>
      %c0_313 = arith.constant 0 : index
      %c6_314 = arith.constant 6 : index
      %c0_315 = arith.constant 0 : index
      %437 = vector.load %arg10[%c0_313, %c6_314, %c0_315] : memref<2x48x128xf32, #tpu.memory_space<vmem>>, vector<1x32x128xf32>
      %438 = vector.shape_cast %437 : vector<1x32x128xf32> to vector<32x128xf32>
      %c0_316 = arith.constant 0 : index
      %c10_317 = arith.constant 10 : index
      %c0_318 = arith.constant 0 : index
      %439 = vector.load %arg10[%c0_316, %c10_317, %c0_318] : memref<2x48x128xf32, #tpu.memory_space<vmem>>, vector<1x32x128xf32>
      %440 = vector.shape_cast %439 : vector<1x32x128xf32> to vector<32x128xf32>
      %441 = arith.addf %438, %440 : vector<32x128xf32>
      %c2_i32_319 = arith.constant 2 : i32
      %442 = tpu.dynamic_rotate %423 by %c2_i32_319 dim 1 : vector<32x128xf32>, i32 -> vector<32x128xf32>
      %443 = arith.addf %441, %442 : vector<32x128xf32>
      %c126_i32_320 = arith.constant 126 : i32
      %444 = tpu.dynamic_rotate %423 by %c126_i32_320 dim 1 : vector<32x128xf32>, i32 -> vector<32x128xf32>
      %445 = arith.addf %443, %444 : vector<32x128xf32>
      %cst_321 = arith.constant -0.0833333358 : f32
      %446 = vector.broadcast %cst_321 : f32 to vector<32x128xf32>
      %447 = arith.mulf %446, %445 : vector<32x128xf32>
      %448 = arith.addf %436, %447 : vector<32x128xf32>
      %c0_322 = arith.constant 0 : index
      %c0_323 = arith.constant 0 : index
      %c0_324 = arith.constant 0 : index
      %449 = vector.load %arg7[%c0_322, %c0_323, %c0_324] : memref<3x32x128xf32, #tpu.memory_space<vmem>>, vector<1x32x128xf32>
      %450 = vector.shape_cast %449 : vector<1x32x128xf32> to vector<32x128xf32>
      %451 = arith.mulf %450, %423 : vector<32x128xf32>
      %c1_325 = arith.constant 1 : index
      %c0_326 = arith.constant 0 : index
      %c0_327 = arith.constant 0 : index
      %452 = vector.load %arg7[%c1_325, %c0_326, %c0_327] : memref<3x32x128xf32, #tpu.memory_space<vmem>>, vector<1x32x128xf32>
      %453 = vector.shape_cast %452 : vector<1x32x128xf32> to vector<32x128xf32>
      %454 = arith.mulf %453, %425 : vector<32x128xf32>
      %455 = arith.subf %451, %454 : vector<32x128xf32>
      %c2_328 = arith.constant 2 : index
      %c0_329 = arith.constant 0 : index
      %c0_330 = arith.constant 0 : index
      %456 = vector.load %arg7[%c2_328, %c0_329, %c0_330] : memref<3x32x128xf32, #tpu.memory_space<vmem>>, vector<1x32x128xf32>
      %457 = vector.shape_cast %456 : vector<1x32x128xf32> to vector<32x128xf32>
      %458 = arith.mulf %457, %448 : vector<32x128xf32>
      %459 = arith.addf %455, %458 : vector<32x128xf32>
      %c1_331 = arith.constant 1 : index
      %c8_332 = arith.constant 8 : index
      %c0_333 = arith.constant 0 : index
      %460 = vector.load %arg10[%c1_331, %c8_332, %c0_333] : memref<2x48x128xf32, #tpu.memory_space<vmem>>, vector<1x32x128xf32>
      %461 = vector.shape_cast %460 : vector<1x32x128xf32> to vector<32x128xf32>
      %462 = vector.shape_cast %459 : vector<32x128xf32> to vector<1x32x128xf32>
      tpu.vector_store %arg10[%c1_331, %c8_332, %c0_333], %462 {strides = array<i32>} : memref<2x48x128xf32, #tpu.memory_space<vmem>>, vector<1x32x128xf32>,
      %c8_i32_334 = arith.constant 8 : i32
      %463 = arith.muli %arg12, %c8_i32_334 : i32
      %464 = arith.addi %17, %463 : i32
      %c6_i32 = arith.constant 6 : i32
      %465 = arith.addi %464, %c6_i32 : i32
      %466 = arith.index_cast %465 : i32 to index
      %467 = memref.load %arg2[%466] : memref<64xf32, #tpu.memory_space<smem>>
      %c8_i32_335 = arith.constant 8 : i32
      %468 = arith.addi %c8_i32_335, %1 : i32
      %c1_336 = arith.constant 1 : index
      %469 = arith.index_cast %468 : i32 to index
      %c0_337 = arith.constant 0 : index
      %470 = vector.load %arg10[%c1_336, %469, %c0_337] : memref<2x48x128xf32, #tpu.memory_space<vmem>>, vector<1x1x128xf32>
      %471 = vector.shape_cast %470 : vector<1x1x128xf32> to vector<1x128xf32>
      %472 = vector.broadcast %467 : f32 to vector<1x128xf32>
      %473 = arith.mulf %13, %472 : vector<1x128xf32>
      %474 = arith.addf %471, %473 : vector<1x128xf32>
      %c8_i32_338 = arith.constant 8 : i32
      %475 = arith.addi %c8_i32_338, %1 : i32
      %c1_339 = arith.constant 1 : index
      %476 = arith.index_cast %475 : i32 to index
      %c0_340 = arith.constant 0 : index
      %477 = vector.load %arg10[%c1_339, %476, %c0_340] : memref<2x48x128xf32, #tpu.memory_space<vmem>>, vector<1x1x128xf32>
      %478 = vector.shape_cast %477 : vector<1x1x128xf32> to vector<1x128xf32>
      %479 = vector.shape_cast %474 : vector<1x128xf32> to vector<1x1x128xf32>
      tpu.vector_store %arg10[%c1_339, %476, %c0_340], %479 {strides = array<i32>} : memref<2x48x128xf32, #tpu.memory_space<vmem>>, vector<1x1x128xf32>,
      %c8_i32_341 = arith.constant 8 : i32
      %480 = arith.addi %c8_i32_341, %5 : i32
      %c1_342 = arith.constant 1 : index
      %481 = arith.index_cast %480 : i32 to index
      %c0_343 = arith.constant 0 : index
      %482 = vector.load %arg10[%c1_342, %481, %c0_343] : memref<2x48x128xf32, #tpu.memory_space<vmem>>, vector<1x1x128xf32>
      %483 = vector.shape_cast %482 : vector<1x1x128xf32> to vector<1x128xf32>
      %c8_i32_344 = arith.constant 8 : i32
      %484 = arith.muli %arg12, %c8_i32_344 : i32
      %c6_i32_345 = arith.constant 6 : i32
      %485 = arith.addi %484, %c6_i32_345 : i32
      %486 = arith.index_cast %485 : i32 to index
      %c0_346 = arith.constant 0 : index
      %487 = vector.load %arg11[%486, %c0_346] : memref<64x128xf32, #tpu.memory_space<vmem>>, vector<1x128xf32>
      tpu.vector_store %arg11[%486, %c0_346], %483 {strides = array<i32>} : memref<64x128xf32, #tpu.memory_space<vmem>>, vector<1x128xf32>,
      %c1_347 = arith.constant 1 : index
      %c8_348 = arith.constant 8 : index
      %c0_349 = arith.constant 0 : index
      %488 = vector.load %arg10[%c1_347, %c8_348, %c0_349] : memref<2x48x128xf32, #tpu.memory_space<vmem>>, vector<1x32x128xf32>
      %489 = vector.shape_cast %488 : vector<1x32x128xf32> to vector<32x128xf32>
      %c0_350 = arith.constant 0 : index
      %c8_351 = arith.constant 8 : index
      %c0_352 = arith.constant 0 : index
      %490 = vector.load %arg10[%c0_350, %c8_351, %c0_352] : memref<2x48x128xf32, #tpu.memory_space<vmem>>, vector<1x32x128xf32>
      %491 = vector.shape_cast %490 : vector<1x32x128xf32> to vector<32x128xf32>
      %c1_353 = arith.constant 1 : index
      %c7_354 = arith.constant 7 : index
      %c0_355 = arith.constant 0 : index
      %492 = vector.load %arg10[%c1_353, %c7_354, %c0_355] : memref<2x48x128xf32, #tpu.memory_space<vmem>>, vector<1x32x128xf32>
      %493 = vector.shape_cast %492 : vector<1x32x128xf32> to vector<32x128xf32>
      %c1_356 = arith.constant 1 : index
      %c9_357 = arith.constant 9 : index
      %c0_358 = arith.constant 0 : index
      %494 = vector.load %arg10[%c1_356, %c9_357, %c0_358] : memref<2x48x128xf32, #tpu.memory_space<vmem>>, vector<1x32x128xf32>
      %495 = vector.shape_cast %494 : vector<1x32x128xf32> to vector<32x128xf32>
      %496 = arith.addf %493, %495 : vector<32x128xf32>
      %c1_i32_359 = arith.constant 1 : i32
      %497 = tpu.dynamic_rotate %489 by %c1_i32_359 dim 1 : vector<32x128xf32>, i32 -> vector<32x128xf32>
      %498 = arith.addf %496, %497 : vector<32x128xf32>
      %c127_i32_360 = arith.constant 127 : i32
      %499 = tpu.dynamic_rotate %489 by %c127_i32_360 dim 1 : vector<32x128xf32>, i32 -> vector<32x128xf32>
      %500 = arith.addf %498, %499 : vector<32x128xf32>
      %cst_361 = arith.constant 1.33333337 : f32
      %501 = vector.broadcast %cst_361 : f32 to vector<32x128xf32>
      %502 = arith.mulf %501, %500 : vector<32x128xf32>
      %c1_362 = arith.constant 1 : index
      %c6_363 = arith.constant 6 : index
      %c0_364 = arith.constant 0 : index
      %503 = vector.load %arg10[%c1_362, %c6_363, %c0_364] : memref<2x48x128xf32, #tpu.memory_space<vmem>>, vector<1x32x128xf32>
      %504 = vector.shape_cast %503 : vector<1x32x128xf32> to vector<32x128xf32>
      %c1_365 = arith.constant 1 : index
      %c10_366 = arith.constant 10 : index
      %c0_367 = arith.constant 0 : index
      %505 = vector.load %arg10[%c1_365, %c10_366, %c0_367] : memref<2x48x128xf32, #tpu.memory_space<vmem>>, vector<1x32x128xf32>
      %506 = vector.shape_cast %505 : vector<1x32x128xf32> to vector<32x128xf32>
      %507 = arith.addf %504, %506 : vector<32x128xf32>
      %c2_i32_368 = arith.constant 2 : i32
      %508 = tpu.dynamic_rotate %489 by %c2_i32_368 dim 1 : vector<32x128xf32>, i32 -> vector<32x128xf32>
      %509 = arith.addf %507, %508 : vector<32x128xf32>
      %c126_i32_369 = arith.constant 126 : i32
      %510 = tpu.dynamic_rotate %489 by %c126_i32_369 dim 1 : vector<32x128xf32>, i32 -> vector<32x128xf32>
      %511 = arith.addf %509, %510 : vector<32x128xf32>
      %cst_370 = arith.constant -0.0833333358 : f32
      %512 = vector.broadcast %cst_370 : f32 to vector<32x128xf32>
      %513 = arith.mulf %512, %511 : vector<32x128xf32>
      %514 = arith.addf %502, %513 : vector<32x128xf32>
      %c0_371 = arith.constant 0 : index
      %c0_372 = arith.constant 0 : index
      %c0_373 = arith.constant 0 : index
      %515 = vector.load %arg7[%c0_371, %c0_372, %c0_373] : memref<3x32x128xf32, #tpu.memory_space<vmem>>, vector<1x32x128xf32>
      %516 = vector.shape_cast %515 : vector<1x32x128xf32> to vector<32x128xf32>
      %517 = arith.mulf %516, %489 : vector<32x128xf32>
      %c1_374 = arith.constant 1 : index
      %c0_375 = arith.constant 0 : index
      %c0_376 = arith.constant 0 : index
      %518 = vector.load %arg7[%c1_374, %c0_375, %c0_376] : memref<3x32x128xf32, #tpu.memory_space<vmem>>, vector<1x32x128xf32>
      %519 = vector.shape_cast %518 : vector<1x32x128xf32> to vector<32x128xf32>
      %520 = arith.mulf %519, %491 : vector<32x128xf32>
      %521 = arith.subf %517, %520 : vector<32x128xf32>
      %c2_377 = arith.constant 2 : index
      %c0_378 = arith.constant 0 : index
      %c0_379 = arith.constant 0 : index
      %522 = vector.load %arg7[%c2_377, %c0_378, %c0_379] : memref<3x32x128xf32, #tpu.memory_space<vmem>>, vector<1x32x128xf32>
      %523 = vector.shape_cast %522 : vector<1x32x128xf32> to vector<32x128xf32>
      %524 = arith.mulf %523, %514 : vector<32x128xf32>
      %525 = arith.addf %521, %524 : vector<32x128xf32>
      %c0_380 = arith.constant 0 : index
      %c8_381 = arith.constant 8 : index
      %c0_382 = arith.constant 0 : index
      %526 = vector.load %arg10[%c0_380, %c8_381, %c0_382] : memref<2x48x128xf32, #tpu.memory_space<vmem>>, vector<1x32x128xf32>
      %527 = vector.shape_cast %526 : vector<1x32x128xf32> to vector<32x128xf32>
      %528 = vector.shape_cast %525 : vector<32x128xf32> to vector<1x32x128xf32>
      tpu.vector_store %arg10[%c0_380, %c8_381, %c0_382], %528 {strides = array<i32>} : memref<2x48x128xf32, #tpu.memory_space<vmem>>, vector<1x32x128xf32>,
      %c8_i32_383 = arith.constant 8 : i32
      %529 = arith.muli %arg12, %c8_i32_383 : i32
      %530 = arith.addi %17, %529 : i32
      %c7_i32 = arith.constant 7 : i32
      %531 = arith.addi %530, %c7_i32 : i32
      %532 = arith.index_cast %531 : i32 to index
      %533 = memref.load %arg2[%532] : memref<64xf32, #tpu.memory_space<smem>>
      %c8_i32_384 = arith.constant 8 : i32
      %534 = arith.addi %c8_i32_384, %1 : i32
      %c0_385 = arith.constant 0 : index
      %535 = arith.index_cast %534 : i32 to index
      %c0_386 = arith.constant 0 : index
      %536 = vector.load %arg10[%c0_385, %535, %c0_386] : memref<2x48x128xf32, #tpu.memory_space<vmem>>, vector<1x1x128xf32>
      %537 = vector.shape_cast %536 : vector<1x1x128xf32> to vector<1x128xf32>
      %538 = vector.broadcast %533 : f32 to vector<1x128xf32>
      %539 = arith.mulf %13, %538 : vector<1x128xf32>
      %540 = arith.addf %537, %539 : vector<1x128xf32>
      %c8_i32_387 = arith.constant 8 : i32
      %541 = arith.addi %c8_i32_387, %1 : i32
      %c0_388 = arith.constant 0 : index
      %542 = arith.index_cast %541 : i32 to index
      %c0_389 = arith.constant 0 : index
      %543 = vector.load %arg10[%c0_388, %542, %c0_389] : memref<2x48x128xf32, #tpu.memory_space<vmem>>, vector<1x1x128xf32>
      %544 = vector.shape_cast %543 : vector<1x1x128xf32> to vector<1x128xf32>
      %545 = vector.shape_cast %540 : vector<1x128xf32> to vector<1x1x128xf32>
      tpu.vector_store %arg10[%c0_388, %542, %c0_389], %545 {strides = array<i32>} : memref<2x48x128xf32, #tpu.memory_space<vmem>>, vector<1x1x128xf32>,
      %c8_i32_390 = arith.constant 8 : i32
      %546 = arith.addi %c8_i32_390, %5 : i32
      %c0_391 = arith.constant 0 : index
      %547 = arith.index_cast %546 : i32 to index
      %c0_392 = arith.constant 0 : index
      %548 = vector.load %arg10[%c0_391, %547, %c0_392] : memref<2x48x128xf32, #tpu.memory_space<vmem>>, vector<1x1x128xf32>
      %549 = vector.shape_cast %548 : vector<1x1x128xf32> to vector<1x128xf32>
      %c8_i32_393 = arith.constant 8 : i32
      %550 = arith.muli %arg12, %c8_i32_393 : i32
      %c7_i32_394 = arith.constant 7 : i32
      %551 = arith.addi %550, %c7_i32_394 : i32
      %552 = arith.index_cast %551 : i32 to index
      %c0_395 = arith.constant 0 : index
      %553 = vector.load %arg11[%552, %c0_395] : memref<64x128xf32, #tpu.memory_space<vmem>>, vector<1x128xf32>
      tpu.vector_store %arg11[%552, %c0_395], %549 {strides = array<i32>} : memref<64x128xf32, #tpu.memory_space<vmem>>, vector<1x128xf32>,
    }
    %c8_i32_2 = arith.constant 8 : i32
    %c0 = arith.constant 0 : index
    %c0_3 = arith.constant 0 : index
    %19 = vector.load %arg11[%c0, %c0_3] : memref<64x128xf32, #tpu.memory_space<vmem>>, vector<64x128xf32>
    %c0_4 = arith.constant 0 : index
    %c0_5 = arith.constant 0 : index
    %c0_6 = arith.constant 0 : index
    %20 = vector.load %arg8[%c0_4, %c0_5, %c0_6] : memref<1x128x128xf32, #tpu.memory_space<vmem>>, vector<1x128x128xf32>
    %21 = vector.shape_cast %20 : vector<1x128x128xf32> to vector<128x128xf32>
    %cst_7 = arith.constant dense<0.000000e+00> : vector<64x128xf32>
    %22 = tpu.matmul %19, %21, %cst_7 {dimension_numbers = #tpu.dot_dimension_numbers<[1], [0], [0], [1], [0, 0, 1, 1], [], []>} : vector<64x128xf32>, vector<128x128xf32>, vector<64x128xf32> -> vector<64x128xf32>
    %c0_8 = arith.constant 0 : index
    %c0_9 = arith.constant 0 : index
    %c0_10 = arith.constant 0 : index
    %23 = vector.load %arg9[%c0_8, %c0_9, %c0_10] : memref<1x64x128xf32, #tpu.memory_space<vmem>>, vector<1x64x128xf32>
    %24 = vector.shape_cast %23 : vector<1x64x128xf32> to vector<64x128xf32>
    %25 = vector.shape_cast %22 : vector<64x128xf32> to vector<1x64x128xf32>
    tpu.vector_store %arg9[%c0_8, %c0_9, %c0_10], %25 {strides = array<i32>} : memref<1x64x128xf32, #tpu.memory_space<vmem>>, vector<1x64x128xf32>,
    return
  }
  func.func @transform_0(%arg0: i32, %arg1: i32) -> i32 {
    %c0_i32 = arith.constant 0 : i32
    %c0_i32_0 = arith.constant 0 : i32
    return %c0_i32 : i32
  }
  func.func @transform_1(%arg0: i32, %arg1: i32) -> i32 {
    %c0_i32 = arith.constant 0 : i32
    %c0_i32_0 = arith.constant 0 : i32
    return %c0_i32 : i32
  }
  func.func @transform_2(%arg0: i32, %arg1: i32) -> i32 {
    %c0_i32 = arith.constant 0 : i32
    %c0_i32_0 = arith.constant 0 : i32
    return %c0_i32 : i32
  }
  func.func @transform_3(%arg0: i32, %arg1: i32) -> i32 {
    %c0_i32 = arith.constant 0 : i32
    %c0_i32_0 = arith.constant 0 : i32
    return %c0_i32 : i32
  }
  func.func @transform_4(%arg0: i32, %arg1: i32) -> i32 {
    %c0_i32 = arith.constant 0 : i32
    %c0_i32_0 = arith.constant 0 : i32
    return %c0_i32 : i32
  }
  func.func @transform_5(%arg0: i32, %arg1: i32) -> (i32, i32, i32) {
    %c0_i32 = arith.constant 0 : i32
    %c0_i32_0 = arith.constant 0 : i32
    %c0_i32_1 = arith.constant 0 : i32
    %c0_i32_2 = arith.constant 0 : i32
    return %c0_i32, %c0_i32_0, %c0_i32_1 : i32, i32, i32
  }
  func.func @transform_6(%arg0: i32, %arg1: i32) -> (i32, i32, i32) {
    %c0_i32 = arith.constant 0 : i32
    %c0_i32_0 = arith.constant 0 : i32
    %c0_i32_1 = arith.constant 0 : i32
    %c0_i32_2 = arith.constant 0 : i32
    return %c0_i32, %c0_i32_0, %c0_i32_1 : i32, i32, i32
  }
  func.func @transform_7(%arg0: i32, %arg1: i32) -> (i32, i32, i32) {
    %c0_i32 = arith.constant 0 : i32
    %c0_i32_0 = arith.constant 0 : i32
    return %arg0, %arg1, %c0_i32 : i32, i32, i32
  }
}

module attributes {stable_mosaic.version = 11 : i64} {
  func.func @kernel(%arg0: i32, %arg1: i32, %arg2: memref<64xf32, #tpu.memory_space<smem>>, %arg3: memref<2xi32, #tpu.memory_space<smem>>, %arg4: memref<2xi32, #tpu.memory_space<smem>>, %arg5: memref<2xi32, #tpu.memory_space<smem>>, %arg6: memref<2xf32, #tpu.memory_space<smem>>, %arg7: memref<3x32x128xf32, #tpu.memory_space<vmem>>, %arg8: memref<1x128x128xf32, #tpu.memory_space<vmem>>, %arg9: memref<1x64x128xf32, #tpu.memory_space<vmem>>, %arg10: memref<2x48x128xf32, #tpu.memory_space<vmem>>, %arg11: memref<64x128xf32, #tpu.memory_space<vmem>>) attributes {dimension_semantics = [#tpu.dimension_semantics<parallel>, #tpu.dimension_semantics<arbitrary>], iteration_bounds = array<i64: 2, 1>, scalar_prefetch = 0 : i64, scratch_operands = 2 : i64, tpu.core_type = #tpu.core_type<tc>, window_params = [{transform_indices = @transform_0, window_bounds = array<i64: 64>}, {transform_indices = @transform_1, window_bounds = array<i64: 2>}, {transform_indices = @transform_2, window_bounds = array<i64: 2>}, {transform_indices = @transform_3, window_bounds = array<i64: 2>}, {transform_indices = @transform_4, window_bounds = array<i64: 2>}, {pipeline_mode = #tpu.pipeline_mode<synchronous>, transform_indices = @transform_5, window_bounds = array<i64: 3, 32, 128>}, {pipeline_mode = #tpu.pipeline_mode<synchronous>, transform_indices = @transform_6, window_bounds = array<i64: 1, 128, 128>}, {transform_indices = @transform_7, window_bounds = array<i64: 1, 64, 128>}]} {
    %0 = arith.index_cast %arg0 : i32 to index
    %1 = memref.load %arg3[%0] : memref<2xi32, #tpu.memory_space<smem>>
    %2 = arith.index_cast %arg0 : i32 to index
    %3 = memref.load %arg4[%2] : memref<2xi32, #tpu.memory_space<smem>>
    %4 = arith.index_cast %arg0 : i32 to index
    %5 = memref.load %arg5[%4] : memref<2xi32, #tpu.memory_space<smem>>
    %6 = tpu.iota {dimensions = array<i32: 1>} : vector<1x128xi32>
    %7 = vector.broadcast %3 : i32 to vector<1x128xi32>
    %8 = arith.cmpi eq, %6, %7 : vector<1x128xi32>
    %9 = arith.index_cast %arg0 : i32 to index
    %10 = memref.load %arg6[%9] : memref<2xf32, #tpu.memory_space<smem>>
    %cst = arith.constant 0.000000e+00 : f32
    %11 = vector.broadcast %10 : f32 to vector<1x128xf32>
    %12 = vector.broadcast %cst : f32 to vector<1x128xf32>
    %13 = arith.select %8, %11, %12 : vector<1x128xi1>, vector<1x128xf32>
    %c0_i32 = arith.constant 0 : i32
    %14 = arith.cmpi eq, %arg1, %c0_i32 : i32
    %15 = arith.extui %14 : i1 to i32
    %c0_i32_0 = arith.constant 0 : i32
    %16 = arith.cmpi ne, %15, %c0_i32_0 : i32
    scf.if %16 {
      %cst_11 = arith.constant 0.000000e+00 : f32
      %26 = vector.broadcast %cst_11 : f32 to vector<2x48x128xf32>
      %c0_12 = arith.constant 0 : index
      %c0_13 = arith.constant 0 : index
      %c0_14 = arith.constant 0 : index
      %27 = vector.load %arg10[%c0_12, %c0_13, %c0_14] : memref<2x48x128xf32, #tpu.memory_space<vmem>>, vector<2x48x128xf32>
      tpu.vector_store %arg10[%c0_12, %c0_13, %c0_14], %26 {strides = array<i32>} : memref<2x48x128xf32, #tpu.memory_space<vmem>>, vector<2x48x128xf32>,
    } else {
    }
    %c64_i32 = arith.constant 64 : i32
    %17 = arith.muli %arg1, %c64_i32 : i32
    %c0_i32_1 = arith.constant 0 : i32
    %c8_i32 = arith.constant 8 : i32
    %18 = arith.addi %c0_i32_1, %c8_i32 : i32
    %c1_i32 = arith.constant 1 : i32
    scf.for %arg12 = %c0_i32_1 to %18 step %c1_i32  : i32 {
      %c0_11 = arith.constant 0 : index
      %c8 = arith.constant 8 : index
      %c0_12 = arith.constant 0 : index
      %26 = vector.load %arg10[%c0_11, %c8, %c0_12] : memref<2x48x128xf32, #tpu.memory_space<vmem>>, vector<1x32x128xf32>
      %27 = vector.shape_cast %26 : vector<1x32x128xf32> to vector<32x128xf32>
      %c1 = arith.constant 1 : index
      %c8_13 = arith.constant 8 : index
      %c0_14 = arith.constant 0 : index
      %28 = vector.load %arg10[%c1, %c8_13, %c0_14] : memref<2x48x128xf32, #tpu.memory_space<vmem>>, vector<1x32x128xf32>
      %29 = vector.shape_cast %28 : vector<1x32x128xf32> to vector<32x128xf32>
      %c0_15 = arith.constant 0 : index
      %c7 = arith.constant 7 : index
      %c0_16 = arith.constant 0 : index
      %30 = vector.load %arg10[%c0_15, %c7, %c0_16] : memref<2x48x128xf32, #tpu.memory_space<vmem>>, vector<1x32x128xf32>
      %31 = vector.shape_cast %30 : vector<1x32x128xf32> to vector<32x128xf32>
      %c0_17 = arith.constant 0 : index
      %c9 = arith.constant 9 : index
      %c0_18 = arith.constant 0 : index
      %32 = vector.load %arg10[%c0_17, %c9, %c0_18] : memref<2x48x128xf32, #tpu.memory_space<vmem>>, vector<1x32x128xf32>
      %33 = vector.shape_cast %32 : vector<1x32x128xf32> to vector<32x128xf32>
      %34 = arith.addf %31, %33 : vector<32x128xf32>
      %c1_i32_19 = arith.constant 1 : i32
      %35 = tpu.dynamic_rotate %27 by %c1_i32_19 dim 1 : vector<32x128xf32>, i32 -> vector<32x128xf32>
      %36 = arith.addf %34, %35 : vector<32x128xf32>
      %c127_i32 = arith.constant 127 : i32
      %37 = tpu.dynamic_rotate %27 by %c127_i32 dim 1 : vector<32x128xf32>, i32 -> vector<32x128xf32>
      %38 = arith.addf %36, %37 : vector<32x128xf32>
      %cst_20 = arith.constant 1.33333337 : f32
      %39 = vector.broadcast %cst_20 : f32 to vector<32x128xf32>
      %40 = arith.mulf %39, %38 : vector<32x128xf32>
      %c0_21 = arith.constant 0 : index
      %c6 = arith.constant 6 : index
      %c0_22 = arith.constant 0 : index
      %41 = vector.load %arg10[%c0_21, %c6, %c0_22] : memref<2x48x128xf32, #tpu.memory_space<vmem>>, vector<1x32x128xf32>
      %42 = vector.shape_cast %41 : vector<1x32x128xf32> to vector<32x128xf32>
      %c0_23 = arith.constant 0 : index
      %c10 = arith.constant 10 : index
      %c0_24 = arith.constant 0 : index
      %43 = vector.load %arg10[%c0_23, %c10, %c0_24] : memref<2x48x128xf32, #tpu.memory_space<vmem>>, vector<1x32x128xf32>
      %44 = vector.shape_cast %43 : vector<1x32x128xf32> to vector<32x128xf32>
      %45 = arith.addf %42, %44 : vector<32x128xf32>
      %c2_i32 = arith.constant 2 : i32
      %46 = tpu.dynamic_rotate %27 by %c2_i32 dim 1 : vector<32x128xf32>, i32 -> vector<32x128xf32>
      %47 = arith.addf %45, %46 : vector<32x128xf32>
      %c126_i32 = arith.constant 126 : i32
      %48 = tpu.dynamic_rotate %27 by %c126_i32 dim 1 : vector<32x128xf32>, i32 -> vector<32x128xf32>
      %49 = arith.addf %47, %48 : vector<32x128xf32>
      %cst_25 = arith.constant -0.0833333358 : f32
      %50 = vector.broadcast %cst_25 : f32 to vector<32x128xf32>
      %51 = arith.mulf %50, %49 : vector<32x128xf32>
      %52 = arith.addf %40, %51 : vector<32x128xf32>
      %c0_26 = arith.constant 0 : index
      %c0_27 = arith.constant 0 : index
      %c0_28 = arith.constant 0 : index
      %53 = vector.load %arg7[%c0_26, %c0_27, %c0_28] : memref<3x32x128xf32, #tpu.memory_space<vmem>>, vector<1x32x128xf32>
      %54 = vector.shape_cast %53 : vector<1x32x128xf32> to vector<32x128xf32>
      %55 = arith.mulf %54, %27 : vector<32x128xf32>
      %c1_29 = arith.constant 1 : index
      %c0_30 = arith.constant 0 : index
      %c0_31 = arith.constant 0 : index
      %56 = vector.load %arg7[%c1_29, %c0_30, %c0_31] : memref<3x32x128xf32, #tpu.memory_space<vmem>>, vector<1x32x128xf32>
      %57 = vector.shape_cast %56 : vector<1x32x128xf32> to vector<32x128xf32>
      %58 = arith.mulf %57, %29 : vector<32x128xf32>
      %59 = arith.subf %55, %58 : vector<32x128xf32>
      %c2 = arith.constant 2 : index
      %c0_32 = arith.constant 0 : index
      %c0_33 = arith.constant 0 : index
      %60 = vector.load %arg7[%c2, %c0_32, %c0_33] : memref<3x32x128xf32, #tpu.memory_space<vmem>>, vector<1x32x128xf32>
      %61 = vector.shape_cast %60 : vector<1x32x128xf32> to vector<32x128xf32>
      %62 = arith.mulf %61, %52 : vector<32x128xf32>
      %63 = arith.addf %59, %62 : vector<32x128xf32>
      %c1_34 = arith.constant 1 : index
      %c8_35 = arith.constant 8 : index
      %c0_36 = arith.constant 0 : index
      %64 = vector.load %arg10[%c1_34, %c8_35, %c0_36] : memref<2x48x128xf32, #tpu.memory_space<vmem>>, vector<1x32x128xf32>
      %65 = vector.shape_cast %64 : vector<1x32x128xf32> to vector<32x128xf32>
      %66 = vector.shape_cast %63 : vector<32x128xf32> to vector<1x32x128xf32>
      tpu.vector_store %arg10[%c1_34, %c8_35, %c0_36], %66 {strides = array<i32>} : memref<2x48x128xf32, #tpu.memory_space<vmem>>, vector<1x32x128xf32>,
      %c8_i32_37 = arith.constant 8 : i32
      %67 = arith.muli %arg12, %c8_i32_37 : i32
      %68 = arith.addi %17, %67 : i32
      %c0_i32_38 = arith.constant 0 : i32
      %69 = arith.addi %68, %c0_i32_38 : i32
      %70 = arith.index_cast %69 : i32 to index
      %71 = memref.load %arg2[%70] : memref<64xf32, #tpu.memory_space<smem>>
      %c8_i32_39 = arith.constant 8 : i32
      %72 = arith.addi %c8_i32_39, %1 : i32
      %c1_40 = arith.constant 1 : index
      %73 = arith.index_cast %72 : i32 to index
      %c0_41 = arith.constant 0 : index
      %74 = vector.load %arg10[%c1_40, %73, %c0_41] : memref<2x48x128xf32, #tpu.memory_space<vmem>>, vector<1x1x128xf32>
      %75 = vector.shape_cast %74 : vector<1x1x128xf32> to vector<1x128xf32>
      %76 = vector.broadcast %71 : f32 to vector<1x128xf32>
      %77 = arith.mulf %13, %76 : vector<1x128xf32>
      %78 = arith.addf %75, %77 : vector<1x128xf32>
      %c8_i32_42 = arith.constant 8 : i32
      %79 = arith.addi %c8_i32_42, %1 : i32
      %c1_43 = arith.constant 1 : index
      %80 = arith.index_cast %79 : i32 to index
      %c0_44 = arith.constant 0 : index
      %81 = vector.load %arg10[%c1_43, %80, %c0_44] : memref<2x48x128xf32, #tpu.memory_space<vmem>>, vector<1x1x128xf32>
      %82 = vector.shape_cast %81 : vector<1x1x128xf32> to vector<1x128xf32>
      %83 = vector.shape_cast %78 : vector<1x128xf32> to vector<1x1x128xf32>
      tpu.vector_store %arg10[%c1_43, %80, %c0_44], %83 {strides = array<i32>} : memref<2x48x128xf32, #tpu.memory_space<vmem>>, vector<1x1x128xf32>,
      %c8_i32_45 = arith.constant 8 : i32
      %84 = arith.addi %c8_i32_45, %5 : i32
      %c1_46 = arith.constant 1 : index
      %85 = arith.index_cast %84 : i32 to index
      %c0_47 = arith.constant 0 : index
      %86 = vector.load %arg10[%c1_46, %85, %c0_47] : memref<2x48x128xf32, #tpu.memory_space<vmem>>, vector<1x1x128xf32>
      %87 = vector.shape_cast %86 : vector<1x1x128xf32> to vector<1x128xf32>
      %c8_i32_48 = arith.constant 8 : i32
      %88 = arith.muli %arg12, %c8_i32_48 : i32
      %c0_i32_49 = arith.constant 0 : i32
      %89 = arith.addi %88, %c0_i32_49 : i32
      %90 = arith.index_cast %89 : i32 to index
      %c0_50 = arith.constant 0 : index
      %91 = vector.load %arg11[%90, %c0_50] : memref<64x128xf32, #tpu.memory_space<vmem>>, vector<1x128xf32>
      tpu.vector_store %arg11[%90, %c0_50], %87 {strides = array<i32>} : memref<64x128xf32, #tpu.memory_space<vmem>>, vector<1x128xf32>,
      %c1_51 = arith.constant 1 : index
      %c8_52 = arith.constant 8 : index
      %c0_53 = arith.constant 0 : index
      %92 = vector.load %arg10[%c1_51, %c8_52, %c0_53] : memref<2x48x128xf32, #tpu.memory_space<vmem>>, vector<1x32x128xf32>
      %93 = vector.shape_cast %92 : vector<1x32x128xf32> to vector<32x128xf32>
      %c0_54 = arith.constant 0 : index
      %c8_55 = arith.constant 8 : index
      %c0_56 = arith.constant 0 : index
      %94 = vector.load %arg10[%c0_54, %c8_55, %c0_56] : memref<2x48x128xf32, #tpu.memory_space<vmem>>, vector<1x32x128xf32>
      %95 = vector.shape_cast %94 : vector<1x32x128xf32> to vector<32x128xf32>
      %c1_57 = arith.constant 1 : index
      %c7_58 = arith.constant 7 : index
      %c0_59 = arith.constant 0 : index
      %96 = vector.load %arg10[%c1_57, %c7_58, %c0_59] : memref<2x48x128xf32, #tpu.memory_space<vmem>>, vector<1x32x128xf32>
      %97 = vector.shape_cast %96 : vector<1x32x128xf32> to vector<32x128xf32>
      %c1_60 = arith.constant 1 : index
      %c9_61 = arith.constant 9 : index
      %c0_62 = arith.constant 0 : index
      %98 = vector.load %arg10[%c1_60, %c9_61, %c0_62] : memref<2x48x128xf32, #tpu.memory_space<vmem>>, vector<1x32x128xf32>
      %99 = vector.shape_cast %98 : vector<1x32x128xf32> to vector<32x128xf32>
      %100 = arith.addf %97, %99 : vector<32x128xf32>
      %c1_i32_63 = arith.constant 1 : i32
      %101 = tpu.dynamic_rotate %93 by %c1_i32_63 dim 1 : vector<32x128xf32>, i32 -> vector<32x128xf32>
      %102 = arith.addf %100, %101 : vector<32x128xf32>
      %c127_i32_64 = arith.constant 127 : i32
      %103 = tpu.dynamic_rotate %93 by %c127_i32_64 dim 1 : vector<32x128xf32>, i32 -> vector<32x128xf32>
      %104 = arith.addf %102, %103 : vector<32x128xf32>
      %cst_65 = arith.constant 1.33333337 : f32
      %105 = vector.broadcast %cst_65 : f32 to vector<32x128xf32>
      %106 = arith.mulf %105, %104 : vector<32x128xf32>
      %c1_66 = arith.constant 1 : index
      %c6_67 = arith.constant 6 : index
      %c0_68 = arith.constant 0 : index
      %107 = vector.load %arg10[%c1_66, %c6_67, %c0_68] : memref<2x48x128xf32, #tpu.memory_space<vmem>>, vector<1x32x128xf32>
      %108 = vector.shape_cast %107 : vector<1x32x128xf32> to vector<32x128xf32>
      %c1_69 = arith.constant 1 : index
      %c10_70 = arith.constant 10 : index
      %c0_71 = arith.constant 0 : index
      %109 = vector.load %arg10[%c1_69, %c10_70, %c0_71] : memref<2x48x128xf32, #tpu.memory_space<vmem>>, vector<1x32x128xf32>
      %110 = vector.shape_cast %109 : vector<1x32x128xf32> to vector<32x128xf32>
      %111 = arith.addf %108, %110 : vector<32x128xf32>
      %c2_i32_72 = arith.constant 2 : i32
      %112 = tpu.dynamic_rotate %93 by %c2_i32_72 dim 1 : vector<32x128xf32>, i32 -> vector<32x128xf32>
      %113 = arith.addf %111, %112 : vector<32x128xf32>
      %c126_i32_73 = arith.constant 126 : i32
      %114 = tpu.dynamic_rotate %93 by %c126_i32_73 dim 1 : vector<32x128xf32>, i32 -> vector<32x128xf32>
      %115 = arith.addf %113, %114 : vector<32x128xf32>
      %cst_74 = arith.constant -0.0833333358 : f32
      %116 = vector.broadcast %cst_74 : f32 to vector<32x128xf32>
      %117 = arith.mulf %116, %115 : vector<32x128xf32>
      %118 = arith.addf %106, %117 : vector<32x128xf32>
      %c0_75 = arith.constant 0 : index
      %c0_76 = arith.constant 0 : index
      %c0_77 = arith.constant 0 : index
      %119 = vector.load %arg7[%c0_75, %c0_76, %c0_77] : memref<3x32x128xf32, #tpu.memory_space<vmem>>, vector<1x32x128xf32>
      %120 = vector.shape_cast %119 : vector<1x32x128xf32> to vector<32x128xf32>
      %121 = arith.mulf %120, %93 : vector<32x128xf32>
      %c1_78 = arith.constant 1 : index
      %c0_79 = arith.constant 0 : index
      %c0_80 = arith.constant 0 : index
      %122 = vector.load %arg7[%c1_78, %c0_79, %c0_80] : memref<3x32x128xf32, #tpu.memory_space<vmem>>, vector<1x32x128xf32>
      %123 = vector.shape_cast %122 : vector<1x32x128xf32> to vector<32x128xf32>
      %124 = arith.mulf %123, %95 : vector<32x128xf32>
      %125 = arith.subf %121, %124 : vector<32x128xf32>
      %c2_81 = arith.constant 2 : index
      %c0_82 = arith.constant 0 : index
      %c0_83 = arith.constant 0 : index
      %126 = vector.load %arg7[%c2_81, %c0_82, %c0_83] : memref<3x32x128xf32, #tpu.memory_space<vmem>>, vector<1x32x128xf32>
      %127 = vector.shape_cast %126 : vector<1x32x128xf32> to vector<32x128xf32>
      %128 = arith.mulf %127, %118 : vector<32x128xf32>
      %129 = arith.addf %125, %128 : vector<32x128xf32>
      %c0_84 = arith.constant 0 : index
      %c8_85 = arith.constant 8 : index
      %c0_86 = arith.constant 0 : index
      %130 = vector.load %arg10[%c0_84, %c8_85, %c0_86] : memref<2x48x128xf32, #tpu.memory_space<vmem>>, vector<1x32x128xf32>
      %131 = vector.shape_cast %130 : vector<1x32x128xf32> to vector<32x128xf32>
      %132 = vector.shape_cast %129 : vector<32x128xf32> to vector<1x32x128xf32>
      tpu.vector_store %arg10[%c0_84, %c8_85, %c0_86], %132 {strides = array<i32>} : memref<2x48x128xf32, #tpu.memory_space<vmem>>, vector<1x32x128xf32>,
      %c8_i32_87 = arith.constant 8 : i32
      %133 = arith.muli %arg12, %c8_i32_87 : i32
      %134 = arith.addi %17, %133 : i32
      %c1_i32_88 = arith.constant 1 : i32
      %135 = arith.addi %134, %c1_i32_88 : i32
      %136 = arith.index_cast %135 : i32 to index
      %137 = memref.load %arg2[%136] : memref<64xf32, #tpu.memory_space<smem>>
      %c8_i32_89 = arith.constant 8 : i32
      %138 = arith.addi %c8_i32_89, %1 : i32
      %c0_90 = arith.constant 0 : index
      %139 = arith.index_cast %138 : i32 to index
      %c0_91 = arith.constant 0 : index
      %140 = vector.load %arg10[%c0_90, %139, %c0_91] : memref<2x48x128xf32, #tpu.memory_space<vmem>>, vector<1x1x128xf32>
      %141 = vector.shape_cast %140 : vector<1x1x128xf32> to vector<1x128xf32>
      %142 = vector.broadcast %137 : f32 to vector<1x128xf32>
      %143 = arith.mulf %13, %142 : vector<1x128xf32>
      %144 = arith.addf %141, %143 : vector<1x128xf32>
      %c8_i32_92 = arith.constant 8 : i32
      %145 = arith.addi %c8_i32_92, %1 : i32
      %c0_93 = arith.constant 0 : index
      %146 = arith.index_cast %145 : i32 to index
      %c0_94 = arith.constant 0 : index
      %147 = vector.load %arg10[%c0_93, %146, %c0_94] : memref<2x48x128xf32, #tpu.memory_space<vmem>>, vector<1x1x128xf32>
      %148 = vector.shape_cast %147 : vector<1x1x128xf32> to vector<1x128xf32>
      %149 = vector.shape_cast %144 : vector<1x128xf32> to vector<1x1x128xf32>
      tpu.vector_store %arg10[%c0_93, %146, %c0_94], %149 {strides = array<i32>} : memref<2x48x128xf32, #tpu.memory_space<vmem>>, vector<1x1x128xf32>,
      %c8_i32_95 = arith.constant 8 : i32
      %150 = arith.addi %c8_i32_95, %5 : i32
      %c0_96 = arith.constant 0 : index
      %151 = arith.index_cast %150 : i32 to index
      %c0_97 = arith.constant 0 : index
      %152 = vector.load %arg10[%c0_96, %151, %c0_97] : memref<2x48x128xf32, #tpu.memory_space<vmem>>, vector<1x1x128xf32>
      %153 = vector.shape_cast %152 : vector<1x1x128xf32> to vector<1x128xf32>
      %c8_i32_98 = arith.constant 8 : i32
      %154 = arith.muli %arg12, %c8_i32_98 : i32
      %c1_i32_99 = arith.constant 1 : i32
      %155 = arith.addi %154, %c1_i32_99 : i32
      %156 = arith.index_cast %155 : i32 to index
      %c0_100 = arith.constant 0 : index
      %157 = vector.load %arg11[%156, %c0_100] : memref<64x128xf32, #tpu.memory_space<vmem>>, vector<1x128xf32>
      tpu.vector_store %arg11[%156, %c0_100], %153 {strides = array<i32>} : memref<64x128xf32, #tpu.memory_space<vmem>>, vector<1x128xf32>,
      %c0_101 = arith.constant 0 : index
      %c8_102 = arith.constant 8 : index
      %c0_103 = arith.constant 0 : index
      %158 = vector.load %arg10[%c0_101, %c8_102, %c0_103] : memref<2x48x128xf32, #tpu.memory_space<vmem>>, vector<1x32x128xf32>
      %159 = vector.shape_cast %158 : vector<1x32x128xf32> to vector<32x128xf32>
      %c1_104 = arith.constant 1 : index
      %c8_105 = arith.constant 8 : index
      %c0_106 = arith.constant 0 : index
      %160 = vector.load %arg10[%c1_104, %c8_105, %c0_106] : memref<2x48x128xf32, #tpu.memory_space<vmem>>, vector<1x32x128xf32>
      %161 = vector.shape_cast %160 : vector<1x32x128xf32> to vector<32x128xf32>
      %c0_107 = arith.constant 0 : index
      %c7_108 = arith.constant 7 : index
      %c0_109 = arith.constant 0 : index
      %162 = vector.load %arg10[%c0_107, %c7_108, %c0_109] : memref<2x48x128xf32, #tpu.memory_space<vmem>>, vector<1x32x128xf32>
      %163 = vector.shape_cast %162 : vector<1x32x128xf32> to vector<32x128xf32>
      %c0_110 = arith.constant 0 : index
      %c9_111 = arith.constant 9 : index
      %c0_112 = arith.constant 0 : index
      %164 = vector.load %arg10[%c0_110, %c9_111, %c0_112] : memref<2x48x128xf32, #tpu.memory_space<vmem>>, vector<1x32x128xf32>
      %165 = vector.shape_cast %164 : vector<1x32x128xf32> to vector<32x128xf32>
      %166 = arith.addf %163, %165 : vector<32x128xf32>
      %c1_i32_113 = arith.constant 1 : i32
      %167 = tpu.dynamic_rotate %159 by %c1_i32_113 dim 1 : vector<32x128xf32>, i32 -> vector<32x128xf32>
      %168 = arith.addf %166, %167 : vector<32x128xf32>
      %c127_i32_114 = arith.constant 127 : i32
      %169 = tpu.dynamic_rotate %159 by %c127_i32_114 dim 1 : vector<32x128xf32>, i32 -> vector<32x128xf32>
      %170 = arith.addf %168, %169 : vector<32x128xf32>
      %cst_115 = arith.constant 1.33333337 : f32
      %171 = vector.broadcast %cst_115 : f32 to vector<32x128xf32>
      %172 = arith.mulf %171, %170 : vector<32x128xf32>
      %c0_116 = arith.constant 0 : index
      %c6_117 = arith.constant 6 : index
      %c0_118 = arith.constant 0 : index
      %173 = vector.load %arg10[%c0_116, %c6_117, %c0_118] : memref<2x48x128xf32, #tpu.memory_space<vmem>>, vector<1x32x128xf32>
      %174 = vector.shape_cast %173 : vector<1x32x128xf32> to vector<32x128xf32>
      %c0_119 = arith.constant 0 : index
      %c10_120 = arith.constant 10 : index
      %c0_121 = arith.constant 0 : index
      %175 = vector.load %arg10[%c0_119, %c10_120, %c0_121] : memref<2x48x128xf32, #tpu.memory_space<vmem>>, vector<1x32x128xf32>
      %176 = vector.shape_cast %175 : vector<1x32x128xf32> to vector<32x128xf32>
      %177 = arith.addf %174, %176 : vector<32x128xf32>
      %c2_i32_122 = arith.constant 2 : i32
      %178 = tpu.dynamic_rotate %159 by %c2_i32_122 dim 1 : vector<32x128xf32>, i32 -> vector<32x128xf32>
      %179 = arith.addf %177, %178 : vector<32x128xf32>
      %c126_i32_123 = arith.constant 126 : i32
      %180 = tpu.dynamic_rotate %159 by %c126_i32_123 dim 1 : vector<32x128xf32>, i32 -> vector<32x128xf32>
      %181 = arith.addf %179, %180 : vector<32x128xf32>
      %cst_124 = arith.constant -0.0833333358 : f32
      %182 = vector.broadcast %cst_124 : f32 to vector<32x128xf32>
      %183 = arith.mulf %182, %181 : vector<32x128xf32>
      %184 = arith.addf %172, %183 : vector<32x128xf32>
      %c0_125 = arith.constant 0 : index
      %c0_126 = arith.constant 0 : index
      %c0_127 = arith.constant 0 : index
      %185 = vector.load %arg7[%c0_125, %c0_126, %c0_127] : memref<3x32x128xf32, #tpu.memory_space<vmem>>, vector<1x32x128xf32>
      %186 = vector.shape_cast %185 : vector<1x32x128xf32> to vector<32x128xf32>
      %187 = arith.mulf %186, %159 : vector<32x128xf32>
      %c1_128 = arith.constant 1 : index
      %c0_129 = arith.constant 0 : index
      %c0_130 = arith.constant 0 : index
      %188 = vector.load %arg7[%c1_128, %c0_129, %c0_130] : memref<3x32x128xf32, #tpu.memory_space<vmem>>, vector<1x32x128xf32>
      %189 = vector.shape_cast %188 : vector<1x32x128xf32> to vector<32x128xf32>
      %190 = arith.mulf %189, %161 : vector<32x128xf32>
      %191 = arith.subf %187, %190 : vector<32x128xf32>
      %c2_131 = arith.constant 2 : index
      %c0_132 = arith.constant 0 : index
      %c0_133 = arith.constant 0 : index
      %192 = vector.load %arg7[%c2_131, %c0_132, %c0_133] : memref<3x32x128xf32, #tpu.memory_space<vmem>>, vector<1x32x128xf32>
      %193 = vector.shape_cast %192 : vector<1x32x128xf32> to vector<32x128xf32>
      %194 = arith.mulf %193, %184 : vector<32x128xf32>
      %195 = arith.addf %191, %194 : vector<32x128xf32>
      %c1_134 = arith.constant 1 : index
      %c8_135 = arith.constant 8 : index
      %c0_136 = arith.constant 0 : index
      %196 = vector.load %arg10[%c1_134, %c8_135, %c0_136] : memref<2x48x128xf32, #tpu.memory_space<vmem>>, vector<1x32x128xf32>
      %197 = vector.shape_cast %196 : vector<1x32x128xf32> to vector<32x128xf32>
      %198 = vector.shape_cast %195 : vector<32x128xf32> to vector<1x32x128xf32>
      tpu.vector_store %arg10[%c1_134, %c8_135, %c0_136], %198 {strides = array<i32>} : memref<2x48x128xf32, #tpu.memory_space<vmem>>, vector<1x32x128xf32>,
      %c8_i32_137 = arith.constant 8 : i32
      %199 = arith.muli %arg12, %c8_i32_137 : i32
      %200 = arith.addi %17, %199 : i32
      %c2_i32_138 = arith.constant 2 : i32
      %201 = arith.addi %200, %c2_i32_138 : i32
      %202 = arith.index_cast %201 : i32 to index
      %203 = memref.load %arg2[%202] : memref<64xf32, #tpu.memory_space<smem>>
      %c8_i32_139 = arith.constant 8 : i32
      %204 = arith.addi %c8_i32_139, %1 : i32
      %c1_140 = arith.constant 1 : index
      %205 = arith.index_cast %204 : i32 to index
      %c0_141 = arith.constant 0 : index
      %206 = vector.load %arg10[%c1_140, %205, %c0_141] : memref<2x48x128xf32, #tpu.memory_space<vmem>>, vector<1x1x128xf32>
      %207 = vector.shape_cast %206 : vector<1x1x128xf32> to vector<1x128xf32>
      %208 = vector.broadcast %203 : f32 to vector<1x128xf32>
      %209 = arith.mulf %13, %208 : vector<1x128xf32>
      %210 = arith.addf %207, %209 : vector<1x128xf32>
      %c8_i32_142 = arith.constant 8 : i32
      %211 = arith.addi %c8_i32_142, %1 : i32
      %c1_143 = arith.constant 1 : index
      %212 = arith.index_cast %211 : i32 to index
      %c0_144 = arith.constant 0 : index
      %213 = vector.load %arg10[%c1_143, %212, %c0_144] : memref<2x48x128xf32, #tpu.memory_space<vmem>>, vector<1x1x128xf32>
      %214 = vector.shape_cast %213 : vector<1x1x128xf32> to vector<1x128xf32>
      %215 = vector.shape_cast %210 : vector<1x128xf32> to vector<1x1x128xf32>
      tpu.vector_store %arg10[%c1_143, %212, %c0_144], %215 {strides = array<i32>} : memref<2x48x128xf32, #tpu.memory_space<vmem>>, vector<1x1x128xf32>,
      %c8_i32_145 = arith.constant 8 : i32
      %216 = arith.addi %c8_i32_145, %5 : i32
      %c1_146 = arith.constant 1 : index
      %217 = arith.index_cast %216 : i32 to index
      %c0_147 = arith.constant 0 : index
      %218 = vector.load %arg10[%c1_146, %217, %c0_147] : memref<2x48x128xf32, #tpu.memory_space<vmem>>, vector<1x1x128xf32>
      %219 = vector.shape_cast %218 : vector<1x1x128xf32> to vector<1x128xf32>
      %c8_i32_148 = arith.constant 8 : i32
      %220 = arith.muli %arg12, %c8_i32_148 : i32
      %c2_i32_149 = arith.constant 2 : i32
      %221 = arith.addi %220, %c2_i32_149 : i32
      %222 = arith.index_cast %221 : i32 to index
      %c0_150 = arith.constant 0 : index
      %223 = vector.load %arg11[%222, %c0_150] : memref<64x128xf32, #tpu.memory_space<vmem>>, vector<1x128xf32>
      tpu.vector_store %arg11[%222, %c0_150], %219 {strides = array<i32>} : memref<64x128xf32, #tpu.memory_space<vmem>>, vector<1x128xf32>,
      %c1_151 = arith.constant 1 : index
      %c8_152 = arith.constant 8 : index
      %c0_153 = arith.constant 0 : index
      %224 = vector.load %arg10[%c1_151, %c8_152, %c0_153] : memref<2x48x128xf32, #tpu.memory_space<vmem>>, vector<1x32x128xf32>
      %225 = vector.shape_cast %224 : vector<1x32x128xf32> to vector<32x128xf32>
      %c0_154 = arith.constant 0 : index
      %c8_155 = arith.constant 8 : index
      %c0_156 = arith.constant 0 : index
      %226 = vector.load %arg10[%c0_154, %c8_155, %c0_156] : memref<2x48x128xf32, #tpu.memory_space<vmem>>, vector<1x32x128xf32>
      %227 = vector.shape_cast %226 : vector<1x32x128xf32> to vector<32x128xf32>
      %c1_157 = arith.constant 1 : index
      %c7_158 = arith.constant 7 : index
      %c0_159 = arith.constant 0 : index
      %228 = vector.load %arg10[%c1_157, %c7_158, %c0_159] : memref<2x48x128xf32, #tpu.memory_space<vmem>>, vector<1x32x128xf32>
      %229 = vector.shape_cast %228 : vector<1x32x128xf32> to vector<32x128xf32>
      %c1_160 = arith.constant 1 : index
      %c9_161 = arith.constant 9 : index
      %c0_162 = arith.constant 0 : index
      %230 = vector.load %arg10[%c1_160, %c9_161, %c0_162] : memref<2x48x128xf32, #tpu.memory_space<vmem>>, vector<1x32x128xf32>
      %231 = vector.shape_cast %230 : vector<1x32x128xf32> to vector<32x128xf32>
      %232 = arith.addf %229, %231 : vector<32x128xf32>
      %c1_i32_163 = arith.constant 1 : i32
      %233 = tpu.dynamic_rotate %225 by %c1_i32_163 dim 1 : vector<32x128xf32>, i32 -> vector<32x128xf32>
      %234 = arith.addf %232, %233 : vector<32x128xf32>
      %c127_i32_164 = arith.constant 127 : i32
      %235 = tpu.dynamic_rotate %225 by %c127_i32_164 dim 1 : vector<32x128xf32>, i32 -> vector<32x128xf32>
      %236 = arith.addf %234, %235 : vector<32x128xf32>
      %cst_165 = arith.constant 1.33333337 : f32
      %237 = vector.broadcast %cst_165 : f32 to vector<32x128xf32>
      %238 = arith.mulf %237, %236 : vector<32x128xf32>
      %c1_166 = arith.constant 1 : index
      %c6_167 = arith.constant 6 : index
      %c0_168 = arith.constant 0 : index
      %239 = vector.load %arg10[%c1_166, %c6_167, %c0_168] : memref<2x48x128xf32, #tpu.memory_space<vmem>>, vector<1x32x128xf32>
      %240 = vector.shape_cast %239 : vector<1x32x128xf32> to vector<32x128xf32>
      %c1_169 = arith.constant 1 : index
      %c10_170 = arith.constant 10 : index
      %c0_171 = arith.constant 0 : index
      %241 = vector.load %arg10[%c1_169, %c10_170, %c0_171] : memref<2x48x128xf32, #tpu.memory_space<vmem>>, vector<1x32x128xf32>
      %242 = vector.shape_cast %241 : vector<1x32x128xf32> to vector<32x128xf32>
      %243 = arith.addf %240, %242 : vector<32x128xf32>
      %c2_i32_172 = arith.constant 2 : i32
      %244 = tpu.dynamic_rotate %225 by %c2_i32_172 dim 1 : vector<32x128xf32>, i32 -> vector<32x128xf32>
      %245 = arith.addf %243, %244 : vector<32x128xf32>
      %c126_i32_173 = arith.constant 126 : i32
      %246 = tpu.dynamic_rotate %225 by %c126_i32_173 dim 1 : vector<32x128xf32>, i32 -> vector<32x128xf32>
      %247 = arith.addf %245, %246 : vector<32x128xf32>
      %cst_174 = arith.constant -0.0833333358 : f32
      %248 = vector.broadcast %cst_174 : f32 to vector<32x128xf32>
      %249 = arith.mulf %248, %247 : vector<32x128xf32>
      %250 = arith.addf %238, %249 : vector<32x128xf32>
      %c0_175 = arith.constant 0 : index
      %c0_176 = arith.constant 0 : index
      %c0_177 = arith.constant 0 : index
      %251 = vector.load %arg7[%c0_175, %c0_176, %c0_177] : memref<3x32x128xf32, #tpu.memory_space<vmem>>, vector<1x32x128xf32>
      %252 = vector.shape_cast %251 : vector<1x32x128xf32> to vector<32x128xf32>
      %253 = arith.mulf %252, %225 : vector<32x128xf32>
      %c1_178 = arith.constant 1 : index
      %c0_179 = arith.constant 0 : index
      %c0_180 = arith.constant 0 : index
      %254 = vector.load %arg7[%c1_178, %c0_179, %c0_180] : memref<3x32x128xf32, #tpu.memory_space<vmem>>, vector<1x32x128xf32>
      %255 = vector.shape_cast %254 : vector<1x32x128xf32> to vector<32x128xf32>
      %256 = arith.mulf %255, %227 : vector<32x128xf32>
      %257 = arith.subf %253, %256 : vector<32x128xf32>
      %c2_181 = arith.constant 2 : index
      %c0_182 = arith.constant 0 : index
      %c0_183 = arith.constant 0 : index
      %258 = vector.load %arg7[%c2_181, %c0_182, %c0_183] : memref<3x32x128xf32, #tpu.memory_space<vmem>>, vector<1x32x128xf32>
      %259 = vector.shape_cast %258 : vector<1x32x128xf32> to vector<32x128xf32>
      %260 = arith.mulf %259, %250 : vector<32x128xf32>
      %261 = arith.addf %257, %260 : vector<32x128xf32>
      %c0_184 = arith.constant 0 : index
      %c8_185 = arith.constant 8 : index
      %c0_186 = arith.constant 0 : index
      %262 = vector.load %arg10[%c0_184, %c8_185, %c0_186] : memref<2x48x128xf32, #tpu.memory_space<vmem>>, vector<1x32x128xf32>
      %263 = vector.shape_cast %262 : vector<1x32x128xf32> to vector<32x128xf32>
      %264 = vector.shape_cast %261 : vector<32x128xf32> to vector<1x32x128xf32>
      tpu.vector_store %arg10[%c0_184, %c8_185, %c0_186], %264 {strides = array<i32>} : memref<2x48x128xf32, #tpu.memory_space<vmem>>, vector<1x32x128xf32>,
      %c8_i32_187 = arith.constant 8 : i32
      %265 = arith.muli %arg12, %c8_i32_187 : i32
      %266 = arith.addi %17, %265 : i32
      %c3_i32 = arith.constant 3 : i32
      %267 = arith.addi %266, %c3_i32 : i32
      %268 = arith.index_cast %267 : i32 to index
      %269 = memref.load %arg2[%268] : memref<64xf32, #tpu.memory_space<smem>>
      %c8_i32_188 = arith.constant 8 : i32
      %270 = arith.addi %c8_i32_188, %1 : i32
      %c0_189 = arith.constant 0 : index
      %271 = arith.index_cast %270 : i32 to index
      %c0_190 = arith.constant 0 : index
      %272 = vector.load %arg10[%c0_189, %271, %c0_190] : memref<2x48x128xf32, #tpu.memory_space<vmem>>, vector<1x1x128xf32>
      %273 = vector.shape_cast %272 : vector<1x1x128xf32> to vector<1x128xf32>
      %274 = vector.broadcast %269 : f32 to vector<1x128xf32>
      %275 = arith.mulf %13, %274 : vector<1x128xf32>
      %276 = arith.addf %273, %275 : vector<1x128xf32>
      %c8_i32_191 = arith.constant 8 : i32
      %277 = arith.addi %c8_i32_191, %1 : i32
      %c0_192 = arith.constant 0 : index
      %278 = arith.index_cast %277 : i32 to index
      %c0_193 = arith.constant 0 : index
      %279 = vector.load %arg10[%c0_192, %278, %c0_193] : memref<2x48x128xf32, #tpu.memory_space<vmem>>, vector<1x1x128xf32>
      %280 = vector.shape_cast %279 : vector<1x1x128xf32> to vector<1x128xf32>
      %281 = vector.shape_cast %276 : vector<1x128xf32> to vector<1x1x128xf32>
      tpu.vector_store %arg10[%c0_192, %278, %c0_193], %281 {strides = array<i32>} : memref<2x48x128xf32, #tpu.memory_space<vmem>>, vector<1x1x128xf32>,
      %c8_i32_194 = arith.constant 8 : i32
      %282 = arith.addi %c8_i32_194, %5 : i32
      %c0_195 = arith.constant 0 : index
      %283 = arith.index_cast %282 : i32 to index
      %c0_196 = arith.constant 0 : index
      %284 = vector.load %arg10[%c0_195, %283, %c0_196] : memref<2x48x128xf32, #tpu.memory_space<vmem>>, vector<1x1x128xf32>
      %285 = vector.shape_cast %284 : vector<1x1x128xf32> to vector<1x128xf32>
      %c8_i32_197 = arith.constant 8 : i32
      %286 = arith.muli %arg12, %c8_i32_197 : i32
      %c3_i32_198 = arith.constant 3 : i32
      %287 = arith.addi %286, %c3_i32_198 : i32
      %288 = arith.index_cast %287 : i32 to index
      %c0_199 = arith.constant 0 : index
      %289 = vector.load %arg11[%288, %c0_199] : memref<64x128xf32, #tpu.memory_space<vmem>>, vector<1x128xf32>
      tpu.vector_store %arg11[%288, %c0_199], %285 {strides = array<i32>} : memref<64x128xf32, #tpu.memory_space<vmem>>, vector<1x128xf32>,
      %c0_200 = arith.constant 0 : index
      %c8_201 = arith.constant 8 : index
      %c0_202 = arith.constant 0 : index
      %290 = vector.load %arg10[%c0_200, %c8_201, %c0_202] : memref<2x48x128xf32, #tpu.memory_space<vmem>>, vector<1x32x128xf32>
      %291 = vector.shape_cast %290 : vector<1x32x128xf32> to vector<32x128xf32>
      %c1_203 = arith.constant 1 : index
      %c8_204 = arith.constant 8 : index
      %c0_205 = arith.constant 0 : index
      %292 = vector.load %arg10[%c1_203, %c8_204, %c0_205] : memref<2x48x128xf32, #tpu.memory_space<vmem>>, vector<1x32x128xf32>
      %293 = vector.shape_cast %292 : vector<1x32x128xf32> to vector<32x128xf32>
      %c0_206 = arith.constant 0 : index
      %c7_207 = arith.constant 7 : index
      %c0_208 = arith.constant 0 : index
      %294 = vector.load %arg10[%c0_206, %c7_207, %c0_208] : memref<2x48x128xf32, #tpu.memory_space<vmem>>, vector<1x32x128xf32>
      %295 = vector.shape_cast %294 : vector<1x32x128xf32> to vector<32x128xf32>
      %c0_209 = arith.constant 0 : index
      %c9_210 = arith.constant 9 : index
      %c0_211 = arith.constant 0 : index
      %296 = vector.load %arg10[%c0_209, %c9_210, %c0_211] : memref<2x48x128xf32, #tpu.memory_space<vmem>>, vector<1x32x128xf32>
      %297 = vector.shape_cast %296 : vector<1x32x128xf32> to vector<32x128xf32>
      %298 = arith.addf %295, %297 : vector<32x128xf32>
      %c1_i32_212 = arith.constant 1 : i32
      %299 = tpu.dynamic_rotate %291 by %c1_i32_212 dim 1 : vector<32x128xf32>, i32 -> vector<32x128xf32>
      %300 = arith.addf %298, %299 : vector<32x128xf32>
      %c127_i32_213 = arith.constant 127 : i32
      %301 = tpu.dynamic_rotate %291 by %c127_i32_213 dim 1 : vector<32x128xf32>, i32 -> vector<32x128xf32>
      %302 = arith.addf %300, %301 : vector<32x128xf32>
      %cst_214 = arith.constant 1.33333337 : f32
      %303 = vector.broadcast %cst_214 : f32 to vector<32x128xf32>
      %304 = arith.mulf %303, %302 : vector<32x128xf32>
      %c0_215 = arith.constant 0 : index
      %c6_216 = arith.constant 6 : index
      %c0_217 = arith.constant 0 : index
      %305 = vector.load %arg10[%c0_215, %c6_216, %c0_217] : memref<2x48x128xf32, #tpu.memory_space<vmem>>, vector<1x32x128xf32>
      %306 = vector.shape_cast %305 : vector<1x32x128xf32> to vector<32x128xf32>
      %c0_218 = arith.constant 0 : index
      %c10_219 = arith.constant 10 : index
      %c0_220 = arith.constant 0 : index
      %307 = vector.load %arg10[%c0_218, %c10_219, %c0_220] : memref<2x48x128xf32, #tpu.memory_space<vmem>>, vector<1x32x128xf32>
      %308 = vector.shape_cast %307 : vector<1x32x128xf32> to vector<32x128xf32>
      %309 = arith.addf %306, %308 : vector<32x128xf32>
      %c2_i32_221 = arith.constant 2 : i32
      %310 = tpu.dynamic_rotate %291 by %c2_i32_221 dim 1 : vector<32x128xf32>, i32 -> vector<32x128xf32>
      %311 = arith.addf %309, %310 : vector<32x128xf32>
      %c126_i32_222 = arith.constant 126 : i32
      %312 = tpu.dynamic_rotate %291 by %c126_i32_222 dim 1 : vector<32x128xf32>, i32 -> vector<32x128xf32>
      %313 = arith.addf %311, %312 : vector<32x128xf32>
      %cst_223 = arith.constant -0.0833333358 : f32
      %314 = vector.broadcast %cst_223 : f32 to vector<32x128xf32>
      %315 = arith.mulf %314, %313 : vector<32x128xf32>
      %316 = arith.addf %304, %315 : vector<32x128xf32>
      %c0_224 = arith.constant 0 : index
      %c0_225 = arith.constant 0 : index
      %c0_226 = arith.constant 0 : index
      %317 = vector.load %arg7[%c0_224, %c0_225, %c0_226] : memref<3x32x128xf32, #tpu.memory_space<vmem>>, vector<1x32x128xf32>
      %318 = vector.shape_cast %317 : vector<1x32x128xf32> to vector<32x128xf32>
      %319 = arith.mulf %318, %291 : vector<32x128xf32>
      %c1_227 = arith.constant 1 : index
      %c0_228 = arith.constant 0 : index
      %c0_229 = arith.constant 0 : index
      %320 = vector.load %arg7[%c1_227, %c0_228, %c0_229] : memref<3x32x128xf32, #tpu.memory_space<vmem>>, vector<1x32x128xf32>
      %321 = vector.shape_cast %320 : vector<1x32x128xf32> to vector<32x128xf32>
      %322 = arith.mulf %321, %293 : vector<32x128xf32>
      %323 = arith.subf %319, %322 : vector<32x128xf32>
      %c2_230 = arith.constant 2 : index
      %c0_231 = arith.constant 0 : index
      %c0_232 = arith.constant 0 : index
      %324 = vector.load %arg7[%c2_230, %c0_231, %c0_232] : memref<3x32x128xf32, #tpu.memory_space<vmem>>, vector<1x32x128xf32>
      %325 = vector.shape_cast %324 : vector<1x32x128xf32> to vector<32x128xf32>
      %326 = arith.mulf %325, %316 : vector<32x128xf32>
      %327 = arith.addf %323, %326 : vector<32x128xf32>
      %c1_233 = arith.constant 1 : index
      %c8_234 = arith.constant 8 : index
      %c0_235 = arith.constant 0 : index
      %328 = vector.load %arg10[%c1_233, %c8_234, %c0_235] : memref<2x48x128xf32, #tpu.memory_space<vmem>>, vector<1x32x128xf32>
      %329 = vector.shape_cast %328 : vector<1x32x128xf32> to vector<32x128xf32>
      %330 = vector.shape_cast %327 : vector<32x128xf32> to vector<1x32x128xf32>
      tpu.vector_store %arg10[%c1_233, %c8_234, %c0_235], %330 {strides = array<i32>} : memref<2x48x128xf32, #tpu.memory_space<vmem>>, vector<1x32x128xf32>,
      %c8_i32_236 = arith.constant 8 : i32
      %331 = arith.muli %arg12, %c8_i32_236 : i32
      %332 = arith.addi %17, %331 : i32
      %c4_i32 = arith.constant 4 : i32
      %333 = arith.addi %332, %c4_i32 : i32
      %334 = arith.index_cast %333 : i32 to index
      %335 = memref.load %arg2[%334] : memref<64xf32, #tpu.memory_space<smem>>
      %c8_i32_237 = arith.constant 8 : i32
      %336 = arith.addi %c8_i32_237, %1 : i32
      %c1_238 = arith.constant 1 : index
      %337 = arith.index_cast %336 : i32 to index
      %c0_239 = arith.constant 0 : index
      %338 = vector.load %arg10[%c1_238, %337, %c0_239] : memref<2x48x128xf32, #tpu.memory_space<vmem>>, vector<1x1x128xf32>
      %339 = vector.shape_cast %338 : vector<1x1x128xf32> to vector<1x128xf32>
      %340 = vector.broadcast %335 : f32 to vector<1x128xf32>
      %341 = arith.mulf %13, %340 : vector<1x128xf32>
      %342 = arith.addf %339, %341 : vector<1x128xf32>
      %c8_i32_240 = arith.constant 8 : i32
      %343 = arith.addi %c8_i32_240, %1 : i32
      %c1_241 = arith.constant 1 : index
      %344 = arith.index_cast %343 : i32 to index
      %c0_242 = arith.constant 0 : index
      %345 = vector.load %arg10[%c1_241, %344, %c0_242] : memref<2x48x128xf32, #tpu.memory_space<vmem>>, vector<1x1x128xf32>
      %346 = vector.shape_cast %345 : vector<1x1x128xf32> to vector<1x128xf32>
      %347 = vector.shape_cast %342 : vector<1x128xf32> to vector<1x1x128xf32>
      tpu.vector_store %arg10[%c1_241, %344, %c0_242], %347 {strides = array<i32>} : memref<2x48x128xf32, #tpu.memory_space<vmem>>, vector<1x1x128xf32>,
      %c8_i32_243 = arith.constant 8 : i32
      %348 = arith.addi %c8_i32_243, %5 : i32
      %c1_244 = arith.constant 1 : index
      %349 = arith.index_cast %348 : i32 to index
      %c0_245 = arith.constant 0 : index
      %350 = vector.load %arg10[%c1_244, %349, %c0_245] : memref<2x48x128xf32, #tpu.memory_space<vmem>>, vector<1x1x128xf32>
      %351 = vector.shape_cast %350 : vector<1x1x128xf32> to vector<1x128xf32>
      %c8_i32_246 = arith.constant 8 : i32
      %352 = arith.muli %arg12, %c8_i32_246 : i32
      %c4_i32_247 = arith.constant 4 : i32
      %353 = arith.addi %352, %c4_i32_247 : i32
      %354 = arith.index_cast %353 : i32 to index
      %c0_248 = arith.constant 0 : index
      %355 = vector.load %arg11[%354, %c0_248] : memref<64x128xf32, #tpu.memory_space<vmem>>, vector<1x128xf32>
      tpu.vector_store %arg11[%354, %c0_248], %351 {strides = array<i32>} : memref<64x128xf32, #tpu.memory_space<vmem>>, vector<1x128xf32>,
      %c1_249 = arith.constant 1 : index
      %c8_250 = arith.constant 8 : index
      %c0_251 = arith.constant 0 : index
      %356 = vector.load %arg10[%c1_249, %c8_250, %c0_251] : memref<2x48x128xf32, #tpu.memory_space<vmem>>, vector<1x32x128xf32>
      %357 = vector.shape_cast %356 : vector<1x32x128xf32> to vector<32x128xf32>
      %c0_252 = arith.constant 0 : index
      %c8_253 = arith.constant 8 : index
      %c0_254 = arith.constant 0 : index
      %358 = vector.load %arg10[%c0_252, %c8_253, %c0_254] : memref<2x48x128xf32, #tpu.memory_space<vmem>>, vector<1x32x128xf32>
      %359 = vector.shape_cast %358 : vector<1x32x128xf32> to vector<32x128xf32>
      %c1_255 = arith.constant 1 : index
      %c7_256 = arith.constant 7 : index
      %c0_257 = arith.constant 0 : index
      %360 = vector.load %arg10[%c1_255, %c7_256, %c0_257] : memref<2x48x128xf32, #tpu.memory_space<vmem>>, vector<1x32x128xf32>
      %361 = vector.shape_cast %360 : vector<1x32x128xf32> to vector<32x128xf32>
      %c1_258 = arith.constant 1 : index
      %c9_259 = arith.constant 9 : index
      %c0_260 = arith.constant 0 : index
      %362 = vector.load %arg10[%c1_258, %c9_259, %c0_260] : memref<2x48x128xf32, #tpu.memory_space<vmem>>, vector<1x32x128xf32>
      %363 = vector.shape_cast %362 : vector<1x32x128xf32> to vector<32x128xf32>
      %364 = arith.addf %361, %363 : vector<32x128xf32>
      %c1_i32_261 = arith.constant 1 : i32
      %365 = tpu.dynamic_rotate %357 by %c1_i32_261 dim 1 : vector<32x128xf32>, i32 -> vector<32x128xf32>
      %366 = arith.addf %364, %365 : vector<32x128xf32>
      %c127_i32_262 = arith.constant 127 : i32
      %367 = tpu.dynamic_rotate %357 by %c127_i32_262 dim 1 : vector<32x128xf32>, i32 -> vector<32x128xf32>
      %368 = arith.addf %366, %367 : vector<32x128xf32>
      %cst_263 = arith.constant 1.33333337 : f32
      %369 = vector.broadcast %cst_263 : f32 to vector<32x128xf32>
      %370 = arith.mulf %369, %368 : vector<32x128xf32>
      %c1_264 = arith.constant 1 : index
      %c6_265 = arith.constant 6 : index
      %c0_266 = arith.constant 0 : index
      %371 = vector.load %arg10[%c1_264, %c6_265, %c0_266] : memref<2x48x128xf32, #tpu.memory_space<vmem>>, vector<1x32x128xf32>
      %372 = vector.shape_cast %371 : vector<1x32x128xf32> to vector<32x128xf32>
      %c1_267 = arith.constant 1 : index
      %c10_268 = arith.constant 10 : index
      %c0_269 = arith.constant 0 : index
      %373 = vector.load %arg10[%c1_267, %c10_268, %c0_269] : memref<2x48x128xf32, #tpu.memory_space<vmem>>, vector<1x32x128xf32>
      %374 = vector.shape_cast %373 : vector<1x32x128xf32> to vector<32x128xf32>
      %375 = arith.addf %372, %374 : vector<32x128xf32>
      %c2_i32_270 = arith.constant 2 : i32
      %376 = tpu.dynamic_rotate %357 by %c2_i32_270 dim 1 : vector<32x128xf32>, i32 -> vector<32x128xf32>
      %377 = arith.addf %375, %376 : vector<32x128xf32>
      %c126_i32_271 = arith.constant 126 : i32
      %378 = tpu.dynamic_rotate %357 by %c126_i32_271 dim 1 : vector<32x128xf32>, i32 -> vector<32x128xf32>
      %379 = arith.addf %377, %378 : vector<32x128xf32>
      %cst_272 = arith.constant -0.0833333358 : f32
      %380 = vector.broadcast %cst_272 : f32 to vector<32x128xf32>
      %381 = arith.mulf %380, %379 : vector<32x128xf32>
      %382 = arith.addf %370, %381 : vector<32x128xf32>
      %c0_273 = arith.constant 0 : index
      %c0_274 = arith.constant 0 : index
      %c0_275 = arith.constant 0 : index
      %383 = vector.load %arg7[%c0_273, %c0_274, %c0_275] : memref<3x32x128xf32, #tpu.memory_space<vmem>>, vector<1x32x128xf32>
      %384 = vector.shape_cast %383 : vector<1x32x128xf32> to vector<32x128xf32>
      %385 = arith.mulf %384, %357 : vector<32x128xf32>
      %c1_276 = arith.constant 1 : index
      %c0_277 = arith.constant 0 : index
      %c0_278 = arith.constant 0 : index
      %386 = vector.load %arg7[%c1_276, %c0_277, %c0_278] : memref<3x32x128xf32, #tpu.memory_space<vmem>>, vector<1x32x128xf32>
      %387 = vector.shape_cast %386 : vector<1x32x128xf32> to vector<32x128xf32>
      %388 = arith.mulf %387, %359 : vector<32x128xf32>
      %389 = arith.subf %385, %388 : vector<32x128xf32>
      %c2_279 = arith.constant 2 : index
      %c0_280 = arith.constant 0 : index
      %c0_281 = arith.constant 0 : index
      %390 = vector.load %arg7[%c2_279, %c0_280, %c0_281] : memref<3x32x128xf32, #tpu.memory_space<vmem>>, vector<1x32x128xf32>
      %391 = vector.shape_cast %390 : vector<1x32x128xf32> to vector<32x128xf32>
      %392 = arith.mulf %391, %382 : vector<32x128xf32>
      %393 = arith.addf %389, %392 : vector<32x128xf32>
      %c0_282 = arith.constant 0 : index
      %c8_283 = arith.constant 8 : index
      %c0_284 = arith.constant 0 : index
      %394 = vector.load %arg10[%c0_282, %c8_283, %c0_284] : memref<2x48x128xf32, #tpu.memory_space<vmem>>, vector<1x32x128xf32>
      %395 = vector.shape_cast %394 : vector<1x32x128xf32> to vector<32x128xf32>
      %396 = vector.shape_cast %393 : vector<32x128xf32> to vector<1x32x128xf32>
      tpu.vector_store %arg10[%c0_282, %c8_283, %c0_284], %396 {strides = array<i32>} : memref<2x48x128xf32, #tpu.memory_space<vmem>>, vector<1x32x128xf32>,
      %c8_i32_285 = arith.constant 8 : i32
      %397 = arith.muli %arg12, %c8_i32_285 : i32
      %398 = arith.addi %17, %397 : i32
      %c5_i32 = arith.constant 5 : i32
      %399 = arith.addi %398, %c5_i32 : i32
      %400 = arith.index_cast %399 : i32 to index
      %401 = memref.load %arg2[%400] : memref<64xf32, #tpu.memory_space<smem>>
      %c8_i32_286 = arith.constant 8 : i32
      %402 = arith.addi %c8_i32_286, %1 : i32
      %c0_287 = arith.constant 0 : index
      %403 = arith.index_cast %402 : i32 to index
      %c0_288 = arith.constant 0 : index
      %404 = vector.load %arg10[%c0_287, %403, %c0_288] : memref<2x48x128xf32, #tpu.memory_space<vmem>>, vector<1x1x128xf32>
      %405 = vector.shape_cast %404 : vector<1x1x128xf32> to vector<1x128xf32>
      %406 = vector.broadcast %401 : f32 to vector<1x128xf32>
      %407 = arith.mulf %13, %406 : vector<1x128xf32>
      %408 = arith.addf %405, %407 : vector<1x128xf32>
      %c8_i32_289 = arith.constant 8 : i32
      %409 = arith.addi %c8_i32_289, %1 : i32
      %c0_290 = arith.constant 0 : index
      %410 = arith.index_cast %409 : i32 to index
      %c0_291 = arith.constant 0 : index
      %411 = vector.load %arg10[%c0_290, %410, %c0_291] : memref<2x48x128xf32, #tpu.memory_space<vmem>>, vector<1x1x128xf32>
      %412 = vector.shape_cast %411 : vector<1x1x128xf32> to vector<1x128xf32>
      %413 = vector.shape_cast %408 : vector<1x128xf32> to vector<1x1x128xf32>
      tpu.vector_store %arg10[%c0_290, %410, %c0_291], %413 {strides = array<i32>} : memref<2x48x128xf32, #tpu.memory_space<vmem>>, vector<1x1x128xf32>,
      %c8_i32_292 = arith.constant 8 : i32
      %414 = arith.addi %c8_i32_292, %5 : i32
      %c0_293 = arith.constant 0 : index
      %415 = arith.index_cast %414 : i32 to index
      %c0_294 = arith.constant 0 : index
      %416 = vector.load %arg10[%c0_293, %415, %c0_294] : memref<2x48x128xf32, #tpu.memory_space<vmem>>, vector<1x1x128xf32>
      %417 = vector.shape_cast %416 : vector<1x1x128xf32> to vector<1x128xf32>
      %c8_i32_295 = arith.constant 8 : i32
      %418 = arith.muli %arg12, %c8_i32_295 : i32
      %c5_i32_296 = arith.constant 5 : i32
      %419 = arith.addi %418, %c5_i32_296 : i32
      %420 = arith.index_cast %419 : i32 to index
      %c0_297 = arith.constant 0 : index
      %421 = vector.load %arg11[%420, %c0_297] : memref<64x128xf32, #tpu.memory_space<vmem>>, vector<1x128xf32>
      tpu.vector_store %arg11[%420, %c0_297], %417 {strides = array<i32>} : memref<64x128xf32, #tpu.memory_space<vmem>>, vector<1x128xf32>,
      %c0_298 = arith.constant 0 : index
      %c8_299 = arith.constant 8 : index
      %c0_300 = arith.constant 0 : index
      %422 = vector.load %arg10[%c0_298, %c8_299, %c0_300] : memref<2x48x128xf32, #tpu.memory_space<vmem>>, vector<1x32x128xf32>
      %423 = vector.shape_cast %422 : vector<1x32x128xf32> to vector<32x128xf32>
      %c1_301 = arith.constant 1 : index
      %c8_302 = arith.constant 8 : index
      %c0_303 = arith.constant 0 : index
      %424 = vector.load %arg10[%c1_301, %c8_302, %c0_303] : memref<2x48x128xf32, #tpu.memory_space<vmem>>, vector<1x32x128xf32>
      %425 = vector.shape_cast %424 : vector<1x32x128xf32> to vector<32x128xf32>
      %c0_304 = arith.constant 0 : index
      %c7_305 = arith.constant 7 : index
      %c0_306 = arith.constant 0 : index
      %426 = vector.load %arg10[%c0_304, %c7_305, %c0_306] : memref<2x48x128xf32, #tpu.memory_space<vmem>>, vector<1x32x128xf32>
      %427 = vector.shape_cast %426 : vector<1x32x128xf32> to vector<32x128xf32>
      %c0_307 = arith.constant 0 : index
      %c9_308 = arith.constant 9 : index
      %c0_309 = arith.constant 0 : index
      %428 = vector.load %arg10[%c0_307, %c9_308, %c0_309] : memref<2x48x128xf32, #tpu.memory_space<vmem>>, vector<1x32x128xf32>
      %429 = vector.shape_cast %428 : vector<1x32x128xf32> to vector<32x128xf32>
      %430 = arith.addf %427, %429 : vector<32x128xf32>
      %c1_i32_310 = arith.constant 1 : i32
      %431 = tpu.dynamic_rotate %423 by %c1_i32_310 dim 1 : vector<32x128xf32>, i32 -> vector<32x128xf32>
      %432 = arith.addf %430, %431 : vector<32x128xf32>
      %c127_i32_311 = arith.constant 127 : i32
      %433 = tpu.dynamic_rotate %423 by %c127_i32_311 dim 1 : vector<32x128xf32>, i32 -> vector<32x128xf32>
      %434 = arith.addf %432, %433 : vector<32x128xf32>
      %cst_312 = arith.constant 1.33333337 : f32
      %435 = vector.broadcast %cst_312 : f32 to vector<32x128xf32>
      %436 = arith.mulf %435, %434 : vector<32x128xf32>
      %c0_313 = arith.constant 0 : index
      %c6_314 = arith.constant 6 : index
      %c0_315 = arith.constant 0 : index
      %437 = vector.load %arg10[%c0_313, %c6_314, %c0_315] : memref<2x48x128xf32, #tpu.memory_space<vmem>>, vector<1x32x128xf32>
      %438 = vector.shape_cast %437 : vector<1x32x128xf32> to vector<32x128xf32>
      %c0_316 = arith.constant 0 : index
      %c10_317 = arith.constant 10 : index
      %c0_318 = arith.constant 0 : index
      %439 = vector.load %arg10[%c0_316, %c10_317, %c0_318] : memref<2x48x128xf32, #tpu.memory_space<vmem>>, vector<1x32x128xf32>
      %440 = vector.shape_cast %439 : vector<1x32x128xf32> to vector<32x128xf32>
      %441 = arith.addf %438, %440 : vector<32x128xf32>
      %c2_i32_319 = arith.constant 2 : i32
      %442 = tpu.dynamic_rotate %423 by %c2_i32_319 dim 1 : vector<32x128xf32>, i32 -> vector<32x128xf32>
      %443 = arith.addf %441, %442 : vector<32x128xf32>
      %c126_i32_320 = arith.constant 126 : i32
      %444 = tpu.dynamic_rotate %423 by %c126_i32_320 dim 1 : vector<32x128xf32>, i32 -> vector<32x128xf32>
      %445 = arith.addf %443, %444 : vector<32x128xf32>
      %cst_321 = arith.constant -0.0833333358 : f32
      %446 = vector.broadcast %cst_321 : f32 to vector<32x128xf32>
      %447 = arith.mulf %446, %445 : vector<32x128xf32>
      %448 = arith.addf %436, %447 : vector<32x128xf32>
      %c0_322 = arith.constant 0 : index
      %c0_323 = arith.constant 0 : index
      %c0_324 = arith.constant 0 : index
      %449 = vector.load %arg7[%c0_322, %c0_323, %c0_324] : memref<3x32x128xf32, #tpu.memory_space<vmem>>, vector<1x32x128xf32>
      %450 = vector.shape_cast %449 : vector<1x32x128xf32> to vector<32x128xf32>
      %451 = arith.mulf %450, %423 : vector<32x128xf32>
      %c1_325 = arith.constant 1 : index
      %c0_326 = arith.constant 0 : index
      %c0_327 = arith.constant 0 : index
      %452 = vector.load %arg7[%c1_325, %c0_326, %c0_327] : memref<3x32x128xf32, #tpu.memory_space<vmem>>, vector<1x32x128xf32>
      %453 = vector.shape_cast %452 : vector<1x32x128xf32> to vector<32x128xf32>
      %454 = arith.mulf %453, %425 : vector<32x128xf32>
      %455 = arith.subf %451, %454 : vector<32x128xf32>
      %c2_328 = arith.constant 2 : index
      %c0_329 = arith.constant 0 : index
      %c0_330 = arith.constant 0 : index
      %456 = vector.load %arg7[%c2_328, %c0_329, %c0_330] : memref<3x32x128xf32, #tpu.memory_space<vmem>>, vector<1x32x128xf32>
      %457 = vector.shape_cast %456 : vector<1x32x128xf32> to vector<32x128xf32>
      %458 = arith.mulf %457, %448 : vector<32x128xf32>
      %459 = arith.addf %455, %458 : vector<32x128xf32>
      %c1_331 = arith.constant 1 : index
      %c8_332 = arith.constant 8 : index
      %c0_333 = arith.constant 0 : index
      %460 = vector.load %arg10[%c1_331, %c8_332, %c0_333] : memref<2x48x128xf32, #tpu.memory_space<vmem>>, vector<1x32x128xf32>
      %461 = vector.shape_cast %460 : vector<1x32x128xf32> to vector<32x128xf32>
      %462 = vector.shape_cast %459 : vector<32x128xf32> to vector<1x32x128xf32>
      tpu.vector_store %arg10[%c1_331, %c8_332, %c0_333], %462 {strides = array<i32>} : memref<2x48x128xf32, #tpu.memory_space<vmem>>, vector<1x32x128xf32>,
      %c8_i32_334 = arith.constant 8 : i32
      %463 = arith.muli %arg12, %c8_i32_334 : i32
      %464 = arith.addi %17, %463 : i32
      %c6_i32 = arith.constant 6 : i32
      %465 = arith.addi %464, %c6_i32 : i32
      %466 = arith.index_cast %465 : i32 to index
      %467 = memref.load %arg2[%466] : memref<64xf32, #tpu.memory_space<smem>>
      %c8_i32_335 = arith.constant 8 : i32
      %468 = arith.addi %c8_i32_335, %1 : i32
      %c1_336 = arith.constant 1 : index
      %469 = arith.index_cast %468 : i32 to index
      %c0_337 = arith.constant 0 : index
      %470 = vector.load %arg10[%c1_336, %469, %c0_337] : memref<2x48x128xf32, #tpu.memory_space<vmem>>, vector<1x1x128xf32>
      %471 = vector.shape_cast %470 : vector<1x1x128xf32> to vector<1x128xf32>
      %472 = vector.broadcast %467 : f32 to vector<1x128xf32>
      %473 = arith.mulf %13, %472 : vector<1x128xf32>
      %474 = arith.addf %471, %473 : vector<1x128xf32>
      %c8_i32_338 = arith.constant 8 : i32
      %475 = arith.addi %c8_i32_338, %1 : i32
      %c1_339 = arith.constant 1 : index
      %476 = arith.index_cast %475 : i32 to index
      %c0_340 = arith.constant 0 : index
      %477 = vector.load %arg10[%c1_339, %476, %c0_340] : memref<2x48x128xf32, #tpu.memory_space<vmem>>, vector<1x1x128xf32>
      %478 = vector.shape_cast %477 : vector<1x1x128xf32> to vector<1x128xf32>
      %479 = vector.shape_cast %474 : vector<1x128xf32> to vector<1x1x128xf32>
      tpu.vector_store %arg10[%c1_339, %476, %c0_340], %479 {strides = array<i32>} : memref<2x48x128xf32, #tpu.memory_space<vmem>>, vector<1x1x128xf32>,
      %c8_i32_341 = arith.constant 8 : i32
      %480 = arith.addi %c8_i32_341, %5 : i32
      %c1_342 = arith.constant 1 : index
      %481 = arith.index_cast %480 : i32 to index
      %c0_343 = arith.constant 0 : index
      %482 = vector.load %arg10[%c1_342, %481, %c0_343] : memref<2x48x128xf32, #tpu.memory_space<vmem>>, vector<1x1x128xf32>
      %483 = vector.shape_cast %482 : vector<1x1x128xf32> to vector<1x128xf32>
      %c8_i32_344 = arith.constant 8 : i32
      %484 = arith.muli %arg12, %c8_i32_344 : i32
      %c6_i32_345 = arith.constant 6 : i32
      %485 = arith.addi %484, %c6_i32_345 : i32
      %486 = arith.index_cast %485 : i32 to index
      %c0_346 = arith.constant 0 : index
      %487 = vector.load %arg11[%486, %c0_346] : memref<64x128xf32, #tpu.memory_space<vmem>>, vector<1x128xf32>
      tpu.vector_store %arg11[%486, %c0_346], %483 {strides = array<i32>} : memref<64x128xf32, #tpu.memory_space<vmem>>, vector<1x128xf32>,
      %c1_347 = arith.constant 1 : index
      %c8_348 = arith.constant 8 : index
      %c0_349 = arith.constant 0 : index
      %488 = vector.load %arg10[%c1_347, %c8_348, %c0_349] : memref<2x48x128xf32, #tpu.memory_space<vmem>>, vector<1x32x128xf32>
      %489 = vector.shape_cast %488 : vector<1x32x128xf32> to vector<32x128xf32>
      %c0_350 = arith.constant 0 : index
      %c8_351 = arith.constant 8 : index
      %c0_352 = arith.constant 0 : index
      %490 = vector.load %arg10[%c0_350, %c8_351, %c0_352] : memref<2x48x128xf32, #tpu.memory_space<vmem>>, vector<1x32x128xf32>
      %491 = vector.shape_cast %490 : vector<1x32x128xf32> to vector<32x128xf32>
      %c1_353 = arith.constant 1 : index
      %c7_354 = arith.constant 7 : index
      %c0_355 = arith.constant 0 : index
      %492 = vector.load %arg10[%c1_353, %c7_354, %c0_355] : memref<2x48x128xf32, #tpu.memory_space<vmem>>, vector<1x32x128xf32>
      %493 = vector.shape_cast %492 : vector<1x32x128xf32> to vector<32x128xf32>
      %c1_356 = arith.constant 1 : index
      %c9_357 = arith.constant 9 : index
      %c0_358 = arith.constant 0 : index
      %494 = vector.load %arg10[%c1_356, %c9_357, %c0_358] : memref<2x48x128xf32, #tpu.memory_space<vmem>>, vector<1x32x128xf32>
      %495 = vector.shape_cast %494 : vector<1x32x128xf32> to vector<32x128xf32>
      %496 = arith.addf %493, %495 : vector<32x128xf32>
      %c1_i32_359 = arith.constant 1 : i32
      %497 = tpu.dynamic_rotate %489 by %c1_i32_359 dim 1 : vector<32x128xf32>, i32 -> vector<32x128xf32>
      %498 = arith.addf %496, %497 : vector<32x128xf32>
      %c127_i32_360 = arith.constant 127 : i32
      %499 = tpu.dynamic_rotate %489 by %c127_i32_360 dim 1 : vector<32x128xf32>, i32 -> vector<32x128xf32>
      %500 = arith.addf %498, %499 : vector<32x128xf32>
      %cst_361 = arith.constant 1.33333337 : f32
      %501 = vector.broadcast %cst_361 : f32 to vector<32x128xf32>
      %502 = arith.mulf %501, %500 : vector<32x128xf32>
      %c1_362 = arith.constant 1 : index
      %c6_363 = arith.constant 6 : index
      %c0_364 = arith.constant 0 : index
      %503 = vector.load %arg10[%c1_362, %c6_363, %c0_364] : memref<2x48x128xf32, #tpu.memory_space<vmem>>, vector<1x32x128xf32>
      %504 = vector.shape_cast %503 : vector<1x32x128xf32> to vector<32x128xf32>
      %c1_365 = arith.constant 1 : index
      %c10_366 = arith.constant 10 : index
      %c0_367 = arith.constant 0 : index
      %505 = vector.load %arg10[%c1_365, %c10_366, %c0_367] : memref<2x48x128xf32, #tpu.memory_space<vmem>>, vector<1x32x128xf32>
      %506 = vector.shape_cast %505 : vector<1x32x128xf32> to vector<32x128xf32>
      %507 = arith.addf %504, %506 : vector<32x128xf32>
      %c2_i32_368 = arith.constant 2 : i32
      %508 = tpu.dynamic_rotate %489 by %c2_i32_368 dim 1 : vector<32x128xf32>, i32 -> vector<32x128xf32>
      %509 = arith.addf %507, %508 : vector<32x128xf32>
      %c126_i32_369 = arith.constant 126 : i32
      %510 = tpu.dynamic_rotate %489 by %c126_i32_369 dim 1 : vector<32x128xf32>, i32 -> vector<32x128xf32>
      %511 = arith.addf %509, %510 : vector<32x128xf32>
      %cst_370 = arith.constant -0.0833333358 : f32
      %512 = vector.broadcast %cst_370 : f32 to vector<32x128xf32>
      %513 = arith.mulf %512, %511 : vector<32x128xf32>
      %514 = arith.addf %502, %513 : vector<32x128xf32>
      %c0_371 = arith.constant 0 : index
      %c0_372 = arith.constant 0 : index
      %c0_373 = arith.constant 0 : index
      %515 = vector.load %arg7[%c0_371, %c0_372, %c0_373] : memref<3x32x128xf32, #tpu.memory_space<vmem>>, vector<1x32x128xf32>
      %516 = vector.shape_cast %515 : vector<1x32x128xf32> to vector<32x128xf32>
      %517 = arith.mulf %516, %489 : vector<32x128xf32>
      %c1_374 = arith.constant 1 : index
      %c0_375 = arith.constant 0 : index
      %c0_376 = arith.constant 0 : index
      %518 = vector.load %arg7[%c1_374, %c0_375, %c0_376] : memref<3x32x128xf32, #tpu.memory_space<vmem>>, vector<1x32x128xf32>
      %519 = vector.shape_cast %518 : vector<1x32x128xf32> to vector<32x128xf32>
      %520 = arith.mulf %519, %491 : vector<32x128xf32>
      %521 = arith.subf %517, %520 : vector<32x128xf32>
      %c2_377 = arith.constant 2 : index
      %c0_378 = arith.constant 0 : index
      %c0_379 = arith.constant 0 : index
      %522 = vector.load %arg7[%c2_377, %c0_378, %c0_379] : memref<3x32x128xf32, #tpu.memory_space<vmem>>, vector<1x32x128xf32>
      %523 = vector.shape_cast %522 : vector<1x32x128xf32> to vector<32x128xf32>
      %524 = arith.mulf %523, %514 : vector<32x128xf32>
      %525 = arith.addf %521, %524 : vector<32x128xf32>
      %c0_380 = arith.constant 0 : index
      %c8_381 = arith.constant 8 : index
      %c0_382 = arith.constant 0 : index
      %526 = vector.load %arg10[%c0_380, %c8_381, %c0_382] : memref<2x48x128xf32, #tpu.memory_space<vmem>>, vector<1x32x128xf32>
      %527 = vector.shape_cast %526 : vector<1x32x128xf32> to vector<32x128xf32>
      %528 = vector.shape_cast %525 : vector<32x128xf32> to vector<1x32x128xf32>
      tpu.vector_store %arg10[%c0_380, %c8_381, %c0_382], %528 {strides = array<i32>} : memref<2x48x128xf32, #tpu.memory_space<vmem>>, vector<1x32x128xf32>,
      %c8_i32_383 = arith.constant 8 : i32
      %529 = arith.muli %arg12, %c8_i32_383 : i32
      %530 = arith.addi %17, %529 : i32
      %c7_i32 = arith.constant 7 : i32
      %531 = arith.addi %530, %c7_i32 : i32
      %532 = arith.index_cast %531 : i32 to index
      %533 = memref.load %arg2[%532] : memref<64xf32, #tpu.memory_space<smem>>
      %c8_i32_384 = arith.constant 8 : i32
      %534 = arith.addi %c8_i32_384, %1 : i32
      %c0_385 = arith.constant 0 : index
      %535 = arith.index_cast %534 : i32 to index
      %c0_386 = arith.constant 0 : index
      %536 = vector.load %arg10[%c0_385, %535, %c0_386] : memref<2x48x128xf32, #tpu.memory_space<vmem>>, vector<1x1x128xf32>
      %537 = vector.shape_cast %536 : vector<1x1x128xf32> to vector<1x128xf32>
      %538 = vector.broadcast %533 : f32 to vector<1x128xf32>
      %539 = arith.mulf %13, %538 : vector<1x128xf32>
      %540 = arith.addf %537, %539 : vector<1x128xf32>
      %c8_i32_387 = arith.constant 8 : i32
      %541 = arith.addi %c8_i32_387, %1 : i32
      %c0_388 = arith.constant 0 : index
      %542 = arith.index_cast %541 : i32 to index
      %c0_389 = arith.constant 0 : index
      %543 = vector.load %arg10[%c0_388, %542, %c0_389] : memref<2x48x128xf32, #tpu.memory_space<vmem>>, vector<1x1x128xf32>
      %544 = vector.shape_cast %543 : vector<1x1x128xf32> to vector<1x128xf32>
      %545 = vector.shape_cast %540 : vector<1x128xf32> to vector<1x1x128xf32>
      tpu.vector_store %arg10[%c0_388, %542, %c0_389], %545 {strides = array<i32>} : memref<2x48x128xf32, #tpu.memory_space<vmem>>, vector<1x1x128xf32>,
      %c8_i32_390 = arith.constant 8 : i32
      %546 = arith.addi %c8_i32_390, %5 : i32
      %c0_391 = arith.constant 0 : index
      %547 = arith.index_cast %546 : i32 to index
      %c0_392 = arith.constant 0 : index
      %548 = vector.load %arg10[%c0_391, %547, %c0_392] : memref<2x48x128xf32, #tpu.memory_space<vmem>>, vector<1x1x128xf32>
      %549 = vector.shape_cast %548 : vector<1x1x128xf32> to vector<1x128xf32>
      %c8_i32_393 = arith.constant 8 : i32
      %550 = arith.muli %arg12, %c8_i32_393 : i32
      %c7_i32_394 = arith.constant 7 : i32
      %551 = arith.addi %550, %c7_i32_394 : i32
      %552 = arith.index_cast %551 : i32 to index
      %c0_395 = arith.constant 0 : index
      %553 = vector.load %arg11[%552, %c0_395] : memref<64x128xf32, #tpu.memory_space<vmem>>, vector<1x128xf32>
      tpu.vector_store %arg11[%552, %c0_395], %549 {strides = array<i32>} : memref<64x128xf32, #tpu.memory_space<vmem>>, vector<1x128xf32>,
    }
    %c8_i32_2 = arith.constant 8 : i32
    %c0 = arith.constant 0 : index
    %c0_3 = arith.constant 0 : index
    %19 = vector.load %arg11[%c0, %c0_3] : memref<64x128xf32, #tpu.memory_space<vmem>>, vector<64x128xf32>
    %c0_4 = arith.constant 0 : index
    %c0_5 = arith.constant 0 : index
    %c0_6 = arith.constant 0 : index
    %20 = vector.load %arg8[%c0_4, %c0_5, %c0_6] : memref<1x128x128xf32, #tpu.memory_space<vmem>>, vector<1x128x128xf32>
    %21 = vector.shape_cast %20 : vector<1x128x128xf32> to vector<128x128xf32>
    %cst_7 = arith.constant dense<0.000000e+00> : vector<64x128xf32>
    %22 = tpu.matmul %19, %21, %cst_7 {dimension_numbers = #tpu.dot_dimension_numbers<[1], [0], [0], [1], [0, 0, 1, 1], [], []>} : vector<64x128xf32>, vector<128x128xf32>, vector<64x128xf32> -> vector<64x128xf32>
    %c0_8 = arith.constant 0 : index
    %c0_9 = arith.constant 0 : index
    %c0_10 = arith.constant 0 : index
    %23 = vector.load %arg9[%c0_8, %c0_9, %c0_10] : memref<1x64x128xf32, #tpu.memory_space<vmem>>, vector<1x64x128xf32>
    %24 = vector.shape_cast %23 : vector<1x64x128xf32> to vector<64x128xf32>
    %25 = vector.shape_cast %22 : vector<64x128xf32> to vector<1x64x128xf32>
    tpu.vector_store %arg9[%c0_8, %c0_9, %c0_10], %25 {strides = array<i32>} : memref<1x64x128xf32, #tpu.memory_space<vmem>>, vector<1x64x128xf32>,
    return
  }
  func.func @transform_0(%arg0: i32, %arg1: i32) -> i32 {
    %c0_i32 = arith.constant 0 : i32
    %c0_i32_0 = arith.constant 0 : i32
    return %c0_i32 : i32
  }
  func.func @transform_1(%arg0: i32, %arg1: i32) -> i32 {
    %c0_i32 = arith.constant 0 : i32
    %c0_i32_0 = arith.constant 0 : i32
    return %c0_i32 : i32
  }
  func.func @transform_2(%arg0: i32, %arg1: i32) -> i32 {
    %c0_i32 = arith.constant 0 : i32
    %c0_i32_0 = arith.constant 0 : i32
    return %c0_i32 : i32
  }
  func.func @transform_3(%arg0: i32, %arg1: i32) -> i32 {
    %c0_i32 = arith.constant 0 : i32
    %c0_i32_0 = arith.constant 0 : i32
    return %c0_i32 : i32
  }
  func.func @transform_4(%arg0: i32, %arg1: i32) -> i32 {
    %c0_i32 = arith.constant 0 : i32
    %c0_i32_0 = arith.constant 0 : i32
    return %c0_i32 : i32
  }
  func.func @transform_5(%arg0: i32, %arg1: i32) -> (i32, i32, i32) {
    %c0_i32 = arith.constant 0 : i32
    %c0_i32_0 = arith.constant 0 : i32
    %c0_i32_1 = arith.constant 0 : i32
    %c0_i32_2 = arith.constant 0 : i32
    return %c0_i32, %c0_i32_0, %c0_i32_1 : i32, i32, i32
  }
  func.func @transform_6(%arg0: i32, %arg1: i32) -> (i32, i32, i32) {
    %c0_i32 = arith.constant 0 : i32
    %c0_i32_0 = arith.constant 0 : i32
    %c0_i32_1 = arith.constant 0 : i32
    %c0_i32_2 = arith.constant 0 : i32
    return %c0_i32, %c0_i32_0, %c0_i32_1 : i32, i32, i32
  }
  func.func @transform_7(%arg0: i32, %arg1: i32) -> (i32, i32, i32) {
    %c0_i32 = arith.constant 0 : i32
    %c0_i32_0 = arith.constant 0 : i32
    return %arg0, %arg1, %c0_i32 : i32, i32, i32
  }
}

</mosaic_0001>

<bundles_post_ra>
// kernel: tpu_custom_call.1
= control target key start
LH: loop header
LB: loop body
LE: loop exit
PB: predicated region body
PF: predicated region fallthrough
CT: control target
= control target key end

     0   :  { %s3262_s0 = inlined_call_operand.hbm [shape: f32[64], index: 0, kind: input, shape index: {}]   ;;  %s3263_s1 = inlined_call_operand.vmem [shape: s32[2], index: 1, kind: input, shape index: {}]   ;;  %s3264_s2 = inlined_call_operand.vmem [shape: s32[2], index: 2, kind: input, shape index: {}]   ;;  %s3265_s3 = inlined_call_operand.vmem [shape: s32[2], index: 3, kind: input, shape index: {}]   ;;  %s3266_s4 = inlined_call_operand.vmem [shape: f32[2], index: 4, kind: input, shape index: {}]   ;;  %s3267_s5 = inlined_call_operand.hbm [shape: f32[3,32,128], index: 5, kind: input, shape index: {}]   ;;  %s3268_s6 = inlined_call_operand.hbm [shape: f32[1,128,128], index: 6, kind: input, shape index: {}]   ;;  %s3269_s7 = inlined_call_operand.hbm [shape: f32[2,64,128], index: 7, kind: output, shape index: {}]  }
   0x1   :  { %3274 = sst [smem:[#allocation26_spill]] %s3262_s0 }
   0x2   :  { %3275 = sst [smem:[#allocation27_spill]] %s3263_s1 }
   0x3   :  { %3276 = sst [smem:[#allocation28_spill]] %s3264_s2 }
   0x4   :  { %3277 = sst [smem:[#allocation29_spill]] %s3265_s3 }
   0x5   :  { %3278 = sst [smem:[#allocation30_spill]] %s3266_s4 }
   0x6   :  { %12 = vsyncpa [#allocation7], 0 }
   0x7   :  { %13 = vsyncpa [#allocation8], 0 }
   0x8   :  { %14 = vsyncpa [#allocation11], 0 }
   0x9   :  { %15 = vsyncpa [#allocation14], 0 }
   0xa   :  { %16 = vsyncpa [#allocation5], 0 }
   0xb   :  { %17 = vsyncpa [#allocation17], 0 }
   0xc   :  { %18 = vsyncpa [#allocation6], 0 }
   0xd   :  { %20 = vsyncpa [#allocation6 + $0x1], 0  ;;  %s2467_s24 = smov 0   ;;  %s2469_s25 = smov 0  }
   0xe   :  { %s2471_s26 = smov 0   ;;  %s2473_s27 = smov 0  }
   0xf   :  { %s2475_s28 = smov 0   ;;  %s2477_s29 = smov 0  }
  0x10 LB: > { %s1846_s30 = sadd.s32 4294967295, %s2404_s29   ;;  %s1847_s8 = sadd.s32 4294967294, %s2404_s29   ;;  %s2404_s29 = sphi %s2477_s29, %s26_s29   ;;  %s2400_s28 = sphi %s2475_s28, %s3298_s28   ;;  %s2396_s27 = sphi %s2473_s27, %s3297_s27   ;;  %s2392_s26 = sphi %s2471_s26, %s3296_s26   ;;  %s2388_s25 = sphi %s2469_s25, %s3295_s25   ;;  %s2384_s24 = sphi %s2467_s24, %s3294_s24  }
  0x11   : > { %s38_s9 = sadd.s32 1, %s2400_s28  ;;  %s194_s10 = sadd.s32 1, %s2392_s26 }
  0x12   : > { %p40_p0 = scmp.ge.s32.totalorder %s38_s9, 2  ;;  %p204_p1 = scmp.ne.s32.totalorder %s2392_s26, %s2388_s25 }
  0x13   : > { %p205_p2 = scmp.eq.s32.totalorder %s1846_s30, 1  ;;  %p210_p3 = scmp.ne.s32.totalorder %s2388_s25, %s2384_s24 }
  0x14   : > { %s3300_s9 = smov (%p40_p0, %s38_s9), 0  ;;  %p211_p5 = scmp.eq.s32.totalorder %s1847_s8, 1 }
  0x15   : > { %p2507_p4 = por %p205_p2, %p204_p1  ;;  %s189_s12 = ssub.s32 %s2400_s28, %s3300_s9 }
  0x16   : > { %p1848_p6 = scmp.ge.s32.totalorder %s2404_s29, 1  ;;  %p192_p7 = scmp.eq.s32.totalorder %s189_s12, 0 }
  0x17   : > { %s3279_s11 = scalar_select %p2507_p4, 1, 0 }
  0x18   : > { %p2514_p8 = por %p211_p5, %p210_p3  ;;  %p218_p9 = scmp.lt.s32.totalorder %s2404_s29, 3 }
  0x19   : > { %s2520_s14 = scalar_select %p192_p7, %s2392_s26, %s194_s10  }
  0x1a   : > { %s3280_s13 = scalar_select %p2514_p8, 1, 0 }
  0x1b   : > { %p2522_p10 = pnand %p1848_p6, %p218_p9  ;;  %p2526_p11 = scmp.eq.s32.totalorder %s1846_s30, 0 }
  0x1c   : > { %s3283_s2 = sld [smem:[#allocation28_spill]]  ;;  %s3285_s1 = sld [smem:[#allocation27_spill]] }
  0x1d   : > { %s3281_s15 = scalar_select %p2522_p10, 1, 0 }
  0x1e   : > { %s3282_s16 = scalar_select %p2526_p11, 1, 0 }
  0x1f   : > { %p2056_p12 = pneg %p2522_p10 }
  0x21   : > { %p2537_p13 = pnand %p2526_p11, %p2056_p12 }
  0x22   : > { %s251_s19 = sshll.u32 %s3283_s2, 4  ;;  %s240_s23 = sshll.u32 %s3285_s1, 4  ;;  %s252_s19 = int_to_ptr.vmem [resolvable:$true] %s251_s19  ;;  %s2544_s23 = int_to_ptr.vmem [resolvable:$true] %s240_s23 }
  0x23   : > { %s2169_s30 = scalar_lea.vmem %s252_s19, 16  ;;  %p2548_p1 = pneg %p2537_p13 }
  0x24   : > { %p2170_p0 = scmp.ne.s32.totalorder %s252_s19, %s2169_s30  ;;  %p2177_p5 = scmp.lt.s32.totalorder %s252_s19, %s252_s19 }
  0x25   : > { %p2178_p6 = scmp.lt.s32.totalorder %s2169_s30, %s2169_s30 }
  0x26   : > { %p2172_p2 = pnand %p2548_p1, %p2170_p0 }
  0x27   : > { %p2179_p7 = por %p2178_p6, %p2177_p5 }
  0x28   : > { %p2173_p3 = pneg %p2172_p2 }
  0x2a   : > { %p2180_p9 = pnand %p2179_p7, %p2173_p3 }
  0x2c   : > { %2183 = shalt.err (!%p2180_p9)
}
  0x2d   : > { %s2410_s10 = smov [#allocation10]   ;;  %s3287_s0 = sld [smem:[#allocation26_spill]] }
  0x2e   : > { %2065 = dma.vmem_to_smem (!%p2537_p13), %s252_s19, 16, %s2410_s10, [#allocation11]  }
  0x33   : > { %s2184_s18 = scalar_lea.hbm %s3287_s0, 16 }
  0x34   : > { %p2185_p12 = scmp.ne.s32.totalorder %s3287_s0, %s2184_s18  ;;  %p2191_p3 = scmp.lt.u32.totalorder %s2184_s18, %s3287_s0 }
  0x36   : > { %p2187_p0 = pnand %p2185_p12, %p2548_p1 }
  0x38   : > { %p2188_p2 = pneg %p2187_p0 }
  0x3a   : > { %p2193_p5 = pnand %p2191_p3, %p2188_p2 }
  0x3c   : > { %2196 = shalt.err (!%p2193_p5)
}
  0x3d   : > { %s2411_s2 = smov [#allocation4]   ;;  %s2197_s12 = scalar_lea.vmem %s2544_s23, 16 }
  0x3e   : > { %2059 = dma.hbm_to_smem (!%p2537_p13), %s3287_s0, 16, %s2411_s2, [#allocation7]  }
  0x3f   : > { %p2198_p6 = scmp.ne.s32.totalorder %s2544_s23, %s2197_s12  ;;  %p2205_p12 = scmp.lt.s32.totalorder %s2544_s23, %s2544_s23 }
  0x40   : > { %p2206_p0 = scmp.lt.s32.totalorder %s2197_s12, %s2197_s12 }
  0x41   : > { %p2200_p7 = pnand %p2198_p6, %p2548_p1 }
  0x42   : > { %p2207_p2 = por %p2206_p0, %p2205_p12 }
  0x43   : > { %p2201_p9 = pneg %p2200_p7 }
  0x45   : > { %p2208_p3 = pnand %p2207_p2, %p2201_p9 }
  0x47   : > { %2211 = shalt.err (!%p2208_p3)
}
  0x48   : > { %s2412_s1 = smov [#allocation9]   ;;  %s3288_s3 = sld [smem:[#allocation29_spill]] }
  0x49   : > { %2062 = dma.vmem_to_smem (!%p2537_p13), %s2544_s23, 16, %s2412_s1, [#allocation8]  }
  0x4a   : > { %s3289_s4 = sld [smem:[#allocation30_spill]] }
  0x4e   : > { %s262_s2 = sshll.u32 %s3288_s3, 4  ;;  %s263_s2 = int_to_ptr.vmem [resolvable:$true] %s262_s2 }
  0x4f   : > { %s2212_s19 = scalar_lea.vmem %s263_s2, 16  ;;  %p2220_p9 = scmp.lt.s32.totalorder %s263_s2, %s263_s2 }
  0x50   : > { %s273_s30 = sshll.u32 %s3289_s4, 4  ;;  %p2213_p5 = scmp.ne.s32.totalorder %s263_s2, %s2212_s19  ;;  %s274_s30 = int_to_ptr.vmem [resolvable:$true] %s273_s30 }
  0x51   : > { %p2221_p12 = scmp.lt.s32.totalorder %s2212_s19, %s2212_s19 }
  0x52   : > { %p2215_p6 = pnand %p2213_p5, %p2548_p1 }
  0x53   : > { %p2222_p0 = por %p2221_p12, %p2220_p9 }
  0x54   : > { %p2216_p7 = pneg %p2215_p6 }
  0x56   : > { %p2223_p2 = pnand %p2222_p0, %p2216_p7 }
  0x58   : > { %2226 = shalt.err (!%p2223_p2)
}
  0x59   : > { %s2413_s23 = smov [#allocation12]   ;;  %s2227_s10 = scalar_lea.vmem %s274_s30, 16 }
  0x5a   : > { %2068 = dma.vmem_to_smem (!%p2537_p13), %s263_s2, 16, %s2413_s23, [#allocation11]  }
  0x5b   : > { %p2228_p3 = scmp.ne.s32.totalorder %s274_s30, %s2227_s10  ;;  %p2235_p11 = scmp.lt.s32.totalorder %s274_s30, %s274_s30 }
  0x5c   : > { %p2236_p10 = scmp.lt.s32.totalorder %s2227_s10, %s2227_s10 }
  0x5d   : > { %p2230_p8 = pnand %p2228_p3, %p2548_p1 }
  0x5e   : > { %p2237_p5 = por %p2236_p10, %p2235_p11 }
  0x5f   : > { %p2231_p4 = pneg %p2230_p8 }
  0x61   : > { %p2238_p6 = pnand %p2237_p5, %p2231_p4 }
  0x63   : > { %2241 = shalt.err (!%p2238_p6)
}
  0x64   : > { %s2414_s12 = smov [#allocation13]   ;;  %s2415_s1 = smov [#allocation15]  }
  0x65   : > { %2071 = dma.vmem_to_smem (!%p2537_p13), %s274_s30, 16, %s2414_s12, [#allocation14]  }
  0x66   : > { %s283_s17 = sshll.u32 %s2415_s1, 4  ;;  %s2242_s21 = scalar_lea.hbm %s3267_s5, 1536  ;;  %s284_s17 = int_to_ptr.vmem [resolvable:$true] %s283_s17 }
  0x67   : > { %p2243_p8 = scmp.ne.s32.totalorder %s3267_s5, %s2242_s21  ;;  %p2249_p11 = scmp.lt.u32.totalorder %s2242_s21, %s3267_s5 }
  0x69   : > { %p2245_p10 = pnand %p2243_p8, %p2548_p1 }
  0x6b   : > { %p2246_p4 = pneg %p2245_p10 }
  0x6d   : > { %p2251_p7 = pnand %p2249_p11, %p2246_p4 }
  0x6f   : > { %2254 = shalt.err (!%p2251_p7)
}
  0x70   : > { %s2255_s30 = scalar_lea.vmem %s284_s17, 1536  ;;  %p2263_p2 = scmp.lt.s32.totalorder %s284_s17, %s284_s17 }
  0x71   : > { %p2256_p9 = scmp.ne.s32.totalorder %s284_s17, %s2255_s30  ;;  %p2264_p3 = scmp.lt.s32.totalorder %s2255_s30, %s2255_s30 }
  0x73   : > { %p2258_p12 = pnand %p2256_p9, %p2548_p1  ;;  %p2265_p5 = por %p2264_p3, %p2263_p2 }
  0x75   : > { %p2259_p0 = pneg %p2258_p12 }
  0x77   : > { %p2266_p6 = pnand %p2265_p5, %p2259_p0 }
  0x79   : > { %2269 = shalt.err (!%p2266_p6)
}
  0x7a   : > { %s2416_s12 = smov 128   ;;  %s2417_s1 = smov 8  }
  0x7b   : > { %2074 = dma.hbm_to_vmem [thread:$0]  (!%p2537_p13), %s3267_s5, 1536, %s284_s17, [#allocation5], %s2416_s12, %s2416_s12, %s2417_s1  }
  0x7c   : > { %s2418_s21 = smov [#allocation16]   ;;  %s2270_s10 = scalar_lea.hbm %s3268_s6, 2048 }
  0x7d   : > { %s296_s22 = sshll.u32 %s2418_s21, 4  ;;  %p2271_p8 = scmp.ne.s32.totalorder %s3268_s6, %s2270_s10  ;;  %s297_s22 = int_to_ptr.vmem [resolvable:$true] %s296_s22 }
  0x7e   : > { %p2277_p11 = scmp.lt.u32.totalorder %s2270_s10, %s3268_s6 }
  0x7f   : > { %p2273_p10 = pnand %p2271_p8, %p2548_p1 }
  0x81   : > { %p2274_p4 = pneg %p2273_p10 }
  0x83   : > { %p2279_p7 = pnand %p2277_p11, %p2274_p4 }
  0x85   : > { %2282 = shalt.err (!%p2279_p7)
}
  0x86   : > { %s2283_s17 = scalar_lea.vmem %s297_s22, 2048  ;;  %p2291_p2 = scmp.lt.s32.totalorder %s297_s22, %s297_s22 }
  0x87   : > { %p2284_p9 = scmp.ne.s32.totalorder %s297_s22, %s2283_s17  ;;  %p2292_p3 = scmp.lt.s32.totalorder %s2283_s17, %s2283_s17 }
  0x89   : > { %p2286_p12 = pnand %p2284_p9, %p2548_p1  ;;  %p2293_p5 = por %p2292_p3, %p2291_p2 }
  0x8b   : > { %p2287_p0 = pneg %p2286_p12 }
  0x8d   : > { %p2294_p6 = pnand %p2293_p5, %p2287_p0 }
  0x8f   : > { %2297 = shalt.err (!%p2294_p6)
}
  0x90   : > { %2077 = dma.hbm_to_vmem [thread:$0]  (!%p2537_p13), %s3268_s6, 2048, %s297_s22, [#allocation17], %s2416_s12, %s2416_s12, %s2417_s1  }
  0x91   : > { %p3290_p8 = scmp.ne.s32.totalorder %s3281_s15, 0 }
  0x92   : > { %p3291_p10 = scmp.ne.s32.totalorder (!%p3290_p8), %s3282_s16, 0 }
  0x93   : > { %312 = sbr.rel (%p3290_p8) target bundleno = 1796 (0x704), region = 48 }
  0x9a   : > { %2355 = dma.done.wait (%p3291_p10), [#allocation7], 16  }
  0x9b   : > { %2357 = vsyncadd (%p3291_p10), [#allocation7], 4294967280 }
  0x9c   : > { %2359 = dma.done.wait (%p3291_p10), [#allocation8], 16  }
  0x9d   : > { %2361 = vsyncadd (%p3291_p10), [#allocation8], 4294967280 }
  0x9e   : > { %2363 = dma.done.wait (%p3291_p10), [#allocation11], 32  }
  0x9f   : > { %2365 = vsyncadd (%p3291_p10), [#allocation11], 4294967264 }
  0xa0   : > { %2367 = dma.done.wait (%p3291_p10), [#allocation14], 16  }
  0xa1   : > { %2369 = vsyncadd (%p3291_p10), [#allocation14], 4294967280 }
  0xa2   : > { %2371 = dma.done.wait (%p3291_p10), [#allocation5], 1536  }
  0xa3   : > { %2373 = vsyncadd (%p3291_p10), [#allocation5], 4294965760 }
  0xa4   : > { %2375 = dma.done.wait (%p3291_p10), [#allocation17], 2048  }
  0xa5   : > { %2377 = vsyncadd (%p3291_p10), [#allocation17], 4294965248 }
  0xa6   : > { %342 = sfence }
  0xa7   : > { %s361_s3 = sand.u32 1, %s2388_s25   ;;  %s2659_s4 = sld [smem:[#allocation9 + %s2396_s27]]  ;;  %v368_v0 = vlaneseq  ;;  %v2419_v1 = vmov 0.0  }
  0xa8   : > { %s1864_s15 = sshll.u32 %s361_s3, 6  ;;  %s366_s20 = sld [smem:[#allocation10 + %s2396_s27]]  ;;  %379 = vst [vmem:[#allocation2] sm:$0xff] %v2419_v1  ;;  %380 = vst [vmem:[#allocation2 + $0x8] sm:$0xff] %v2419_v1 }
  0xa9   : > { %381 = vst [vmem:[#allocation2 + $0x10] sm:$0xff] %v2419_v1  ;;  %382 = vst [vmem:[#allocation2 + $0x18] sm:$0xff] %v2419_v1  ;;  %s2665_s16 = sld [smem:[#allocation12 + %s2396_s27]]  ;;  %v369_v2 = vand.u32 127, %v368_v0  ;;  %s2670_s12 = scalar_lea.vmem [#allocation18], %s1864_s15 }
  0xaa   : > { %383 = vst [vmem:[#allocation2 + $0x20] sm:$0xff] %v2419_v1  ;;  %384 = vst [vmem:[#allocation2 + $0x28] sm:$0xff] %v2419_v1  ;;  %s372_s8 = sld [smem:[#allocation13 + %s2396_s27]]  ;;  %s2672_s1 = smov 0  }
  0xab   : > { %385 = vst [vmem:[#allocation2 + $0x30] sm:$0xff] %v2419_v1  ;;  %386 = vst [vmem:[#allocation2 + $0x38] sm:$0xff] %v2419_v1 }
  0xac   : > { %387 = vst [vmem:[#allocation2 + $0x40] sm:$0xff] %v2419_v1  ;;  %388 = vst [vmem:[#allocation2 + $0x48] sm:$0xff] %v2419_v1 }
  0xad   : > { %389 = vst [vmem:[#allocation2 + $0x50] sm:$0xff] %v2419_v1  ;;  %390 = vst [vmem:[#allocation2 + $0x58] sm:$0xff] %v2419_v1 }
  0xae   : > { %v370_v3 = vstv %s366_s20 }
  0xaf   : > { %vm371_vm0 = vcmp.eq.s32.totalorder %v369_v2, %v370_v3 }
  0xb0   : > { %v373_v4 = vstv %s372_s8 }
  0xb1   : > { %v2668_v5 = vsel %vm371_vm0, %v373_v4, 0.0 }
  0xb2 LB: >> { %v2677_v6 = vld [vmem:[#allocation2 + $0x18] sm:$0xff]  ;;  %v2679_v7 = vld [vmem:[#allocation2 + $0x8] sm:$0xff]  ;;  %s2420_s2 = smov 1   ;;  %v2685_v8 = vld [vmem:[#allocation2 + $0x20] sm:$0xff]  ;;  %s2421_s21 = smov 2   ;;  %s2408_s1 = sphi %s2672_s1, %s397_s1  }
  0xb3   : >> { %423 = vrot.lane.b32.xlu1 %v2677_v6, %s2420_s2  ;;  %419 = vrot.lane.b32.xlu0 %v2679_v7, %s2420_s2  ;;  %v399_v9 = vld [vmem:[#allocation2 + $0x10] sm:$0xff]  ;;  %s2422_s22 = smov 127   ;;  %s2423_s19 = smov 126   ;;  %v407_v20 = vld [vmem:[#allocation2 + $0x7] sm:$0xff]  ;;  %v413_v23 = vld [vmem:[#allocation2 + $0x19] sm:$0xff] }
  0xb4   : >> { %v408_v18 = vld [vmem:[#allocation2 + $0xf] sm:$0xff]  ;;  %v409_v22 = vld [vmem:[#allocation2 + $0x17] sm:$0xff]  ;;  %v410_v24 = vld [vmem:[#allocation2 + $0x1f] sm:$0xff]  ;;  %s2746_s23 = sshll.u32 %s2408_s1, 3  ;;  %s2759_s30 = scalar_lea.vmem [#allocation2], %s2659_s4 }
  0xb5   : >> { %v412_v19 = vld [vmem:[#allocation2 + $0x11] sm:$0xff]  ;;  %v411_v21 = vld [vmem:[#allocation2 + $0x9] sm:$0xff]  ;;  %v414_v25 = vld [vmem:[#allocation2 + $0x21] sm:$0xff]  ;;  %v417_v44 = vadd.f32 %v413_v23, %v409_v22  ;;  %s531_s10 = sld [smem:[#allocation4 + %s2746_s23]]  ;;  %s2764_s17 = scalar_lea.vmem [#allocation2], %s2665_s16 }
  0xb6   : >> { %v448_v26 = vld [vmem:[#allocation2 + $0xe] sm:$0xff]  ;;  %v416_v27 = vadd.f32 %v412_v19, %v408_v18  ;;  %v447_v29 = vld [vmem:[#allocation2 + $0x6] sm:$0xff]  ;;  %v415_v33 = vadd.f32 %v411_v21, %v407_v20  ;;  %v403_v37 = vld [vmem:[#allocation2 + $0x38] sm:$0xff]  ;;  %v418_v45 = vadd.f32 %v414_v25, %v410_v24  ;;  %s2768_s0 = scalar_lea.vmem [#allocation3], %s2746_s23  ;;  %s674_s18 = sadd.s32 1, %s2746_s23 }
  0xb7   : >> { %425 = vrot.lane.b32.xlu1 %v2685_v8, %s2420_s2  ;;  %421 = vrot.lane.b32.xlu0 %v399_v9, %s2420_s2  ;;  %v452_v28 = vld [vmem:[#allocation2 + $0x12] sm:$0xff]  ;;  %v451_v30 = vld [vmem:[#allocation2 + $0xa] sm:$0xff]  ;;  %v404_v34 = vld [vmem:[#allocation2 + $0x40] sm:$0xff]  ;;  %s675_s15 = sld [smem:[#allocation4 + %s674_s18]]  ;;  %s815_s20 = sadd.s32 2, %s2746_s23 }
  0xb8   : >> { %v2713_v35 = vld [vmem:[#allocation15 + $0x8] sm:$0xff]  ;;  %v2717_v38 = vld [vmem:[#allocation15] sm:$0xff]  ;;  %v456_v40 = vadd.f32 %v452_v28, %v448_v26  ;;  %v455_v41 = vadd.f32 %v451_v30, %v447_v29  ;;  %v449_v47 = vld [vmem:[#allocation2 + $0x16] sm:$0xff]  ;;  %s816_s8 = sld [smem:[#allocation4 + %s815_s20]]  ;;  %s397_s1 = sadd.s32 1, %s2408_s1  }
  0xb9   : >> { %v2715_v36 = vld [vmem:[#allocation15 + $0x28] sm:$0xff]  ;;  %v2719_v39 = vld [vmem:[#allocation15 + $0x20] sm:$0xff]  ;;  %v496_v53 = vmul.f32 %v2713_v35, %v399_v9  ;;  %v495_v55 = vmul.f32 %v2717_v38, %v2679_v7  ;;  %v406_v2 = vld [vmem:[#allocation2 + $0x50] sm:$0xff]  ;;  %p394_p13 = scmp.ge.s32.totalorder %s397_s1, 8  }
  0xba   : >> { %v450_v42 = vld [vmem:[#allocation2 + $0x1e] sm:$0xff]  ;;  %v505_v51 = vmul.f32 %v2715_v36, %v404_v34  ;;  %v504_v54 = vmul.f32 %v2719_v39, %v403_v37  ;;  %v2730_v19 = vld [vmem:[#allocation15 + $0x10] sm:$0xff]  ;;  %v2735_v25 = vld [vmem:[#allocation15 + $0x48] sm:$0xff]  ;;  %s1909_s4 = sshll.u32 (%p394_p13), %s2396_s27, 10  ;;  %s1674_s16 = sshll.u32 (%p394_p13), %s2670_s12, 4  ;;  %s3208_s16 = int_to_ptr.vmem [resolvable:$true] %s1674_s16 }
  0xbb   : >> { %461 = vrot.lane.b32.xlu1 %v399_v9, %s2421_s21  ;;  %459 = vrot.lane.b32.xlu0 %v2679_v7, %s2421_s21  ;;  %v454_v43 = vld [vmem:[#allocation2 + $0x22] sm:$0xff]  ;;  %v453_v48 = vld [vmem:[#allocation2 + $0x1a] sm:$0xff]  ;;  %s3216_s27 = scalar_lea.sflag (%p394_p13), [#allocation6], %s361_s3  ;;  %p3292_p4 = scmp.ne.s32.totalorder (%p394_p13), %s3279_s11, 0 }
  0xbc   : >> { %v458_v56 = vadd.f32 %v454_v43, %v450_v42  ;;  %v457_v60 = vadd.f32 %v453_v48, %v449_v47  ;;  %v2726_v3 = vld [vmem:[#allocation15 + $0x18] sm:$0xff]  ;;  %v508_v18 = vsub.f32 %v495_v55, %v504_v54  ;;  %v2737_v26 = vld [vmem:[#allocation15 + $0x40] sm:$0xff]  ;;  %v536_v55 = vstv %s531_s10  ;;  %s954_s10 = sadd.s32 3, %s2746_s23 }
  0xbd   : >> { %v2728_v4 = vld [vmem:[#allocation15 + $0x38] sm:$0xff]  ;;  %s955_s18 = sld [smem:[#allocation4 + %s954_s10]] }
  0xbe   : >> { %v507_v28 = vmul.f32 %v2728_v4, %v406_v2 }
  0xbf   : >> { %465 = vrot.lane.b32.xlu1 %v2685_v8, %s2421_s21  ;;  %463 = vrot.lane.b32.xlu0 %v2677_v6, %s2421_s21 }
  0xc3   : >> { %433 = vrot.lane.b32.xlu1 %v399_v9, %s2422_s22  ;;  %431 = vrot.lane.b32.xlu0 %v2679_v7, %s2422_s22 }
  0xc7   : >> { %437 = vrot.lane.b32.xlu1 %v2685_v8, %s2422_s22  ;;  %435 = vrot.lane.b32.xlu0 %v2677_v6, %s2422_s22 }
  0xcb   : >> { %473 = vrot.lane.b32.xlu1 %v399_v9, %s2423_s19  ;;  %471 = vrot.lane.b32.xlu0 %v2679_v7, %s2423_s19  ;;  %v405_v7 = vld [vmem:[#allocation2 + $0x48] sm:$0xff] }
  0xcf   : >> { %477 = vrot.lane.b32.xlu1 %v2685_v8, %s2423_s19  ;;  %475 = vrot.lane.b32.xlu0 %v2677_v6, %s2423_s19 }
 0x125   : >> { %v424_v10 = vpop.permute.xlu1 %423  ;;  %v420_v11 = vpop.permute.xlu0 %419 }
 0x126   : >> { %v427_v52 = vadd.f32 %v420_v11, %v415_v33  ;;  %v429_v62 = vadd.f32 %v424_v10, %v417_v44  ;;  %v509_v11 = vsub.f32 %v496_v53, %v505_v51 }
 0x129   : >> { %v426_v12 = vpop.permute.xlu1 %425  ;;  %v422_v13 = vpop.permute.xlu0 %421 }
 0x12a   : >> { %v428_v46 = vadd.f32 %v422_v13, %v416_v27  ;;  %v430_v63 = vadd.f32 %v426_v12, %v418_v45  ;;  %v498_v27 = vmul.f32 %v2726_v3, %v2685_v8 }
 0x12c   : >> { %v511_v44 = vsub.f32 %v498_v27, %v507_v28 }
 0x12d   : >> { %v462_v14 = vpop.permute.xlu1 %461  ;;  %v460_v15 = vpop.permute.xlu0 %459 }
 0x12e   : >> { %v468_v58 = vadd.f32 %v462_v14, %v456_v40  ;;  %v467_v59 = vadd.f32 %v460_v15, %v455_v41  ;;  %v2732_v14 = vld [vmem:[#allocation15 + $0x30] sm:$0xff] }
 0x12f   : >> { %v506_v30 = vmul.f32 %v2732_v14, %v405_v7 }
 0x131   : >> { %v466_v16 = vpop.permute.xlu1 %465  ;;  %v2711_v17 = vpop.permute.xlu0 %463 }
 0x132   : >> { %v470_v15 = vadd.f32 %v466_v16, %v458_v56  ;;  %v469_v21 = vadd.f32 %v2711_v17, %v457_v60  ;;  %v497_v16 = vmul.f32 %v2730_v19, %v2677_v6  ;;  %v2750_v6 = vld [vmem:[#allocation15 + $0x58] sm:$0xff]  ;;  %v537_v56 = vmul.f32 %v536_v55, %v2668_v5 }
 0x134   : >> { %v510_v45 = vsub.f32 %v497_v16, %v506_v30 }
 0x135   : >> { %v434_v31 = vpop.permute.xlu1 %433  ;;  %v432_v32 = vpop.permute.xlu0 %431 }
 0x136   : >> { %v440_v57 = vadd.f32 %v434_v31, %v428_v46  ;;  %v439_v61 = vadd.f32 %v432_v32, %v427_v52  ;;  %v2752_v46 = vld [vmem:[#allocation15 + $0x50] sm:$0xff] }
 0x138   : >> { %v444_v20 = vmul.f32 1.3333334, %v440_v57  ;;  %v443_v22 = vmul.f32 1.3333334, %v439_v61 }
 0x139   : >> { %v438_v49 = vpop.permute.xlu1 %437  ;;  %v436_v50 = vpop.permute.xlu0 %435 }
 0x13a   : >> { %v442_v10 = vadd.f32 %v438_v49, %v430_v63  ;;  %v441_v12 = vadd.f32 %v436_v50, %v429_v62 }
 0x13c   : >> { %v446_v37 = vmul.f32 1.3333334, %v442_v10  ;;  %v445_v40 = vmul.f32 1.3333334, %v441_v12 }
 0x13d   : >> { %v474_v0 = vpop.permute.xlu1 %473  ;;  %v472_v1 = vpop.permute.xlu0 %471 }
 0x13e   : >> { %v480_v9 = vadd.f32 %v474_v0, %v468_v58  ;;  %v479_v13 = vadd.f32 %v472_v1, %v467_v59 }
 0x140   : >> { %v484_v23 = vmul.f32 -0.083333336, %v480_v9  ;;  %v483_v24 = vmul.f32 -0.083333336, %v479_v13 }
 0x141   : >> { %v478_v29 = vpop.permute.xlu1 %477  ;;  %v476_v17 = vpop.permute.xlu0 %475 }
 0x142   : >> { %v488_v31 = vadd.f32 %v484_v23, %v444_v20  ;;  %v487_v32 = vadd.f32 %v483_v24, %v443_v22  ;;  %v482_v33 = vadd.f32 %v478_v29, %v470_v15  ;;  %v481_v34 = vadd.f32 %v476_v17, %v469_v21 }
 0x144   : >> { %v518_v8 = vmul.f32 %v2735_v25, %v488_v31  ;;  %v517_v41 = vmul.f32 %v2737_v26, %v487_v32  ;;  %v486_v42 = vmul.f32 -0.083333336, %v482_v33  ;;  %v485_v43 = vmul.f32 -0.083333336, %v481_v34 }
 0x146   : >> { %v522_v47 = vadd.f32 %v518_v8, %v509_v11  ;;  %v521_v48 = vadd.f32 %v517_v41, %v508_v18  ;;  %v490_v49 = vadd.f32 %v486_v42, %v446_v37  ;;  %v489_v50 = vadd.f32 %v485_v43, %v445_v40 }
 0x148   : >> { %526 = vst [vmem:[#allocation2 + $0x40] sm:$0xff] %v522_v47  ;;  %525 = vst [vmem:[#allocation2 + $0x38] sm:$0xff] %v521_v48  ;;  %v520_v51 = vmul.f32 %v2750_v6, %v490_v49  ;;  %v519_v52 = vmul.f32 %v2752_v46, %v489_v50 }
 0x14a   : >> { %v524_v53 = vadd.f32 %v520_v51, %v511_v44  ;;  %v523_v54 = vadd.f32 %v519_v52, %v510_v45 }
 0x14c   : >> { %528 = vst [vmem:[#allocation2 + $0x50] sm:$0xff] %v524_v53  ;;  %527 = vst [vmem:[#allocation2 + $0x48] sm:$0xff] %v523_v54 }
 0x153   : >> { %v1866_v57 = vld [vmem:[%s2759_s30 + $0x38] sm:$0x1] }
 0x154   : >> { %v538_v58 = vadd.f32 %v1866_v57, %v537_v56 }
 0x156   : >> { %1867 = vst [vmem:[%s2759_s30 + $0x38] sm:$0x1] %v538_v58 }
 0x15d   : >> { %v1868_v59 = vld [vmem:[%s2764_s17 + $0x38] sm:$0x1]  ;;  %v2771_v60 = vld [vmem:[#allocation2 + $0x40] sm:$0xff]  ;;  %v2779_v62 = vld [vmem:[#allocation2 + $0x50] sm:$0xff] }
 0x15e   : >> { %545 = vst [vmem:[%s2768_s0] sm:$0x1] %v1868_v59  ;;  %v2773_v61 = vld [vmem:[#allocation2 + $0x38] sm:$0xff]  ;;  %568 = vrot.lane.b32.xlu1 %v2771_v60, %s2420_s2  ;;  %v2781_v63 = vld [vmem:[#allocation2 + $0x48] sm:$0xff]  ;;  %v551_v51 = vld [vmem:[#allocation2 + $0x10] sm:$0xff]  ;;  %v643_v56 = vmul.f32 %v2771_v60, %v2713_v35 }
 0x15f   : >> { %566 = vrot.lane.b32.xlu0 %v2773_v61, %s2420_s2  ;;  %v559_v15 = vld [vmem:[#allocation2 + $0x41] sm:$0xff]  ;;  %v558_v10 = vld [vmem:[#allocation2 + $0x39] sm:$0xff]  ;;  %v557_v24 = vld [vmem:[#allocation2 + $0x4f] sm:$0xff] }
 0x160   : >> { %v555_v20 = vld [vmem:[#allocation2 + $0x3f] sm:$0xff]  ;;  %v554_v12 = vld [vmem:[#allocation2 + $0x37] sm:$0xff]  ;;  %v556_v23 = vld [vmem:[#allocation2 + $0x47] sm:$0xff] }
 0x161   : >> { %v560_v27 = vld [vmem:[#allocation2 + $0x49] sm:$0xff]  ;;  %v595_v29 = vld [vmem:[#allocation2 + $0x3e] sm:$0xff]  ;;  %v563_v30 = vadd.f32 %v559_v15, %v555_v20  ;;  %v594_v17 = vld [vmem:[#allocation2 + $0x36] sm:$0xff]  ;;  %v562_v33 = vadd.f32 %v558_v10, %v554_v12  ;;  %v642_v15 = vmul.f32 %v2773_v61, %v2717_v38  ;;  %v651_v20 = vmul.f32 %v551_v51, %v2715_v36 }
 0x162   : >> { %572 = vrot.lane.b32.xlu1 %v2779_v62, %s2420_s2  ;;  %v599_v28 = vld [vmem:[#allocation2 + $0x42] sm:$0xff]  ;;  %v598_v16 = vld [vmem:[#allocation2 + $0x3a] sm:$0xff]  ;;  %v600_v32 = vld [vmem:[#allocation2 + $0x4a] sm:$0xff]  ;;  %v564_v48 = vadd.f32 %v560_v27, %v556_v23 }
 0x163   : >> { %570 = vrot.lane.b32.xlu0 %v2781_v63, %s2420_s2  ;;  %v596_v31 = vld [vmem:[#allocation2 + $0x46] sm:$0xff]  ;;  %v561_v34 = vld [vmem:[#allocation2 + $0x51] sm:$0xff]  ;;  %v603_v43 = vadd.f32 %v599_v28, %v595_v29  ;;  %v602_v44 = vadd.f32 %v598_v16, %v594_v17 }
 0x164   : >> { %v597_v41 = vld [vmem:[#allocation2 + $0x4e] sm:$0xff]  ;;  %v565_v47 = vadd.f32 %v561_v34, %v557_v24  ;;  %v604_v49 = vadd.f32 %v600_v32, %v596_v31 }
 0x165   : >> { %v601_v45 = vld [vmem:[#allocation2 + $0x52] sm:$0xff]  ;;  %v550_v52 = vld [vmem:[#allocation2 + $0x8] sm:$0xff] }
 0x166   : >> { %608 = vrot.lane.b32.xlu1 %v2771_v60, %s2421_s21  ;;  %v605_v59 = vadd.f32 %v601_v45, %v597_v41  ;;  %v650_v12 = vmul.f32 %v550_v52, %v2719_v39 }
 0x167   : >> { %606 = vrot.lane.b32.xlu0 %v2773_v61, %s2421_s21 }
 0x16a   : >> { %612 = vrot.lane.b32.xlu1 %v2779_v62, %s2421_s21 }
 0x16b   : >> { %610 = vrot.lane.b32.xlu0 %v2781_v63, %s2421_s21 }
 0x16e   : >> { %580 = vrot.lane.b32.xlu1 %v2771_v60, %s2422_s22 }
 0x16f   : >> { %578 = vrot.lane.b32.xlu0 %v2773_v61, %s2422_s22 }
 0x172   : >> { %584 = vrot.lane.b32.xlu1 %v2779_v62, %s2422_s22 }
 0x173   : >> { %582 = vrot.lane.b32.xlu0 %v2781_v63, %s2422_s22 }
 0x176   : >> { %620 = vrot.lane.b32.xlu1 %v2771_v60, %s2423_s19 }
 0x177   : >> { %618 = vrot.lane.b32.xlu0 %v2773_v61, %s2423_s19  ;;  %v645_v61 = vmul.f32 %v2779_v62, %v2726_v3 }
 0x17a   : >> { %624 = vrot.lane.b32.xlu1 %v2779_v62, %s2423_s19 }
 0x17b   : >> { %622 = vrot.lane.b32.xlu0 %v2781_v63, %s2423_s19 }
 0x1d0   : >> { %v569_v0 = vpop.permute.xlu1 %568 }
 0x1d1   : >> { %v567_v1 = vpop.permute.xlu0 %566  ;;  %v575_v37 = vadd.f32 %v569_v0, %v563_v30  ;;  %v644_v30 = vmul.f32 %v2781_v63, %v2730_v19 }
 0x1d2   : >> { %v574_v42 = vadd.f32 %v567_v1, %v562_v33 }
 0x1d4   : >> { %v573_v2 = vpop.permute.xlu1 %572 }
 0x1d5   : >> { %v571_v9 = vpop.permute.xlu0 %570  ;;  %v577_v57 = vadd.f32 %v573_v2, %v565_v47 }
 0x1d6   : >> { %v576_v58 = vadd.f32 %v571_v9, %v564_v48 }
 0x1d8   : >> { %v609_v11 = vpop.permute.xlu1 %608 }
 0x1d9   : >> { %v607_v13 = vpop.permute.xlu0 %606  ;;  %v615_v53 = vadd.f32 %v609_v11, %v603_v43  ;;  %v553_v11 = vld [vmem:[#allocation2 + $0x20] sm:$0xff] }
 0x1da   : >> { %v614_v54 = vadd.f32 %v607_v13, %v602_v44  ;;  %v552_v13 = vld [vmem:[#allocation2 + $0x18] sm:$0xff]  ;;  %v653_v29 = vmul.f32 %v553_v11, %v2728_v4 }
 0x1db   : >> { %v652_v17 = vmul.f32 %v552_v13, %v2732_v14 }
 0x1dc   : >> { %v613_v18 = vpop.permute.xlu1 %612  ;;  %v657_v48 = vsub.f32 %v645_v61, %v653_v29 }
 0x1dd   : >> { %v611_v7 = vpop.permute.xlu0 %610 }
 0x1de   : >> { %v616_v9 = vadd.f32 %v611_v7, %v604_v49 }
 0x1e0   : >> { %v581_v21 = vpop.permute.xlu1 %580 }
 0x1e1   : >> { %v579_v22 = vpop.permute.xlu0 %578  ;;  %v587_v50 = vadd.f32 %v581_v21, %v575_v37 }
 0x1e2   : >> { %v586_v55 = vadd.f32 %v579_v22, %v574_v42  ;;  %v617_v22 = vadd.f32 %v613_v18, %v605_v59 }
 0x1e3   : >> { %v591_v23 = vmul.f32 1.3333334, %v587_v50  ;;  %v656_v50 = vsub.f32 %v644_v30, %v652_v17 }
 0x1e4   : >> { %v585_v40 = vpop.permute.xlu1 %584  ;;  %v590_v24 = vmul.f32 1.3333334, %v586_v55 }
 0x1e5   : >> { %v583_v8 = vpop.permute.xlu0 %582  ;;  %v589_v60 = vadd.f32 %v585_v40, %v577_v57  ;;  %v655_v40 = vsub.f32 %v643_v56, %v651_v20 }
 0x1e6   : >> { %v588_v2 = vadd.f32 %v583_v8, %v576_v58  ;;  %v654_v8 = vsub.f32 %v642_v15, %v650_v12 }
 0x1e7   : >> { %v593_v34 = vmul.f32 1.3333334, %v589_v60 }
 0x1e8   : >> { %v621_v0 = vpop.permute.xlu1 %620  ;;  %v592_v37 = vmul.f32 1.3333334, %v588_v2 }
 0x1e9   : >> { %v619_v1 = vpop.permute.xlu0 %618  ;;  %v627_v10 = vadd.f32 %v621_v0, %v615_v53 }
 0x1ea   : >> { %v626_v21 = vadd.f32 %v619_v1, %v614_v54  ;;  %v678_v54 = vstv %s675_s15  ;;  %s1093_s15 = sadd.s32 4, %s2746_s23 }
 0x1eb   : >> { %v631_v27 = vmul.f32 -0.083333336, %v627_v10  ;;  %v679_v55 = vmul.f32 %v678_v54, %v2668_v5  ;;  %s1094_s20 = sld [smem:[#allocation4 + %s1093_s15]] }
 0x1ec   : >> { %v630_v28 = vmul.f32 -0.083333336, %v626_v21  ;;  %v625_v16 = vpop.permute.xlu1 %624 }
 0x1ed   : >> { %v623_v18 = vpop.permute.xlu0 %622  ;;  %v635_v31 = vadd.f32 %v631_v27, %v591_v23  ;;  %v629_v33 = vadd.f32 %v625_v16, %v617_v22 }
 0x1ee   : >> { %v634_v32 = vadd.f32 %v630_v28, %v590_v24  ;;  %v628_v7 = vadd.f32 %v623_v18, %v616_v9 }
 0x1ef   : >> { %v663_v62 = vmul.f32 %v635_v31, %v2735_v25  ;;  %v633_v42 = vmul.f32 -0.083333336, %v629_v33 }
 0x1f0   : >> { %v662_v41 = vmul.f32 %v634_v32, %v2737_v26  ;;  %v632_v43 = vmul.f32 -0.083333336, %v628_v7 }
 0x1f1   : >> { %v667_v63 = vadd.f32 %v663_v62, %v655_v40  ;;  %v637_v45 = vadd.f32 %v633_v42, %v593_v34 }
 0x1f2   : >> { %v666_v44 = vadd.f32 %v662_v41, %v654_v8  ;;  %v636_v47 = vadd.f32 %v632_v43, %v592_v37 }
 0x1f3   : >> { %671 = vst [vmem:[#allocation2 + $0x10] sm:$0xff] %v667_v63  ;;  %v665_v49 = vmul.f32 %v637_v45, %v2750_v6 }
 0x1f4   : >> { %670 = vst [vmem:[#allocation2 + $0x8] sm:$0xff] %v666_v44  ;;  %v664_v51 = vmul.f32 %v636_v47, %v2752_v46 }
 0x1f5   : >> { %v669_v52 = vadd.f32 %v665_v49, %v657_v48 }
 0x1f6   : >> { %v668_v53 = vadd.f32 %v664_v51, %v656_v50 }
 0x1f7   : >> { %673 = vst [vmem:[#allocation2 + $0x20] sm:$0xff] %v669_v52 }
 0x1f8   : >> { %672 = vst [vmem:[#allocation2 + $0x18] sm:$0xff] %v668_v53 }
 0x1ff   : >> { %v1869_v56 = vld [vmem:[%s2759_s30 + $0x8] sm:$0x1] }
 0x200   : >> { %v680_v57 = vadd.f32 %v1869_v56, %v679_v55 }
 0x202   : >> { %1870 = vst [vmem:[%s2759_s30 + $0x8] sm:$0x1] %v680_v57 }
 0x209   : >> { %v1871_v58 = vld [vmem:[%s2764_s17 + $0x8] sm:$0x1]  ;;  %v688_v59 = vld [vmem:[#allocation2 + $0x10] sm:$0xff]  ;;  %v2838_v1 = vld [vmem:[#allocation2 + $0x20] sm:$0xff] }
 0x20a   : >> { %v2832_v0 = vld [vmem:[#allocation2 + $0x8] sm:$0xff]  ;;  %1873 = vst [vmem:[%s2768_s0 + $0x1] sm:$0x1] %v1871_v58  ;;  %709 = vrot.lane.b32.xlu1 %v688_v59, %s2420_s2  ;;  %v2840_v15 = vld [vmem:[#allocation2 + $0x18] sm:$0xff]  ;;  %v692_v49 = vld [vmem:[#allocation2 + $0x40] sm:$0xff]  ;;  %v784_v50 = vmul.f32 %v688_v59, %v2713_v35 }
 0x20b   : >> { %707 = vrot.lane.b32.xlu0 %v2832_v0, %s2420_s2  ;;  %v696_v60 = vld [vmem:[#allocation2 + $0xf] sm:$0xff]  ;;  %v695_v9 = vld [vmem:[#allocation2 + $0x7] sm:$0xff]  ;;  %v698_v61 = vld [vmem:[#allocation2 + $0x1f] sm:$0xff]  ;;  %v783_v55 = vmul.f32 %v2832_v0, %v2717_v38 }
 0x20c   : >> { %v700_v2 = vld [vmem:[#allocation2 + $0x11] sm:$0xff]  ;;  %v699_v24 = vld [vmem:[#allocation2 + $0x9] sm:$0xff]  ;;  %v702_v32 = vld [vmem:[#allocation2 + $0x21] sm:$0xff] }
 0x20d   : >> { %v736_v29 = vld [vmem:[#allocation2 + $0xe] sm:$0xff]  ;;  %v704_v16 = vadd.f32 %v700_v2, %v696_v60  ;;  %v735_v17 = vld [vmem:[#allocation2 + $0x6] sm:$0xff]  ;;  %v703_v31 = vadd.f32 %v699_v24, %v695_v9  ;;  %v697_v33 = vld [vmem:[#allocation2 + $0x17] sm:$0xff]  ;;  %v706_v45 = vadd.f32 %v702_v32, %v698_v61  ;;  %v792_v2 = vmul.f32 %v692_v49, %v2715_v36 }
 0x20e   : >> { %713 = vrot.lane.b32.xlu1 %v2838_v1, %s2420_s2  ;;  %v740_v30 = vld [vmem:[#allocation2 + $0x12] sm:$0xff]  ;;  %v739_v18 = vld [vmem:[#allocation2 + $0xa] sm:$0xff]  ;;  %v738_v37 = vld [vmem:[#allocation2 + $0x1e] sm:$0xff] }
 0x20f   : >> { %711 = vrot.lane.b32.xlu0 %v2840_v15, %s2420_s2  ;;  %v701_v7 = vld [vmem:[#allocation2 + $0x19] sm:$0xff]  ;;  %v744_v41 = vadd.f32 %v740_v30, %v736_v29  ;;  %v743_v42 = vadd.f32 %v739_v18, %v735_v17  ;;  %v742_v43 = vld [vmem:[#allocation2 + $0x22] sm:$0xff]  ;;  %v786_v30 = vmul.f32 %v2838_v1, %v2726_v3 }
 0x210   : >> { %v737_v63 = vld [vmem:[#allocation2 + $0x16] sm:$0xff]  ;;  %v705_v47 = vadd.f32 %v701_v7, %v697_v33  ;;  %v746_v58 = vadd.f32 %v742_v43, %v738_v37  ;;  %v693_v61 = vld [vmem:[#allocation2 + $0x48] sm:$0xff] }
 0x211   : >> { %v741_v44 = vld [vmem:[#allocation2 + $0x1a] sm:$0xff]  ;;  %v793_v32 = vmul.f32 %v693_v61, %v2732_v14 }
 0x212   : >> { %749 = vrot.lane.b32.xlu1 %v688_v59, %s2421_s21  ;;  %v691_v51 = vld [vmem:[#allocation2 + $0x38] sm:$0xff] }
 0x213   : >> { %747 = vrot.lane.b32.xlu0 %v2832_v0, %s2421_s21  ;;  %v791_v24 = vmul.f32 %v691_v51, %v2719_v39 }
 0x216   : >> { %753 = vrot.lane.b32.xlu1 %v2838_v1, %s2421_s21 }
 0x217   : >> { %751 = vrot.lane.b32.xlu0 %v2840_v15, %s2421_s21 }
 0x21a   : >> { %721 = vrot.lane.b32.xlu1 %v688_v59, %s2422_s22 }
 0x21b   : >> { %719 = vrot.lane.b32.xlu0 %v2832_v0, %s2422_s22 }
 0x21e   : >> { %725 = vrot.lane.b32.xlu1 %v2838_v1, %s2422_s22 }
 0x21f   : >> { %723 = vrot.lane.b32.xlu0 %v2840_v15, %s2422_s22 }
 0x222   : >> { %761 = vrot.lane.b32.xlu1 %v688_v59, %s2423_s19  ;;  %v694_v59 = vld [vmem:[#allocation2 + $0x50] sm:$0xff] }
 0x223   : >> { %759 = vrot.lane.b32.xlu0 %v2832_v0, %s2423_s19  ;;  %v794_v17 = vmul.f32 %v694_v59, %v2728_v4 }
 0x226   : >> { %765 = vrot.lane.b32.xlu1 %v2838_v1, %s2423_s19 }
 0x227   : >> { %763 = vrot.lane.b32.xlu0 %v2840_v15, %s2423_s19 }
 0x27c   : >> { %v710_v20 = vpop.permute.xlu1 %709 }
 0x27d   : >> { %v708_v10 = vpop.permute.xlu0 %707  ;;  %v716_v34 = vadd.f32 %v710_v20, %v704_v16  ;;  %v745_v20 = vadd.f32 %v741_v44, %v737_v63 }
 0x27e   : >> { %v715_v62 = vadd.f32 %v708_v10, %v703_v31  ;;  %v785_v31 = vmul.f32 %v2840_v15, %v2730_v19 }
 0x280   : >> { %v714_v12 = vpop.permute.xlu1 %713  ;;  %v797_v49 = vsub.f32 %v785_v31, %v793_v32 }
 0x281   : >> { %v712_v21 = vpop.permute.xlu0 %711  ;;  %v718_v56 = vadd.f32 %v714_v12, %v706_v45 }
 0x282   : >> { %v717_v57 = vadd.f32 %v712_v21, %v705_v47  ;;  %v798_v47 = vsub.f32 %v786_v30, %v794_v17 }
 0x284   : >> { %v750_v11 = vpop.permute.xlu1 %749 }
 0x285   : >> { %v748_v13 = vpop.permute.xlu0 %747  ;;  %v756_v52 = vadd.f32 %v750_v11, %v744_v41 }
 0x286   : >> { %v755_v53 = vadd.f32 %v748_v13, %v743_v42 }
 0x288   : >> { %v754_v22 = vpop.permute.xlu1 %753 }
 0x289   : >> { %v752_v23 = vpop.permute.xlu0 %751  ;;  %v758_v11 = vadd.f32 %v754_v22, %v746_v58 }
 0x28a   : >> { %v757_v0 = vadd.f32 %v752_v23, %v745_v20 }
 0x28c   : >> { %v722_v27 = vpop.permute.xlu1 %721 }
 0x28d   : >> { %v720_v28 = vpop.permute.xlu0 %719  ;;  %v728_v48 = vadd.f32 %v722_v27, %v716_v34 }
 0x28e   : >> { %v727_v54 = vadd.f32 %v720_v28, %v715_v62  ;;  %v795_v62 = vsub.f32 %v783_v55, %v791_v24 }
 0x28f   : >> { %v732_v13 = vmul.f32 1.3333334, %v728_v48 }
 0x290   : >> { %v726_v40 = vpop.permute.xlu1 %725  ;;  %v731_v12 = vmul.f32 1.3333334, %v727_v54 }
 0x291   : >> { %v724_v8 = vpop.permute.xlu0 %723  ;;  %v730_v28 = vadd.f32 %v726_v40, %v718_v56 }
 0x292   : >> { %v729_v29 = vadd.f32 %v724_v8, %v717_v57  ;;  %v796_v8 = vsub.f32 %v784_v50, %v792_v2 }
 0x293   : >> { %v734_v37 = vmul.f32 1.3333334, %v730_v28 }
 0x294   : >> { %v762_v10 = vpop.permute.xlu1 %761  ;;  %v733_v40 = vmul.f32 1.3333334, %v729_v29 }
 0x295   : >> { %v760_v60 = vpop.permute.xlu0 %759  ;;  %v768_v9 = vadd.f32 %v762_v10, %v756_v52 }
 0x296   : >> { %v767_v27 = vadd.f32 %v760_v60, %v755_v53  ;;  %v818_v53 = vstv %s816_s8  ;;  %s1232_s8 = sadd.s32 5, %s2746_s23 }
 0x297   : >> { %v772_v21 = vmul.f32 -0.083333336, %v768_v9  ;;  %v819_v54 = vmul.f32 %v818_v53, %v2668_v5  ;;  %s1233_s10 = sld [smem:[#allocation4 + %s1232_s8]] }
 0x298   : >> { %v771_v16 = vmul.f32 -0.083333336, %v767_v27  ;;  %v766_v18 = vpop.permute.xlu1 %765 }
 0x299   : >> { %v764_v22 = vpop.permute.xlu0 %763  ;;  %v776_v33 = vadd.f32 %v772_v21, %v732_v13  ;;  %v770_v34 = vadd.f32 %v766_v18, %v758_v11 }
 0x29a   : >> { %v775_v7 = vadd.f32 %v771_v16, %v731_v12  ;;  %v769_v23 = vadd.f32 %v764_v22, %v757_v0 }
 0x29b   : >> { %v804_v1 = vmul.f32 %v776_v33, %v2735_v25  ;;  %v774_v42 = vmul.f32 -0.083333336, %v770_v34 }
 0x29c   : >> { %v803_v41 = vmul.f32 %v775_v7, %v2737_v26  ;;  %v773_v43 = vmul.f32 -0.083333336, %v769_v23 }
 0x29d   : >> { %v808_v15 = vadd.f32 %v804_v1, %v796_v8  ;;  %v778_v44 = vadd.f32 %v774_v42, %v734_v37 }
 0x29e   : >> { %v807_v63 = vadd.f32 %v803_v41, %v795_v62  ;;  %v777_v45 = vadd.f32 %v773_v43, %v733_v40 }
 0x29f   : >> { %812 = vst [vmem:[#allocation2 + $0x40] sm:$0xff] %v808_v15  ;;  %v806_v48 = vmul.f32 %v778_v44, %v2750_v6 }
 0x2a0   : >> { %811 = vst [vmem:[#allocation2 + $0x38] sm:$0xff] %v807_v63  ;;  %v805_v50 = vmul.f32 %v777_v45, %v2752_v46 }
 0x2a1   : >> { %v810_v51 = vadd.f32 %v806_v48, %v798_v47 }
 0x2a2   : >> { %v809_v52 = vadd.f32 %v805_v50, %v797_v49 }
 0x2a3   : >> { %814 = vst [vmem:[#allocation2 + $0x50] sm:$0xff] %v810_v51 }
 0x2a4   : >> { %813 = vst [vmem:[#allocation2 + $0x48] sm:$0xff] %v809_v52 }
 0x2ab   : >> { %v1874_v55 = vld [vmem:[%s2759_s30 + $0x38] sm:$0x1] }
 0x2ac   : >> { %v820_v56 = vadd.f32 %v1874_v55, %v819_v54 }
 0x2ae   : >> { %1875 = vst [vmem:[%s2759_s30 + $0x38] sm:$0x1] %v820_v56 }
 0x2b5   : >> { %v1876_v57 = vld [vmem:[%s2764_s17 + $0x38] sm:$0x1]  ;;  %v827_v58 = vld [vmem:[#allocation2 + $0x40] sm:$0xff]  ;;  %v2893_v10 = vld [vmem:[#allocation2 + $0x50] sm:$0xff] }
 0x2b6   : >> { %v2887_v20 = vld [vmem:[#allocation2 + $0x38] sm:$0xff]  ;;  %1878 = vst [vmem:[%s2768_s0 + $0x2] sm:$0x1] %v1876_v57  ;;  %848 = vrot.lane.b32.xlu1 %v827_v58, %s2420_s2  ;;  %v2895_v60 = vld [vmem:[#allocation2 + $0x48] sm:$0xff]  ;;  %v831_v48 = vld [vmem:[#allocation2 + $0x10] sm:$0xff]  ;;  %v923_v49 = vmul.f32 %v827_v58, %v2713_v35 }
 0x2b7   : >> { %846 = vrot.lane.b32.xlu0 %v2887_v20, %s2420_s2  ;;  %v835_v28 = vld [vmem:[#allocation2 + $0x3f] sm:$0xff]  ;;  %v834_v0 = vld [vmem:[#allocation2 + $0x37] sm:$0xff]  ;;  %v837_v30 = vld [vmem:[#allocation2 + $0x4f] sm:$0xff]  ;;  %v922_v54 = vmul.f32 %v2887_v20, %v2717_v38 }
 0x2b8   : >> { %v839_v29 = vld [vmem:[#allocation2 + $0x41] sm:$0xff]  ;;  %v838_v12 = vld [vmem:[#allocation2 + $0x39] sm:$0xff]  ;;  %v841_v7 = vld [vmem:[#allocation2 + $0x51] sm:$0xff] }
 0x2b9   : >> { %v875_v17 = vld [vmem:[#allocation2 + $0x3e] sm:$0xff]  ;;  %v843_v18 = vadd.f32 %v839_v29, %v835_v28  ;;  %v874_v32 = vld [vmem:[#allocation2 + $0x36] sm:$0xff]  ;;  %v842_v33 = vadd.f32 %v838_v12, %v834_v0  ;;  %v836_v34 = vld [vmem:[#allocation2 + $0x47] sm:$0xff]  ;;  %v845_v44 = vadd.f32 %v841_v7, %v837_v30  ;;  %v931_v29 = vmul.f32 %v831_v48, %v2715_v36 }
 0x2ba   : >> { %852 = vrot.lane.b32.xlu1 %v2893_v10, %s2420_s2  ;;  %v879_v31 = vld [vmem:[#allocation2 + $0x42] sm:$0xff]  ;;  %v878_v22 = vld [vmem:[#allocation2 + $0x3a] sm:$0xff]  ;;  %v877_v40 = vld [vmem:[#allocation2 + $0x4e] sm:$0xff] }
 0x2bb   : >> { %850 = vrot.lane.b32.xlu0 %v2895_v60, %s2420_s2  ;;  %v840_v23 = vld [vmem:[#allocation2 + $0x49] sm:$0xff]  ;;  %v883_v41 = vadd.f32 %v879_v31, %v875_v17  ;;  %v882_v42 = vadd.f32 %v878_v22, %v874_v32  ;;  %v881_v43 = vld [vmem:[#allocation2 + $0x52] sm:$0xff]  ;;  %v833_v35 = vld [vmem:[#allocation2 + $0x20] sm:$0xff]  ;;  %v925_v17 = vmul.f32 %v2893_v10, %v2726_v3 }
 0x2bc   : >> { %v876_v15 = vld [vmem:[#allocation2 + $0x46] sm:$0xff]  ;;  %v844_v45 = vadd.f32 %v840_v23, %v836_v34  ;;  %v885_v57 = vadd.f32 %v881_v43, %v877_v40  ;;  %v933_v36 = vmul.f32 %v833_v35, %v2728_v4  ;;  %v935_v23 = vsub.f32 %v923_v49, %v931_v29 }
 0x2bd   : >> { %v880_v63 = vld [vmem:[#allocation2 + $0x4a] sm:$0xff] }
 0x2be   : >> { %888 = vrot.lane.b32.xlu1 %v827_v58, %s2421_s21  ;;  %v830_v50 = vld [vmem:[#allocation2 + $0x8] sm:$0xff] }
 0x2bf   : >> { %886 = vrot.lane.b32.xlu0 %v2887_v20, %s2421_s21  ;;  %v930_v12 = vmul.f32 %v830_v50, %v2719_v39  ;;  %v924_v39 = vmul.f32 %v2895_v60, %v2730_v19  ;;  %v2983_v35 = vld [vmem:[#allocation15 + $0x8] sm:$0xff] }
 0x2c2   : >> { %892 = vrot.lane.b32.xlu1 %v2893_v10, %s2421_s21 }
 0x2c3   : >> { %890 = vrot.lane.b32.xlu0 %v2895_v60, %s2421_s21 }
 0x2c6   : >> { %860 = vrot.lane.b32.xlu1 %v827_v58, %s2422_s22 }
 0x2c7   : >> { %858 = vrot.lane.b32.xlu0 %v2887_v20, %s2422_s22 }
 0x2ca   : >> { %864 = vrot.lane.b32.xlu1 %v2893_v10, %s2422_s22 }
 0x2cb   : >> { %862 = vrot.lane.b32.xlu0 %v2895_v60, %s2422_s22 }
 0x2ce   : >> { %900 = vrot.lane.b32.xlu1 %v827_v58, %s2423_s19  ;;  %v832_v58 = vld [vmem:[#allocation2 + $0x18] sm:$0xff] }
 0x2cf   : >> { %898 = vrot.lane.b32.xlu0 %v2887_v20, %s2423_s19  ;;  %v932_v31 = vmul.f32 %v832_v58, %v2732_v14 }
 0x2d2   : >> { %904 = vrot.lane.b32.xlu1 %v2893_v10, %s2423_s19 }
 0x2d3   : >> { %902 = vrot.lane.b32.xlu0 %v2895_v60, %s2423_s19 }
 0x328   : >> { %v849_v2 = vpop.permute.xlu1 %848 }
 0x329   : >> { %v847_v9 = vpop.permute.xlu0 %846  ;;  %v855_v37 = vadd.f32 %v849_v2, %v843_v18  ;;  %v884_v2 = vadd.f32 %v880_v63, %v876_v15 }
 0x32a   : >> { %v854_v1 = vadd.f32 %v847_v9, %v842_v33 }
 0x32c   : >> { %v853_v24 = vpop.permute.xlu1 %852 }
 0x32d   : >> { %v851_v27 = vpop.permute.xlu0 %850  ;;  %v857_v55 = vadd.f32 %v853_v24, %v845_v44 }
 0x32e   : >> { %v856_v56 = vadd.f32 %v851_v27, %v844_v45 }
 0x330   : >> { %v889_v59 = vpop.permute.xlu1 %888 }
 0x331   : >> { %v887_v61 = vpop.permute.xlu0 %886  ;;  %v895_v51 = vadd.f32 %v889_v59, %v883_v41  ;;  %v936_v41 = vsub.f32 %v924_v39, %v932_v31  ;;  %v2987_v39 = vld [vmem:[#allocation15] sm:$0xff] }
 0x332   : >> { %v894_v52 = vadd.f32 %v887_v61, %v882_v42  ;;  %v2989_v31 = vld [vmem:[#allocation15 + $0x20] sm:$0xff] }
 0x334   : >> { %v893_v11 = vpop.permute.xlu1 %892 }
 0x335   : >> { %v891_v13 = vpop.permute.xlu0 %890  ;;  %v897_v59 = vadd.f32 %v893_v11, %v885_v57 }
 0x336   : >> { %v896_v38 = vadd.f32 %v891_v13, %v884_v2 }
 0x338   : >> { %v861_v21 = vpop.permute.xlu1 %860 }
 0x339   : >> { %v859_v16 = vpop.permute.xlu0 %858  ;;  %v867_v47 = vadd.f32 %v861_v21, %v855_v37  ;;  %v934_v37 = vsub.f32 %v922_v54, %v930_v12 }
 0x33a   : >> { %v866_v53 = vadd.f32 %v859_v16, %v854_v1 }
 0x33b   : >> { %v871_v61 = vmul.f32 1.3333334, %v867_v47 }
 0x33c   : >> { %v865_v8 = vpop.permute.xlu1 %864  ;;  %v870_v20 = vmul.f32 1.3333334, %v866_v53 }
 0x33d   : >> { %v863_v62 = vpop.permute.xlu0 %862  ;;  %v869_v16 = vadd.f32 %v865_v8, %v857_v55 }
 0x33e   : >> { %v868_v30 = vadd.f32 %v863_v62, %v856_v56  ;;  %v937_v62 = vsub.f32 %v925_v17, %v933_v36 }
 0x33f   : >> { %v873_v7 = vmul.f32 1.3333334, %v869_v16 }
 0x340   : >> { %v901_v9 = vpop.permute.xlu1 %900  ;;  %v872_v34 = vmul.f32 1.3333334, %v868_v30 }
 0x341   : >> { %v899_v28 = vpop.permute.xlu0 %898  ;;  %v907_v0 = vadd.f32 %v901_v9, %v895_v51 }
 0x342   : >> { %v906_v21 = vadd.f32 %v899_v28, %v894_v52 }
 0x343   : >> { %v911_v24 = vmul.f32 -0.083333336, %v907_v0 }
 0x344   : >> { %v910_v27 = vmul.f32 -0.083333336, %v906_v21  ;;  %v905_v18 = vpop.permute.xlu1 %904 }
 0x345   : >> { %v903_v32 = vpop.permute.xlu0 %902  ;;  %v915_v11 = vadd.f32 %v911_v24, %v871_v61  ;;  %v909_v33 = vadd.f32 %v905_v18, %v897_v59  ;;  %v2985_v18 = vld [vmem:[#allocation15 + $0x28] sm:$0xff] }
 0x346   : >> { %v914_v22 = vadd.f32 %v910_v27, %v870_v20  ;;  %v908_v13 = vadd.f32 %v903_v32, %v896_v38 }
 0x347   : >> { %v943_v3 = vmul.f32 %v915_v11, %v2735_v25  ;;  %v913_v10 = vmul.f32 -0.083333336, %v909_v33 }
 0x348   : >> { %v942_v4 = vmul.f32 %v914_v22, %v2737_v26  ;;  %v912_v40 = vmul.f32 -0.083333336, %v908_v13  ;;  %v957_v26 = vstv %s955_s18  ;;  %s1371_s18 = sadd.s32 6, %s2746_s23 }
 0x349   : >> { %v947_v19 = vadd.f32 %v943_v3, %v935_v23  ;;  %v917_v60 = vadd.f32 %v913_v10, %v873_v7  ;;  %v958_v15 = vmul.f32 %v957_v26, %v2668_v5  ;;  %v2996_v26 = vld [vmem:[#allocation15 + $0x18] sm:$0xff]  ;;  %s1372_s15 = sld [smem:[#allocation4 + %s1371_s18]] }
 0x34a   : >> { %v946_v14 = vadd.f32 %v942_v4, %v934_v37  ;;  %v916_v8 = vadd.f32 %v912_v40, %v872_v34 }
 0x34b   : >> { %951 = vst [vmem:[#allocation2 + $0x10] sm:$0xff] %v947_v19  ;;  %v945_v1 = vmul.f32 %v917_v60, %v2750_v6 }
 0x34c   : >> { %950 = vst [vmem:[#allocation2 + $0x8] sm:$0xff] %v946_v14  ;;  %v944_v42 = vmul.f32 %v916_v8, %v2752_v46 }
 0x34d   : >> { %v949_v25 = vadd.f32 %v945_v1, %v937_v62 }
 0x34e   : >> { %v948_v43 = vadd.f32 %v944_v42, %v936_v41 }
 0x34f   : >> { %953 = vst [vmem:[#allocation2 + $0x20] sm:$0xff] %v949_v25 }
 0x350   : >> { %952 = vst [vmem:[#allocation2 + $0x18] sm:$0xff] %v948_v43 }
 0x357   : >> { %v1879_v63 = vld [vmem:[%s2759_s30 + $0x8] sm:$0x1] }
 0x358   : >> { %v959_v44 = vadd.f32 %v1879_v63, %v958_v15 }
 0x35a   : >> { %1880 = vst [vmem:[%s2759_s30 + $0x8] sm:$0x1] %v959_v44 }
 0x361   : >> { %v2941_v45 = vld [vmem:[#allocation2 + $0x10] sm:$0xff]  ;;  %v2943_v47 = vld [vmem:[#allocation2 + $0x8] sm:$0xff]  ;;  %v2949_v6 = vld [vmem:[#allocation2 + $0x20] sm:$0xff] }
 0x362   : >> { %987 = vrot.lane.b32.xlu1 %v2941_v45, %s2420_s2  ;;  %985 = vrot.lane.b32.xlu0 %v2943_v47, %s2420_s2  ;;  %v2951_v46 = vld [vmem:[#allocation2 + $0x18] sm:$0xff]  ;;  %v1881_v48 = vld [vmem:[%s2764_s17 + $0x8] sm:$0x1]  ;;  %v974_v57 = vld [vmem:[#allocation2 + $0xf] sm:$0xff]  ;;  %v1062_v10 = vmul.f32 %v2983_v35, %v2941_v45  ;;  %v1061_v8 = vmul.f32 %v2987_v39, %v2943_v47 }
 0x363   : >> { %1883 = vst [vmem:[%s2768_s0 + $0x3] sm:$0x1] %v1881_v48  ;;  %v978_v2 = vld [vmem:[#allocation2 + $0x11] sm:$0xff]  ;;  %v973_v9 = vld [vmem:[#allocation2 + $0x7] sm:$0xff]  ;;  %v976_v12 = vld [vmem:[#allocation2 + $0x1f] sm:$0xff] }
 0x364   : >> { %v977_v28 = vld [vmem:[#allocation2 + $0x9] sm:$0xff]  ;;  %v982_v58 = vadd.f32 %v978_v2, %v974_v57  ;;  %v1018_v59 = vld [vmem:[#allocation2 + $0x12] sm:$0xff]  ;;  %v980_v38 = vld [vmem:[#allocation2 + $0x21] sm:$0xff] }
 0x365   : >> { %v1014_v21 = vld [vmem:[#allocation2 + $0xe] sm:$0xff]  ;;  %v1013_v61 = vld [vmem:[#allocation2 + $0x6] sm:$0xff]  ;;  %v981_v30 = vadd.f32 %v977_v28, %v973_v9  ;;  %v975_v20 = vld [vmem:[#allocation2 + $0x17] sm:$0xff]  ;;  %v984_v34 = vadd.f32 %v980_v38, %v976_v12 }
 0x366   : >> { %991 = vrot.lane.b32.xlu1 %v2949_v6, %s2420_s2  ;;  %989 = vrot.lane.b32.xlu0 %v2951_v46, %s2420_s2  ;;  %v1017_v16 = vld [vmem:[#allocation2 + $0xa] sm:$0xff]  ;;  %v979_v24 = vld [vmem:[#allocation2 + $0x19] sm:$0xff]  ;;  %v1022_v11 = vadd.f32 %v1018_v59, %v1014_v21  ;;  %v1020_v13 = vld [vmem:[#allocation2 + $0x22] sm:$0xff] }
 0x367   : >> { %v1021_v22 = vadd.f32 %v1017_v16, %v1013_v61  ;;  %v1016_v33 = vld [vmem:[#allocation2 + $0x1e] sm:$0xff]  ;;  %v983_v23 = vadd.f32 %v979_v24, %v975_v20  ;;  %v1015_v37 = vld [vmem:[#allocation2 + $0x16] sm:$0xff] }
 0x368   : >> { %v970_v7 = vld [vmem:[#allocation2 + $0x40] sm:$0xff]  ;;  %v969_v40 = vld [vmem:[#allocation2 + $0x38] sm:$0xff]  ;;  %v1024_v41 = vadd.f32 %v1020_v13, %v1016_v33  ;;  %v972_v48 = vld [vmem:[#allocation2 + $0x50] sm:$0xff] }
 0x369   : >> { %v1019_v3 = vld [vmem:[#allocation2 + $0x1a] sm:$0xff]  ;;  %v1070_v42 = vmul.f32 %v2985_v18, %v970_v7  ;;  %v1069_v44 = vmul.f32 %v2989_v31, %v969_v40  ;;  %v3003_v57 = vld [vmem:[#allocation15 + $0x30] sm:$0xff] }
 0x36a   : >> { %1027 = vrot.lane.b32.xlu1 %v2941_v45, %s2421_s21  ;;  %1025 = vrot.lane.b32.xlu0 %v2943_v47, %s2421_s21  ;;  %v1023_v15 = vadd.f32 %v1019_v3, %v1015_v37  ;;  %v3007_v21 = vld [vmem:[#allocation15 + $0x40] sm:$0xff]  ;;  %v3018_v33 = vld [vmem:[#allocation15 + $0x58] sm:$0xff] }
 0x36b   : >> { %v1074_v12 = vsub.f32 %v1062_v10, %v1070_v42 }
 0x36e   : >> { %1031 = vrot.lane.b32.xlu1 %v2949_v6, %s2421_s21  ;;  %1029 = vrot.lane.b32.xlu0 %v2951_v46, %s2421_s21 }
 0x372   : >> { %999 = vrot.lane.b32.xlu1 %v2941_v45, %s2422_s22  ;;  %997 = vrot.lane.b32.xlu0 %v2943_v47, %s2422_s22 }
 0x376   : >> { %1003 = vrot.lane.b32.xlu1 %v2949_v6, %s2422_s22  ;;  %1001 = vrot.lane.b32.xlu0 %v2951_v46, %s2422_s22 }
 0x37a   : >> { %1039 = vrot.lane.b32.xlu1 %v2941_v45, %s2423_s19  ;;  %1037 = vrot.lane.b32.xlu0 %v2943_v47, %s2423_s19 }
 0x37e   : >> { %1043 = vrot.lane.b32.xlu1 %v2949_v6, %s2423_s19  ;;  %1041 = vrot.lane.b32.xlu0 %v2951_v46, %s2423_s19 }
 0x3d4   : >> { %v988_v49 = vpop.permute.xlu1 %987  ;;  %v986_v50 = vpop.permute.xlu0 %985 }
 0x3d5   : >> { %v994_v27 = vadd.f32 %v988_v49, %v982_v58  ;;  %v993_v32 = vadd.f32 %v986_v50, %v981_v30  ;;  %v2999_v49 = vld [vmem:[#allocation15 + $0x38] sm:$0xff]  ;;  %v3001_v50 = vld [vmem:[#allocation15 + $0x10] sm:$0xff]  ;;  %v1064_v58 = vmul.f32 %v2996_v26, %v2949_v6 }
 0x3d6   : >> { %v1063_v61 = vmul.f32 %v3001_v50, %v2951_v46  ;;  %v3020_v46 = vld [vmem:[#allocation15 + $0x50] sm:$0xff] }
 0x3d8   : >> { %v992_v51 = vpop.permute.xlu1 %991  ;;  %v990_v52 = vpop.permute.xlu0 %989 }
 0x3d9   : >> { %v996_v62 = vadd.f32 %v992_v51, %v984_v34  ;;  %v995_v1 = vadd.f32 %v990_v52, %v983_v23 }
 0x3dc   : >> { %v1028_v53 = vpop.permute.xlu1 %1027  ;;  %v1026_v54 = vpop.permute.xlu0 %1025 }
 0x3dd   : >> { %v1034_v19 = vadd.f32 %v1028_v53, %v1022_v11  ;;  %v1033_v14 = vadd.f32 %v1026_v54, %v1021_v22  ;;  %v971_v54 = vld [vmem:[#allocation2 + $0x48] sm:$0xff] }
 0x3e0   : >> { %v1032_v55 = vpop.permute.xlu1 %1031  ;;  %v1030_v56 = vpop.permute.xlu0 %1029 }
 0x3e1   : >> { %v1036_v47 = vadd.f32 %v1032_v55, %v1024_v41  ;;  %v1035_v2 = vadd.f32 %v1030_v56, %v1023_v15  ;;  %v1072_v55 = vmul.f32 %v2999_v49, %v972_v48 }
 0x3e3   : >> { %v1076_v37 = vsub.f32 %v1064_v58, %v1072_v55 }
 0x3e4   : >> { %v1000_v29 = vpop.permute.xlu1 %999  ;;  %v998_v0 = vpop.permute.xlu0 %997 }
 0x3e5   : >> { %v1006_v4 = vadd.f32 %v1000_v29, %v994_v27  ;;  %v1005_v60 = vadd.f32 %v998_v0, %v993_v32  ;;  %v3005_v0 = vld [vmem:[#allocation15 + $0x48] sm:$0xff] }
 0x3e7   : >> { %v1010_v51 = vmul.f32 1.3333334, %v1006_v4  ;;  %v1009_v9 = vmul.f32 1.3333334, %v1005_v60 }
 0x3e8   : >> { %v1004_v17 = vpop.permute.xlu1 %1003  ;;  %v1002_v36 = vpop.permute.xlu0 %1001 }
 0x3e9   : >> { %v1008_v52 = vadd.f32 %v1004_v17, %v996_v62  ;;  %v1007_v53 = vadd.f32 %v1002_v36, %v995_v1  ;;  %v1073_v17 = vsub.f32 %v1061_v8, %v1069_v44  ;;  %v1071_v36 = vmul.f32 %v3003_v57, %v971_v54 }
 0x3eb   : >> { %v1012_v24 = vmul.f32 1.3333334, %v1008_v52  ;;  %v1011_v27 = vmul.f32 1.3333334, %v1007_v53  ;;  %v1075_v4 = vsub.f32 %v1063_v61, %v1071_v36 }
 0x3ec   : >> { %v1040_v25 = vpop.permute.xlu1 %1039  ;;  %v1038_v43 = vpop.permute.xlu0 %1037 }
 0x3ed   : >> { %v1046_v63 = vadd.f32 %v1040_v25, %v1034_v19  ;;  %v1045_v45 = vadd.f32 %v1038_v43, %v1033_v14  ;;  %v1096_v14 = vstv %s1094_s20 }
 0x3ee   : >> { %v1097_v60 = vmul.f32 %v1096_v14, %v2668_v5 }
 0x3ef   : >> { %v1050_v28 = vmul.f32 -0.083333336, %v1046_v63  ;;  %v1049_v29 = vmul.f32 -0.083333336, %v1045_v45 }
 0x3f0   : >> { %v1044_v59 = vpop.permute.xlu1 %1043  ;;  %v1042_v16 = vpop.permute.xlu0 %1041 }
 0x3f1   : >> { %v1054_v56 = vadd.f32 %v1050_v28, %v1010_v51  ;;  %v1053_v30 = vadd.f32 %v1049_v29, %v1009_v9  ;;  %v1048_v38 = vadd.f32 %v1044_v59, %v1036_v47  ;;  %v1047_v20 = vadd.f32 %v1042_v16, %v1035_v2 }
 0x3f3   : >> { %v1082_v32 = vmul.f32 %v3005_v0, %v1054_v56  ;;  %v1081_v6 = vmul.f32 %v3007_v21, %v1053_v30  ;;  %v1052_v11 = vmul.f32 -0.083333336, %v1048_v38  ;;  %v1051_v22 = vmul.f32 -0.083333336, %v1047_v20 }
 0x3f5   : >> { %v1086_v13 = vadd.f32 %v1082_v32, %v1074_v12  ;;  %v1085_v7 = vadd.f32 %v1081_v6, %v1073_v17  ;;  %v1056_v34 = vadd.f32 %v1052_v11, %v1012_v24  ;;  %v1055_v23 = vadd.f32 %v1051_v22, %v1011_v27 }
 0x3f7   : >> { %1089 = vst [vmem:[#allocation2 + $0x38] sm:$0xff] %v1085_v7  ;;  %1090 = vst [vmem:[#allocation2 + $0x40] sm:$0xff] %v1086_v13  ;;  %v1084_v3 = vmul.f32 %v3018_v33, %v1056_v34  ;;  %v1083_v10 = vmul.f32 %v3020_v46, %v1055_v23 }
 0x3f9   : >> { %v1088_v40 = vadd.f32 %v1084_v3, %v1076_v37  ;;  %v1087_v19 = vadd.f32 %v1083_v10, %v1075_v4 }
 0x3fb   : >> { %1092 = vst [vmem:[#allocation2 + $0x50] sm:$0xff] %v1088_v40  ;;  %1091 = vst [vmem:[#allocation2 + $0x48] sm:$0xff] %v1087_v19 }
 0x402   : >> { %v1884_v8 = vld [vmem:[%s2759_s30 + $0x38] sm:$0x1] }
 0x403   : >> { %v1098_v62 = vadd.f32 %v1884_v8, %v1097_v60 }
 0x405   : >> { %1885 = vst [vmem:[%s2759_s30 + $0x38] sm:$0x1] %v1098_v62 }
 0x40c   : >> { %v1105_v1 = vld [vmem:[#allocation2 + $0x40] sm:$0xff]  ;;  %v3027_v41 = vld [vmem:[#allocation2 + $0x38] sm:$0xff]  ;;  %v3032_v42 = vld [vmem:[#allocation2 + $0x50] sm:$0xff] }
 0x40d   : >> { %1126 = vrot.lane.b32.xlu1 %v1105_v1, %s2420_s2  ;;  %1124 = vrot.lane.b32.xlu0 %v3027_v41, %s2420_s2  ;;  %v3034_v25 = vld [vmem:[#allocation2 + $0x48] sm:$0xff]  ;;  %v1886_v43 = vld [vmem:[%s2764_s17 + $0x38] sm:$0x1]  ;;  %v1113_v53 = vld [vmem:[#allocation2 + $0x3f] sm:$0xff]  ;;  %v1201_v4 = vmul.f32 %v1105_v1, %v2983_v35  ;;  %v1200_v60 = vmul.f32 %v3027_v41, %v2987_v39 }
 0x40e   : >> { %1888 = vst [vmem:[%s2768_s0 + $0x4] sm:$0x1] %v1886_v43  ;;  %v1117_v54 = vld [vmem:[#allocation2 + $0x41] sm:$0xff]  ;;  %v1112_v2 = vld [vmem:[#allocation2 + $0x37] sm:$0xff]  ;;  %v1115_v12 = vld [vmem:[#allocation2 + $0x4f] sm:$0xff] }
 0x40f   : >> { %v1116_v9 = vld [vmem:[#allocation2 + $0x39] sm:$0xff]  ;;  %v1121_v55 = vadd.f32 %v1117_v54, %v1113_v53  ;;  %v1157_v59 = vld [vmem:[#allocation2 + $0x42] sm:$0xff]  ;;  %v1119_v30 = vld [vmem:[#allocation2 + $0x51] sm:$0xff] }
 0x410   : >> { %v1153_v58 = vld [vmem:[#allocation2 + $0x3e] sm:$0xff]  ;;  %v1152_v61 = vld [vmem:[#allocation2 + $0x36] sm:$0xff]  ;;  %v1120_v56 = vadd.f32 %v1116_v9, %v1112_v2  ;;  %v1114_v38 = vld [vmem:[#allocation2 + $0x47] sm:$0xff]  ;;  %v1123_v7 = vadd.f32 %v1119_v30, %v1115_v12  ;;  %v1202_v30 = vmul.f32 %v3034_v25, %v3001_v50 }
 0x411   : >> { %1130 = vrot.lane.b32.xlu1 %v3032_v42, %s2420_s2  ;;  %1128 = vrot.lane.b32.xlu0 %v3034_v25, %s2420_s2  ;;  %v1156_v16 = vld [vmem:[#allocation2 + $0x3a] sm:$0xff]  ;;  %v1118_v20 = vld [vmem:[#allocation2 + $0x49] sm:$0xff]  ;;  %v1161_v32 = vadd.f32 %v1157_v59, %v1153_v58  ;;  %v1159_v22 = vld [vmem:[#allocation2 + $0x52] sm:$0xff] }
 0x412   : >> { %v1160_v6 = vadd.f32 %v1156_v16, %v1152_v61  ;;  %v1155_v11 = vld [vmem:[#allocation2 + $0x4e] sm:$0xff]  ;;  %v1122_v34 = vadd.f32 %v1118_v20, %v1114_v38  ;;  %v1154_v23 = vld [vmem:[#allocation2 + $0x46] sm:$0xff]  ;;  %v1110_v58 = vld [vmem:[#allocation2 + $0x18] sm:$0xff]  ;;  %v1203_v61 = vmul.f32 %v3032_v42, %v2996_v26 }
 0x413   : >> { %v1109_v13 = vld [vmem:[#allocation2 + $0x10] sm:$0xff]  ;;  %v1108_v10 = vld [vmem:[#allocation2 + $0x8] sm:$0xff]  ;;  %v1163_v43 = vadd.f32 %v1159_v22, %v1155_v11 }
 0x414   : >> { %v1158_v37 = vld [vmem:[#allocation2 + $0x4a] sm:$0xff]  ;;  %v1208_v9 = vmul.f32 %v1108_v10, %v2989_v31 }
 0x415   : >> { %1166 = vrot.lane.b32.xlu1 %v1105_v1, %s2421_s21  ;;  %1164 = vrot.lane.b32.xlu0 %v3027_v41, %s2421_s21  ;;  %v1162_v54 = vadd.f32 %v1158_v37, %v1154_v23 }
 0x419   : >> { %1170 = vrot.lane.b32.xlu1 %v3032_v42, %s2421_s21  ;;  %1168 = vrot.lane.b32.xlu0 %v3034_v25, %s2421_s21 }
 0x41d   : >> { %1138 = vrot.lane.b32.xlu1 %v1105_v1, %s2422_s22  ;;  %1136 = vrot.lane.b32.xlu0 %v3027_v41, %s2422_s22 }
 0x421   : >> { %1142 = vrot.lane.b32.xlu1 %v3032_v42, %s2422_s22  ;;  %1140 = vrot.lane.b32.xlu0 %v3034_v25, %s2422_s22 }
 0x425   : >> { %1178 = vrot.lane.b32.xlu1 %v1105_v1, %s2423_s19  ;;  %1176 = vrot.lane.b32.xlu0 %v3027_v41, %s2423_s19  ;;  %v1111_v1 = vld [vmem:[#allocation2 + $0x20] sm:$0xff] }
 0x426   : >> { %v1211_v16 = vmul.f32 %v1111_v1, %v2999_v49 }
 0x428   : >> { %v1215_v23 = vsub.f32 %v1203_v61, %v1211_v16 }
 0x429   : >> { %1182 = vrot.lane.b32.xlu1 %v3032_v42, %s2423_s19  ;;  %1180 = vrot.lane.b32.xlu0 %v3034_v25, %s2423_s19 }
 0x47f   : >> { %v1127_v15 = vpop.permute.xlu1 %1126  ;;  %v1125_v63 = vpop.permute.xlu0 %1124 }
 0x480   : >> { %v1133_v24 = vadd.f32 %v1127_v15, %v1121_v55  ;;  %v1132_v36 = vadd.f32 %v1125_v63, %v1120_v56  ;;  %v1209_v15 = vmul.f32 %v1109_v13, %v2985_v18 }
 0x482   : >> { %v1213_v59 = vsub.f32 %v1201_v4, %v1209_v15 }
 0x483   : >> { %v1131_v44 = vpop.permute.xlu1 %1130  ;;  %v1129_v45 = vpop.permute.xlu0 %1128 }
 0x484   : >> { %v1135_v8 = vadd.f32 %v1131_v44, %v1123_v7  ;;  %v1134_v62 = vadd.f32 %v1129_v45, %v1122_v34 }
 0x487   : >> { %v1167_v48 = vpop.permute.xlu1 %1166  ;;  %v1165_v47 = vpop.permute.xlu0 %1164 }
 0x488   : >> { %v1173_v40 = vadd.f32 %v1167_v48, %v1161_v32  ;;  %v1172_v19 = vadd.f32 %v1165_v47, %v1160_v6  ;;  %v1210_v32 = vmul.f32 %v1110_v58, %v3003_v57 }
 0x48b   : >> { %v1171_v51 = vpop.permute.xlu1 %1170  ;;  %v1169_v52 = vpop.permute.xlu0 %1168 }
 0x48c   : >> { %v1175_v48 = vadd.f32 %v1171_v51, %v1163_v43  ;;  %v1174_v41 = vadd.f32 %v1169_v52, %v1162_v54 }
 0x48f   : >> { %v1139_v28 = vpop.permute.xlu1 %1138  ;;  %v1137_v29 = vpop.permute.xlu0 %1136 }
 0x490   : >> { %v1145_v3 = vadd.f32 %v1139_v28, %v1133_v24  ;;  %v1144_v14 = vadd.f32 %v1137_v29, %v1132_v36  ;;  %v1212_v36 = vsub.f32 %v1200_v60, %v1208_v9 }
 0x492   : >> { %v1149_v47 = vmul.f32 1.3333334, %v1145_v3  ;;  %v1148_v44 = vmul.f32 1.3333334, %v1144_v14  ;;  %v1214_v3 = vsub.f32 %v1202_v30, %v1210_v32 }
 0x493   : >> { %v1143_v27 = vpop.permute.xlu1 %1142  ;;  %v1141_v17 = vpop.permute.xlu0 %1140 }
 0x494   : >> { %v1147_v29 = vadd.f32 %v1143_v27, %v1135_v8  ;;  %v1146_v12 = vadd.f32 %v1141_v17, %v1134_v62 }
 0x496   : >> { %v1151_v52 = vmul.f32 1.3333334, %v1147_v29  ;;  %v1150_v17 = vmul.f32 1.3333334, %v1146_v12 }
 0x497   : >> { %v1179_v63 = vpop.permute.xlu1 %1178  ;;  %v1177_v53 = vpop.permute.xlu0 %1176 }
 0x498   : >> { %v1185_v2 = vadd.f32 %v1179_v63, %v1173_v40  ;;  %v1184_v28 = vadd.f32 %v1177_v53, %v1172_v19  ;;  %v1235_v19 = vstv %s1233_s10 }
 0x499   : >> { %v1236_v14 = vmul.f32 %v1235_v19, %v2668_v5 }
 0x49a   : >> { %v1189_v45 = vmul.f32 -0.083333336, %v1185_v2  ;;  %v1188_v55 = vmul.f32 -0.083333336, %v1184_v28 }
 0x49b   : >> { %v1183_v56 = vpop.permute.xlu1 %1182  ;;  %v1181_v38 = vpop.permute.xlu0 %1180 }
 0x49c   : >> { %v1193_v51 = vadd.f32 %v1189_v45, %v1149_v47  ;;  %v1192_v20 = vadd.f32 %v1188_v55, %v1148_v44  ;;  %v1187_v24 = vadd.f32 %v1183_v56, %v1175_v48  ;;  %v1186_v27 = vadd.f32 %v1181_v38, %v1174_v41 }
 0x49e   : >> { %v1221_v6 = vmul.f32 %v1193_v51, %v3005_v0  ;;  %v1220_v42 = vmul.f32 %v1192_v20, %v3007_v21  ;;  %v1191_v11 = vmul.f32 -0.083333336, %v1187_v24  ;;  %v1190_v22 = vmul.f32 -0.083333336, %v1186_v27 }
 0x4a0   : >> { %v1225_v13 = vadd.f32 %v1221_v6, %v1213_v59  ;;  %v1224_v25 = vadd.f32 %v1220_v42, %v1212_v36  ;;  %v1195_v7 = vadd.f32 %v1191_v11, %v1151_v52  ;;  %v1194_v34 = vadd.f32 %v1190_v22, %v1150_v17 }
 0x4a2   : >> { %1228 = vst [vmem:[#allocation2 + $0x8] sm:$0xff] %v1224_v25  ;;  %1229 = vst [vmem:[#allocation2 + $0x10] sm:$0xff] %v1225_v13  ;;  %v1223_v37 = vmul.f32 %v1195_v7, %v3018_v33  ;;  %v1222_v4 = vmul.f32 %v1194_v34, %v3020_v46 }
 0x4a4   : >> { %v1227_v10 = vadd.f32 %v1223_v37, %v1215_v23  ;;  %v1226_v40 = vadd.f32 %v1222_v4, %v1214_v3 }
 0x4a6   : >> { %1231 = vst [vmem:[#allocation2 + $0x20] sm:$0xff] %v1227_v10  ;;  %1230 = vst [vmem:[#allocation2 + $0x18] sm:$0xff] %v1226_v40 }
 0x4ad   : >> { %v1889_v60 = vld [vmem:[%s2759_s30 + $0x8] sm:$0x1] }
 0x4ae   : >> { %v1237_v8 = vadd.f32 %v1889_v60, %v1236_v14 }
 0x4b0   : >> { %1890 = vst [vmem:[%s2759_s30 + $0x8] sm:$0x1] %v1237_v8 }
 0x4b7   : >> { %v1244_v62 = vld [vmem:[#allocation2 + $0x10] sm:$0xff]  ;;  %v3082_v43 = vld [vmem:[#allocation2 + $0x8] sm:$0xff]  ;;  %v3087_v15 = vld [vmem:[#allocation2 + $0x20] sm:$0xff] }
 0x4b8   : >> { %1265 = vrot.lane.b32.xlu1 %v1244_v62, %s2420_s2  ;;  %1263 = vrot.lane.b32.xlu0 %v3082_v43, %s2420_s2  ;;  %v3089_v63 = vld [vmem:[#allocation2 + $0x18] sm:$0xff]  ;;  %v1891_v53 = vld [vmem:[%s2764_s17 + $0x8] sm:$0x1]  ;;  %v1252_v12 = vld [vmem:[#allocation2 + $0xf] sm:$0xff]  ;;  %v1340_v3 = vmul.f32 %v1244_v62, %v2983_v35  ;;  %v1339_v14 = vmul.f32 %v3082_v43, %v2987_v39 }
 0x4b9   : >> { %1893 = vst [vmem:[%s2768_s0 + $0x5] sm:$0x1] %v1891_v53  ;;  %v1256_v58 = vld [vmem:[#allocation2 + $0x11] sm:$0xff]  ;;  %v1251_v41 = vld [vmem:[#allocation2 + $0x7] sm:$0xff]  ;;  %v1254_v59 = vld [vmem:[#allocation2 + $0x1f] sm:$0xff] }
 0x4ba   : >> { %v1255_v44 = vld [vmem:[#allocation2 + $0x9] sm:$0xff]  ;;  %v1260_v16 = vadd.f32 %v1256_v58, %v1252_v12  ;;  %v1296_v56 = vld [vmem:[#allocation2 + $0x12] sm:$0xff]  ;;  %v1258_v20 = vld [vmem:[#allocation2 + $0x21] sm:$0xff] }
 0x4bb   : >> { %v1292_v61 = vld [vmem:[#allocation2 + $0xe] sm:$0xff]  ;;  %v1291_v30 = vld [vmem:[#allocation2 + $0x6] sm:$0xff]  ;;  %v1259_v51 = vadd.f32 %v1255_v44, %v1251_v41  ;;  %v1253_v24 = vld [vmem:[#allocation2 + $0x17] sm:$0xff]  ;;  %v1262_v25 = vadd.f32 %v1258_v20, %v1254_v59  ;;  %v1341_v20 = vmul.f32 %v3089_v63, %v3001_v50 }
 0x4bc   : >> { %1269 = vrot.lane.b32.xlu1 %v3087_v15, %s2420_s2  ;;  %1267 = vrot.lane.b32.xlu0 %v3089_v63, %s2420_s2  ;;  %v1295_v38 = vld [vmem:[#allocation2 + $0xa] sm:$0xff]  ;;  %v1257_v27 = vld [vmem:[#allocation2 + $0x19] sm:$0xff]  ;;  %v1300_v6 = vadd.f32 %v1296_v56, %v1292_v61  ;;  %v1298_v22 = vld [vmem:[#allocation2 + $0x22] sm:$0xff] }
 0x4bd   : >> { %v1299_v42 = vadd.f32 %v1295_v38, %v1291_v30  ;;  %v1294_v11 = vld [vmem:[#allocation2 + $0x1e] sm:$0xff]  ;;  %v1261_v7 = vadd.f32 %v1257_v27, %v1253_v24  ;;  %v1293_v34 = vld [vmem:[#allocation2 + $0x16] sm:$0xff]  ;;  %v1249_v61 = vld [vmem:[#allocation2 + $0x48] sm:$0xff]  ;;  %v1342_v30 = vmul.f32 %v3087_v15, %v2996_v26 }
 0x4be   : >> { %v1248_v13 = vld [vmem:[#allocation2 + $0x40] sm:$0xff]  ;;  %v1247_v4 = vld [vmem:[#allocation2 + $0x38] sm:$0xff]  ;;  %v1302_v53 = vadd.f32 %v1298_v22, %v1294_v11 }
 0x4bf   : >> { %v1297_v23 = vld [vmem:[#allocation2 + $0x1a] sm:$0xff]  ;;  %v1347_v44 = vmul.f32 %v1247_v4, %v2989_v31 }
 0x4c0   : >> { %1305 = vrot.lane.b32.xlu1 %v1244_v62, %s2421_s21  ;;  %1303 = vrot.lane.b32.xlu0 %v3082_v43, %s2421_s21  ;;  %v1301_v58 = vadd.f32 %v1297_v23, %v1293_v34 }
 0x4c4   : >> { %1309 = vrot.lane.b32.xlu1 %v3087_v15, %s2421_s21  ;;  %1307 = vrot.lane.b32.xlu0 %v3089_v63, %s2421_s21 }
 0x4c8   : >> { %1277 = vrot.lane.b32.xlu1 %v1244_v62, %s2422_s22  ;;  %1275 = vrot.lane.b32.xlu0 %v3082_v43, %s2422_s22 }
 0x4cc   : >> { %1281 = vrot.lane.b32.xlu1 %v3087_v15, %s2422_s22  ;;  %1279 = vrot.lane.b32.xlu0 %v3089_v63, %s2422_s22 }
 0x4d0   : >> { %1317 = vrot.lane.b32.xlu1 %v1244_v62, %s2423_s19  ;;  %1315 = vrot.lane.b32.xlu0 %v3082_v43, %s2423_s19  ;;  %v1250_v62 = vld [vmem:[#allocation2 + $0x50] sm:$0xff] }
 0x4d1   : >> { %v1350_v38 = vmul.f32 %v1250_v62, %v2999_v49 }
 0x4d3   : >> { %v1354_v34 = vsub.f32 %v1342_v30, %v1350_v38 }
 0x4d4   : >> { %1321 = vrot.lane.b32.xlu1 %v3087_v15, %s2423_s19  ;;  %1319 = vrot.lane.b32.xlu0 %v3089_v63, %s2423_s19 }
 0x52a   : >> { %v1266_v54 = vpop.permute.xlu1 %1265  ;;  %v1264_v2 = vpop.permute.xlu0 %1263 }
 0x52b   : >> { %v1272_v52 = vadd.f32 %v1266_v54, %v1260_v16  ;;  %v1271_v32 = vadd.f32 %v1264_v2, %v1259_v51  ;;  %v1348_v54 = vmul.f32 %v1248_v13, %v2985_v18 }
 0x52d   : >> { %v1352_v56 = vsub.f32 %v1340_v3, %v1348_v54 }
 0x52e   : >> { %v1270_v9 = vpop.permute.xlu1 %1269  ;;  %v1268_v28 = vpop.permute.xlu0 %1267 }
 0x52f   : >> { %v1274_v60 = vadd.f32 %v1270_v9, %v1262_v25  ;;  %v1273_v8 = vadd.f32 %v1268_v28, %v1261_v7 }
 0x532   : >> { %v1306_v1 = vpop.permute.xlu1 %1305  ;;  %v1304_v48 = vpop.permute.xlu0 %1303 }
 0x533   : >> { %v1312_v10 = vadd.f32 %v1306_v1, %v1300_v6  ;;  %v1311_v40 = vadd.f32 %v1304_v48, %v1299_v42  ;;  %v1349_v6 = vmul.f32 %v1249_v61, %v3003_v57 }
 0x536   : >> { %v1310_v47 = vpop.permute.xlu1 %1309  ;;  %v1308_v29 = vpop.permute.xlu0 %1307 }
 0x537   : >> { %v1314_v1 = vadd.f32 %v1310_v47, %v1302_v53  ;;  %v1313_v43 = vadd.f32 %v1308_v29, %v1301_v58 }
 0x53a   : >> { %v1278_v45 = vpop.permute.xlu1 %1277  ;;  %v1276_v55 = vpop.permute.xlu0 %1275 }
 0x53b   : >> { %v1284_v37 = vadd.f32 %v1278_v45, %v1272_v52  ;;  %v1283_v19 = vadd.f32 %v1276_v55, %v1271_v32  ;;  %v1351_v32 = vsub.f32 %v1339_v14, %v1347_v44 }
 0x53d   : >> { %v1288_v48 = vmul.f32 1.3333334, %v1284_v37  ;;  %v1287_v9 = vmul.f32 1.3333334, %v1283_v19  ;;  %v1353_v37 = vsub.f32 %v1341_v20, %v1349_v6 }
 0x53e   : >> { %v1282_v17 = vpop.permute.xlu1 %1281  ;;  %v1280_v36 = vpop.permute.xlu0 %1279 }
 0x53f   : >> { %v1286_v55 = vadd.f32 %v1282_v17, %v1274_v60  ;;  %v1285_v59 = vadd.f32 %v1280_v36, %v1273_v8 }
 0x541   : >> { %v1290_v29 = vmul.f32 1.3333334, %v1286_v55  ;;  %v1289_v36 = vmul.f32 1.3333334, %v1285_v59 }
 0x542   : >> { %v1318_v2 = vpop.permute.xlu1 %1317  ;;  %v1316_v12 = vpop.permute.xlu0 %1315 }
 0x543   : >> { %v1324_v41 = vadd.f32 %v1318_v2, %v1312_v10  ;;  %v1323_v45 = vadd.f32 %v1316_v12, %v1311_v40  ;;  %v1374_v40 = vstv %s1372_s15 }
 0x544   : >> { %v1375_v19 = vmul.f32 %v1374_v40, %v2668_v5 }
 0x545   : >> { %v1328_v28 = vmul.f32 -0.083333336, %v1324_v41  ;;  %v1327_v16 = vmul.f32 -0.083333336, %v1323_v45 }
 0x546   : >> { %v1322_v51 = vpop.permute.xlu1 %1321  ;;  %v1320_v24 = vpop.permute.xlu0 %1319 }
 0x547   : >> { %v1332_v47 = vadd.f32 %v1328_v28, %v1288_v48  ;;  %v1331_v27 = vadd.f32 %v1327_v16, %v1287_v9  ;;  %v1326_v52 = vadd.f32 %v1322_v51, %v1314_v1  ;;  %v1325_v17 = vadd.f32 %v1320_v24, %v1313_v43 }
 0x549   : >> { %v1360_v42 = vmul.f32 %v1332_v47, %v3005_v0  ;;  %v1359_v15 = vmul.f32 %v1331_v27, %v3007_v21  ;;  %v1330_v11 = vmul.f32 -0.083333336, %v1326_v52  ;;  %v1329_v22 = vmul.f32 -0.083333336, %v1325_v17 }
 0x54b   : >> { %v1364_v13 = vadd.f32 %v1360_v42, %v1352_v56  ;;  %v1363_v63 = vadd.f32 %v1359_v15, %v1351_v32  ;;  %v1334_v25 = vadd.f32 %v1330_v11, %v1290_v29  ;;  %v1333_v7 = vadd.f32 %v1329_v22, %v1289_v36 }
 0x54d   : >> { %1367 = vst [vmem:[#allocation2 + $0x38] sm:$0xff] %v1363_v63  ;;  %1368 = vst [vmem:[#allocation2 + $0x40] sm:$0xff] %v1364_v13  ;;  %v1362_v23 = vmul.f32 %v1334_v25, %v3018_v33  ;;  %v1361_v3 = vmul.f32 %v1333_v7, %v3020_v46 }
 0x54f   : >> { %v1366_v4 = vadd.f32 %v1362_v23, %v1354_v34  ;;  %v1365_v10 = vadd.f32 %v1361_v3, %v1353_v37 }
 0x551   : >> { %1370 = vst [vmem:[#allocation2 + $0x50] sm:$0xff] %v1366_v4  ;;  %1369 = vst [vmem:[#allocation2 + $0x48] sm:$0xff] %v1365_v10 }
 0x558   : >> { %v1894_v14 = vld [vmem:[%s2759_s30 + $0x38] sm:$0x1] }
 0x559   : >> { %v1376_v60 = vadd.f32 %v1894_v14, %v1375_v19 }
 0x55b   : >> { %1895 = vst [vmem:[%s2759_s30 + $0x38] sm:$0x1] %v1376_v60 }
 0x562   : >> { %v1896_v8 = vld [vmem:[%s2764_s17 + $0x38] sm:$0x1]  ;;  %v1383_v53 = vld [vmem:[#allocation2 + $0x40] sm:$0xff]  ;;  %v3144_v2 = vld [vmem:[#allocation2 + $0x50] sm:$0xff] }
 0x563   : >> { %v3138_v54 = vld [vmem:[#allocation2 + $0x38] sm:$0xff]  ;;  %1898 = vst [vmem:[%s2768_s0 + $0x6] sm:$0x1] %v1896_v8  ;;  %1404 = vrot.lane.b32.xlu1 %v1383_v53, %s2420_s2  ;;  %v3146_v12 = vld [vmem:[#allocation2 + $0x48] sm:$0xff]  ;;  %v1387_v23 = vld [vmem:[#allocation2 + $0x10] sm:$0xff]  ;;  %v1479_v37 = vmul.f32 %v1383_v53, %v2983_v35 }
 0x564   : >> { %1402 = vrot.lane.b32.xlu0 %v3138_v54, %s2420_s2  ;;  %v1391_v59 = vld [vmem:[#allocation2 + $0x3f] sm:$0xff]  ;;  %v1390_v43 = vld [vmem:[#allocation2 + $0x37] sm:$0xff]  ;;  %v1393_v56 = vld [vmem:[#allocation2 + $0x4f] sm:$0xff]  ;;  %v1478_v19 = vmul.f32 %v3138_v54, %v2987_v39 }
 0x565   : >> { %v1395_v61 = vld [vmem:[#allocation2 + $0x41] sm:$0xff]  ;;  %v1394_v9 = vld [vmem:[#allocation2 + $0x39] sm:$0xff]  ;;  %v1397_v27 = vld [vmem:[#allocation2 + $0x51] sm:$0xff] }
 0x566   : >> { %v1431_v30 = vld [vmem:[#allocation2 + $0x3e] sm:$0xff]  ;;  %v1399_v38 = vadd.f32 %v1395_v61, %v1391_v59  ;;  %v1430_v20 = vld [vmem:[#allocation2 + $0x36] sm:$0xff]  ;;  %v1398_v47 = vadd.f32 %v1394_v9, %v1390_v43  ;;  %v1392_v52 = vld [vmem:[#allocation2 + $0x47] sm:$0xff]  ;;  %v1401_v25 = vadd.f32 %v1397_v27, %v1393_v56  ;;  %v1487_v61 = vmul.f32 %v1387_v23, %v2985_v18 }
 0x567   : >> { %1408 = vrot.lane.b32.xlu1 %v3144_v2, %s2420_s2  ;;  %v1435_v51 = vld [vmem:[#allocation2 + $0x42] sm:$0xff]  ;;  %v1434_v24 = vld [vmem:[#allocation2 + $0x3a] sm:$0xff]  ;;  %v1433_v36 = vld [vmem:[#allocation2 + $0x4e] sm:$0xff] }
 0x568   : >> { %1406 = vrot.lane.b32.xlu0 %v3146_v12, %s2420_s2  ;;  %v1396_v17 = vld [vmem:[#allocation2 + $0x49] sm:$0xff]  ;;  %v1439_v15 = vadd.f32 %v1435_v51, %v1431_v30  ;;  %v1438_v11 = vadd.f32 %v1434_v24, %v1430_v20  ;;  %v1437_v22 = vld [vmem:[#allocation2 + $0x52] sm:$0xff]  ;;  %v1389_v35 = vld [vmem:[#allocation2 + $0x20] sm:$0xff]  ;;  %v1481_v30 = vmul.f32 %v3144_v2, %v2996_v26  ;;  %s1510_s2 = sadd.s32 7, %s2746_s23  ;;  %s2298_s23 = scalar_lea.vmem (%p394_p13), %s3208_s16, 1024 }
 0x569   : >> { %v1432_v13 = vld [vmem:[#allocation2 + $0x46] sm:$0xff]  ;;  %v1400_v7 = vadd.f32 %v1396_v17, %v1392_v52  ;;  %v1441_v8 = vadd.f32 %v1437_v22, %v1433_v36  ;;  %v1489_v18 = vmul.f32 %v1389_v35, %v2999_v49  ;;  %v1491_v17 = vsub.f32 %v1479_v37, %v1487_v61  ;;  %v1532_v37 = vld [vmem:[#allocation16 + $0x18] sm:$0xff] (%p394_p13)  ;;  %v1539_v61 = vld [vmem:[#allocation16 + $0x50] sm:$0xff] (%p394_p13)  ;;  %p2299_p1 = scmp.ne.s32.totalorder (%p394_p13), %s3208_s16, %s2298_s23 }
 0x56a   : >> { %v1436_v63 = vld [vmem:[#allocation2 + $0x4a] sm:$0xff] }
 0x56b   : >> { %1444 = vrot.lane.b32.xlu1 %v1383_v53, %s2421_s21  ;;  %v1386_v3 = vld [vmem:[#allocation2 + $0x8] sm:$0xff]  ;;  %p2300_p11 = pnand (%p394_p13), %p2299_p1, %p3292_p4 }
 0x56c   : >> { %1442 = vrot.lane.b32.xlu0 %v3138_v54, %s2421_s21  ;;  %v1486_v9 = vmul.f32 %v1386_v3, %v2989_v31  ;;  %v1480_v31 = vmul.f32 %v3146_v12, %v3001_v50  ;;  %v1542_v35 = vld [vmem:[#allocation16 + $0x68] sm:$0xff] (%p394_p13) }
 0x56d   : > { %p2301_p7 = pneg (%p394_p13), %p2300_p11 }
 0x56f   : >> { %1448 = vrot.lane.b32.xlu1 %v3144_v2, %s2421_s21 }
 0x570   : >> { %1446 = vrot.lane.b32.xlu0 %v3146_v12, %s2421_s21  ;;  %s1511_s21 = sld [smem:[#allocation4 + %s1510_s2]] }
 0x573   : >> { %1416 = vrot.lane.b32.xlu1 %v1383_v53, %s2422_s22 }
 0x574   : >> { %1414 = vrot.lane.b32.xlu0 %v3138_v54, %s2422_s22 }
 0x576   : >> { %v1513_v22 = vstv %s1511_s21 }
 0x577   : >> { %1420 = vrot.lane.b32.xlu1 %v3144_v2, %s2422_s22 }
 0x578   : >> { %1418 = vrot.lane.b32.xlu0 %v3146_v12, %s2422_s22 }
 0x57b   : >> { %1456 = vrot.lane.b32.xlu1 %v1383_v53, %s2423_s19  ;;  %v1388_v53 = vld [vmem:[#allocation2 + $0x18] sm:$0xff] }
 0x57c   : >> { %1454 = vrot.lane.b32.xlu0 %v3138_v54, %s2423_s19  ;;  %v1488_v51 = vmul.f32 %v1388_v53, %v3003_v57 }
 0x57f   : >> { %1460 = vrot.lane.b32.xlu1 %v3144_v2, %s2423_s19 }
 0x580   : >> { %1458 = vrot.lane.b32.xlu0 %v3146_v12, %s2423_s19  ;;  %s3206_s19 = scalar_lea.hbm (%p394_p13), %s3269_s7, %s1909_s4 }
 0x5d5   : >> { %v1405_v58 = vpop.permute.xlu1 %1404 }
 0x5d6   : >> { %v1403_v41 = vpop.permute.xlu0 %1402  ;;  %v1411_v29 = vadd.f32 %v1405_v58, %v1399_v38  ;;  %v1440_v58 = vadd.f32 %v1436_v63, %v1432_v13  ;;  %v1514_v13 = vmul.f32 %v1513_v22, %v2668_v5 }
 0x5d7   : >> { %v1410_v42 = vadd.f32 %v1403_v41, %v1398_v47 }
 0x5d9   : >> { %v1409_v44 = vpop.permute.xlu1 %1408 }
 0x5da   : >> { %v1407_v45 = vpop.permute.xlu0 %1406  ;;  %v1413_v14 = vadd.f32 %v1409_v44, %v1401_v25 }
 0x5db   : >> { %v1412_v60 = vadd.f32 %v1407_v45, %v1400_v7 }
 0x5dd   : >> { %v1445_v62 = vpop.permute.xlu1 %1444 }
 0x5de   : >> { %v1443_v1 = vpop.permute.xlu0 %1442  ;;  %v1451_v4 = vadd.f32 %v1445_v62, %v1439_v15  ;;  %v1492_v15 = vsub.f32 %v1480_v31, %v1488_v51 }
 0x5df   : >> { %v1450_v10 = vadd.f32 %v1443_v1, %v1438_v11 }
 0x5e1   : >> { %v1449_v48 = vpop.permute.xlu1 %1448 }
 0x5e2   : >> { %v1447_v55 = vpop.permute.xlu0 %1446  ;;  %v1453_v62 = vadd.f32 %v1449_v48, %v1441_v8  ;;  %v1536_v8 = vld [vmem:[#allocation16 + $0x38] sm:$0xff] (%p394_p13) }
 0x5e3   : >> { %v1452_v39 = vadd.f32 %v1447_v55, %v1440_v58  ;;  %v1537_v58 = vld [vmem:[#allocation16 + $0x40] sm:$0xff] (%p394_p13) }
 0x5e5   : >> { %v1417_v28 = vpop.permute.xlu1 %1416 }
 0x5e6   : >> { %v1415_v16 = vpop.permute.xlu0 %1414  ;;  %v1423_v34 = vadd.f32 %v1417_v28, %v1411_v29  ;;  %v1490_v29 = vsub.f32 %v1478_v19, %v1486_v9 }
 0x5e7   : >> { %v1422_v40 = vadd.f32 %v1415_v16, %v1410_v42 }
 0x5e8   : >> { %v1427_v1 = vmul.f32 1.3333334, %v1423_v34  ;;  %v1531_v34 = vld [vmem:[#allocation16 + $0x10] sm:$0xff] (%p394_p13) }
 0x5e9   : >> { %v1421_v32 = vpop.permute.xlu1 %1420  ;;  %v1426_v54 = vmul.f32 1.3333334, %v1422_v40  ;;  %v1982_v3 = vpack.c.bf16 (%p394_p13), %v1532_v37, %v1531_v34 }
 0x5ea   : >> { %v1419_v6 = vpop.permute.xlu0 %1418  ;;  %v1425_v16 = vadd.f32 %v1421_v32, %v1413_v14 }
 0x5eb   : >> { %v1424_v56 = vadd.f32 %v1419_v6, %v1412_v60  ;;  %v1493_v6 = vsub.f32 %v1481_v30, %v1489_v18  ;;  %v1535_v60 = vld [vmem:[#allocation16 + $0x30] sm:$0xff] (%p394_p13) }
 0x5ec   : >> { %v1429_v27 = vmul.f32 1.3333334, %v1425_v16  ;;  %v1990_v5 = vpack.c.bf16 (%p394_p13), %v1536_v8, %v1535_v60 }
 0x5ed   : >> { %v1457_v41 = vpop.permute.xlu1 %1456  ;;  %v1428_v52 = vmul.f32 1.3333334, %v1424_v56 }
 0x5ee   : >> { %v1455_v59 = vpop.permute.xlu0 %1454  ;;  %v1463_v43 = vadd.f32 %v1457_v41, %v1451_v4  ;;  %v1533_v4 = vld [vmem:[#allocation16 + $0x20] sm:$0xff] (%p394_p13)  ;;  %v1538_v41 = vld [vmem:[#allocation16 + $0x48] sm:$0xff] (%p394_p13) }
 0x5ef   : >> { %v1462_v28 = vadd.f32 %v1455_v59, %v1450_v10  ;;  %v1534_v10 = vld [vmem:[#allocation16 + $0x28] sm:$0xff] (%p394_p13)  ;;  %v1994_v59 = vpack.c.bf16 (%p394_p13), %v1538_v41, %v1537_v58 }
 0x5f0   : >> { %v1467_v44 = vmul.f32 -0.083333336, %v1463_v43  ;;  %v1986_v40 = vpack.c.bf16 (%p394_p13), %v1534_v10, %v1533_v4  ;;  %v1540_v43 = vld [vmem:[#allocation16 + $0x58] sm:$0xff] (%p394_p13) }
 0x5f1   : >> { %v1466_v45 = vmul.f32 -0.083333336, %v1462_v28  ;;  %v1461_v38 = vpop.permute.xlu1 %1460  ;;  %v1998_v9 = vpack.c.bf16 (%p394_p13), %v1540_v43, %v1539_v61  ;;  %v1541_v28 = vld [vmem:[#allocation16 + $0x60] sm:$0xff] (%p394_p13) }
 0x5f2   : >> { %v1459_v20 = vpop.permute.xlu0 %1458  ;;  %v1471_v48 = vadd.f32 %v1467_v44, %v1427_v1  ;;  %v1465_v47 = vadd.f32 %v1461_v38, %v1453_v62  ;;  %v2002_v53 = vpack.c.bf16 (%p394_p13), %v1542_v35, %v1541_v28  ;;  %v1543_v62 = vld [vmem:[#allocation16 + $0x70] sm:$0xff] (%p394_p13)  ;;  %v1544_v1 = vld [vmem:[#allocation16 + $0x78] sm:$0xff] (%p394_p13) }
 0x5f3   : >> { %v1470_v24 = vadd.f32 %v1466_v45, %v1426_v54  ;;  %v1464_v55 = vadd.f32 %v1459_v20, %v1452_v39  ;;  %v2006_v16 = vpack.c.bf16 (%p394_p13), %v1544_v1, %v1543_v62 }
 0x5f4   : >> { %v1499_v26 = vmul.f32 %v1471_v48, %v3005_v0  ;;  %v1469_v2 = vmul.f32 -0.083333336, %v1465_v47 }
 0x5f5   : >> { %v1498_v49 = vmul.f32 %v1470_v24, %v3007_v21  ;;  %v1468_v36 = vmul.f32 -0.083333336, %v1464_v55 }
 0x5f6   : >> { %v1503_v50 = vadd.f32 %v1499_v26, %v1491_v17  ;;  %v1473_v12 = vadd.f32 %v1469_v2, %v1429_v27 }
 0x5f7   : >> { %v1502_v57 = vadd.f32 %v1498_v49, %v1490_v29  ;;  %v1472_v32 = vadd.f32 %v1468_v36, %v1428_v52 }
 0x5f8   : >> { %1507 = vst [vmem:[#allocation2 + $0x10] sm:$0xff] %v1503_v50  ;;  %v1501_v42 = vmul.f32 %v1473_v12, %v3018_v33  ;;  %v1529_v33 = vld [vmem:[#allocation16] sm:$0xff] (%p394_p13) }
 0x5f9   : >> { %1506 = vst [vmem:[#allocation2 + $0x8] sm:$0xff] %v1502_v57  ;;  %v1500_v0 = vmul.f32 %v1472_v32, %v3020_v46  ;;  %v1530_v46 = vld [vmem:[#allocation16 + $0x8] sm:$0xff] (%p394_p13) }
 0x5fa   : >> { %v1505_v21 = vadd.f32 %v1501_v42, %v1493_v6  ;;  %v1978_v23 = vpack.c.bf16 (%p394_p13), %v1530_v46, %v1529_v33 }
 0x5fb   : >> { %v1504_v11 = vadd.f32 %v1500_v0, %v1492_v15 }
 0x5fc   : >> { %1509 = vst [vmem:[#allocation2 + $0x20] sm:$0xff] %v1505_v21  ;;  %1979 = vmatprep.subr.bf16.mxu0 (%p394_p13), %v1978_v23  ;;  %2010 = vmatprep.subr.bf16.mxu1 (%p394_p13), %v1978_v23 }
 0x5fd   : >> { %1508 = vst [vmem:[#allocation2 + $0x18] sm:$0xff] %v1504_v11  ;;  %1981 = vmatpush3.bf16.msra.mxu0 (%p394_p13), %v1978_v23  ;;  %2018 = vmatpush3.bf16.msra.mxu1 (%p394_p13), %v1978_v23 }
 0x5fe   : > { %1983 = vmatprep.subr.bf16.mxu0 (%p394_p13), %v1982_v3  ;;  %2011 = vmatprep.subr.bf16.mxu1 (%p394_p13), %v1982_v3 }
 0x601   : > { %1985 = vmatpush3.bf16.msra.mxu0 (%p394_p13), %v1982_v3  ;;  %2019 = vmatpush3.bf16.msra.mxu1 (%p394_p13), %v1982_v3 }
 0x602   : > { %1987 = vmatprep.subr.bf16.mxu0 (%p394_p13), %v1986_v40  ;;  %2012 = vmatprep.subr.bf16.mxu1 (%p394_p13), %v1986_v40 }
 0x604   : >> { %v1899_v63 = vld [vmem:[%s2759_s30 + $0x8] sm:$0x1] }
 0x605   : >> { %v1515_v25 = vadd.f32 %v1899_v63, %v1514_v13  ;;  %1989 = vmatpush3.bf16.msra.mxu0 (%p394_p13), %v1986_v40  ;;  %2020 = vmatpush3.bf16.msra.mxu1 (%p394_p13), %v1986_v40 }
 0x606   : > { %1991 = vmatprep.subr.bf16.mxu0 (%p394_p13), %v1990_v5  ;;  %2013 = vmatprep.subr.bf16.mxu1 (%p394_p13), %v1990_v5 }
 0x607   : >> { %1900 = vst [vmem:[%s2759_s30 + $0x8] sm:$0x1] %v1515_v25  ;;  %s2424_s30 = smov (%p394_p13), [#allocation18]  }
 0x609   : > { %1993 = vmatpush3.bf16.msra.mxu0 (%p394_p13), %v1990_v5  ;;  %2021 = vmatpush3.bf16.msra.mxu1 (%p394_p13), %v1990_v5 }
 0x60a   : > { %1995 = vmatprep.subr.bf16.mxu0 (%p394_p13), %v1994_v59  ;;  %2014 = vmatprep.subr.bf16.mxu1 (%p394_p13), %v1994_v59 }
 0x60c   : > { %396 = sbr.rel (!%p394_p13) target bundleno = 178 (0xb2), region = 137 }
 0x60d   : > { %1997 = vmatpush3.bf16.msra.mxu0 (%p394_p13), %v1994_v59  ;;  %2022 = vmatpush3.bf16.msra.mxu1 (%p394_p13), %v1994_v59 }
 0x60e   : >> { %v1901_v7 = vld [vmem:[%s2764_s17 + $0x8] sm:$0x1]  ;;  %1999 = vmatprep.subr.bf16.mxu0 (%p394_p13), %v1998_v9  ;;  %2015 = vmatprep.subr.bf16.mxu1 (%p394_p13), %v1998_v9  ;;  %s2302_s17 = sshll.u32 (%p394_p13), %s2424_s30, 4  ;;  %s2303_s17 = int_to_ptr.vmem [resolvable:$false] %s2302_s17 }
 0x60f   : >> { %1903 = vst [vmem:[%s2768_s0 + $0x7] sm:$0x1] %v1901_v7  ;;  %s2304_s0 = scalar_lea.vmem (%p394_p13), %s2303_s17, 2048  ;;  %p2305_p9 = scmp.lt.s32.totalorder (%p394_p13), %s3208_s16, %s2303_s17 }
 0x610   : > { %p2306_p12 = scmp.lt.s32.totalorder (%p394_p13), %s2304_s0, %s2298_s23 }
 0x611   : > { %2001 = vmatpush3.bf16.msra.mxu0 (%p394_p13), %v1998_v9  ;;  %2023 = vmatpush3.bf16.msra.mxu1 (%p394_p13), %v1998_v9 }
 0x612   : > { %2003 = vmatprep.subr.bf16.mxu0 (%p394_p13), %v2002_v53  ;;  %2016 = vmatprep.subr.bf16.mxu1 (%p394_p13), %v2002_v53  ;;  %p2307_p0 = por (%p394_p13), %p2306_p12, %p2305_p9 }
 0x614   : > { %p2308_p2 = pnand %p2307_p0, %p2301_p7 }
 0x615   : > { %2005 = vmatpush3.bf16.msra.mxu0 %v2002_v53  ;;  %2024 = vmatpush3.bf16.msra.mxu1 %v2002_v53 }
 0x616   : > { %v1521_v19 = vld [vmem:[#allocation3] sm:$0xff]  ;;  %2007 = vmatprep.subr.bf16.mxu0 %v2006_v16  ;;  %2017 = vmatprep.subr.bf16.mxu1 %v2006_v16  ;;  %v1522_v56 = vld [vmem:[#allocation3 + $0x8] sm:$0xff]  ;;  %v1523_v54 = vld [vmem:[#allocation3 + $0x10] sm:$0xff] }
 0x617   : > { %v1525_v14 = vld [vmem:[#allocation3 + $0x20] sm:$0xff]  ;;  %1966 = vmatprep.mubr.f32.mxu0 %v1521_v19  ;;  %v1526_v39 = vld [vmem:[#allocation3 + $0x28] sm:$0xff]  ;;  %v1527_v44 = vld [vmem:[#allocation3 + $0x30] sm:$0xff] }
 0x618   : > { %1972 = vmatprep.mubr.f32.mxu1 %v1525_v14  ;;  %v1524_v45 = vld [vmem:[#allocation3 + $0x18] sm:$0xff] }
 0x619   : > { %2009 = vmatpush3.bf16.msra.mxu0 %v2006_v16  ;;  %2025 = vmatpush3.bf16.msra.mxu1 %v2006_v16  ;;  %v1528_v30 = vld [vmem:[#allocation3 + $0x38] sm:$0xff] }
 0x61c   : > { %1967 = vmatmul.mubr.f32.vlgmr.msra.gmra.mrb[0].mxu0 %v1522_v56  ;;  %1973 = vmatmul.mubr.f32.vlgmr.msra.gmra.mrb[0].mxu1 %v1526_v39 }
 0x61d   : > { %1969 = vmatprep.mubr.f32.mxu0 %v1523_v54  ;;  %1975 = vmatprep.mubr.f32.mxu1 %v1527_v44 }
 0x620   : > { %1970 = vmatmul.mubr.f32.gmra.mrb[2].mxu0 %v1524_v45  ;;  %1976 = vmatmul.mubr.f32.gmra.mrb[2].mxu1 %v1528_v30 }
 0x6ef   : > { %v1968_v18 = vpop.f32.mrb[0].mxu0  ;;  %v1974_v38 = vpop.f32.mrb[0].mxu1 }
 0x6f0   : > { %1651 = vst [vmem:[%s2670_s12 + $0x8] sm:$0xff] %v1968_v18  ;;  %1655 = vst [vmem:[%s2670_s12 + $0x28] sm:$0xff] %v1974_v38  ;;  %v1611_v31 = vpop.f32.mrb[1].mxu0  ;;  %v1631_v51 = vpop.f32.mrb[1].mxu1 }
 0x6f1   : > { %1650 = vst [vmem:[%s2670_s12] sm:$0xff] %v1611_v31  ;;  %1654 = vst [vmem:[%s2670_s12 + $0x20] sm:$0xff] %v1631_v51 }
 0x6f3   : > { %v1971_v20 = vpop.f32.mrb[2].mxu0  ;;  %v1977_v48 = vpop.f32.mrb[2].mxu1 }
 0x6f4   : > { %1653 = vst [vmem:[%s2670_s12 + $0x18] sm:$0xff] %v1971_v20  ;;  %1657 = vst [vmem:[%s2670_s12 + $0x38] sm:$0xff] %v1977_v48  ;;  %v1621_v24 = vpop.f32.mrb[3].mxu0  ;;  %v1641_v47 = vpop.f32.mrb[3].mxu1 }
 0x6f5   : > { %1652 = vst [vmem:[%s2670_s12 + $0x10] sm:$0xff] %v1621_v24  ;;  %1656 = vst [vmem:[%s2670_s12 + $0x30] sm:$0xff] %v1641_v47 }
 0x6f6   : > { %2311 = shalt.err (!%p2308_p2)
}
 0x6f7   : > { %s2312_s3 = scalar_lea.hbm %s3206_s19, 1024  ;;  %s2316_s8 = scalar_lea.hbm %s3269_s7, 2048 }
 0x6f8   : > { %p2313_p3 = scmp.ne.s32.totalorder %s3206_s19, %s2312_s3  ;;  %p2317_p8 = scmp.lt.u32.totalorder %s3206_s19, %s3269_s7 }
 0x6f9   : > { %p2318_p10 = scmp.lt.u32.totalorder %s2316_s8, %s2312_s3  ;;  %p2320_p1 = scmp.lt.u32.totalorder %s2312_s3, %s3206_s19 }
 0x6fa   : > { %p2314_p5 = pnand %p2313_p3, %p3292_p4 }
 0x6fb   : > { %p2319_p13 = por %p2318_p10, %p2317_p8 }
 0x6fc   : > { %p2315_p6 = pneg %p2314_p5 }
 0x6fd   : > { %p2321_p11 = por %p2320_p1, %p2319_p13 }
 0x6ff   : > { %p2322_p7 = pnand %p2321_p11, %p2315_p6 }
 0x701   : > { %2325 = shalt.err (!%p2322_p7)
}
 0x702   : > { %s2425_s15 = smov 128   ;;  %s2426_s2 = smov 8  }
 0x703   : > { %2054 = dma.vmem_to_hbm [thread:$0]  (%p3292_p4), %s3208_s16, 1024, %s3206_s19, %s3216_s27, %s2425_s15, %s2425_s15, %s2426_s2  }
 0x704 PF: > { %p2096_p9 = scmp.ge.s32.totalorder %s2404_s29, 2  ;;  %s1689_s21 = sand.u32 1, %s2384_s24  }
 0x705   : > { %p3293_p12 = scmp.ne.s32.totalorder %s3280_s13, 0  ;;  %s1690_s4 = scalar_lea.sflag [#allocation6], %s1689_s21 }
 0x707   : > { %p2079_p0 = pnand %p2096_p9, %p3293_p12 }
 0x709   : > { %2379 = dma.done.wait (!%p2079_p0), %s1690_s4, 1024  }
 0x70a   : > { %2381 = vsyncadd (!%p2079_p0), %s1690_s4, 4294966272  ;;  %s26_s29 = sadd.s32 1, %s2404_s29   ;;  %s3294_s24 = smov %s2388_s25 }
 0x70b   : > { %p23_p2 = scmp.ge.s32.totalorder %s26_s29, 4   ;;  %s3295_s25 = smov %s2392_s26 }
 0x70c   : > { %s3296_s26 = smov %s2520_s14  ;;  %s3297_s27 = smov %s2400_s28 }
 0x70d   : > { %s3298_s28 = smov %s3300_s9  ;;  %25 = sbr.rel (!%p23_p2) target bundleno = 16 (0x10), region = 148 }
 0x714   :  { %1695 = vsyncpa [#allocation5], 1 }
 0x715   :  { %1697 = vsyncpa [#allocation5 + $0x1], 1 }
 0x716   :  { %1698 = vsyncpa [#allocation17], 1 }
 0x717   :  { %1699 = vsyncpa [#allocation6], 1 }
 0x718   :  { %1701 = vsyncpa [#allocation6 + $0x1], 1 }
 0x719   :  { %1702 = vsyncpa [#allocation7], 1 }
 0x71a   :  { %1704 = vsyncpa [#allocation7 + $0x1], 1 }
 0x71b   :  { %1705 = vsyncpa [#allocation8], 1 }
 0x71c   :  { %1707 = vsyncpa [#allocation8 + $0x1], 1 }
 0x71d   :  { %1708 = vsyncpa [#allocation11], 1 }
 0x71e   :  { %1709 = vsyncpa [#allocation14], 1 }

// kernel: tpu_custom_call.1
= control target key start
LH: loop header
LB: loop body
LE: loop exit
PB: predicated region body
PF: predicated region fallthrough
CT: control target
= control target key end

     0   :  { %s3262_s0 = inlined_call_operand.hbm [shape: f32[64], index: 0, kind: input, shape index: {}]   ;;  %s3263_s1 = inlined_call_operand.vmem [shape: s32[2], index: 1, kind: input, shape index: {}]   ;;  %s3264_s2 = inlined_call_operand.vmem [shape: s32[2], index: 2, kind: input, shape index: {}]   ;;  %s3265_s3 = inlined_call_operand.vmem [shape: s32[2], index: 3, kind: input, shape index: {}]   ;;  %s3266_s4 = inlined_call_operand.vmem [shape: f32[2], index: 4, kind: input, shape index: {}]   ;;  %s3267_s5 = inlined_call_operand.hbm [shape: f32[3,32,128], index: 5, kind: input, shape index: {}]   ;;  %s3268_s6 = inlined_call_operand.hbm [shape: f32[1,128,128], index: 6, kind: input, shape index: {}]   ;;  %s3269_s7 = inlined_call_operand.hbm [shape: f32[2,64,128], index: 7, kind: output, shape index: {}]  }
   0x1   :  { %3274 = sst [smem:[#allocation26_spill]] %s3262_s0 }
   0x2   :  { %3275 = sst [smem:[#allocation27_spill]] %s3263_s1 }
   0x3   :  { %3276 = sst [smem:[#allocation28_spill]] %s3264_s2 }
   0x4   :  { %3277 = sst [smem:[#allocation29_spill]] %s3265_s3 }
   0x5   :  { %3278 = sst [smem:[#allocation30_spill]] %s3266_s4 }
   0x6   :  { %12 = vsyncpa [#allocation7], 0 }
   0x7   :  { %13 = vsyncpa [#allocation8], 0 }
   0x8   :  { %14 = vsyncpa [#allocation11], 0 }
   0x9   :  { %15 = vsyncpa [#allocation14], 0 }
   0xa   :  { %16 = vsyncpa [#allocation5], 0 }
   0xb   :  { %17 = vsyncpa [#allocation17], 0 }
   0xc   :  { %18 = vsyncpa [#allocation6], 0 }
   0xd   :  { %20 = vsyncpa [#allocation6 + $0x1], 0  ;;  %s2467_s24 = smov 0   ;;  %s2469_s25 = smov 0  }
   0xe   :  { %s2471_s26 = smov 0   ;;  %s2473_s27 = smov 0  }
   0xf   :  { %s2475_s28 = smov 0   ;;  %s2477_s29 = smov 0  }
  0x10 LB: > { %s1846_s30 = sadd.s32 4294967295, %s2404_s29   ;;  %s1847_s8 = sadd.s32 4294967294, %s2404_s29   ;;  %s2404_s29 = sphi %s2477_s29, %s26_s29   ;;  %s2400_s28 = sphi %s2475_s28, %s3298_s28   ;;  %s2396_s27 = sphi %s2473_s27, %s3297_s27   ;;  %s2392_s26 = sphi %s2471_s26, %s3296_s26   ;;  %s2388_s25 = sphi %s2469_s25, %s3295_s25   ;;  %s2384_s24 = sphi %s2467_s24, %s3294_s24  }
  0x11   : > { %s38_s9 = sadd.s32 1, %s2400_s28  ;;  %s194_s10 = sadd.s32 1, %s2392_s26 }
  0x12   : > { %p40_p0 = scmp.ge.s32.totalorder %s38_s9, 2  ;;  %p204_p1 = scmp.ne.s32.totalorder %s2392_s26, %s2388_s25 }
  0x13   : > { %p205_p2 = scmp.eq.s32.totalorder %s1846_s30, 1  ;;  %p210_p3 = scmp.ne.s32.totalorder %s2388_s25, %s2384_s24 }
  0x14   : > { %s3300_s9 = smov (%p40_p0, %s38_s9), 0  ;;  %p211_p5 = scmp.eq.s32.totalorder %s1847_s8, 1 }
  0x15   : > { %p2507_p4 = por %p205_p2, %p204_p1  ;;  %s189_s12 = ssub.s32 %s2400_s28, %s3300_s9 }
  0x16   : > { %p1848_p6 = scmp.ge.s32.totalorder %s2404_s29, 1  ;;  %p192_p7 = scmp.eq.s32.totalorder %s189_s12, 0 }
  0x17   : > { %s3279_s11 = scalar_select %p2507_p4, 1, 0 }
  0x18   : > { %p2514_p8 = por %p211_p5, %p210_p3  ;;  %p218_p9 = scmp.lt.s32.totalorder %s2404_s29, 3 }
  0x19   : > { %s2520_s14 = scalar_select %p192_p7, %s2392_s26, %s194_s10  }
  0x1a   : > { %s3280_s13 = scalar_select %p2514_p8, 1, 0 }
  0x1b   : > { %p2522_p10 = pnand %p1848_p6, %p218_p9  ;;  %p2526_p11 = scmp.eq.s32.totalorder %s1846_s30, 0 }
  0x1c   : > { %s3283_s2 = sld [smem:[#allocation28_spill]]  ;;  %s3285_s1 = sld [smem:[#allocation27_spill]] }
  0x1d   : > { %s3281_s15 = scalar_select %p2522_p10, 1, 0 }
  0x1e   : > { %s3282_s16 = scalar_select %p2526_p11, 1, 0 }
  0x1f   : > { %p2056_p12 = pneg %p2522_p10 }
  0x21   : > { %p2537_p13 = pnand %p2526_p11, %p2056_p12 }
  0x22   : > { %s251_s19 = sshll.u32 %s3283_s2, 4  ;;  %s240_s23 = sshll.u32 %s3285_s1, 4  ;;  %s252_s19 = int_to_ptr.vmem [resolvable:$true] %s251_s19  ;;  %s2544_s23 = int_to_ptr.vmem [resolvable:$true] %s240_s23 }
  0x23   : > { %s2169_s30 = scalar_lea.vmem %s252_s19, 16  ;;  %p2548_p1 = pneg %p2537_p13 }
  0x24   : > { %p2170_p0 = scmp.ne.s32.totalorder %s252_s19, %s2169_s30  ;;  %p2177_p5 = scmp.lt.s32.totalorder %s252_s19, %s252_s19 }
  0x25   : > { %p2178_p6 = scmp.lt.s32.totalorder %s2169_s30, %s2169_s30 }
  0x26   : > { %p2172_p2 = pnand %p2548_p1, %p2170_p0 }
  0x27   : > { %p2179_p7 = por %p2178_p6, %p2177_p5 }
  0x28   : > { %p2173_p3 = pneg %p2172_p2 }
  0x2a   : > { %p2180_p9 = pnand %p2179_p7, %p2173_p3 }
  0x2c   : > { %2183 = shalt.err (!%p2180_p9)
}
  0x2d   : > { %s2410_s10 = smov [#allocation10]   ;;  %s3287_s0 = sld [smem:[#allocation26_spill]] }
  0x2e   : > { %2065 = dma.vmem_to_smem (!%p2537_p13), %s252_s19, 16, %s2410_s10, [#allocation11]  }
  0x33   : > { %s2184_s18 = scalar_lea.hbm %s3287_s0, 16 }
  0x34   : > { %p2185_p12 = scmp.ne.s32.totalorder %s3287_s0, %s2184_s18  ;;  %p2191_p3 = scmp.lt.u32.totalorder %s2184_s18, %s3287_s0 }
  0x36   : > { %p2187_p0 = pnand %p2185_p12, %p2548_p1 }
  0x38   : > { %p2188_p2 = pneg %p2187_p0 }
  0x3a   : > { %p2193_p5 = pnand %p2191_p3, %p2188_p2 }
  0x3c   : > { %2196 = shalt.err (!%p2193_p5)
}
  0x3d   : > { %s2411_s2 = smov [#allocation4]   ;;  %s2197_s12 = scalar_lea.vmem %s2544_s23, 16 }
  0x3e   : > { %2059 = dma.hbm_to_smem (!%p2537_p13), %s3287_s0, 16, %s2411_s2, [#allocation7]  }
  0x3f   : > { %p2198_p6 = scmp.ne.s32.totalorder %s2544_s23, %s2197_s12  ;;  %p2205_p12 = scmp.lt.s32.totalorder %s2544_s23, %s2544_s23 }
  0x40   : > { %p2206_p0 = scmp.lt.s32.totalorder %s2197_s12, %s2197_s12 }
  0x41   : > { %p2200_p7 = pnand %p2198_p6, %p2548_p1 }
  0x42   : > { %p2207_p2 = por %p2206_p0, %p2205_p12 }
  0x43   : > { %p2201_p9 = pneg %p2200_p7 }
  0x45   : > { %p2208_p3 = pnand %p2207_p2, %p2201_p9 }
  0x47   : > { %2211 = shalt.err (!%p2208_p3)
}
  0x48   : > { %s2412_s1 = smov [#allocation9]   ;;  %s3288_s3 = sld [smem:[#allocation29_spill]] }
  0x49   : > { %2062 = dma.vmem_to_smem (!%p2537_p13), %s2544_s23, 16, %s2412_s1, [#allocation8]  }
  0x4a   : > { %s3289_s4 = sld [smem:[#allocation30_spill]] }
  0x4e   : > { %s262_s2 = sshll.u32 %s3288_s3, 4  ;;  %s263_s2 = int_to_ptr.vmem [resolvable:$true] %s262_s2 }
  0x4f   : > { %s2212_s19 = scalar_lea.vmem %s263_s2, 16  ;;  %p2220_p9 = scmp.lt.s32.totalorder %s263_s2, %s263_s2 }
  0x50   : > { %s273_s30 = sshll.u32 %s3289_s4, 4  ;;  %p2213_p5 = scmp.ne.s32.totalorder %s263_s2, %s2212_s19  ;;  %s274_s30 = int_to_ptr.vmem [resolvable:$true] %s273_s30 }
  0x51   : > { %p2221_p12 = scmp.lt.s32.totalorder %s2212_s19, %s2212_s19 }
  0x52   : > { %p2215_p6 = pnand %p2213_p5, %p2548_p1 }
  0x53   : > { %p2222_p0 = por %p2221_p12, %p2220_p9 }
  0x54   : > { %p2216_p7 = pneg %p2215_p6 }
  0x56   : > { %p2223_p2 = pnand %p2222_p0, %p2216_p7 }
  0x58   : > { %2226 = shalt.err (!%p2223_p2)
}
  0x59   : > { %s2413_s23 = smov [#allocation12]   ;;  %s2227_s10 = scalar_lea.vmem %s274_s30, 16 }
  0x5a   : > { %2068 = dma.vmem_to_smem (!%p2537_p13), %s263_s2, 16, %s2413_s23, [#allocation11]  }
  0x5b   : > { %p2228_p3 = scmp.ne.s32.totalorder %s274_s30, %s2227_s10  ;;  %p2235_p11 = scmp.lt.s32.totalorder %s274_s30, %s274_s30 }
  0x5c   : > { %p2236_p10 = scmp.lt.s32.totalorder %s2227_s10, %s2227_s10 }
  0x5d   : > { %p2230_p8 = pnand %p2228_p3, %p2548_p1 }
  0x5e   : > { %p2237_p5 = por %p2236_p10, %p2235_p11 }
  0x5f   : > { %p2231_p4 = pneg %p2230_p8 }
  0x61   : > { %p2238_p6 = pnand %p2237_p5, %p2231_p4 }
  0x63   : > { %2241 = shalt.err (!%p2238_p6)
}
  0x64   : > { %s2414_s12 = smov [#allocation13]   ;;  %s2415_s1 = smov [#allocation15]  }
  0x65   : > { %2071 = dma.vmem_to_smem (!%p2537_p13), %s274_s30, 16, %s2414_s12, [#allocation14]  }
  0x66   : > { %s283_s17 = sshll.u32 %s2415_s1, 4  ;;  %s2242_s21 = scalar_lea.hbm %s3267_s5, 1536  ;;  %s284_s17 = int_to_ptr.vmem [resolvable:$true] %s283_s17 }
  0x67   : > { %p2243_p8 = scmp.ne.s32.totalorder %s3267_s5, %s2242_s21  ;;  %p2249_p11 = scmp.lt.u32.totalorder %s2242_s21, %s3267_s5 }
  0x69   : > { %p2245_p10 = pnand %p2243_p8, %p2548_p1 }
  0x6b   : > { %p2246_p4 = pneg %p2245_p10 }
  0x6d   : > { %p2251_p7 = pnand %p2249_p11, %p2246_p4 }
  0x6f   : > { %2254 = shalt.err (!%p2251_p7)
}
  0x70   : > { %s2255_s30 = scalar_lea.vmem %s284_s17, 1536  ;;  %p2263_p2 = scmp.lt.s32.totalorder %s284_s17, %s284_s17 }
  0x71   : > { %p2256_p9 = scmp.ne.s32.totalorder %s284_s17, %s2255_s30  ;;  %p2264_p3 = scmp.lt.s32.totalorder %s2255_s30, %s2255_s30 }
  0x73   : > { %p2258_p12 = pnand %p2256_p9, %p2548_p1  ;;  %p2265_p5 = por %p2264_p3, %p2263_p2 }
  0x75   : > { %p2259_p0 = pneg %p2258_p12 }
  0x77   : > { %p2266_p6 = pnand %p2265_p5, %p2259_p0 }
  0x79   : > { %2269 = shalt.err (!%p2266_p6)
}
  0x7a   : > { %s2416_s12 = smov 128   ;;  %s2417_s1 = smov 8  }
  0x7b   : > { %2074 = dma.hbm_to_vmem [thread:$0]  (!%p2537_p13), %s3267_s5, 1536, %s284_s17, [#allocation5], %s2416_s12, %s2416_s12, %s2417_s1  }
  0x7c   : > { %s2418_s21 = smov [#allocation16]   ;;  %s2270_s10 = scalar_lea.hbm %s3268_s6, 2048 }
  0x7d   : > { %s296_s22 = sshll.u32 %s2418_s21, 4  ;;  %p2271_p8 = scmp.ne.s32.totalorder %s3268_s6, %s2270_s10  ;;  %s297_s22 = int_to_ptr.vmem [resolvable:$true] %s296_s22 }
  0x7e   : > { %p2277_p11 = scmp.lt.u32.totalorder %s2270_s10, %s3268_s6 }
  0x7f   : > { %p2273_p10 = pnand %p2271_p8, %p2548_p1 }
  0x81   : > { %p2274_p4 = pneg %p2273_p10 }
  0x83   : > { %p2279_p7 = pnand %p2277_p11, %p2274_p4 }
  0x85   : > { %2282 = shalt.err (!%p2279_p7)
}
  0x86   : > { %s2283_s17 = scalar_lea.vmem %s297_s22, 2048  ;;  %p2291_p2 = scmp.lt.s32.totalorder %s297_s22, %s297_s22 }
  0x87   : > { %p2284_p9 = scmp.ne.s32.totalorder %s297_s22, %s2283_s17  ;;  %p2292_p3 = scmp.lt.s32.totalorder %s2283_s17, %s2283_s17 }
  0x89   : > { %p2286_p12 = pnand %p2284_p9, %p2548_p1  ;;  %p2293_p5 = por %p2292_p3, %p2291_p2 }
  0x8b   : > { %p2287_p0 = pneg %p2286_p12 }
  0x8d   : > { %p2294_p6 = pnand %p2293_p5, %p2287_p0 }
  0x8f   : > { %2297 = shalt.err (!%p2294_p6)
}
  0x90   : > { %2077 = dma.hbm_to_vmem [thread:$0]  (!%p2537_p13), %s3268_s6, 2048, %s297_s22, [#allocation17], %s2416_s12, %s2416_s12, %s2417_s1  }
  0x91   : > { %p3290_p8 = scmp.ne.s32.totalorder %s3281_s15, 0 }
  0x92   : > { %p3291_p10 = scmp.ne.s32.totalorder (!%p3290_p8), %s3282_s16, 0 }
  0x93   : > { %312 = sbr.rel (%p3290_p8) target bundleno = 1796 (0x704), region = 48 }
  0x9a   : > { %2355 = dma.done.wait (%p3291_p10), [#allocation7], 16  }
  0x9b   : > { %2357 = vsyncadd (%p3291_p10), [#allocation7], 4294967280 }
  0x9c   : > { %2359 = dma.done.wait (%p3291_p10), [#allocation8], 16  }
  0x9d   : > { %2361 = vsyncadd (%p3291_p10), [#allocation8], 4294967280 }
  0x9e   : > { %2363 = dma.done.wait (%p3291_p10), [#allocation11], 32  }
  0x9f   : > { %2365 = vsyncadd (%p3291_p10), [#allocation11], 4294967264 }
  0xa0   : > { %2367 = dma.done.wait (%p3291_p10), [#allocation14], 16  }
  0xa1   : > { %2369 = vsyncadd (%p3291_p10), [#allocation14], 4294967280 }
  0xa2   : > { %2371 = dma.done.wait (%p3291_p10), [#allocation5], 1536  }
  0xa3   : > { %2373 = vsyncadd (%p3291_p10), [#allocation5], 4294965760 }
  0xa4   : > { %2375 = dma.done.wait (%p3291_p10), [#allocation17], 2048  }
  0xa5   : > { %2377 = vsyncadd (%p3291_p10), [#allocation17], 4294965248 }
  0xa6   : > { %342 = sfence }
  0xa7   : > { %s361_s3 = sand.u32 1, %s2388_s25   ;;  %s2659_s4 = sld [smem:[#allocation9 + %s2396_s27]]  ;;  %v368_v0 = vlaneseq  ;;  %v2419_v1 = vmov 0.0  }
  0xa8   : > { %s1864_s15 = sshll.u32 %s361_s3, 6  ;;  %s366_s20 = sld [smem:[#allocation10 + %s2396_s27]]  ;;  %379 = vst [vmem:[#allocation2] sm:$0xff] %v2419_v1  ;;  %380 = vst [vmem:[#allocation2 + $0x8] sm:$0xff] %v2419_v1 }
  0xa9   : > { %381 = vst [vmem:[#allocation2 + $0x10] sm:$0xff] %v2419_v1  ;;  %382 = vst [vmem:[#allocation2 + $0x18] sm:$0xff] %v2419_v1  ;;  %s2665_s16 = sld [smem:[#allocation12 + %s2396_s27]]  ;;  %v369_v2 = vand.u32 127, %v368_v0  ;;  %s2670_s12 = scalar_lea.vmem [#allocation18], %s1864_s15 }
  0xaa   : > { %383 = vst [vmem:[#allocation2 + $0x20] sm:$0xff] %v2419_v1  ;;  %384 = vst [vmem:[#allocation2 + $0x28] sm:$0xff] %v2419_v1  ;;  %s372_s8 = sld [smem:[#allocation13 + %s2396_s27]]  ;;  %s2672_s1 = smov 0  }
  0xab   : > { %385 = vst [vmem:[#allocation2 + $0x30] sm:$0xff] %v2419_v1  ;;  %386 = vst [vmem:[#allocation2 + $0x38] sm:$0xff] %v2419_v1 }
  0xac   : > { %387 = vst [vmem:[#allocation2 + $0x40] sm:$0xff] %v2419_v1  ;;  %388 = vst [vmem:[#allocation2 + $0x48] sm:$0xff] %v2419_v1 }
  0xad   : > { %389 = vst [vmem:[#allocation2 + $0x50] sm:$0xff] %v2419_v1  ;;  %390 = vst [vmem:[#allocation2 + $0x58] sm:$0xff] %v2419_v1 }
  0xae   : > { %v370_v3 = vstv %s366_s20 }
  0xaf   : > { %vm371_vm0 = vcmp.eq.s32.totalorder %v369_v2, %v370_v3 }
  0xb0   : > { %v373_v4 = vstv %s372_s8 }
  0xb1   : > { %v2668_v5 = vsel %vm371_vm0, %v373_v4, 0.0 }
  0xb2 LB: >> { %v2677_v6 = vld [vmem:[#allocation2 + $0x18] sm:$0xff]  ;;  %v2679_v7 = vld [vmem:[#allocation2 + $0x8] sm:$0xff]  ;;  %s2420_s2 = smov 1   ;;  %v2685_v8 = vld [vmem:[#allocation2 + $0x20] sm:$0xff]  ;;  %s2421_s21 = smov 2   ;;  %s2408_s1 = sphi %s2672_s1, %s397_s1  }
  0xb3   : >> { %423 = vrot.lane.b32.xlu1 %v2677_v6, %s2420_s2  ;;  %419 = vrot.lane.b32.xlu0 %v2679_v7, %s2420_s2  ;;  %v399_v9 = vld [vmem:[#allocation2 + $0x10] sm:$0xff]  ;;  %s2422_s22 = smov 127   ;;  %s2423_s19 = smov 126   ;;  %v407_v20 = vld [vmem:[#allocation2 + $0x7] sm:$0xff]  ;;  %v413_v23 = vld [vmem:[#allocation2 + $0x19] sm:$0xff] }
  0xb4   : >> { %v408_v18 = vld [vmem:[#allocation2 + $0xf] sm:$0xff]  ;;  %v409_v22 = vld [vmem:[#allocation2 + $0x17] sm:$0xff]  ;;  %v410_v24 = vld [vmem:[#allocation2 + $0x1f] sm:$0xff]  ;;  %s2746_s23 = sshll.u32 %s2408_s1, 3  ;;  %s2759_s30 = scalar_lea.vmem [#allocation2], %s2659_s4 }
  0xb5   : >> { %v412_v19 = vld [vmem:[#allocation2 + $0x11] sm:$0xff]  ;;  %v411_v21 = vld [vmem:[#allocation2 + $0x9] sm:$0xff]  ;;  %v414_v25 = vld [vmem:[#allocation2 + $0x21] sm:$0xff]  ;;  %v417_v44 = vadd.f32 %v413_v23, %v409_v22  ;;  %s531_s10 = sld [smem:[#allocation4 + %s2746_s23]]  ;;  %s2764_s17 = scalar_lea.vmem [#allocation2], %s2665_s16 }
  0xb6   : >> { %v448_v26 = vld [vmem:[#allocation2 + $0xe] sm:$0xff]  ;;  %v416_v27 = vadd.f32 %v412_v19, %v408_v18  ;;  %v447_v29 = vld [vmem:[#allocation2 + $0x6] sm:$0xff]  ;;  %v415_v33 = vadd.f32 %v411_v21, %v407_v20  ;;  %v403_v37 = vld [vmem:[#allocation2 + $0x38] sm:$0xff]  ;;  %v418_v45 = vadd.f32 %v414_v25, %v410_v24  ;;  %s2768_s0 = scalar_lea.vmem [#allocation3], %s2746_s23  ;;  %s674_s18 = sadd.s32 1, %s2746_s23 }
  0xb7   : >> { %425 = vrot.lane.b32.xlu1 %v2685_v8, %s2420_s2  ;;  %421 = vrot.lane.b32.xlu0 %v399_v9, %s2420_s2  ;;  %v452_v28 = vld [vmem:[#allocation2 + $0x12] sm:$0xff]  ;;  %v451_v30 = vld [vmem:[#allocation2 + $0xa] sm:$0xff]  ;;  %v404_v34 = vld [vmem:[#allocation2 + $0x40] sm:$0xff]  ;;  %s675_s15 = sld [smem:[#allocation4 + %s674_s18]]  ;;  %s815_s20 = sadd.s32 2, %s2746_s23 }
  0xb8   : >> { %v2713_v35 = vld [vmem:[#allocation15 + $0x8] sm:$0xff]  ;;  %v2717_v38 = vld [vmem:[#allocation15] sm:$0xff]  ;;  %v456_v40 = vadd.f32 %v452_v28, %v448_v26  ;;  %v455_v41 = vadd.f32 %v451_v30, %v447_v29  ;;  %v449_v47 = vld [vmem:[#allocation2 + $0x16] sm:$0xff]  ;;  %s816_s8 = sld [smem:[#allocation4 + %s815_s20]]  ;;  %s397_s1 = sadd.s32 1, %s2408_s1  }
  0xb9   : >> { %v2715_v36 = vld [vmem:[#allocation15 + $0x28] sm:$0xff]  ;;  %v2719_v39 = vld [vmem:[#allocation15 + $0x20] sm:$0xff]  ;;  %v496_v53 = vmul.f32 %v2713_v35, %v399_v9  ;;  %v495_v55 = vmul.f32 %v2717_v38, %v2679_v7  ;;  %v406_v2 = vld [vmem:[#allocation2 + $0x50] sm:$0xff]  ;;  %p394_p13 = scmp.ge.s32.totalorder %s397_s1, 8  }
  0xba   : >> { %v450_v42 = vld [vmem:[#allocation2 + $0x1e] sm:$0xff]  ;;  %v505_v51 = vmul.f32 %v2715_v36, %v404_v34  ;;  %v504_v54 = vmul.f32 %v2719_v39, %v403_v37  ;;  %v2730_v19 = vld [vmem:[#allocation15 + $0x10] sm:$0xff]  ;;  %v2735_v25 = vld [vmem:[#allocation15 + $0x48] sm:$0xff]  ;;  %s1909_s4 = sshll.u32 (%p394_p13), %s2396_s27, 10  ;;  %s1674_s16 = sshll.u32 (%p394_p13), %s2670_s12, 4  ;;  %s3208_s16 = int_to_ptr.vmem [resolvable:$true] %s1674_s16 }
  0xbb   : >> { %461 = vrot.lane.b32.xlu1 %v399_v9, %s2421_s21  ;;  %459 = vrot.lane.b32.xlu0 %v2679_v7, %s2421_s21  ;;  %v454_v43 = vld [vmem:[#allocation2 + $0x22] sm:$0xff]  ;;  %v453_v48 = vld [vmem:[#allocation2 + $0x1a] sm:$0xff]  ;;  %s3216_s27 = scalar_lea.sflag (%p394_p13), [#allocation6], %s361_s3  ;;  %p3292_p4 = scmp.ne.s32.totalorder (%p394_p13), %s3279_s11, 0 }
  0xbc   : >> { %v458_v56 = vadd.f32 %v454_v43, %v450_v42  ;;  %v457_v60 = vadd.f32 %v453_v48, %v449_v47  ;;  %v2726_v3 = vld [vmem:[#allocation15 + $0x18] sm:$0xff]  ;;  %v508_v18 = vsub.f32 %v495_v55, %v504_v54  ;;  %v2737_v26 = vld [vmem:[#allocation15 + $0x40] sm:$0xff]  ;;  %v536_v55 = vstv %s531_s10  ;;  %s954_s10 = sadd.s32 3, %s2746_s23 }
  0xbd   : >> { %v2728_v4 = vld [vmem:[#allocation15 + $0x38] sm:$0xff]  ;;  %s955_s18 = sld [smem:[#allocation4 + %s954_s10]] }
  0xbe   : >> { %v507_v28 = vmul.f32 %v2728_v4, %v406_v2 }
  0xbf   : >> { %465 = vrot.lane.b32.xlu1 %v2685_v8, %s2421_s21  ;;  %463 = vrot.lane.b32.xlu0 %v2677_v6, %s2421_s21 }
  0xc3   : >> { %433 = vrot.lane.b32.xlu1 %v399_v9, %s2422_s22  ;;  %431 = vrot.lane.b32.xlu0 %v2679_v7, %s2422_s22 }
  0xc7   : >> { %437 = vrot.lane.b32.xlu1 %v2685_v8, %s2422_s22  ;;  %435 = vrot.lane.b32.xlu0 %v2677_v6, %s2422_s22 }
  0xcb   : >> { %473 = vrot.lane.b32.xlu1 %v399_v9, %s2423_s19  ;;  %471 = vrot.lane.b32.xlu0 %v2679_v7, %s2423_s19  ;;  %v405_v7 = vld [vmem:[#allocation2 + $0x48] sm:$0xff] }
  0xcf   : >> { %477 = vrot.lane.b32.xlu1 %v2685_v8, %s2423_s19  ;;  %475 = vrot.lane.b32.xlu0 %v2677_v6, %s2423_s19 }
 0x125   : >> { %v424_v10 = vpop.permute.xlu1 %423  ;;  %v420_v11 = vpop.permute.xlu0 %419 }
 0x126   : >> { %v427_v52 = vadd.f32 %v420_v11, %v415_v33  ;;  %v429_v62 = vadd.f32 %v424_v10, %v417_v44  ;;  %v509_v11 = vsub.f32 %v496_v53, %v505_v51 }
 0x129   : >> { %v426_v12 = vpop.permute.xlu1 %425  ;;  %v422_v13 = vpop.permute.xlu0 %421 }
 0x12a   : >> { %v428_v46 = vadd.f32 %v422_v13, %v416_v27  ;;  %v430_v63 = vadd.f32 %v426_v12, %v418_v45  ;;  %v498_v27 = vmul.f32 %v2726_v3, %v2685_v8 }
 0x12c   : >> { %v511_v44 = vsub.f32 %v498_v27, %v507_v28 }
 0x12d   : >> { %v462_v14 = vpop.permute.xlu1 %461  ;;  %v460_v15 = vpop.permute.xlu0 %459 }
 0x12e   : >> { %v468_v58 = vadd.f32 %v462_v14, %v456_v40  ;;  %v467_v59 = vadd.f32 %v460_v15, %v455_v41  ;;  %v2732_v14 = vld [vmem:[#allocation15 + $0x30] sm:$0xff] }
 0x12f   : >> { %v506_v30 = vmul.f32 %v2732_v14, %v405_v7 }
 0x131   : >> { %v466_v16 = vpop.permute.xlu1 %465  ;;  %v2711_v17 = vpop.permute.xlu0 %463 }
 0x132   : >> { %v470_v15 = vadd.f32 %v466_v16, %v458_v56  ;;  %v469_v21 = vadd.f32 %v2711_v17, %v457_v60  ;;  %v497_v16 = vmul.f32 %v2730_v19, %v2677_v6  ;;  %v2750_v6 = vld [vmem:[#allocation15 + $0x58] sm:$0xff]  ;;  %v537_v56 = vmul.f32 %v536_v55, %v2668_v5 }
 0x134   : >> { %v510_v45 = vsub.f32 %v497_v16, %v506_v30 }
 0x135   : >> { %v434_v31 = vpop.permute.xlu1 %433  ;;  %v432_v32 = vpop.permute.xlu0 %431 }
 0x136   : >> { %v440_v57 = vadd.f32 %v434_v31, %v428_v46  ;;  %v439_v61 = vadd.f32 %v432_v32, %v427_v52  ;;  %v2752_v46 = vld [vmem:[#allocation15 + $0x50] sm:$0xff] }
 0x138   : >> { %v444_v20 = vmul.f32 1.3333334, %v440_v57  ;;  %v443_v22 = vmul.f32 1.3333334, %v439_v61 }
 0x139   : >> { %v438_v49 = vpop.permute.xlu1 %437  ;;  %v436_v50 = vpop.permute.xlu0 %435 }
 0x13a   : >> { %v442_v10 = vadd.f32 %v438_v49, %v430_v63  ;;  %v441_v12 = vadd.f32 %v436_v50, %v429_v62 }
 0x13c   : >> { %v446_v37 = vmul.f32 1.3333334, %v442_v10  ;;  %v445_v40 = vmul.f32 1.3333334, %v441_v12 }
 0x13d   : >> { %v474_v0 = vpop.permute.xlu1 %473  ;;  %v472_v1 = vpop.permute.xlu0 %471 }
 0x13e   : >> { %v480_v9 = vadd.f32 %v474_v0, %v468_v58  ;;  %v479_v13 = vadd.f32 %v472_v1, %v467_v59 }
 0x140   : >> { %v484_v23 = vmul.f32 -0.083333336, %v480_v9  ;;  %v483_v24 = vmul.f32 -0.083333336, %v479_v13 }
 0x141   : >> { %v478_v29 = vpop.permute.xlu1 %477  ;;  %v476_v17 = vpop.permute.xlu0 %475 }
 0x142   : >> { %v488_v31 = vadd.f32 %v484_v23, %v444_v20  ;;  %v487_v32 = vadd.f32 %v483_v24, %v443_v22  ;;  %v482_v33 = vadd.f32 %v478_v29, %v470_v15  ;;  %v481_v34 = vadd.f32 %v476_v17, %v469_v21 }
 0x144   : >> { %v518_v8 = vmul.f32 %v2735_v25, %v488_v31  ;;  %v517_v41 = vmul.f32 %v2737_v26, %v487_v32  ;;  %v486_v42 = vmul.f32 -0.083333336, %v482_v33  ;;  %v485_v43 = vmul.f32 -0.083333336, %v481_v34 }
 0x146   : >> { %v522_v47 = vadd.f32 %v518_v8, %v509_v11  ;;  %v521_v48 = vadd.f32 %v517_v41, %v508_v18  ;;  %v490_v49 = vadd.f32 %v486_v42, %v446_v37  ;;  %v489_v50 = vadd.f32 %v485_v43, %v445_v40 }
 0x148   : >> { %526 = vst [vmem:[#allocation2 + $0x40] sm:$0xff] %v522_v47  ;;  %525 = vst [vmem:[#allocation2 + $0x38] sm:$0xff] %v521_v48  ;;  %v520_v51 = vmul.f32 %v2750_v6, %v490_v49  ;;  %v519_v52 = vmul.f32 %v2752_v46, %v489_v50 }
 0x14a   : >> { %v524_v53 = vadd.f32 %v520_v51, %v511_v44  ;;  %v523_v54 = vadd.f32 %v519_v52, %v510_v45 }
 0x14c   : >> { %528 = vst [vmem:[#allocation2 + $0x50] sm:$0xff] %v524_v53  ;;  %527 = vst [vmem:[#allocation2 + $0x48] sm:$0xff] %v523_v54 }
 0x153   : >> { %v1866_v57 = vld [vmem:[%s2759_s30 + $0x38] sm:$0x1] }
 0x154   : >> { %v538_v58 = vadd.f32 %v1866_v57, %v537_v56 }
 0x156   : >> { %1867 = vst [vmem:[%s2759_s30 + $0x38] sm:$0x1] %v538_v58 }
 0x15d   : >> { %v1868_v59 = vld [vmem:[%s2764_s17 + $0x38] sm:$0x1]  ;;  %v2771_v60 = vld [vmem:[#allocation2 + $0x40] sm:$0xff]  ;;  %v2779_v62 = vld [vmem:[#allocation2 + $0x50] sm:$0xff] }
 0x15e   : >> { %545 = vst [vmem:[%s2768_s0] sm:$0x1] %v1868_v59  ;;  %v2773_v61 = vld [vmem:[#allocation2 + $0x38] sm:$0xff]  ;;  %568 = vrot.lane.b32.xlu1 %v2771_v60, %s2420_s2  ;;  %v2781_v63 = vld [vmem:[#allocation2 + $0x48] sm:$0xff]  ;;  %v551_v51 = vld [vmem:[#allocation2 + $0x10] sm:$0xff]  ;;  %v643_v56 = vmul.f32 %v2771_v60, %v2713_v35 }
 0x15f   : >> { %566 = vrot.lane.b32.xlu0 %v2773_v61, %s2420_s2  ;;  %v559_v15 = vld [vmem:[#allocation2 + $0x41] sm:$0xff]  ;;  %v558_v10 = vld [vmem:[#allocation2 + $0x39] sm:$0xff]  ;;  %v557_v24 = vld [vmem:[#allocation2 + $0x4f] sm:$0xff] }
 0x160   : >> { %v555_v20 = vld [vmem:[#allocation2 + $0x3f] sm:$0xff]  ;;  %v554_v12 = vld [vmem:[#allocation2 + $0x37] sm:$0xff]  ;;  %v556_v23 = vld [vmem:[#allocation2 + $0x47] sm:$0xff] }
 0x161   : >> { %v560_v27 = vld [vmem:[#allocation2 + $0x49] sm:$0xff]  ;;  %v595_v29 = vld [vmem:[#allocation2 + $0x3e] sm:$0xff]  ;;  %v563_v30 = vadd.f32 %v559_v15, %v555_v20  ;;  %v594_v17 = vld [vmem:[#allocation2 + $0x36] sm:$0xff]  ;;  %v562_v33 = vadd.f32 %v558_v10, %v554_v12  ;;  %v642_v15 = vmul.f32 %v2773_v61, %v2717_v38  ;;  %v651_v20 = vmul.f32 %v551_v51, %v2715_v36 }
 0x162   : >> { %572 = vrot.lane.b32.xlu1 %v2779_v62, %s2420_s2  ;;  %v599_v28 = vld [vmem:[#allocation2 + $0x42] sm:$0xff]  ;;  %v598_v16 = vld [vmem:[#allocation2 + $0x3a] sm:$0xff]  ;;  %v600_v32 = vld [vmem:[#allocation2 + $0x4a] sm:$0xff]  ;;  %v564_v48 = vadd.f32 %v560_v27, %v556_v23 }
 0x163   : >> { %570 = vrot.lane.b32.xlu0 %v2781_v63, %s2420_s2  ;;  %v596_v31 = vld [vmem:[#allocation2 + $0x46] sm:$0xff]  ;;  %v561_v34 = vld [vmem:[#allocation2 + $0x51] sm:$0xff]  ;;  %v603_v43 = vadd.f32 %v599_v28, %v595_v29  ;;  %v602_v44 = vadd.f32 %v598_v16, %v594_v17 }
 0x164   : >> { %v597_v41 = vld [vmem:[#allocation2 + $0x4e] sm:$0xff]  ;;  %v565_v47 = vadd.f32 %v561_v34, %v557_v24  ;;  %v604_v49 = vadd.f32 %v600_v32, %v596_v31 }
 0x165   : >> { %v601_v45 = vld [vmem:[#allocation2 + $0x52] sm:$0xff]  ;;  %v550_v52 = vld [vmem:[#allocation2 + $0x8] sm:$0xff] }
 0x166   : >> { %608 = vrot.lane.b32.xlu1 %v2771_v60, %s2421_s21  ;;  %v605_v59 = vadd.f32 %v601_v45, %v597_v41  ;;  %v650_v12 = vmul.f32 %v550_v52, %v2719_v39 }
 0x167   : >> { %606 = vrot.lane.b32.xlu0 %v2773_v61, %s2421_s21 }
 0x16a   : >> { %612 = vrot.lane.b32.xlu1 %v2779_v62, %s2421_s21 }
 0x16b   : >> { %610 = vrot.lane.b32.xlu0 %v2781_v63, %s2421_s21 }
 0x16e   : >> { %580 = vrot.lane.b32.xlu1 %v2771_v60, %s2422_s22 }
 0x16f   : >> { %578 = vrot.lane.b32.xlu0 %v2773_v61, %s2422_s22 }
 0x172   : >> { %584 = vrot.lane.b32.xlu1 %v2779_v62, %s2422_s22 }
 0x173   : >> { %582 = vrot.lane.b32.xlu0 %v2781_v63, %s2422_s22 }
 0x176   : >> { %620 = vrot.lane.b32.xlu1 %v2771_v60, %s2423_s19 }
 0x177   : >> { %618 = vrot.lane.b32.xlu0 %v2773_v61, %s2423_s19  ;;  %v645_v61 = vmul.f32 %v2779_v62, %v2726_v3 }
 0x17a   : >> { %624 = vrot.lane.b32.xlu1 %v2779_v62, %s2423_s19 }
 0x17b   : >> { %622 = vrot.lane.b32.xlu0 %v2781_v63, %s2423_s19 }
 0x1d0   : >> { %v569_v0 = vpop.permute.xlu1 %568 }
 0x1d1   : >> { %v567_v1 = vpop.permute.xlu0 %566  ;;  %v575_v37 = vadd.f32 %v569_v0, %v563_v30  ;;  %v644_v30 = vmul.f32 %v2781_v63, %v2730_v19 }
 0x1d2   : >> { %v574_v42 = vadd.f32 %v567_v1, %v562_v33 }
 0x1d4   : >> { %v573_v2 = vpop.permute.xlu1 %572 }
 0x1d5   : >> { %v571_v9 = vpop.permute.xlu0 %570  ;;  %v577_v57 = vadd.f32 %v573_v2, %v565_v47 }
 0x1d6   : >> { %v576_v58 = vadd.f32 %v571_v9, %v564_v48 }
 0x1d8   : >> { %v609_v11 = vpop.permute.xlu1 %608 }
 0x1d9   : >> { %v607_v13 = vpop.permute.xlu0 %606  ;;  %v615_v53 = vadd.f32 %v609_v11, %v603_v43  ;;  %v553_v11 = vld [vmem:[#allocation2 + $0x20] sm:$0xff] }
 0x1da   : >> { %v614_v54 = vadd.f32 %v607_v13, %v602_v44  ;;  %v552_v13 = vld [vmem:[#allocation2 + $0x18] sm:$0xff]  ;;  %v653_v29 = vmul.f32 %v553_v11, %v2728_v4 }
 0x1db   : >> { %v652_v17 = vmul.f32 %v552_v13, %v2732_v14 }
 0x1dc   : >> { %v613_v18 = vpop.permute.xlu1 %612  ;;  %v657_v48 = vsub.f32 %v645_v61, %v653_v29 }
 0x1dd   : >> { %v611_v7 = vpop.permute.xlu0 %610 }
 0x1de   : >> { %v616_v9 = vadd.f32 %v611_v7, %v604_v49 }
 0x1e0   : >> { %v581_v21 = vpop.permute.xlu1 %580 }
 0x1e1   : >> { %v579_v22 = vpop.permute.xlu0 %578  ;;  %v587_v50 = vadd.f32 %v581_v21, %v575_v37 }
 0x1e2   : >> { %v586_v55 = vadd.f32 %v579_v22, %v574_v42  ;;  %v617_v22 = vadd.f32 %v613_v18, %v605_v59 }
 0x1e3   : >> { %v591_v23 = vmul.f32 1.3333334, %v587_v50  ;;  %v656_v50 = vsub.f32 %v644_v30, %v652_v17 }
 0x1e4   : >> { %v585_v40 = vpop.permute.xlu1 %584  ;;  %v590_v24 = vmul.f32 1.3333334, %v586_v55 }
 0x1e5   : >> { %v583_v8 = vpop.permute.xlu0 %582  ;;  %v589_v60 = vadd.f32 %v585_v40, %v577_v57  ;;  %v655_v40 = vsub.f32 %v643_v56, %v651_v20 }
 0x1e6   : >> { %v588_v2 = vadd.f32 %v583_v8, %v576_v58  ;;  %v654_v8 = vsub.f32 %v642_v15, %v650_v12 }
 0x1e7   : >> { %v593_v34 = vmul.f32 1.3333334, %v589_v60 }
 0x1e8   : >> { %v621_v0 = vpop.permute.xlu1 %620  ;;  %v592_v37 = vmul.f32 1.3333334, %v588_v2 }
 0x1e9   : >> { %v619_v1 = vpop.permute.xlu0 %618  ;;  %v627_v10 = vadd.f32 %v621_v0, %v615_v53 }
 0x1ea   : >> { %v626_v21 = vadd.f32 %v619_v1, %v614_v54  ;;  %v678_v54 = vstv %s675_s15  ;;  %s1093_s15 = sadd.s32 4, %s2746_s23 }
 0x1eb   : >> { %v631_v27 = vmul.f32 -0.083333336, %v627_v10  ;;  %v679_v55 = vmul.f32 %v678_v54, %v2668_v5  ;;  %s1094_s20 = sld [smem:[#allocation4 + %s1093_s15]] }
 0x1ec   : >> { %v630_v28 = vmul.f32 -0.083333336, %v626_v21  ;;  %v625_v16 = vpop.permute.xlu1 %624 }
 0x1ed   : >> { %v623_v18 = vpop.permute.xlu0 %622  ;;  %v635_v31 = vadd.f32 %v631_v27, %v591_v23  ;;  %v629_v33 = vadd.f32 %v625_v16, %v617_v22 }
 0x1ee   : >> { %v634_v32 = vadd.f32 %v630_v28, %v590_v24  ;;  %v628_v7 = vadd.f32 %v623_v18, %v616_v9 }
 0x1ef   : >> { %v663_v62 = vmul.f32 %v635_v31, %v2735_v25  ;;  %v633_v42 = vmul.f32 -0.083333336, %v629_v33 }
 0x1f0   : >> { %v662_v41 = vmul.f32 %v634_v32, %v2737_v26  ;;  %v632_v43 = vmul.f32 -0.083333336, %v628_v7 }
 0x1f1   : >> { %v667_v63 = vadd.f32 %v663_v62, %v655_v40  ;;  %v637_v45 = vadd.f32 %v633_v42, %v593_v34 }
 0x1f2   : >> { %v666_v44 = vadd.f32 %v662_v41, %v654_v8  ;;  %v636_v47 = vadd.f32 %v632_v43, %v592_v37 }
 0x1f3   : >> { %671 = vst [vmem:[#allocation2 + $0x10] sm:$0xff] %v667_v63  ;;  %v665_v49 = vmul.f32 %v637_v45, %v2750_v6 }
 0x1f4   : >> { %670 = vst [vmem:[#allocation2 + $0x8] sm:$0xff] %v666_v44  ;;  %v664_v51 = vmul.f32 %v636_v47, %v2752_v46 }
 0x1f5   : >> { %v669_v52 = vadd.f32 %v665_v49, %v657_v48 }
 0x1f6   : >> { %v668_v53 = vadd.f32 %v664_v51, %v656_v50 }
 0x1f7   : >> { %673 = vst [vmem:[#allocation2 + $0x20] sm:$0xff] %v669_v52 }
 0x1f8   : >> { %672 = vst [vmem:[#allocation2 + $0x18] sm:$0xff] %v668_v53 }
 0x1ff   : >> { %v1869_v56 = vld [vmem:[%s2759_s30 + $0x8] sm:$0x1] }
 0x200   : >> { %v680_v57 = vadd.f32 %v1869_v56, %v679_v55 }
 0x202   : >> { %1870 = vst [vmem:[%s2759_s30 + $0x8] sm:$0x1] %v680_v57 }
 0x209   : >> { %v1871_v58 = vld [vmem:[%s2764_s17 + $0x8] sm:$0x1]  ;;  %v688_v59 = vld [vmem:[#allocation2 + $0x10] sm:$0xff]  ;;  %v2838_v1 = vld [vmem:[#allocation2 + $0x20] sm:$0xff] }
 0x20a   : >> { %v2832_v0 = vld [vmem:[#allocation2 + $0x8] sm:$0xff]  ;;  %1873 = vst [vmem:[%s2768_s0 + $0x1] sm:$0x1] %v1871_v58  ;;  %709 = vrot.lane.b32.xlu1 %v688_v59, %s2420_s2  ;;  %v2840_v15 = vld [vmem:[#allocation2 + $0x18] sm:$0xff]  ;;  %v692_v49 = vld [vmem:[#allocation2 + $0x40] sm:$0xff]  ;;  %v784_v50 = vmul.f32 %v688_v59, %v2713_v35 }
 0x20b   : >> { %707 = vrot.lane.b32.xlu0 %v2832_v0, %s2420_s2  ;;  %v696_v60 = vld [vmem:[#allocation2 + $0xf] sm:$0xff]  ;;  %v695_v9 = vld [vmem:[#allocation2 + $0x7] sm:$0xff]  ;;  %v698_v61 = vld [vmem:[#allocation2 + $0x1f] sm:$0xff]  ;;  %v783_v55 = vmul.f32 %v2832_v0, %v2717_v38 }
 0x20c   : >> { %v700_v2 = vld [vmem:[#allocation2 + $0x11] sm:$0xff]  ;;  %v699_v24 = vld [vmem:[#allocation2 + $0x9] sm:$0xff]  ;;  %v702_v32 = vld [vmem:[#allocation2 + $0x21] sm:$0xff] }
 0x20d   : >> { %v736_v29 = vld [vmem:[#allocation2 + $0xe] sm:$0xff]  ;;  %v704_v16 = vadd.f32 %v700_v2, %v696_v60  ;;  %v735_v17 = vld [vmem:[#allocation2 + $0x6] sm:$0xff]  ;;  %v703_v31 = vadd.f32 %v699_v24, %v695_v9  ;;  %v697_v33 = vld [vmem:[#allocation2 + $0x17] sm:$0xff]  ;;  %v706_v45 = vadd.f32 %v702_v32, %v698_v61  ;;  %v792_v2 = vmul.f32 %v692_v49, %v2715_v36 }
 0x20e   : >> { %713 = vrot.lane.b32.xlu1 %v2838_v1, %s2420_s2  ;;  %v740_v30 = vld [vmem:[#allocation2 + $0x12] sm:$0xff]  ;;  %v739_v18 = vld [vmem:[#allocation2 + $0xa] sm:$0xff]  ;;  %v738_v37 = vld [vmem:[#allocation2 + $0x1e] sm:$0xff] }
 0x20f   : >> { %711 = vrot.lane.b32.xlu0 %v2840_v15, %s2420_s2  ;;  %v701_v7 = vld [vmem:[#allocation2 + $0x19] sm:$0xff]  ;;  %v744_v41 = vadd.f32 %v740_v30, %v736_v29  ;;  %v743_v42 = vadd.f32 %v739_v18, %v735_v17  ;;  %v742_v43 = vld [vmem:[#allocation2 + $0x22] sm:$0xff]  ;;  %v786_v30 = vmul.f32 %v2838_v1, %v2726_v3 }
 0x210   : >> { %v737_v63 = vld [vmem:[#allocation2 + $0x16] sm:$0xff]  ;;  %v705_v47 = vadd.f32 %v701_v7, %v697_v33  ;;  %v746_v58 = vadd.f32 %v742_v43, %v738_v37  ;;  %v693_v61 = vld [vmem:[#allocation2 + $0x48] sm:$0xff] }
 0x211   : >> { %v741_v44 = vld [vmem:[#allocation2 + $0x1a] sm:$0xff]  ;;  %v793_v32 = vmul.f32 %v693_v61, %v2732_v14 }
 0x212   : >> { %749 = vrot.lane.b32.xlu1 %v688_v59, %s2421_s21  ;;  %v691_v51 = vld [vmem:[#allocation2 + $0x38] sm:$0xff] }
 0x213   : >> { %747 = vrot.lane.b32.xlu0 %v2832_v0, %s2421_s21  ;;  %v791_v24 = vmul.f32 %v691_v51, %v2719_v39 }
 0x216   : >> { %753 = vrot.lane.b32.xlu1 %v2838_v1, %s2421_s21 }
 0x217   : >> { %751 = vrot.lane.b32.xlu0 %v2840_v15, %s2421_s21 }
 0x21a   : >> { %721 = vrot.lane.b32.xlu1 %v688_v59, %s2422_s22 }
 0x21b   : >> { %719 = vrot.lane.b32.xlu0 %v2832_v0, %s2422_s22 }
 0x21e   : >> { %725 = vrot.lane.b32.xlu1 %v2838_v1, %s2422_s22 }
 0x21f   : >> { %723 = vrot.lane.b32.xlu0 %v2840_v15, %s2422_s22 }
 0x222   : >> { %761 = vrot.lane.b32.xlu1 %v688_v59, %s2423_s19  ;;  %v694_v59 = vld [vmem:[#allocation2 + $0x50] sm:$0xff] }
 0x223   : >> { %759 = vrot.lane.b32.xlu0 %v2832_v0, %s2423_s19  ;;  %v794_v17 = vmul.f32 %v694_v59, %v2728_v4 }
 0x226   : >> { %765 = vrot.lane.b32.xlu1 %v2838_v1, %s2423_s19 }
 0x227   : >> { %763 = vrot.lane.b32.xlu0 %v2840_v15, %s2423_s19 }
 0x27c   : >> { %v710_v20 = vpop.permute.xlu1 %709 }
 0x27d   : >> { %v708_v10 = vpop.permute.xlu0 %707  ;;  %v716_v34 = vadd.f32 %v710_v20, %v704_v16  ;;  %v745_v20 = vadd.f32 %v741_v44, %v737_v63 }
 0x27e   : >> { %v715_v62 = vadd.f32 %v708_v10, %v703_v31  ;;  %v785_v31 = vmul.f32 %v2840_v15, %v2730_v19 }
 0x280   : >> { %v714_v12 = vpop.permute.xlu1 %713  ;;  %v797_v49 = vsub.f32 %v785_v31, %v793_v32 }
 0x281   : >> { %v712_v21 = vpop.permute.xlu0 %711  ;;  %v718_v56 = vadd.f32 %v714_v12, %v706_v45 }
 0x282   : >> { %v717_v57 = vadd.f32 %v712_v21, %v705_v47  ;;  %v798_v47 = vsub.f32 %v786_v30, %v794_v17 }
 0x284   : >> { %v750_v11 = vpop.permute.xlu1 %749 }
 0x285   : >> { %v748_v13 = vpop.permute.xlu0 %747  ;;  %v756_v52 = vadd.f32 %v750_v11, %v744_v41 }
 0x286   : >> { %v755_v53 = vadd.f32 %v748_v13, %v743_v42 }
 0x288   : >> { %v754_v22 = vpop.permute.xlu1 %753 }
 0x289   : >> { %v752_v23 = vpop.permute.xlu0 %751  ;;  %v758_v11 = vadd.f32 %v754_v22, %v746_v58 }
 0x28a   : >> { %v757_v0 = vadd.f32 %v752_v23, %v745_v20 }
 0x28c   : >> { %v722_v27 = vpop.permute.xlu1 %721 }
 0x28d   : >> { %v720_v28 = vpop.permute.xlu0 %719  ;;  %v728_v48 = vadd.f32 %v722_v27, %v716_v34 }
 0x28e   : >> { %v727_v54 = vadd.f32 %v720_v28, %v715_v62  ;;  %v795_v62 = vsub.f32 %v783_v55, %v791_v24 }
 0x28f   : >> { %v732_v13 = vmul.f32 1.3333334, %v728_v48 }
 0x290   : >> { %v726_v40 = vpop.permute.xlu1 %725  ;;  %v731_v12 = vmul.f32 1.3333334, %v727_v54 }
 0x291   : >> { %v724_v8 = vpop.permute.xlu0 %723  ;;  %v730_v28 = vadd.f32 %v726_v40, %v718_v56 }
 0x292   : >> { %v729_v29 = vadd.f32 %v724_v8, %v717_v57  ;;  %v796_v8 = vsub.f32 %v784_v50, %v792_v2 }
 0x293   : >> { %v734_v37 = vmul.f32 1.3333334, %v730_v28 }
 0x294   : >> { %v762_v10 = vpop.permute.xlu1 %761  ;;  %v733_v40 = vmul.f32 1.3333334, %v729_v29 }
 0x295   : >> { %v760_v60 = vpop.permute.xlu0 %759  ;;  %v768_v9 = vadd.f32 %v762_v10, %v756_v52 }
 0x296   : >> { %v767_v27 = vadd.f32 %v760_v60, %v755_v53  ;;  %v818_v53 = vstv %s816_s8  ;;  %s1232_s8 = sadd.s32 5, %s2746_s23 }
 0x297   : >> { %v772_v21 = vmul.f32 -0.083333336, %v768_v9  ;;  %v819_v54 = vmul.f32 %v818_v53, %v2668_v5  ;;  %s1233_s10 = sld [smem:[#allocation4 + %s1232_s8]] }
 0x298   : >> { %v771_v16 = vmul.f32 -0.083333336, %v767_v27  ;;  %v766_v18 = vpop.permute.xlu1 %765 }
 0x299   : >> { %v764_v22 = vpop.permute.xlu0 %763  ;;  %v776_v33 = vadd.f32 %v772_v21, %v732_v13  ;;  %v770_v34 = vadd.f32 %v766_v18, %v758_v11 }
 0x29a   : >> { %v775_v7 = vadd.f32 %v771_v16, %v731_v12  ;;  %v769_v23 = vadd.f32 %v764_v22, %v757_v0 }
 0x29b   : >> { %v804_v1 = vmul.f32 %v776_v33, %v2735_v25  ;;  %v774_v42 = vmul.f32 -0.083333336, %v770_v34 }
 0x29c   : >> { %v803_v41 = vmul.f32 %v775_v7, %v2737_v26  ;;  %v773_v43 = vmul.f32 -0.083333336, %v769_v23 }
 0x29d   : >> { %v808_v15 = vadd.f32 %v804_v1, %v796_v8  ;;  %v778_v44 = vadd.f32 %v774_v42, %v734_v37 }
 0x29e   : >> { %v807_v63 = vadd.f32 %v803_v41, %v795_v62  ;;  %v777_v45 = vadd.f32 %v773_v43, %v733_v40 }
 0x29f   : >> { %812 = vst [vmem:[#allocation2 + $0x40] sm:$0xff] %v808_v15  ;;  %v806_v48 = vmul.f32 %v778_v44, %v2750_v6 }
 0x2a0   : >> { %811 = vst [vmem:[#allocation2 + $0x38] sm:$0xff] %v807_v63  ;;  %v805_v50 = vmul.f32 %v777_v45, %v2752_v46 }
 0x2a1   : >> { %v810_v51 = vadd.f32 %v806_v48, %v798_v47 }
 0x2a2   : >> { %v809_v52 = vadd.f32 %v805_v50, %v797_v49 }
 0x2a3   : >> { %814 = vst [vmem:[#allocation2 + $0x50] sm:$0xff] %v810_v51 }
 0x2a4   : >> { %813 = vst [vmem:[#allocation2 + $0x48] sm:$0xff] %v809_v52 }
 0x2ab   : >> { %v1874_v55 = vld [vmem:[%s2759_s30 + $0x38] sm:$0x1] }
 0x2ac   : >> { %v820_v56 = vadd.f32 %v1874_v55, %v819_v54 }
 0x2ae   : >> { %1875 = vst [vmem:[%s2759_s30 + $0x38] sm:$0x1] %v820_v56 }
 0x2b5   : >> { %v1876_v57 = vld [vmem:[%s2764_s17 + $0x38] sm:$0x1]  ;;  %v827_v58 = vld [vmem:[#allocation2 + $0x40] sm:$0xff]  ;;  %v2893_v10 = vld [vmem:[#allocation2 + $0x50] sm:$0xff] }
 0x2b6   : >> { %v2887_v20 = vld [vmem:[#allocation2 + $0x38] sm:$0xff]  ;;  %1878 = vst [vmem:[%s2768_s0 + $0x2] sm:$0x1] %v1876_v57  ;;  %848 = vrot.lane.b32.xlu1 %v827_v58, %s2420_s2  ;;  %v2895_v60 = vld [vmem:[#allocation2 + $0x48] sm:$0xff]  ;;  %v831_v48 = vld [vmem:[#allocation2 + $0x10] sm:$0xff]  ;;  %v923_v49 = vmul.f32 %v827_v58, %v2713_v35 }
 0x2b7   : >> { %846 = vrot.lane.b32.xlu0 %v2887_v20, %s2420_s2  ;;  %v835_v28 = vld [vmem:[#allocation2 + $0x3f] sm:$0xff]  ;;  %v834_v0 = vld [vmem:[#allocation2 + $0x37] sm:$0xff]  ;;  %v837_v30 = vld [vmem:[#allocation2 + $0x4f] sm:$0xff]  ;;  %v922_v54 = vmul.f32 %v2887_v20, %v2717_v38 }
 0x2b8   : >> { %v839_v29 = vld [vmem:[#allocation2 + $0x41] sm:$0xff]  ;;  %v838_v12 = vld [vmem:[#allocation2 + $0x39] sm:$0xff]  ;;  %v841_v7 = vld [vmem:[#allocation2 + $0x51] sm:$0xff] }
 0x2b9   : >> { %v875_v17 = vld [vmem:[#allocation2 + $0x3e] sm:$0xff]  ;;  %v843_v18 = vadd.f32 %v839_v29, %v835_v28  ;;  %v874_v32 = vld [vmem:[#allocation2 + $0x36] sm:$0xff]  ;;  %v842_v33 = vadd.f32 %v838_v12, %v834_v0  ;;  %v836_v34 = vld [vmem:[#allocation2 + $0x47] sm:$0xff]  ;;  %v845_v44 = vadd.f32 %v841_v7, %v837_v30  ;;  %v931_v29 = vmul.f32 %v831_v48, %v2715_v36 }
 0x2ba   : >> { %852 = vrot.lane.b32.xlu1 %v2893_v10, %s2420_s2  ;;  %v879_v31 = vld [vmem:[#allocation2 + $0x42] sm:$0xff]  ;;  %v878_v22 = vld [vmem:[#allocation2 + $0x3a] sm:$0xff]  ;;  %v877_v40 = vld [vmem:[#allocation2 + $0x4e] sm:$0xff] }
 0x2bb   : >> { %850 = vrot.lane.b32.xlu0 %v2895_v60, %s2420_s2  ;;  %v840_v23 = vld [vmem:[#allocation2 + $0x49] sm:$0xff]  ;;  %v883_v41 = vadd.f32 %v879_v31, %v875_v17  ;;  %v882_v42 = vadd.f32 %v878_v22, %v874_v32  ;;  %v881_v43 = vld [vmem:[#allocation2 + $0x52] sm:$0xff]  ;;  %v833_v35 = vld [vmem:[#allocation2 + $0x20] sm:$0xff]  ;;  %v925_v17 = vmul.f32 %v2893_v10, %v2726_v3 }
 0x2bc   : >> { %v876_v15 = vld [vmem:[#allocation2 + $0x46] sm:$0xff]  ;;  %v844_v45 = vadd.f32 %v840_v23, %v836_v34  ;;  %v885_v57 = vadd.f32 %v881_v43, %v877_v40  ;;  %v933_v36 = vmul.f32 %v833_v35, %v2728_v4  ;;  %v935_v23 = vsub.f32 %v923_v49, %v931_v29 }
 0x2bd   : >> { %v880_v63 = vld [vmem:[#allocation2 + $0x4a] sm:$0xff] }
 0x2be   : >> { %888 = vrot.lane.b32.xlu1 %v827_v58, %s2421_s21  ;;  %v830_v50 = vld [vmem:[#allocation2 + $0x8] sm:$0xff] }
 0x2bf   : >> { %886 = vrot.lane.b32.xlu0 %v2887_v20, %s2421_s21  ;;  %v930_v12 = vmul.f32 %v830_v50, %v2719_v39  ;;  %v924_v39 = vmul.f32 %v2895_v60, %v2730_v19  ;;  %v2983_v35 = vld [vmem:[#allocation15 + $0x8] sm:$0xff] }
 0x2c2   : >> { %892 = vrot.lane.b32.xlu1 %v2893_v10, %s2421_s21 }
 0x2c3   : >> { %890 = vrot.lane.b32.xlu0 %v2895_v60, %s2421_s21 }
 0x2c6   : >> { %860 = vrot.lane.b32.xlu1 %v827_v58, %s2422_s22 }
 0x2c7   : >> { %858 = vrot.lane.b32.xlu0 %v2887_v20, %s2422_s22 }
 0x2ca   : >> { %864 = vrot.lane.b32.xlu1 %v2893_v10, %s2422_s22 }
 0x2cb   : >> { %862 = vrot.lane.b32.xlu0 %v2895_v60, %s2422_s22 }
 0x2ce   : >> { %900 = vrot.lane.b32.xlu1 %v827_v58, %s2423_s19  ;;  %v832_v58 = vld [vmem:[#allocation2 + $0x18] sm:$0xff] }
 0x2cf   : >> { %898 = vrot.lane.b32.xlu0 %v2887_v20, %s2423_s19  ;;  %v932_v31 = vmul.f32 %v832_v58, %v2732_v14 }
 0x2d2   : >> { %904 = vrot.lane.b32.xlu1 %v2893_v10, %s2423_s19 }
 0x2d3   : >> { %902 = vrot.lane.b32.xlu0 %v2895_v60, %s2423_s19 }
 0x328   : >> { %v849_v2 = vpop.permute.xlu1 %848 }
 0x329   : >> { %v847_v9 = vpop.permute.xlu0 %846  ;;  %v855_v37 = vadd.f32 %v849_v2, %v843_v18  ;;  %v884_v2 = vadd.f32 %v880_v63, %v876_v15 }
 0x32a   : >> { %v854_v1 = vadd.f32 %v847_v9, %v842_v33 }
 0x32c   : >> { %v853_v24 = vpop.permute.xlu1 %852 }
 0x32d   : >> { %v851_v27 = vpop.permute.xlu0 %850  ;;  %v857_v55 = vadd.f32 %v853_v24, %v845_v44 }
 0x32e   : >> { %v856_v56 = vadd.f32 %v851_v27, %v844_v45 }
 0x330   : >> { %v889_v59 = vpop.permute.xlu1 %888 }
 0x331   : >> { %v887_v61 = vpop.permute.xlu0 %886  ;;  %v895_v51 = vadd.f32 %v889_v59, %v883_v41  ;;  %v936_v41 = vsub.f32 %v924_v39, %v932_v31  ;;  %v2987_v39 = vld [vmem:[#allocation15] sm:$0xff] }
 0x332   : >> { %v894_v52 = vadd.f32 %v887_v61, %v882_v42  ;;  %v2989_v31 = vld [vmem:[#allocation15 + $0x20] sm:$0xff] }
 0x334   : >> { %v893_v11 = vpop.permute.xlu1 %892 }
 0x335   : >> { %v891_v13 = vpop.permute.xlu0 %890  ;;  %v897_v59 = vadd.f32 %v893_v11, %v885_v57 }
 0x336   : >> { %v896_v38 = vadd.f32 %v891_v13, %v884_v2 }
 0x338   : >> { %v861_v21 = vpop.permute.xlu1 %860 }
 0x339   : >> { %v859_v16 = vpop.permute.xlu0 %858  ;;  %v867_v47 = vadd.f32 %v861_v21, %v855_v37  ;;  %v934_v37 = vsub.f32 %v922_v54, %v930_v12 }
 0x33a   : >> { %v866_v53 = vadd.f32 %v859_v16, %v854_v1 }
 0x33b   : >> { %v871_v61 = vmul.f32 1.3333334, %v867_v47 }
 0x33c   : >> { %v865_v8 = vpop.permute.xlu1 %864  ;;  %v870_v20 = vmul.f32 1.3333334, %v866_v53 }
 0x33d   : >> { %v863_v62 = vpop.permute.xlu0 %862  ;;  %v869_v16 = vadd.f32 %v865_v8, %v857_v55 }
 0x33e   : >> { %v868_v30 = vadd.f32 %v863_v62, %v856_v56  ;;  %v937_v62 = vsub.f32 %v925_v17, %v933_v36 }
 0x33f   : >> { %v873_v7 = vmul.f32 1.3333334, %v869_v16 }
 0x340   : >> { %v901_v9 = vpop.permute.xlu1 %900  ;;  %v872_v34 = vmul.f32 1.3333334, %v868_v30 }
 0x341   : >> { %v899_v28 = vpop.permute.xlu0 %898  ;;  %v907_v0 = vadd.f32 %v901_v9, %v895_v51 }
 0x342   : >> { %v906_v21 = vadd.f32 %v899_v28, %v894_v52 }
 0x343   : >> { %v911_v24 = vmul.f32 -0.083333336, %v907_v0 }
 0x344   : >> { %v910_v27 = vmul.f32 -0.083333336, %v906_v21  ;;  %v905_v18 = vpop.permute.xlu1 %904 }
 0x345   : >> { %v903_v32 = vpop.permute.xlu0 %902  ;;  %v915_v11 = vadd.f32 %v911_v24, %v871_v61  ;;  %v909_v33 = vadd.f32 %v905_v18, %v897_v59  ;;  %v2985_v18 = vld [vmem:[#allocation15 + $0x28] sm:$0xff] }
 0x346   : >> { %v914_v22 = vadd.f32 %v910_v27, %v870_v20  ;;  %v908_v13 = vadd.f32 %v903_v32, %v896_v38 }
 0x347   : >> { %v943_v3 = vmul.f32 %v915_v11, %v2735_v25  ;;  %v913_v10 = vmul.f32 -0.083333336, %v909_v33 }
 0x348   : >> { %v942_v4 = vmul.f32 %v914_v22, %v2737_v26  ;;  %v912_v40 = vmul.f32 -0.083333336, %v908_v13  ;;  %v957_v26 = vstv %s955_s18  ;;  %s1371_s18 = sadd.s32 6, %s2746_s23 }
 0x349   : >> { %v947_v19 = vadd.f32 %v943_v3, %v935_v23  ;;  %v917_v60 = vadd.f32 %v913_v10, %v873_v7  ;;  %v958_v15 = vmul.f32 %v957_v26, %v2668_v5  ;;  %v2996_v26 = vld [vmem:[#allocation15 + $0x18] sm:$0xff]  ;;  %s1372_s15 = sld [smem:[#allocation4 + %s1371_s18]] }
 0x34a   : >> { %v946_v14 = vadd.f32 %v942_v4, %v934_v37  ;;  %v916_v8 = vadd.f32 %v912_v40, %v872_v34 }
 0x34b   : >> { %951 = vst [vmem:[#allocation2 + $0x10] sm:$0xff] %v947_v19  ;;  %v945_v1 = vmul.f32 %v917_v60, %v2750_v6 }
 0x34c   : >> { %950 = vst [vmem:[#allocation2 + $0x8] sm:$0xff] %v946_v14  ;;  %v944_v42 = vmul.f32 %v916_v8, %v2752_v46 }
 0x34d   : >> { %v949_v25 = vadd.f32 %v945_v1, %v937_v62 }
 0x34e   : >> { %v948_v43 = vadd.f32 %v944_v42, %v936_v41 }
 0x34f   : >> { %953 = vst [vmem:[#allocation2 + $0x20] sm:$0xff] %v949_v25 }
 0x350   : >> { %952 = vst [vmem:[#allocation2 + $0x18] sm:$0xff] %v948_v43 }
 0x357   : >> { %v1879_v63 = vld [vmem:[%s2759_s30 + $0x8] sm:$0x1] }
 0x358   : >> { %v959_v44 = vadd.f32 %v1879_v63, %v958_v15 }
 0x35a   : >> { %1880 = vst [vmem:[%s2759_s30 + $0x8] sm:$0x1] %v959_v44 }
 0x361   : >> { %v2941_v45 = vld [vmem:[#allocation2 + $0x10] sm:$0xff]  ;;  %v2943_v47 = vld [vmem:[#allocation2 + $0x8] sm:$0xff]  ;;  %v2949_v6 = vld [vmem:[#allocation2 + $0x20] sm:$0xff] }
 0x362   : >> { %987 = vrot.lane.b32.xlu1 %v2941_v45, %s2420_s2  ;;  %985 = vrot.lane.b32.xlu0 %v2943_v47, %s2420_s2  ;;  %v2951_v46 = vld [vmem:[#allocation2 + $0x18] sm:$0xff]  ;;  %v1881_v48 = vld [vmem:[%s2764_s17 + $0x8] sm:$0x1]  ;;  %v974_v57 = vld [vmem:[#allocation2 + $0xf] sm:$0xff]  ;;  %v1062_v10 = vmul.f32 %v2983_v35, %v2941_v45  ;;  %v1061_v8 = vmul.f32 %v2987_v39, %v2943_v47 }
 0x363   : >> { %1883 = vst [vmem:[%s2768_s0 + $0x3] sm:$0x1] %v1881_v48  ;;  %v978_v2 = vld [vmem:[#allocation2 + $0x11] sm:$0xff]  ;;  %v973_v9 = vld [vmem:[#allocation2 + $0x7] sm:$0xff]  ;;  %v976_v12 = vld [vmem:[#allocation2 + $0x1f] sm:$0xff] }
 0x364   : >> { %v977_v28 = vld [vmem:[#allocation2 + $0x9] sm:$0xff]  ;;  %v982_v58 = vadd.f32 %v978_v2, %v974_v57  ;;  %v1018_v59 = vld [vmem:[#allocation2 + $0x12] sm:$0xff]  ;;  %v980_v38 = vld [vmem:[#allocation2 + $0x21] sm:$0xff] }
 0x365   : >> { %v1014_v21 = vld [vmem:[#allocation2 + $0xe] sm:$0xff]  ;;  %v1013_v61 = vld [vmem:[#allocation2 + $0x6] sm:$0xff]  ;;  %v981_v30 = vadd.f32 %v977_v28, %v973_v9  ;;  %v975_v20 = vld [vmem:[#allocation2 + $0x17] sm:$0xff]  ;;  %v984_v34 = vadd.f32 %v980_v38, %v976_v12 }
 0x366   : >> { %991 = vrot.lane.b32.xlu1 %v2949_v6, %s2420_s2  ;;  %989 = vrot.lane.b32.xlu0 %v2951_v46, %s2420_s2  ;;  %v1017_v16 = vld [vmem:[#allocation2 + $0xa] sm:$0xff]  ;;  %v979_v24 = vld [vmem:[#allocation2 + $0x19] sm:$0xff]  ;;  %v1022_v11 = vadd.f32 %v1018_v59, %v1014_v21  ;;  %v1020_v13 = vld [vmem:[#allocation2 + $0x22] sm:$0xff] }
 0x367   : >> { %v1021_v22 = vadd.f32 %v1017_v16, %v1013_v61  ;;  %v1016_v33 = vld [vmem:[#allocation2 + $0x1e] sm:$0xff]  ;;  %v983_v23 = vadd.f32 %v979_v24, %v975_v20  ;;  %v1015_v37 = vld [vmem:[#allocation2 + $0x16] sm:$0xff] }
 0x368   : >> { %v970_v7 = vld [vmem:[#allocation2 + $0x40] sm:$0xff]  ;;  %v969_v40 = vld [vmem:[#allocation2 + $0x38] sm:$0xff]  ;;  %v1024_v41 = vadd.f32 %v1020_v13, %v1016_v33  ;;  %v972_v48 = vld [vmem:[#allocation2 + $0x50] sm:$0xff] }
 0x369   : >> { %v1019_v3 = vld [vmem:[#allocation2 + $0x1a] sm:$0xff]  ;;  %v1070_v42 = vmul.f32 %v2985_v18, %v970_v7  ;;  %v1069_v44 = vmul.f32 %v2989_v31, %v969_v40  ;;  %v3003_v57 = vld [vmem:[#allocation15 + $0x30] sm:$0xff] }
 0x36a   : >> { %1027 = vrot.lane.b32.xlu1 %v2941_v45, %s2421_s21  ;;  %1025 = vrot.lane.b32.xlu0 %v2943_v47, %s2421_s21  ;;  %v1023_v15 = vadd.f32 %v1019_v3, %v1015_v37  ;;  %v3007_v21 = vld [vmem:[#allocation15 + $0x40] sm:$0xff]  ;;  %v3018_v33 = vld [vmem:[#allocation15 + $0x58] sm:$0xff] }
 0x36b   : >> { %v1074_v12 = vsub.f32 %v1062_v10, %v1070_v42 }
 0x36e   : >> { %1031 = vrot.lane.b32.xlu1 %v2949_v6, %s2421_s21  ;;  %1029 = vrot.lane.b32.xlu0 %v2951_v46, %s2421_s21 }
 0x372   : >> { %999 = vrot.lane.b32.xlu1 %v2941_v45, %s2422_s22  ;;  %997 = vrot.lane.b32.xlu0 %v2943_v47, %s2422_s22 }
 0x376   : >> { %1003 = vrot.lane.b32.xlu1 %v2949_v6, %s2422_s22  ;;  %1001 = vrot.lane.b32.xlu0 %v2951_v46, %s2422_s22 }
 0x37a   : >> { %1039 = vrot.lane.b32.xlu1 %v2941_v45, %s2423_s19  ;;  %1037 = vrot.lane.b32.xlu0 %v2943_v47, %s2423_s19 }
 0x37e   : >> { %1043 = vrot.lane.b32.xlu1 %v2949_v6, %s2423_s19  ;;  %1041 = vrot.lane.b32.xlu0 %v2951_v46, %s2423_s19 }
 0x3d4   : >> { %v988_v49 = vpop.permute.xlu1 %987  ;;  %v986_v50 = vpop.permute.xlu0 %985 }
 0x3d5   : >> { %v994_v27 = vadd.f32 %v988_v49, %v982_v58  ;;  %v993_v32 = vadd.f32 %v986_v50, %v981_v30  ;;  %v2999_v49 = vld [vmem:[#allocation15 + $0x38] sm:$0xff]  ;;  %v3001_v50 = vld [vmem:[#allocation15 + $0x10] sm:$0xff]  ;;  %v1064_v58 = vmul.f32 %v2996_v26, %v2949_v6 }
 0x3d6   : >> { %v1063_v61 = vmul.f32 %v3001_v50, %v2951_v46  ;;  %v3020_v46 = vld [vmem:[#allocation15 + $0x50] sm:$0xff] }
 0x3d8   : >> { %v992_v51 = vpop.permute.xlu1 %991  ;;  %v990_v52 = vpop.permute.xlu0 %989 }
 0x3d9   : >> { %v996_v62 = vadd.f32 %v992_v51, %v984_v34  ;;  %v995_v1 = vadd.f32 %v990_v52, %v983_v23 }
 0x3dc   : >> { %v1028_v53 = vpop.permute.xlu1 %1027  ;;  %v1026_v54 = vpop.permute.xlu0 %1025 }
 0x3dd   : >> { %v1034_v19 = vadd.f32 %v1028_v53, %v1022_v11  ;;  %v1033_v14 = vadd.f32 %v1026_v54, %v1021_v22  ;;  %v971_v54 = vld [vmem:[#allocation2 + $0x48] sm:$0xff] }
 0x3e0   : >> { %v1032_v55 = vpop.permute.xlu1 %1031  ;;  %v1030_v56 = vpop.permute.xlu0 %1029 }
 0x3e1   : >> { %v1036_v47 = vadd.f32 %v1032_v55, %v1024_v41  ;;  %v1035_v2 = vadd.f32 %v1030_v56, %v1023_v15  ;;  %v1072_v55 = vmul.f32 %v2999_v49, %v972_v48 }
 0x3e3   : >> { %v1076_v37 = vsub.f32 %v1064_v58, %v1072_v55 }
 0x3e4   : >> { %v1000_v29 = vpop.permute.xlu1 %999  ;;  %v998_v0 = vpop.permute.xlu0 %997 }
 0x3e5   : >> { %v1006_v4 = vadd.f32 %v1000_v29, %v994_v27  ;;  %v1005_v60 = vadd.f32 %v998_v0, %v993_v32  ;;  %v3005_v0 = vld [vmem:[#allocation15 + $0x48] sm:$0xff] }
 0x3e7   : >> { %v1010_v51 = vmul.f32 1.3333334, %v1006_v4  ;;  %v1009_v9 = vmul.f32 1.3333334, %v1005_v60 }
 0x3e8   : >> { %v1004_v17 = vpop.permute.xlu1 %1003  ;;  %v1002_v36 = vpop.permute.xlu0 %1001 }
 0x3e9   : >> { %v1008_v52 = vadd.f32 %v1004_v17, %v996_v62  ;;  %v1007_v53 = vadd.f32 %v1002_v36, %v995_v1  ;;  %v1073_v17 = vsub.f32 %v1061_v8, %v1069_v44  ;;  %v1071_v36 = vmul.f32 %v3003_v57, %v971_v54 }
 0x3eb   : >> { %v1012_v24 = vmul.f32 1.3333334, %v1008_v52  ;;  %v1011_v27 = vmul.f32 1.3333334, %v1007_v53  ;;  %v1075_v4 = vsub.f32 %v1063_v61, %v1071_v36 }
 0x3ec   : >> { %v1040_v25 = vpop.permute.xlu1 %1039  ;;  %v1038_v43 = vpop.permute.xlu0 %1037 }
 0x3ed   : >> { %v1046_v63 = vadd.f32 %v1040_v25, %v1034_v19  ;;  %v1045_v45 = vadd.f32 %v1038_v43, %v1033_v14  ;;  %v1096_v14 = vstv %s1094_s20 }
 0x3ee   : >> { %v1097_v60 = vmul.f32 %v1096_v14, %v2668_v5 }
 0x3ef   : >> { %v1050_v28 = vmul.f32 -0.083333336, %v1046_v63  ;;  %v1049_v29 = vmul.f32 -0.083333336, %v1045_v45 }
 0x3f0   : >> { %v1044_v59 = vpop.permute.xlu1 %1043  ;;  %v1042_v16 = vpop.permute.xlu0 %1041 }
 0x3f1   : >> { %v1054_v56 = vadd.f32 %v1050_v28, %v1010_v51  ;;  %v1053_v30 = vadd.f32 %v1049_v29, %v1009_v9  ;;  %v1048_v38 = vadd.f32 %v1044_v59, %v1036_v47  ;;  %v1047_v20 = vadd.f32 %v1042_v16, %v1035_v2 }
 0x3f3   : >> { %v1082_v32 = vmul.f32 %v3005_v0, %v1054_v56  ;;  %v1081_v6 = vmul.f32 %v3007_v21, %v1053_v30  ;;  %v1052_v11 = vmul.f32 -0.083333336, %v1048_v38  ;;  %v1051_v22 = vmul.f32 -0.083333336, %v1047_v20 }
 0x3f5   : >> { %v1086_v13 = vadd.f32 %v1082_v32, %v1074_v12  ;;  %v1085_v7 = vadd.f32 %v1081_v6, %v1073_v17  ;;  %v1056_v34 = vadd.f32 %v1052_v11, %v1012_v24  ;;  %v1055_v23 = vadd.f32 %v1051_v22, %v1011_v27 }
 0x3f7   : >> { %1089 = vst [vmem:[#allocation2 + $0x38] sm:$0xff] %v1085_v7  ;;  %1090 = vst [vmem:[#allocation2 + $0x40] sm:$0xff] %v1086_v13  ;;  %v1084_v3 = vmul.f32 %v3018_v33, %v1056_v34  ;;  %v1083_v10 = vmul.f32 %v3020_v46, %v1055_v23 }
 0x3f9   : >> { %v1088_v40 = vadd.f32 %v1084_v3, %v1076_v37  ;;  %v1087_v19 = vadd.f32 %v1083_v10, %v1075_v4 }
 0x3fb   : >> { %1092 = vst [vmem:[#allocation2 + $0x50] sm:$0xff] %v1088_v40  ;;  %1091 = vst [vmem:[#allocation2 + $0x48] sm:$0xff] %v1087_v19 }
 0x402   : >> { %v1884_v8 = vld [vmem:[%s2759_s30 + $0x38] sm:$0x1] }
 0x403   : >> { %v1098_v62 = vadd.f32 %v1884_v8, %v1097_v60 }
 0x405   : >> { %1885 = vst [vmem:[%s2759_s30 + $0x38] sm:$0x1] %v1098_v62 }
 0x40c   : >> { %v1105_v1 = vld [vmem:[#allocation2 + $0x40] sm:$0xff]  ;;  %v3027_v41 = vld [vmem:[#allocation2 + $0x38] sm:$0xff]  ;;  %v3032_v42 = vld [vmem:[#allocation2 + $0x50] sm:$0xff] }
 0x40d   : >> { %1126 = vrot.lane.b32.xlu1 %v1105_v1, %s2420_s2  ;;  %1124 = vrot.lane.b32.xlu0 %v3027_v41, %s2420_s2  ;;  %v3034_v25 = vld [vmem:[#allocation2 + $0x48] sm:$0xff]  ;;  %v1886_v43 = vld [vmem:[%s2764_s17 + $0x38] sm:$0x1]  ;;  %v1113_v53 = vld [vmem:[#allocation2 + $0x3f] sm:$0xff]  ;;  %v1201_v4 = vmul.f32 %v1105_v1, %v2983_v35  ;;  %v1200_v60 = vmul.f32 %v3027_v41, %v2987_v39 }
 0x40e   : >> { %1888 = vst [vmem:[%s2768_s0 + $0x4] sm:$0x1] %v1886_v43  ;;  %v1117_v54 = vld [vmem:[#allocation2 + $0x41] sm:$0xff]  ;;  %v1112_v2 = vld [vmem:[#allocation2 + $0x37] sm:$0xff]  ;;  %v1115_v12 = vld [vmem:[#allocation2 + $0x4f] sm:$0xff] }
 0x40f   : >> { %v1116_v9 = vld [vmem:[#allocation2 + $0x39] sm:$0xff]  ;;  %v1121_v55 = vadd.f32 %v1117_v54, %v1113_v53  ;;  %v1157_v59 = vld [vmem:[#allocation2 + $0x42] sm:$0xff]  ;;  %v1119_v30 = vld [vmem:[#allocation2 + $0x51] sm:$0xff] }
 0x410   : >> { %v1153_v58 = vld [vmem:[#allocation2 + $0x3e] sm:$0xff]  ;;  %v1152_v61 = vld [vmem:[#allocation2 + $0x36] sm:$0xff]  ;;  %v1120_v56 = vadd.f32 %v1116_v9, %v1112_v2  ;;  %v1114_v38 = vld [vmem:[#allocation2 + $0x47] sm:$0xff]  ;;  %v1123_v7 = vadd.f32 %v1119_v30, %v1115_v12  ;;  %v1202_v30 = vmul.f32 %v3034_v25, %v3001_v50 }
 0x411   : >> { %1130 = vrot.lane.b32.xlu1 %v3032_v42, %s2420_s2  ;;  %1128 = vrot.lane.b32.xlu0 %v3034_v25, %s2420_s2  ;;  %v1156_v16 = vld [vmem:[#allocation2 + $0x3a] sm:$0xff]  ;;  %v1118_v20 = vld [vmem:[#allocation2 + $0x49] sm:$0xff]  ;;  %v1161_v32 = vadd.f32 %v1157_v59, %v1153_v58  ;;  %v1159_v22 = vld [vmem:[#allocation2 + $0x52] sm:$0xff] }
 0x412   : >> { %v1160_v6 = vadd.f32 %v1156_v16, %v1152_v61  ;;  %v1155_v11 = vld [vmem:[#allocation2 + $0x4e] sm:$0xff]  ;;  %v1122_v34 = vadd.f32 %v1118_v20, %v1114_v38  ;;  %v1154_v23 = vld [vmem:[#allocation2 + $0x46] sm:$0xff]  ;;  %v1110_v58 = vld [vmem:[#allocation2 + $0x18] sm:$0xff]  ;;  %v1203_v61 = vmul.f32 %v3032_v42, %v2996_v26 }
 0x413   : >> { %v1109_v13 = vld [vmem:[#allocation2 + $0x10] sm:$0xff]  ;;  %v1108_v10 = vld [vmem:[#allocation2 + $0x8] sm:$0xff]  ;;  %v1163_v43 = vadd.f32 %v1159_v22, %v1155_v11 }
 0x414   : >> { %v1158_v37 = vld [vmem:[#allocation2 + $0x4a] sm:$0xff]  ;;  %v1208_v9 = vmul.f32 %v1108_v10, %v2989_v31 }
 0x415   : >> { %1166 = vrot.lane.b32.xlu1 %v1105_v1, %s2421_s21  ;;  %1164 = vrot.lane.b32.xlu0 %v3027_v41, %s2421_s21  ;;  %v1162_v54 = vadd.f32 %v1158_v37, %v1154_v23 }
 0x419   : >> { %1170 = vrot.lane.b32.xlu1 %v3032_v42, %s2421_s21  ;;  %1168 = vrot.lane.b32.xlu0 %v3034_v25, %s2421_s21 }
 0x41d   : >> { %1138 = vrot.lane.b32.xlu1 %v1105_v1, %s2422_s22  ;;  %1136 = vrot.lane.b32.xlu0 %v3027_v41, %s2422_s22 }
 0x421   : >> { %1142 = vrot.lane.b32.xlu1 %v3032_v42, %s2422_s22  ;;  %1140 = vrot.lane.b32.xlu0 %v3034_v25, %s2422_s22 }
 0x425   : >> { %1178 = vrot.lane.b32.xlu1 %v1105_v1, %s2423_s19  ;;  %1176 = vrot.lane.b32.xlu0 %v3027_v41, %s2423_s19  ;;  %v1111_v1 = vld [vmem:[#allocation2 + $0x20] sm:$0xff] }
 0x426   : >> { %v1211_v16 = vmul.f32 %v1111_v1, %v2999_v49 }
 0x428   : >> { %v1215_v23 = vsub.f32 %v1203_v61, %v1211_v16 }
 0x429   : >> { %1182 = vrot.lane.b32.xlu1 %v3032_v42, %s2423_s19  ;;  %1180 = vrot.lane.b32.xlu0 %v3034_v25, %s2423_s19 }
 0x47f   : >> { %v1127_v15 = vpop.permute.xlu1 %1126  ;;  %v1125_v63 = vpop.permute.xlu0 %1124 }
 0x480   : >> { %v1133_v24 = vadd.f32 %v1127_v15, %v1121_v55  ;;  %v1132_v36 = vadd.f32 %v1125_v63, %v1120_v56  ;;  %v1209_v15 = vmul.f32 %v1109_v13, %v2985_v18 }
 0x482   : >> { %v1213_v59 = vsub.f32 %v1201_v4, %v1209_v15 }
 0x483   : >> { %v1131_v44 = vpop.permute.xlu1 %1130  ;;  %v1129_v45 = vpop.permute.xlu0 %1128 }
 0x484   : >> { %v1135_v8 = vadd.f32 %v1131_v44, %v1123_v7  ;;  %v1134_v62 = vadd.f32 %v1129_v45, %v1122_v34 }
 0x487   : >> { %v1167_v48 = vpop.permute.xlu1 %1166  ;;  %v1165_v47 = vpop.permute.xlu0 %1164 }
 0x488   : >> { %v1173_v40 = vadd.f32 %v1167_v48, %v1161_v32  ;;  %v1172_v19 = vadd.f32 %v1165_v47, %v1160_v6  ;;  %v1210_v32 = vmul.f32 %v1110_v58, %v3003_v57 }
 0x48b   : >> { %v1171_v51 = vpop.permute.xlu1 %1170  ;;  %v1169_v52 = vpop.permute.xlu0 %1168 }
 0x48c   : >> { %v1175_v48 = vadd.f32 %v1171_v51, %v1163_v43  ;;  %v1174_v41 = vadd.f32 %v1169_v52, %v1162_v54 }
 0x48f   : >> { %v1139_v28 = vpop.permute.xlu1 %1138  ;;  %v1137_v29 = vpop.permute.xlu0 %1136 }
 0x490   : >> { %v1145_v3 = vadd.f32 %v1139_v28, %v1133_v24  ;;  %v1144_v14 = vadd.f32 %v1137_v29, %v1132_v36  ;;  %v1212_v36 = vsub.f32 %v1200_v60, %v1208_v9 }
 0x492   : >> { %v1149_v47 = vmul.f32 1.3333334, %v1145_v3  ;;  %v1148_v44 = vmul.f32 1.3333334, %v1144_v14  ;;  %v1214_v3 = vsub.f32 %v1202_v30, %v1210_v32 }
 0x493   : >> { %v1143_v27 = vpop.permute.xlu1 %1142  ;;  %v1141_v17 = vpop.permute.xlu0 %1140 }
 0x494   : >> { %v1147_v29 = vadd.f32 %v1143_v27, %v1135_v8  ;;  %v1146_v12 = vadd.f32 %v1141_v17, %v1134_v62 }
 0x496   : >> { %v1151_v52 = vmul.f32 1.3333334, %v1147_v29  ;;  %v1150_v17 = vmul.f32 1.3333334, %v1146_v12 }
 0x497   : >> { %v1179_v63 = vpop.permute.xlu1 %1178  ;;  %v1177_v53 = vpop.permute.xlu0 %1176 }
 0x498   : >> { %v1185_v2 = vadd.f32 %v1179_v63, %v1173_v40  ;;  %v1184_v28 = vadd.f32 %v1177_v53, %v1172_v19  ;;  %v1235_v19 = vstv %s1233_s10 }
 0x499   : >> { %v1236_v14 = vmul.f32 %v1235_v19, %v2668_v5 }
 0x49a   : >> { %v1189_v45 = vmul.f32 -0.083333336, %v1185_v2  ;;  %v1188_v55 = vmul.f32 -0.083333336, %v1184_v28 }
 0x49b   : >> { %v1183_v56 = vpop.permute.xlu1 %1182  ;;  %v1181_v38 = vpop.permute.xlu0 %1180 }
 0x49c   : >> { %v1193_v51 = vadd.f32 %v1189_v45, %v1149_v47  ;;  %v1192_v20 = vadd.f32 %v1188_v55, %v1148_v44  ;;  %v1187_v24 = vadd.f32 %v1183_v56, %v1175_v48  ;;  %v1186_v27 = vadd.f32 %v1181_v38, %v1174_v41 }
 0x49e   : >> { %v1221_v6 = vmul.f32 %v1193_v51, %v3005_v0  ;;  %v1220_v42 = vmul.f32 %v1192_v20, %v3007_v21  ;;  %v1191_v11 = vmul.f32 -0.083333336, %v1187_v24  ;;  %v1190_v22 = vmul.f32 -0.083333336, %v1186_v27 }
 0x4a0   : >> { %v1225_v13 = vadd.f32 %v1221_v6, %v1213_v59  ;;  %v1224_v25 = vadd.f32 %v1220_v42, %v1212_v36  ;;  %v1195_v7 = vadd.f32 %v1191_v11, %v1151_v52  ;;  %v1194_v34 = vadd.f32 %v1190_v22, %v1150_v17 }
 0x4a2   : >> { %1228 = vst [vmem:[#allocation2 + $0x8] sm:$0xff] %v1224_v25  ;;  %1229 = vst [vmem:[#allocation2 + $0x10] sm:$0xff] %v1225_v13  ;;  %v1223_v37 = vmul.f32 %v1195_v7, %v3018_v33  ;;  %v1222_v4 = vmul.f32 %v1194_v34, %v3020_v46 }
 0x4a4   : >> { %v1227_v10 = vadd.f32 %v1223_v37, %v1215_v23  ;;  %v1226_v40 = vadd.f32 %v1222_v4, %v1214_v3 }
 0x4a6   : >> { %1231 = vst [vmem:[#allocation2 + $0x20] sm:$0xff] %v1227_v10  ;;  %1230 = vst [vmem:[#allocation2 + $0x18] sm:$0xff] %v1226_v40 }
 0x4ad   : >> { %v1889_v60 = vld [vmem:[%s2759_s30 + $0x8] sm:$0x1] }
 0x4ae   : >> { %v1237_v8 = vadd.f32 %v1889_v60, %v1236_v14 }
 0x4b0   : >> { %1890 = vst [vmem:[%s2759_s30 + $0x8] sm:$0x1] %v1237_v8 }
 0x4b7   : >> { %v1244_v62 = vld [vmem:[#allocation2 + $0x10] sm:$0xff]  ;;  %v3082_v43 = vld [vmem:[#allocation2 + $0x8] sm:$0xff]  ;;  %v3087_v15 = vld [vmem:[#allocation2 + $0x20] sm:$0xff] }
 0x4b8   : >> { %1265 = vrot.lane.b32.xlu1 %v1244_v62, %s2420_s2  ;;  %1263 = vrot.lane.b32.xlu0 %v3082_v43, %s2420_s2  ;;  %v3089_v63 = vld [vmem:[#allocation2 + $0x18] sm:$0xff]  ;;  %v1891_v53 = vld [vmem:[%s2764_s17 + $0x8] sm:$0x1]  ;;  %v1252_v12 = vld [vmem:[#allocation2 + $0xf] sm:$0xff]  ;;  %v1340_v3 = vmul.f32 %v1244_v62, %v2983_v35  ;;  %v1339_v14 = vmul.f32 %v3082_v43, %v2987_v39 }
 0x4b9   : >> { %1893 = vst [vmem:[%s2768_s0 + $0x5] sm:$0x1] %v1891_v53  ;;  %v1256_v58 = vld [vmem:[#allocation2 + $0x11] sm:$0xff]  ;;  %v1251_v41 = vld [vmem:[#allocation2 + $0x7] sm:$0xff]  ;;  %v1254_v59 = vld [vmem:[#allocation2 + $0x1f] sm:$0xff] }
 0x4ba   : >> { %v1255_v44 = vld [vmem:[#allocation2 + $0x9] sm:$0xff]  ;;  %v1260_v16 = vadd.f32 %v1256_v58, %v1252_v12  ;;  %v1296_v56 = vld [vmem:[#allocation2 + $0x12] sm:$0xff]  ;;  %v1258_v20 = vld [vmem:[#allocation2 + $0x21] sm:$0xff] }
 0x4bb   : >> { %v1292_v61 = vld [vmem:[#allocation2 + $0xe] sm:$0xff]  ;;  %v1291_v30 = vld [vmem:[#allocation2 + $0x6] sm:$0xff]  ;;  %v1259_v51 = vadd.f32 %v1255_v44, %v1251_v41  ;;  %v1253_v24 = vld [vmem:[#allocation2 + $0x17] sm:$0xff]  ;;  %v1262_v25 = vadd.f32 %v1258_v20, %v1254_v59  ;;  %v1341_v20 = vmul.f32 %v3089_v63, %v3001_v50 }
 0x4bc   : >> { %1269 = vrot.lane.b32.xlu1 %v3087_v15, %s2420_s2  ;;  %1267 = vrot.lane.b32.xlu0 %v3089_v63, %s2420_s2  ;;  %v1295_v38 = vld [vmem:[#allocation2 + $0xa] sm:$0xff]  ;;  %v1257_v27 = vld [vmem:[#allocation2 + $0x19] sm:$0xff]  ;;  %v1300_v6 = vadd.f32 %v1296_v56, %v1292_v61  ;;  %v1298_v22 = vld [vmem:[#allocation2 + $0x22] sm:$0xff] }
 0x4bd   : >> { %v1299_v42 = vadd.f32 %v1295_v38, %v1291_v30  ;;  %v1294_v11 = vld [vmem:[#allocation2 + $0x1e] sm:$0xff]  ;;  %v1261_v7 = vadd.f32 %v1257_v27, %v1253_v24  ;;  %v1293_v34 = vld [vmem:[#allocation2 + $0x16] sm:$0xff]  ;;  %v1249_v61 = vld [vmem:[#allocation2 + $0x48] sm:$0xff]  ;;  %v1342_v30 = vmul.f32 %v3087_v15, %v2996_v26 }
 0x4be   : >> { %v1248_v13 = vld [vmem:[#allocation2 + $0x40] sm:$0xff]  ;;  %v1247_v4 = vld [vmem:[#allocation2 + $0x38] sm:$0xff]  ;;  %v1302_v53 = vadd.f32 %v1298_v22, %v1294_v11 }
 0x4bf   : >> { %v1297_v23 = vld [vmem:[#allocation2 + $0x1a] sm:$0xff]  ;;  %v1347_v44 = vmul.f32 %v1247_v4, %v2989_v31 }
 0x4c0   : >> { %1305 = vrot.lane.b32.xlu1 %v1244_v62, %s2421_s21  ;;  %1303 = vrot.lane.b32.xlu0 %v3082_v43, %s2421_s21  ;;  %v1301_v58 = vadd.f32 %v1297_v23, %v1293_v34 }
 0x4c4   : >> { %1309 = vrot.lane.b32.xlu1 %v3087_v15, %s2421_s21  ;;  %1307 = vrot.lane.b32.xlu0 %v3089_v63, %s2421_s21 }
 0x4c8   : >> { %1277 = vrot.lane.b32.xlu1 %v1244_v62, %s2422_s22  ;;  %1275 = vrot.lane.b32.xlu0 %v3082_v43, %s2422_s22 }
 0x4cc   : >> { %1281 = vrot.lane.b32.xlu1 %v3087_v15, %s2422_s22  ;;  %1279 = vrot.lane.b32.xlu0 %v3089_v63, %s2422_s22 }
 0x4d0   : >> { %1317 = vrot.lane.b32.xlu1 %v1244_v62, %s2423_s19  ;;  %1315 = vrot.lane.b32.xlu0 %v3082_v43, %s2423_s19  ;;  %v1250_v62 = vld [vmem:[#allocation2 + $0x50] sm:$0xff] }
 0x4d1   : >> { %v1350_v38 = vmul.f32 %v1250_v62, %v2999_v49 }
 0x4d3   : >> { %v1354_v34 = vsub.f32 %v1342_v30, %v1350_v38 }
 0x4d4   : >> { %1321 = vrot.lane.b32.xlu1 %v3087_v15, %s2423_s19  ;;  %1319 = vrot.lane.b32.xlu0 %v3089_v63, %s2423_s19 }
 0x52a   : >> { %v1266_v54 = vpop.permute.xlu1 %1265  ;;  %v1264_v2 = vpop.permute.xlu0 %1263 }
 0x52b   : >> { %v1272_v52 = vadd.f32 %v1266_v54, %v1260_v16  ;;  %v1271_v32 = vadd.f32 %v1264_v2, %v1259_v51  ;;  %v1348_v54 = vmul.f32 %v1248_v13, %v2985_v18 }
 0x52d   : >> { %v1352_v56 = vsub.f32 %v1340_v3, %v1348_v54 }
 0x52e   : >> { %v1270_v9 = vpop.permute.xlu1 %1269  ;;  %v1268_v28 = vpop.permute.xlu0 %1267 }
 0x52f   : >> { %v1274_v60 = vadd.f32 %v1270_v9, %v1262_v25  ;;  %v1273_v8 = vadd.f32 %v1268_v28, %v1261_v7 }
 0x532   : >> { %v1306_v1 = vpop.permute.xlu1 %1305  ;;  %v1304_v48 = vpop.permute.xlu0 %1303 }
 0x533   : >> { %v1312_v10 = vadd.f32 %v1306_v1, %v1300_v6  ;;  %v1311_v40 = vadd.f32 %v1304_v48, %v1299_v42  ;;  %v1349_v6 = vmul.f32 %v1249_v61, %v3003_v57 }
 0x536   : >> { %v1310_v47 = vpop.permute.xlu1 %1309  ;;  %v1308_v29 = vpop.permute.xlu0 %1307 }
 0x537   : >> { %v1314_v1 = vadd.f32 %v1310_v47, %v1302_v53  ;;  %v1313_v43 = vadd.f32 %v1308_v29, %v1301_v58 }
 0x53a   : >> { %v1278_v45 = vpop.permute.xlu1 %1277  ;;  %v1276_v55 = vpop.permute.xlu0 %1275 }
 0x53b   : >> { %v1284_v37 = vadd.f32 %v1278_v45, %v1272_v52  ;;  %v1283_v19 = vadd.f32 %v1276_v55, %v1271_v32  ;;  %v1351_v32 = vsub.f32 %v1339_v14, %v1347_v44 }
 0x53d   : >> { %v1288_v48 = vmul.f32 1.3333334, %v1284_v37  ;;  %v1287_v9 = vmul.f32 1.3333334, %v1283_v19  ;;  %v1353_v37 = vsub.f32 %v1341_v20, %v1349_v6 }
 0x53e   : >> { %v1282_v17 = vpop.permute.xlu1 %1281  ;;  %v1280_v36 = vpop.permute.xlu0 %1279 }
 0x53f   : >> { %v1286_v55 = vadd.f32 %v1282_v17, %v1274_v60  ;;  %v1285_v59 = vadd.f32 %v1280_v36, %v1273_v8 }
 0x541   : >> { %v1290_v29 = vmul.f32 1.3333334, %v1286_v55  ;;  %v1289_v36 = vmul.f32 1.3333334, %v1285_v59 }
 0x542   : >> { %v1318_v2 = vpop.permute.xlu1 %1317  ;;  %v1316_v12 = vpop.permute.xlu0 %1315 }
 0x543   : >> { %v1324_v41 = vadd.f32 %v1318_v2, %v1312_v10  ;;  %v1323_v45 = vadd.f32 %v1316_v12, %v1311_v40  ;;  %v1374_v40 = vstv %s1372_s15 }
 0x544   : >> { %v1375_v19 = vmul.f32 %v1374_v40, %v2668_v5 }
 0x545   : >> { %v1328_v28 = vmul.f32 -0.083333336, %v1324_v41  ;;  %v1327_v16 = vmul.f32 -0.083333336, %v1323_v45 }
 0x546   : >> { %v1322_v51 = vpop.permute.xlu1 %1321  ;;  %v1320_v24 = vpop.permute.xlu0 %1319 }
 0x547   : >> { %v1332_v47 = vadd.f32 %v1328_v28, %v1288_v48  ;;  %v1331_v27 = vadd.f32 %v1327_v16, %v1287_v9  ;;  %v1326_v52 = vadd.f32 %v1322_v51, %v1314_v1  ;;  %v1325_v17 = vadd.f32 %v1320_v24, %v1313_v43 }
 0x549   : >> { %v1360_v42 = vmul.f32 %v1332_v47, %v3005_v0  ;;  %v1359_v15 = vmul.f32 %v1331_v27, %v3007_v21  ;;  %v1330_v11 = vmul.f32 -0.083333336, %v1326_v52  ;;  %v1329_v22 = vmul.f32 -0.083333336, %v1325_v17 }
 0x54b   : >> { %v1364_v13 = vadd.f32 %v1360_v42, %v1352_v56  ;;  %v1363_v63 = vadd.f32 %v1359_v15, %v1351_v32  ;;  %v1334_v25 = vadd.f32 %v1330_v11, %v1290_v29  ;;  %v1333_v7 = vadd.f32 %v1329_v22, %v1289_v36 }
 0x54d   : >> { %1367 = vst [vmem:[#allocation2 + $0x38] sm:$0xff] %v1363_v63  ;;  %1368 = vst [vmem:[#allocation2 + $0x40] sm:$0xff] %v1364_v13  ;;  %v1362_v23 = vmul.f32 %v1334_v25, %v3018_v33  ;;  %v1361_v3 = vmul.f32 %v1333_v7, %v3020_v46 }
 0x54f   : >> { %v1366_v4 = vadd.f32 %v1362_v23, %v1354_v34  ;;  %v1365_v10 = vadd.f32 %v1361_v3, %v1353_v37 }
 0x551   : >> { %1370 = vst [vmem:[#allocation2 + $0x50] sm:$0xff] %v1366_v4  ;;  %1369 = vst [vmem:[#allocation2 + $0x48] sm:$0xff] %v1365_v10 }
 0x558   : >> { %v1894_v14 = vld [vmem:[%s2759_s30 + $0x38] sm:$0x1] }
 0x559   : >> { %v1376_v60 = vadd.f32 %v1894_v14, %v1375_v19 }
 0x55b   : >> { %1895 = vst [vmem:[%s2759_s30 + $0x38] sm:$0x1] %v1376_v60 }
 0x562   : >> { %v1896_v8 = vld [vmem:[%s2764_s17 + $0x38] sm:$0x1]  ;;  %v1383_v53 = vld [vmem:[#allocation2 + $0x40] sm:$0xff]  ;;  %v3144_v2 = vld [vmem:[#allocation2 + $0x50] sm:$0xff] }
 0x563   : >> { %v3138_v54 = vld [vmem:[#allocation2 + $0x38] sm:$0xff]  ;;  %1898 = vst [vmem:[%s2768_s0 + $0x6] sm:$0x1] %v1896_v8  ;;  %1404 = vrot.lane.b32.xlu1 %v1383_v53, %s2420_s2  ;;  %v3146_v12 = vld [vmem:[#allocation2 + $0x48] sm:$0xff]  ;;  %v1387_v23 = vld [vmem:[#allocation2 + $0x10] sm:$0xff]  ;;  %v1479_v37 = vmul.f32 %v1383_v53, %v2983_v35 }
 0x564   : >> { %1402 = vrot.lane.b32.xlu0 %v3138_v54, %s2420_s2  ;;  %v1391_v59 = vld [vmem:[#allocation2 + $0x3f] sm:$0xff]  ;;  %v1390_v43 = vld [vmem:[#allocation2 + $0x37] sm:$0xff]  ;;  %v1393_v56 = vld [vmem:[#allocation2 + $0x4f] sm:$0xff]  ;;  %v1478_v19 = vmul.f32 %v3138_v54, %v2987_v39 }
 0x565   : >> { %v1395_v61 = vld [vmem:[#allocation2 + $0x41] sm:$0xff]  ;;  %v1394_v9 = vld [vmem:[#allocation2 + $0x39] sm:$0xff]  ;;  %v1397_v27 = vld [vmem:[#allocation2 + $0x51] sm:$0xff] }
 0x566   : >> { %v1431_v30 = vld [vmem:[#allocation2 + $0x3e] sm:$0xff]  ;;  %v1399_v38 = vadd.f32 %v1395_v61, %v1391_v59  ;;  %v1430_v20 = vld [vmem:[#allocation2 + $0x36] sm:$0xff]  ;;  %v1398_v47 = vadd.f32 %v1394_v9, %v1390_v43  ;;  %v1392_v52 = vld [vmem:[#allocation2 + $0x47] sm:$0xff]  ;;  %v1401_v25 = vadd.f32 %v1397_v27, %v1393_v56  ;;  %v1487_v61 = vmul.f32 %v1387_v23, %v2985_v18 }
 0x567   : >> { %1408 = vrot.lane.b32.xlu1 %v3144_v2, %s2420_s2  ;;  %v1435_v51 = vld [vmem:[#allocation2 + $0x42] sm:$0xff]  ;;  %v1434_v24 = vld [vmem:[#allocation2 + $0x3a] sm:$0xff]  ;;  %v1433_v36 = vld [vmem:[#allocation2 + $0x4e] sm:$0xff] }
 0x568   : >> { %1406 = vrot.lane.b32.xlu0 %v3146_v12, %s2420_s2  ;;  %v1396_v17 = vld [vmem:[#allocation2 + $0x49] sm:$0xff]  ;;  %v1439_v15 = vadd.f32 %v1435_v51, %v1431_v30  ;;  %v1438_v11 = vadd.f32 %v1434_v24, %v1430_v20  ;;  %v1437_v22 = vld [vmem:[#allocation2 + $0x52] sm:$0xff]  ;;  %v1389_v35 = vld [vmem:[#allocation2 + $0x20] sm:$0xff]  ;;  %v1481_v30 = vmul.f32 %v3144_v2, %v2996_v26  ;;  %s1510_s2 = sadd.s32 7, %s2746_s23  ;;  %s2298_s23 = scalar_lea.vmem (%p394_p13), %s3208_s16, 1024 }
 0x569   : >> { %v1432_v13 = vld [vmem:[#allocation2 + $0x46] sm:$0xff]  ;;  %v1400_v7 = vadd.f32 %v1396_v17, %v1392_v52  ;;  %v1441_v8 = vadd.f32 %v1437_v22, %v1433_v36  ;;  %v1489_v18 = vmul.f32 %v1389_v35, %v2999_v49  ;;  %v1491_v17 = vsub.f32 %v1479_v37, %v1487_v61  ;;  %v1532_v37 = vld [vmem:[#allocation16 + $0x18] sm:$0xff] (%p394_p13)  ;;  %v1539_v61 = vld [vmem:[#allocation16 + $0x50] sm:$0xff] (%p394_p13)  ;;  %p2299_p1 = scmp.ne.s32.totalorder (%p394_p13), %s3208_s16, %s2298_s23 }
 0x56a   : >> { %v1436_v63 = vld [vmem:[#allocation2 + $0x4a] sm:$0xff] }
 0x56b   : >> { %1444 = vrot.lane.b32.xlu1 %v1383_v53, %s2421_s21  ;;  %v1386_v3 = vld [vmem:[#allocation2 + $0x8] sm:$0xff]  ;;  %p2300_p11 = pnand (%p394_p13), %p2299_p1, %p3292_p4 }
 0x56c   : >> { %1442 = vrot.lane.b32.xlu0 %v3138_v54, %s2421_s21  ;;  %v1486_v9 = vmul.f32 %v1386_v3, %v2989_v31  ;;  %v1480_v31 = vmul.f32 %v3146_v12, %v3001_v50  ;;  %v1542_v35 = vld [vmem:[#allocation16 + $0x68] sm:$0xff] (%p394_p13) }
 0x56d   : > { %p2301_p7 = pneg (%p394_p13), %p2300_p11 }
 0x56f   : >> { %1448 = vrot.lane.b32.xlu1 %v3144_v2, %s2421_s21 }
 0x570   : >> { %1446 = vrot.lane.b32.xlu0 %v3146_v12, %s2421_s21  ;;  %s1511_s21 = sld [smem:[#allocation4 + %s1510_s2]] }
 0x573   : >> { %1416 = vrot.lane.b32.xlu1 %v1383_v53, %s2422_s22 }
 0x574   : >> { %1414 = vrot.lane.b32.xlu0 %v3138_v54, %s2422_s22 }
 0x576   : >> { %v1513_v22 = vstv %s1511_s21 }
 0x577   : >> { %1420 = vrot.lane.b32.xlu1 %v3144_v2, %s2422_s22 }
 0x578   : >> { %1418 = vrot.lane.b32.xlu0 %v3146_v12, %s2422_s22 }
 0x57b   : >> { %1456 = vrot.lane.b32.xlu1 %v1383_v53, %s2423_s19  ;;  %v1388_v53 = vld [vmem:[#allocation2 + $0x18] sm:$0xff] }
 0x57c   : >> { %1454 = vrot.lane.b32.xlu0 %v3138_v54, %s2423_s19  ;;  %v1488_v51 = vmul.f32 %v1388_v53, %v3003_v57 }
 0x57f   : >> { %1460 = vrot.lane.b32.xlu1 %v3144_v2, %s2423_s19 }
 0x580   : >> { %1458 = vrot.lane.b32.xlu0 %v3146_v12, %s2423_s19  ;;  %s3206_s19 = scalar_lea.hbm (%p394_p13), %s3269_s7, %s1909_s4 }
 0x5d5   : >> { %v1405_v58 = vpop.permute.xlu1 %1404 }
 0x5d6   : >> { %v1403_v41 = vpop.permute.xlu0 %1402  ;;  %v1411_v29 = vadd.f32 %v1405_v58, %v1399_v38  ;;  %v1440_v58 = vadd.f32 %v1436_v63, %v1432_v13  ;;  %v1514_v13 = vmul.f32 %v1513_v22, %v2668_v5 }
 0x5d7   : >> { %v1410_v42 = vadd.f32 %v1403_v41, %v1398_v47 }
 0x5d9   : >> { %v1409_v44 = vpop.permute.xlu1 %1408 }
 0x5da   : >> { %v1407_v45 = vpop.permute.xlu0 %1406  ;;  %v1413_v14 = vadd.f32 %v1409_v44, %v1401_v25 }
 0x5db   : >> { %v1412_v60 = vadd.f32 %v1407_v45, %v1400_v7 }
 0x5dd   : >> { %v1445_v62 = vpop.permute.xlu1 %1444 }
 0x5de   : >> { %v1443_v1 = vpop.permute.xlu0 %1442  ;;  %v1451_v4 = vadd.f32 %v1445_v62, %v1439_v15  ;;  %v1492_v15 = vsub.f32 %v1480_v31, %v1488_v51 }
 0x5df   : >> { %v1450_v10 = vadd.f32 %v1443_v1, %v1438_v11 }
 0x5e1   : >> { %v1449_v48 = vpop.permute.xlu1 %1448 }
 0x5e2   : >> { %v1447_v55 = vpop.permute.xlu0 %1446  ;;  %v1453_v62 = vadd.f32 %v1449_v48, %v1441_v8  ;;  %v1536_v8 = vld [vmem:[#allocation16 + $0x38] sm:$0xff] (%p394_p13) }
 0x5e3   : >> { %v1452_v39 = vadd.f32 %v1447_v55, %v1440_v58  ;;  %v1537_v58 = vld [vmem:[#allocation16 + $0x40] sm:$0xff] (%p394_p13) }
 0x5e5   : >> { %v1417_v28 = vpop.permute.xlu1 %1416 }
 0x5e6   : >> { %v1415_v16 = vpop.permute.xlu0 %1414  ;;  %v1423_v34 = vadd.f32 %v1417_v28, %v1411_v29  ;;  %v1490_v29 = vsub.f32 %v1478_v19, %v1486_v9 }
 0x5e7   : >> { %v1422_v40 = vadd.f32 %v1415_v16, %v1410_v42 }
 0x5e8   : >> { %v1427_v1 = vmul.f32 1.3333334, %v1423_v34  ;;  %v1531_v34 = vld [vmem:[#allocation16 + $0x10] sm:$0xff] (%p394_p13) }
 0x5e9   : >> { %v1421_v32 = vpop.permute.xlu1 %1420  ;;  %v1426_v54 = vmul.f32 1.3333334, %v1422_v40  ;;  %v1982_v3 = vpack.c.bf16 (%p394_p13), %v1532_v37, %v1531_v34 }
 0x5ea   : >> { %v1419_v6 = vpop.permute.xlu0 %1418  ;;  %v1425_v16 = vadd.f32 %v1421_v32, %v1413_v14 }
 0x5eb   : >> { %v1424_v56 = vadd.f32 %v1419_v6, %v1412_v60  ;;  %v1493_v6 = vsub.f32 %v1481_v30, %v1489_v18  ;;  %v1535_v60 = vld [vmem:[#allocation16 + $0x30] sm:$0xff] (%p394_p13) }
 0x5ec   : >> { %v1429_v27 = vmul.f32 1.3333334, %v1425_v16  ;;  %v1990_v5 = vpack.c.bf16 (%p394_p13), %v1536_v8, %v1535_v60 }
 0x5ed   : >> { %v1457_v41 = vpop.permute.xlu1 %1456  ;;  %v1428_v52 = vmul.f32 1.3333334, %v1424_v56 }
 0x5ee   : >> { %v1455_v59 = vpop.permute.xlu0 %1454  ;;  %v1463_v43 = vadd.f32 %v1457_v41, %v1451_v4  ;;  %v1533_v4 = vld [vmem:[#allocation16 + $0x20] sm:$0xff] (%p394_p13)  ;;  %v1538_v41 = vld [vmem:[#allocation16 + $0x48] sm:$0xff] (%p394_p13) }
 0x5ef   : >> { %v1462_v28 = vadd.f32 %v1455_v59, %v1450_v10  ;;  %v1534_v10 = vld [vmem:[#allocation16 + $0x28] sm:$0xff] (%p394_p13)  ;;  %v1994_v59 = vpack.c.bf16 (%p394_p13), %v1538_v41, %v1537_v58 }
 0x5f0   : >> { %v1467_v44 = vmul.f32 -0.083333336, %v1463_v43  ;;  %v1986_v40 = vpack.c.bf16 (%p394_p13), %v1534_v10, %v1533_v4  ;;  %v1540_v43 = vld [vmem:[#allocation16 + $0x58] sm:$0xff] (%p394_p13) }
 0x5f1   : >> { %v1466_v45 = vmul.f32 -0.083333336, %v1462_v28  ;;  %v1461_v38 = vpop.permute.xlu1 %1460  ;;  %v1998_v9 = vpack.c.bf16 (%p394_p13), %v1540_v43, %v1539_v61  ;;  %v1541_v28 = vld [vmem:[#allocation16 + $0x60] sm:$0xff] (%p394_p13) }
 0x5f2   : >> { %v1459_v20 = vpop.permute.xlu0 %1458  ;;  %v1471_v48 = vadd.f32 %v1467_v44, %v1427_v1  ;;  %v1465_v47 = vadd.f32 %v1461_v38, %v1453_v62  ;;  %v2002_v53 = vpack.c.bf16 (%p394_p13), %v1542_v35, %v1541_v28  ;;  %v1543_v62 = vld [vmem:[#allocation16 + $0x70] sm:$0xff] (%p394_p13)  ;;  %v1544_v1 = vld [vmem:[#allocation16 + $0x78] sm:$0xff] (%p394_p13) }
 0x5f3   : >> { %v1470_v24 = vadd.f32 %v1466_v45, %v1426_v54  ;;  %v1464_v55 = vadd.f32 %v1459_v20, %v1452_v39  ;;  %v2006_v16 = vpack.c.bf16 (%p394_p13), %v1544_v1, %v1543_v62 }
 0x5f4   : >> { %v1499_v26 = vmul.f32 %v1471_v48, %v3005_v0  ;;  %v1469_v2 = vmul.f32 -0.083333336, %v1465_v47 }
 0x5f5   : >> { %v1498_v49 = vmul.f32 %v1470_v24, %v3007_v21  ;;  %v1468_v36 = vmul.f32 -0.083333336, %v1464_v55 }
 0x5f6   : >> { %v1503_v50 = vadd.f32 %v1499_v26, %v1491_v17  ;;  %v1473_v12 = vadd.f32 %v1469_v2, %v1429_v27 }
 0x5f7   : >> { %v1502_v57 = vadd.f32 %v1498_v49, %v1490_v29  ;;  %v1472_v32 = vadd.f32 %v1468_v36, %v1428_v52 }
 0x5f8   : >> { %1507 = vst [vmem:[#allocation2 + $0x10] sm:$0xff] %v1503_v50  ;;  %v1501_v42 = vmul.f32 %v1473_v12, %v3018_v33  ;;  %v1529_v33 = vld [vmem:[#allocation16] sm:$0xff] (%p394_p13) }
 0x5f9   : >> { %1506 = vst [vmem:[#allocation2 + $0x8] sm:$0xff] %v1502_v57  ;;  %v1500_v0 = vmul.f32 %v1472_v32, %v3020_v46  ;;  %v1530_v46 = vld [vmem:[#allocation16 + $0x8] sm:$0xff] (%p394_p13) }
 0x5fa   : >> { %v1505_v21 = vadd.f32 %v1501_v42, %v1493_v6  ;;  %v1978_v23 = vpack.c.bf16 (%p394_p13), %v1530_v46, %v1529_v33 }
 0x5fb   : >> { %v1504_v11 = vadd.f32 %v1500_v0, %v1492_v15 }
 0x5fc   : >> { %1509 = vst [vmem:[#allocation2 + $0x20] sm:$0xff] %v1505_v21  ;;  %1979 = vmatprep.subr.bf16.mxu0 (%p394_p13), %v1978_v23  ;;  %2010 = vmatprep.subr.bf16.mxu1 (%p394_p13), %v1978_v23 }
 0x5fd   : >> { %1508 = vst [vmem:[#allocation2 + $0x18] sm:$0xff] %v1504_v11  ;;  %1981 = vmatpush3.bf16.msra.mxu0 (%p394_p13), %v1978_v23  ;;  %2018 = vmatpush3.bf16.msra.mxu1 (%p394_p13), %v1978_v23 }
 0x5fe   : > { %1983 = vmatprep.subr.bf16.mxu0 (%p394_p13), %v1982_v3  ;;  %2011 = vmatprep.subr.bf16.mxu1 (%p394_p13), %v1982_v3 }
 0x601   : > { %1985 = vmatpush3.bf16.msra.mxu0 (%p394_p13), %v1982_v3  ;;  %2019 = vmatpush3.bf16.msra.mxu1 (%p394_p13), %v1982_v3 }
 0x602   : > { %1987 = vmatprep.subr.bf16.mxu0 (%p394_p13), %v1986_v40  ;;  %2012 = vmatprep.subr.bf16.mxu1 (%p394_p13), %v1986_v40 }
 0x604   : >> { %v1899_v63 = vld [vmem:[%s2759_s30 + $0x8] sm:$0x1] }
 0x605   : >> { %v1515_v25 = vadd.f32 %v1899_v63, %v1514_v13  ;;  %1989 = vmatpush3.bf16.msra.mxu0 (%p394_p13), %v1986_v40  ;;  %2020 = vmatpush3.bf16.msra.mxu1 (%p394_p13), %v1986_v40 }
 0x606   : > { %1991 = vmatprep.subr.bf16.mxu0 (%p394_p13), %v1990_v5  ;;  %2013 = vmatprep.subr.bf16.mxu1 (%p394_p13), %v1990_v5 }
 0x607   : >> { %1900 = vst [vmem:[%s2759_s30 + $0x8] sm:$0x1] %v1515_v25  ;;  %s2424_s30 = smov (%p394_p13), [#allocation18]  }
 0x609   : > { %1993 = vmatpush3.bf16.msra.mxu0 (%p394_p13), %v1990_v5  ;;  %2021 = vmatpush3.bf16.msra.mxu1 (%p394_p13), %v1990_v5 }
 0x60a   : > { %1995 = vmatprep.subr.bf16.mxu0 (%p394_p13), %v1994_v59  ;;  %2014 = vmatprep.subr.bf16.mxu1 (%p394_p13), %v1994_v59 }
 0x60c   : > { %396 = sbr.rel (!%p394_p13) target bundleno = 178 (0xb2), region = 137 }
 0x60d   : > { %1997 = vmatpush3.bf16.msra.mxu0 (%p394_p13), %v1994_v59  ;;  %2022 = vmatpush3.bf16.msra.mxu1 (%p394_p13), %v1994_v59 }
 0x60e   : >> { %v1901_v7 = vld [vmem:[%s2764_s17 + $0x8] sm:$0x1]  ;;  %1999 = vmatprep.subr.bf16.mxu0 (%p394_p13), %v1998_v9  ;;  %2015 = vmatprep.subr.bf16.mxu1 (%p394_p13), %v1998_v9  ;;  %s2302_s17 = sshll.u32 (%p394_p13), %s2424_s30, 4  ;;  %s2303_s17 = int_to_ptr.vmem [resolvable:$false] %s2302_s17 }
 0x60f   : >> { %1903 = vst [vmem:[%s2768_s0 + $0x7] sm:$0x1] %v1901_v7  ;;  %s2304_s0 = scalar_lea.vmem (%p394_p13), %s2303_s17, 2048  ;;  %p2305_p9 = scmp.lt.s32.totalorder (%p394_p13), %s3208_s16, %s2303_s17 }
 0x610   : > { %p2306_p12 = scmp.lt.s32.totalorder (%p394_p13), %s2304_s0, %s2298_s23 }
 0x611   : > { %2001 = vmatpush3.bf16.msra.mxu0 (%p394_p13), %v1998_v9  ;;  %2023 = vmatpush3.bf16.msra.mxu1 (%p394_p13), %v1998_v9 }
 0x612   : > { %2003 = vmatprep.subr.bf16.mxu0 (%p394_p13), %v2002_v53  ;;  %2016 = vmatprep.subr.bf16.mxu1 (%p394_p13), %v2002_v53  ;;  %p2307_p0 = por (%p394_p13), %p2306_p12, %p2305_p9 }
 0x614   : > { %p2308_p2 = pnand %p2307_p0, %p2301_p7 }
 0x615   : > { %2005 = vmatpush3.bf16.msra.mxu0 %v2002_v53  ;;  %2024 = vmatpush3.bf16.msra.mxu1 %v2002_v53 }
 0x616   : > { %v1521_v19 = vld [vmem:[#allocation3] sm:$0xff]  ;;  %2007 = vmatprep.subr.bf16.mxu0 %v2006_v16  ;;  %2017 = vmatprep.subr.bf16.mxu1 %v2006_v16  ;;  %v1522_v56 = vld [vmem:[#allocation3 + $0x8] sm:$0xff]  ;;  %v1523_v54 = vld [vmem:[#allocation3 + $0x10] sm:$0xff] }
 0x617   : > { %v1525_v14 = vld [vmem:[#allocation3 + $0x20] sm:$0xff]  ;;  %1966 = vmatprep.mubr.f32.mxu0 %v1521_v19  ;;  %v1526_v39 = vld [vmem:[#allocation3 + $0x28] sm:$0xff]  ;;  %v1527_v44 = vld [vmem:[#allocation3 + $0x30] sm:$0xff] }
 0x618   : > { %1972 = vmatprep.mubr.f32.mxu1 %v1525_v14  ;;  %v1524_v45 = vld [vmem:[#allocation3 + $0x18] sm:$0xff] }
 0x619   : > { %2009 = vmatpush3.bf16.msra.mxu0 %v2006_v16  ;;  %2025 = vmatpush3.bf16.msra.mxu1 %v2006_v16  ;;  %v1528_v30 = vld [vmem:[#allocation3 + $0x38] sm:$0xff] }
 0x61c   : > { %1967 = vmatmul.mubr.f32.vlgmr.msra.gmra.mrb[0].mxu0 %v1522_v56  ;;  %1973 = vmatmul.mubr.f32.vlgmr.msra.gmra.mrb[0].mxu1 %v1526_v39 }
 0x61d   : > { %1969 = vmatprep.mubr.f32.mxu0 %v1523_v54  ;;  %1975 = vmatprep.mubr.f32.mxu1 %v1527_v44 }
 0x620   : > { %1970 = vmatmul.mubr.f32.gmra.mrb[2].mxu0 %v1524_v45  ;;  %1976 = vmatmul.mubr.f32.gmra.mrb[2].mxu1 %v1528_v30 }
 0x6ef   : > { %v1968_v18 = vpop.f32.mrb[0].mxu0  ;;  %v1974_v38 = vpop.f32.mrb[0].mxu1 }
 0x6f0   : > { %1651 = vst [vmem:[%s2670_s12 + $0x8] sm:$0xff] %v1968_v18  ;;  %1655 = vst [vmem:[%s2670_s12 + $0x28] sm:$0xff] %v1974_v38  ;;  %v1611_v31 = vpop.f32.mrb[1].mxu0  ;;  %v1631_v51 = vpop.f32.mrb[1].mxu1 }
 0x6f1   : > { %1650 = vst [vmem:[%s2670_s12] sm:$0xff] %v1611_v31  ;;  %1654 = vst [vmem:[%s2670_s12 + $0x20] sm:$0xff] %v1631_v51 }
 0x6f3   : > { %v1971_v20 = vpop.f32.mrb[2].mxu0  ;;  %v1977_v48 = vpop.f32.mrb[2].mxu1 }
 0x6f4   : > { %1653 = vst [vmem:[%s2670_s12 + $0x18] sm:$0xff] %v1971_v20  ;;  %1657 = vst [vmem:[%s2670_s12 + $0x38] sm:$0xff] %v1977_v48  ;;  %v1621_v24 = vpop.f32.mrb[3].mxu0  ;;  %v1641_v47 = vpop.f32.mrb[3].mxu1 }
 0x6f5   : > { %1652 = vst [vmem:[%s2670_s12 + $0x10] sm:$0xff] %v1621_v24  ;;  %1656 = vst [vmem:[%s2670_s12 + $0x30] sm:$0xff] %v1641_v47 }
 0x6f6   : > { %2311 = shalt.err (!%p2308_p2)
}
 0x6f7   : > { %s2312_s3 = scalar_lea.hbm %s3206_s19, 1024  ;;  %s2316_s8 = scalar_lea.hbm %s3269_s7, 2048 }
 0x6f8   : > { %p2313_p3 = scmp.ne.s32.totalorder %s3206_s19, %s2312_s3  ;;  %p2317_p8 = scmp.lt.u32.totalorder %s3206_s19, %s3269_s7 }
 0x6f9   : > { %p2318_p10 = scmp.lt.u32.totalorder %s2316_s8, %s2312_s3  ;;  %p2320_p1 = scmp.lt.u32.totalorder %s2312_s3, %s3206_s19 }
 0x6fa   : > { %p2314_p5 = pnand %p2313_p3, %p3292_p4 }
 0x6fb   : > { %p2319_p13 = por %p2318_p10, %p2317_p8 }
 0x6fc   : > { %p2315_p6 = pneg %p2314_p5 }
 0x6fd   : > { %p2321_p11 = por %p2320_p1, %p2319_p13 }
 0x6ff   : > { %p2322_p7 = pnand %p2321_p11, %p2315_p6 }
 0x701   : > { %2325 = shalt.err (!%p2322_p7)
}
 0x702   : > { %s2425_s15 = smov 128   ;;  %s2426_s2 = smov 8  }
 0x703   : > { %2054 = dma.vmem_to_hbm [thread:$0]  (%p3292_p4), %s3208_s16, 1024, %s3206_s19, %s3216_s27, %s2425_s15, %s2425_s15, %s2426_s2  }
 0x704 PF: > { %p2096_p9 = scmp.ge.s32.totalorder %s2404_s29, 2  ;;  %s1689_s21 = sand.u32 1, %s2384_s24  }
 0x705   : > { %p3293_p12 = scmp.ne.s32.totalorder %s3280_s13, 0  ;;  %s1690_s4 = scalar_lea.sflag [#allocation6], %s1689_s21 }
 0x707   : > { %p2079_p0 = pnand %p2096_p9, %p3293_p12 }
 0x709   : > { %2379 = dma.done.wait (!%p2079_p0), %s1690_s4, 1024  }
 0x70a   : > { %2381 = vsyncadd (!%p2079_p0), %s1690_s4, 4294966272  ;;  %s26_s29 = sadd.s32 1, %s2404_s29   ;;  %s3294_s24 = smov %s2388_s25 }
 0x70b   : > { %p23_p2 = scmp.ge.s32.totalorder %s26_s29, 4   ;;  %s3295_s25 = smov %s2392_s26 }
 0x70c   : > { %s3296_s26 = smov %s2520_s14  ;;  %s3297_s27 = smov %s2400_s28 }
 0x70d   : > { %s3298_s28 = smov %s3300_s9  ;;  %25 = sbr.rel (!%p23_p2) target bundleno = 16 (0x10), region = 148 }
 0x714   :  { %1695 = vsyncpa [#allocation5], 1 }
 0x715   :  { %1697 = vsyncpa [#allocation5 + $0x1], 1 }
 0x716   :  { %1698 = vsyncpa [#allocation17], 1 }
 0x717   :  { %1699 = vsyncpa [#allocation6], 1 }
 0x718   :  { %1701 = vsyncpa [#allocation6 + $0x1], 1 }
 0x719   :  { %1702 = vsyncpa [#allocation7], 1 }
 0x71a   :  { %1704 = vsyncpa [#allocation7 + $0x1], 1 }
 0x71b   :  { %1705 = vsyncpa [#allocation8], 1 }
 0x71c   :  { %1707 = vsyncpa [#allocation8 + $0x1], 1 }
 0x71d   :  { %1708 = vsyncpa [#allocation11], 1 }
 0x71e   :  { %1709 = vsyncpa [#allocation14], 1 }

</bundles_post_ra>
